<compile_context>
chip_gen: v6e
topology: v6e:2x2x1
jax: 0.10.0
libtpu: 0.0.40
codegen_flags: <defaults>
</compile_context>

<pallas_src>
import functools

import jax
import jax.numpy as jnp
from jax import lax
from jax.experimental import pallas as pl
from jax.experimental.pallas import tpu as pltpu


# ----------------------------------------------------------------------------
# Fused Pallas kernel: all 8 WaveNet blocks + skip accumulation + output head.
# One grid step processes `bpg` batch elements folded into matmul rows.
# ----------------------------------------------------------------------------
def gwn_fused_kernel(h_ref, adj1_ref, adj2_ref,
                     wt0_ref, wt1_ref, bt_ref, ws_ref, bs_ref,
                     w1_ref, w2_ref, bg_ref,
                     we1_ref, be1_ref, we2_ref, be2_ref,
                     out_ref, *, dilations, n, bpg, cr, cd):
    f32 = jnp.float32
    bf16 = jnp.bfloat16
    bn = bpg * n                              # rows per time step
    t_in = h_ref.shape[1] // bn
    dn_batched = (((2,), (1,)), ((0,), (0,)))  # batched (tb) node contraction

    h = h_ref[0]                              # (t_in*bn, cr) f32, time-major
    adj1 = adj1_ref[...]                      # (n, n) bf16
    adj2 = adj2_ref[...]
    skip = None

    # ---- WaveNet blocks, statically unrolled ----
    for k, d in enumerate(dilations):
        t_out = t_in - d
        tb = t_out * bpg
        m = tb * n
        dbn = d * bn

        h16 = h.astype(bf16)                  # one f32->bf16 cast per block
        xl16 = h16[0:m]                       # temporal tap at t
        xr16 = h16[dbn:dbn + m]               # temporal tap at t+d (residual)

        # skip 1x1 conv on the block input at the (global) last time step only.
        # Exact: every temporal conv trims from the front, so the last time
        # index is preserved and skip_out[..., -1:] selects exactly these rows.
        sk = (jnp.dot(h16[(t_in - 1) * bn:t_in * bn], ws_ref[k],
                      preferred_element_type=f32) + bs_ref[k])
        skip = sk if skip is None else skip + sk

        # gated dilated temporal conv; [tanh | sigmoid] branches fused (2cd lanes)
        p = (jnp.dot(xl16, wt0_ref[k], preferred_element_type=f32)
             + jnp.dot(xr16, wt1_ref[k], preferred_element_type=f32)
             + bt_ref[k])
        g = jnp.tanh(p[:, 0:cd]) * jax.nn.sigmoid(p[:, cd:2 * cd])
        g16 = g.astype(bf16)

        # GCN input projections (channels stay on the lane axis)
        h1 = jnp.dot(g16, w1_ref[k], preferred_element_type=f32)
        h2 = jnp.dot(g16, w2_ref[k], preferred_element_type=f32)

        # graph convolutions as batched node contractions over (time*batch);
        # no per-time-step lane packing / unpacking.
        h1b = h1.reshape(tb, n, cr).astype(bf16)
        h2b = h2.reshape(tb, n, cr).astype(bf16)
        a1 = jnp.broadcast_to(adj1, (tb, n, n))
        a2 = jnp.broadcast_to(adj2, (tb, n, n))
        gcn = (lax.dot_general(a1, h1b, dn_batched, preferred_element_type=f32)
               + lax.dot_general(a2, h2b, dn_batched, preferred_element_type=f32))

        # combined GCN bias (b1+b2) added once + residual (f32, right tap)
        h = gcn.reshape(m, cr) + bg_ref[k] + h[dbn:dbn + m]
        # TODO(synk): F.dropout(p=0.3) (functional default training=True) and
        # the discarded self.bn[k](x) call are omitted (inference-parity only).
        t_in = t_out

    # ---- output head: relu -> end1(1x1) -> relu -> end2(1x1) ----
    s = jnp.maximum(skip, 0.0)
    e = jnp.maximum(
        jnp.dot(s.astype(bf16), we1_ref[...], preferred_element_type=f32)
        + be1_ref[...], 0.0)
    out_ref[0] = (
        jnp.dot(e.astype(bf16), we2_ref[...], preferred_element_type=f32)
        + be2_ref[...])                        # (bpg*n, c2)


# ----------------------------------------------------------------------------
# Plain-JAX glue: adjacency normalization (tiny, data-independent setup)
# ----------------------------------------------------------------------------
def gcn_norm_sparse(edge_index, edge_weight, n):
    # PyG GCNConv gcn_norm: add self-loops (w=1), D^-1/2 (A+I) D^-1/2,
    # aggregation source->target => dense A[dst, src] = w.
    src, dst = edge_index[0], edge_index[1]
    a = jnp.zeros((n, n), jnp.float32).at[dst, src].add(edge_weight)
    a = a + jnp.eye(n, dtype=jnp.float32)
    deg = a.sum(axis=1)
    dis = jnp.where(deg > 0.0, 1.0 / jnp.sqrt(deg), 0.0)
    return dis[:, None] * a * dis[None, :]


def dense_gcn_norm(adp):
    # PyG DenseGCNConv: diag := 1, deg = rowsum.clamp(min=1), D^-1/2 A D^-1/2
    n = adp.shape[0]
    a = jnp.where(jnp.eye(n, dtype=bool), 1.0, adp)
    deg = jnp.maximum(a.sum(axis=1), 1.0)
    dis = 1.0 / jnp.sqrt(deg)
    return dis[:, None] * a * dis[None, :]


def _pack_params(params):
    bf16 = jnp.bfloat16
    blocks = params["blocks"]
    cr = params["w_in"].shape[1]
    cd = blocks[0]["wa0"].shape[1]
    cs = blocks[0]["ws"].shape[1]
    wt0 = jnp.stack([jnp.concatenate([bk["wa0"], bk["wb0"]], axis=1)
                     for bk in blocks]).astype(bf16)        # (K, cr, 2cd)
    wt1 = jnp.stack([jnp.concatenate([bk["wa1"], bk["wb1"]], axis=1)
                     for bk in blocks]).astype(bf16)        # (K, cr, 2cd)
    bt = jnp.stack([jnp.concatenate([bk["ba"], bk["bb"]], axis=1)
                    for bk in blocks])                      # (K, 1, 2cd) f32
    ws = jnp.stack([bk["ws"] for bk in blocks]).astype(bf16)   # (K, cr, cs)
    bs = jnp.stack([bk["bs"] for bk in blocks])                # (K, 1, cs) f32
    w1 = jnp.stack([bk["w1"] for bk in blocks]).astype(bf16)   # (K, cd, cr)
    w2 = jnp.stack([bk["w2"] for bk in blocks]).astype(bf16)   # (K, cd, cr)
    bg = jnp.stack([bk["b1"] + bk["b2"] for bk in blocks])     # (K, 1, cr) f32
    packed = {
        "wt0": wt0, "wt1": wt1, "bt": bt, "ws": ws, "bs": bs,
        "w1": w1, "w2": w2, "bg": bg,
        "we1": params["w_e1"].astype(bf16), "be1": params["b_e1"],
        "we2": params["w_e2"].astype(bf16), "be2": params["b_e2"],
    }
    return packed, cr, cd, cs


def _const_spec(a):
    zeros = (0,) * a.ndim
    return pl.BlockSpec(a.shape, lambda i, _z=zeros: _z)


# ----------------------------------------------------------------------------
# Full forward (one fused pallas_call)
# ----------------------------------------------------------------------------
@functools.partial(jax.jit, static_argnames=("dilations", "out_timesteps",
                                              "out_channels", "batch_groups"))
def graphwavenet_forward(params, x, edge_index, edge_weight,
                         dilations, out_timesteps, out_channels,
                         batch_groups=None):
    b, t, n, cin = x.shape
    total_d = sum(dilations)
    pad = max(total_d + 1 - t, 0)
    t_pad = t + pad

    # grid policy: 2-wide "parallel" grid when possible (keeps both v7x
    # TensorCores busy); remaining batch is folded into matmul rows so
    # single-TC chips get larger-M matmuls instead of extra tiny grid steps.
    if batch_groups is None:
        batch_groups = 2 if (b % 2 == 0 and b >= 2) else 1
    assert b % batch_groups == 0
    bpg = b // batch_groups

    pk, cr, cd, cs = _pack_params(params)
    ce = pk["we1"].shape[1]
    c2 = pk["we2"].shape[1]

    # adaptive adjacency softmax(relu(e1@e2)) + GCN normalizations (tiny setup)
    adp = jax.nn.softmax(jnp.maximum(params["e1"] @ params["e2"], 0.0), axis=1)
    adj1 = gcn_norm_sparse(edge_index, edge_weight, n).astype(jnp.bfloat16)
    adj2 = dense_gcn_norm(adp).astype(jnp.bfloat16)

    # input 1x1 conv + left zero-pad in time (zeros @ W + b == b), done in XLA
    h0 = jnp.einsum('btnc,cr->btnr', x, params["w_in"]) + params["b_in"]
    if pad > 0:
        pad_rows = jnp.broadcast_to(params["b_in"].reshape(1, 1, 1, cr),
                                    (b, pad, n, cr))
        h0 = jnp.concatenate([pad_rows, h0], axis=1)        # (B, t_pad, N, cr)

    # time-major layout with batch folded into rows: (G, t_pad*bpg*n, cr)
    h0 = jnp.transpose(h0, (1, 0, 2, 3)).reshape(t_pad, batch_groups, bpg, n, cr)
    h0 = jnp.transpose(h0, (1, 0, 2, 3, 4)).reshape(
        batch_groups, t_pad * bpg * n, cr)

    kernel = functools.partial(
        gwn_fused_kernel, dilations=tuple(dilations), n=n, bpg=bpg, cr=cr, cd=cd)

    args = [h0, adj1, adj2, pk["wt0"], pk["wt1"], pk["bt"], pk["ws"], pk["bs"],
            pk["w1"], pk["w2"], pk["bg"], pk["we1"], pk["be1"],
            pk["we2"], pk["be2"]]
    in_specs = ([pl.BlockSpec((1, t_pad * bpg * n, cr), lambda i: (i, 0, 0))]
                + [_const_spec(a) for a in args[1:]])

    # advisory cost estimate so XLA schedules the setup/epilogue around us
    flops, trans = 0, 0
    t_cur = t_pad
    for d in dilations:
        t_out = t_cur - d
        m = t_out * b * n
        flops += 2 * 2 * m * cr * (2 * cd)          # two-tap gated conv
        flops += 2 * (b * n) * cr * cs              # skip conv (last step)
        flops += 2 * 2 * m * cd * cr                # GCN projections
        flops += 2 * 2 * t_out * b * n * n * cr     # graph convolutions
        trans += 2 * m * cd                         # tanh + sigmoid
        t_cur = t_out
    flops += 2 * (b * n) * cs * ce + 2 * (b * n) * ce * c2
    bytes_accessed = (sum(int(a.size) * a.dtype.itemsize for a in args)
                      + b * n * c2 * 4)
    cost = pl.CostEstimate(flops=flops, transcendentals=trans,
                           bytes_accessed=bytes_accessed)

    out3 = pl.pallas_call(
        kernel,
        grid=(batch_groups,),
        in_specs=in_specs,
        out_specs=pl.BlockSpec((1, bpg * n, c2), lambda i: (i, 0, 0)),
        out_shape=jax.ShapeDtypeStruct((batch_groups, bpg * n, c2), jnp.float32),
        compiler_params=pltpu.CompilerParams(
            dimension_semantics=("parallel",)),
        cost_estimate=cost,
    )(*args)

    # Reproduce torch's raw NCHW view: (B, C2, N, 1).reshape(B, T_out, N, C_out)
    out = jnp.transpose(out3.reshape(b, n, c2), (0, 2, 1)).reshape(
        b, out_timesteps, n, out_channels)
    return out


# ----------------------------------------------------------------------------
# Deterministic parameter init (synthetic; shapes follow GraphWaveNet.__init__)
# ----------------------------------------------------------------------------
def init_params(key, num_nodes, in_ch, out_ch, out_t, dilations,
                emb=10, cr=32, cd=32, cs=64, ce=64):
    keys = iter(jax.random.split(key, 16 + 12 * len(dilations)))

    def rnd(shape, scale=0.1):
        return (scale * jax.random.normal(next(keys), shape)).astype(jnp.float32)

    params = {
        "e1": rnd((num_nodes, emb), 1.0),
        "e2": rnd((emb, num_nodes), 1.0),
        "w_in": rnd((in_ch, cr)), "b_in": rnd((1, cr), 0.01),
        "w_e1": rnd((cs, ce)), "b_e1": rnd((1, ce), 0.01),
        "w_e2": rnd((ce, out_ch * out_t)), "b_e2": rnd((1, out_ch * out_t), 0.01),
        "blocks": [],
    }
    for _ in dilations:
        params["blocks"].append({
            "wa0": rnd((cr, cd)), "wa1": rnd((cr, cd)), "ba": rnd((1, cd), 0.01),
            "wb0": rnd((cr, cd)), "wb1": rnd((cr, cd)), "bb": rnd((1, cd), 0.01),
            "ws": rnd((cr, cs)), "bs": rnd((1, cs), 0.01),
            "w1": rnd((cd, cr)), "b1": rnd((1, cr), 0.01),
            "w2": rnd((cd, cr)), "b2": rnd((1, cr), 0.01),
        })
    return params


if __name__ == "__main__":
    key = jax.random.PRNGKey(0)
    k_x, k_w, k_ew = jax.random.split(key, 3)

    B, T, N, C_IN = 2, 8, 16, 4
    OUT_CH, OUT_T = 2, 4
    DILATIONS = (1, 2, 1, 2, 1, 2, 1, 2)

    x = jax.random.normal(k_x, (B, T, N, C_IN), jnp.float32)

    # simple bidirectional ring graph (no self-loops; GCN norm adds them)
    idx = jnp.arange(N, dtype=jnp.int32)
    src = jnp.concatenate([idx, (idx + 1) % N])
    dst = jnp.concatenate([(idx + 1) % N, idx])
    edge_index = jnp.stack([src, dst]).astype(jnp.int32)
    edge_weight = jax.random.uniform(k_ew, (2 * N,), minval=0.5, maxval=1.5)

    params = init_params(k_w, N, C_IN, OUT_CH, OUT_T, DILATIONS)

    out = graphwavenet_forward(params, x, edge_index, edge_weight,
                               dilations=DILATIONS,
                               out_timesteps=OUT_T, out_channels=OUT_CH)
    out = jax.block_until_ready(out)
    assert out.shape == (B, OUT_T, N, OUT_CH), out.shape
    assert bool(jnp.all(jnp.isfinite(out)))
    print("KERNEL_OK")
</pallas_src>

<mosaic_0001>
module attributes {stable_mosaic.version = 11 : i64} {
  func.func private @main(%arg0: i32) attributes {dimension_semantics = [#tpu.dimension_semantics<core_parallel>], iteration_bounds = array<i64: 2>, tpu.core_type = #tpu.core_type<sc_scalar_subcore>, window_params = []} {
    return
  }
}

module attributes {stable_mosaic.version = 11 : i64} {
  func.func private @main(%arg0: i32) attributes {dimension_semantics = [#tpu.dimension_semantics<core_parallel>], iteration_bounds = array<i64: 2>, tpu.core_type = #tpu.core_type<sc_scalar_subcore>, window_params = []} {
    return
  }
}

module attributes {stable_mosaic.version = 11 : i64} {
  func.func @gwn_fused_kernel(%arg0: i32, %arg1: memref<1x208x32xf32, #tpu.memory_space<vmem>>, %arg2: memref<16x16xbf16, #tpu.memory_space<vmem>>, %arg3: memref<16x16xbf16, #tpu.memory_space<vmem>>, %arg4: memref<8x32x64xbf16, #tpu.memory_space<vmem>>, %arg5: memref<8x32x64xbf16, #tpu.memory_space<vmem>>, %arg6: memref<8x1x64xf32, #tpu.memory_space<vmem>>, %arg7: memref<8x32x64xbf16, #tpu.memory_space<vmem>>, %arg8: memref<8x1x64xf32, #tpu.memory_space<vmem>>, %arg9: memref<8x32x32xbf16, #tpu.memory_space<vmem>>, %arg10: memref<8x32x32xbf16, #tpu.memory_space<vmem>>, %arg11: memref<8x1x32xf32, #tpu.memory_space<vmem>>, %arg12: memref<64x64xbf16, #tpu.memory_space<vmem>>, %arg13: memref<1x64xf32, #tpu.memory_space<vmem>>, %arg14: memref<64x8xbf16, #tpu.memory_space<vmem>>, %arg15: memref<1x8xf32, #tpu.memory_space<vmem>>, %arg16: memref<1x16x8xf32, #tpu.memory_space<vmem>>) attributes {dimension_semantics = [#tpu.dimension_semantics<parallel>], iteration_bounds = array<i64: 2>, scalar_prefetch = 0 : i64, scratch_operands = 0 : i64, tpu.core_type = #tpu.core_type<tc>, window_params = [{transform_indices = @transform_0, window_bounds = array<i64: 1, 208, 32>}, {pipeline_mode = #tpu.pipeline_mode<synchronous>, transform_indices = @transform_1, window_bounds = array<i64: 16, 16>}, {pipeline_mode = #tpu.pipeline_mode<synchronous>, transform_indices = @transform_2, window_bounds = array<i64: 16, 16>}, {pipeline_mode = #tpu.pipeline_mode<synchronous>, transform_indices = @transform_3, window_bounds = array<i64: 8, 32, 64>}, {pipeline_mode = #tpu.pipeline_mode<synchronous>, transform_indices = @transform_4, window_bounds = array<i64: 8, 32, 64>}, {pipeline_mode = #tpu.pipeline_mode<synchronous>, transform_indices = @transform_5, window_bounds = array<i64: 8, 1, 64>}, {pipeline_mode = #tpu.pipeline_mode<synchronous>, transform_indices = @transform_6, window_bounds = array<i64: 8, 32, 64>}, {pipeline_mode = #tpu.pipeline_mode<synchronous>, transform_indices = @transform_7, window_bounds = array<i64: 8, 1, 64>}, {pipeline_mode = #tpu.pipeline_mode<synchronous>, transform_indices = @transform_8, window_bounds = array<i64: 8, 32, 32>}, {pipeline_mode = #tpu.pipeline_mode<synchronous>, transform_indices = @transform_9, window_bounds = array<i64: 8, 32, 32>}, {pipeline_mode = #tpu.pipeline_mode<synchronous>, transform_indices = @transform_10, window_bounds = array<i64: 8, 1, 32>}, {pipeline_mode = #tpu.pipeline_mode<synchronous>, transform_indices = @transform_11, window_bounds = array<i64: 64, 64>}, {pipeline_mode = #tpu.pipeline_mode<synchronous>, transform_indices = @transform_12, window_bounds = array<i64: 1, 64>}, {pipeline_mode = #tpu.pipeline_mode<synchronous>, transform_indices = @transform_13, window_bounds = array<i64: 64, 8>}, {pipeline_mode = #tpu.pipeline_mode<synchronous>, transform_indices = @transform_14, window_bounds = array<i64: 1, 8>}, {transform_indices = @transform_15, window_bounds = array<i64: 1, 16, 8>}]} {
    %c0 = arith.constant 0 : index
    %c0_0 = arith.constant 0 : index
    %c0_1 = arith.constant 0 : index
    %0 = vector.load %arg1[%c0, %c0_0, %c0_1] : memref<1x208x32xf32, #tpu.memory_space<vmem>>, vector<1x208x32xf32>
    %1 = vector.shape_cast %0 : vector<1x208x32xf32> to vector<208x32xf32>
    %c0_2 = arith.constant 0 : index
    %c0_3 = arith.constant 0 : index
    %2 = vector.load %arg2[%c0_2, %c0_3] : memref<16x16xbf16, #tpu.memory_space<vmem>>, vector<16x16xbf16>
    %c0_4 = arith.constant 0 : index
    %c0_5 = arith.constant 0 : index
    %3 = vector.load %arg3[%c0_4, %c0_5] : memref<16x16xbf16, #tpu.memory_space<vmem>>, vector<16x16xbf16>
    %4 = arith.truncf %1 : vector<208x32xf32> to vector<208x32xbf16>
    %5 = vector.extract_strided_slice %4 {offsets = [0, 0], sizes = [192, 32], strides = [1, 1]} : vector<208x32xbf16> to vector<192x32xbf16>
    %6 = vector.extract_strided_slice %4 {offsets = [16, 0], sizes = [192, 32], strides = [1, 1]} : vector<208x32xbf16> to vector<192x32xbf16>
    %7 = vector.extract_strided_slice %4 {offsets = [192, 0], sizes = [16, 32], strides = [1, 1]} : vector<208x32xbf16> to vector<16x32xbf16>
    %c0_6 = arith.constant 0 : index
    %c0_7 = arith.constant 0 : index
    %c0_8 = arith.constant 0 : index
    %8 = vector.load %arg7[%c0_6, %c0_7, %c0_8] : memref<8x32x64xbf16, #tpu.memory_space<vmem>>, vector<1x32x64xbf16>
    %9 = vector.shape_cast %8 : vector<1x32x64xbf16> to vector<32x64xbf16>
    %cst = arith.constant dense<0.000000e+00> : vector<16x64xf32>
    %10 = tpu.matmul %7, %9, %cst {dimension_numbers = #tpu.dot_dimension_numbers<[1], [0], [0], [1], [0, 0, 1, 1], [], []>} : vector<16x32xbf16>, vector<32x64xbf16>, vector<16x64xf32> -> vector<16x64xf32>
    %c0_9 = arith.constant 0 : index
    %c0_10 = arith.constant 0 : index
    %c0_11 = arith.constant 0 : index
    %11 = vector.load %arg8[%c0_9, %c0_10, %c0_11] : memref<8x1x64xf32, #tpu.memory_space<vmem>>, vector<1x1x64xf32>
    %12 = vector.shape_cast %11 : vector<1x1x64xf32> to vector<1x64xf32>
    %13 = vector.broadcast %12 : vector<1x64xf32> to vector<16x64xf32>
    %14 = arith.addf %10, %13 : vector<16x64xf32>
    %c0_12 = arith.constant 0 : index
    %c0_13 = arith.constant 0 : index
    %c0_14 = arith.constant 0 : index
    %15 = vector.load %arg4[%c0_12, %c0_13, %c0_14] : memref<8x32x64xbf16, #tpu.memory_space<vmem>>, vector<1x32x64xbf16>
    %16 = vector.shape_cast %15 : vector<1x32x64xbf16> to vector<32x64xbf16>
    %cst_15 = arith.constant dense<0.000000e+00> : vector<192x64xf32>
    %17 = tpu.matmul %5, %16, %cst_15 {dimension_numbers = #tpu.dot_dimension_numbers<[1], [0], [0], [1], [0, 0, 1, 1], [], []>} : vector<192x32xbf16>, vector<32x64xbf16>, vector<192x64xf32> -> vector<192x64xf32>
    %c0_16 = arith.constant 0 : index
    %c0_17 = arith.constant 0 : index
    %c0_18 = arith.constant 0 : index
    %18 = vector.load %arg5[%c0_16, %c0_17, %c0_18] : memref<8x32x64xbf16, #tpu.memory_space<vmem>>, vector<1x32x64xbf16>
    %19 = vector.shape_cast %18 : vector<1x32x64xbf16> to vector<32x64xbf16>
    %cst_19 = arith.constant dense<0.000000e+00> : vector<192x64xf32>
    %20 = tpu.matmul %6, %19, %cst_19 {dimension_numbers = #tpu.dot_dimension_numbers<[1], [0], [0], [1], [0, 0, 1, 1], [], []>} : vector<192x32xbf16>, vector<32x64xbf16>, vector<192x64xf32> -> vector<192x64xf32>
    %21 = arith.addf %17, %20 : vector<192x64xf32>
    %c0_20 = arith.constant 0 : index
    %c0_21 = arith.constant 0 : index
    %c0_22 = arith.constant 0 : index
    %22 = vector.load %arg6[%c0_20, %c0_21, %c0_22] : memref<8x1x64xf32, #tpu.memory_space<vmem>>, vector<1x1x64xf32>
    %23 = vector.shape_cast %22 : vector<1x1x64xf32> to vector<1x64xf32>
    %24 = vector.broadcast %23 : vector<1x64xf32> to vector<192x64xf32>
    %25 = arith.addf %21, %24 : vector<192x64xf32>
    %26 = vector.extract_strided_slice %25 {offsets = [0, 0], sizes = [192, 32], strides = [1, 1]} : vector<192x64xf32> to vector<192x32xf32>
    %27 = math.tanh %26 : vector<192x32xf32>
    %28 = vector.extract_strided_slice %25 {offsets = [0, 32], sizes = [192, 32], strides = [1, 1]} : vector<192x64xf32> to vector<192x32xf32>
    %29 = arith.negf %28 : vector<192x32xf32>
    %30 = math.exp %29 : vector<192x32xf32>
    %cst_23 = arith.constant 1.000000e+00 : f32
    %31 = vector.broadcast %cst_23 : f32 to vector<192x32xf32>
    %32 = arith.addf %31, %30 : vector<192x32xf32>
    %33 = arith.divf %31, %32 : vector<192x32xf32>
    %34 = arith.mulf %27, %33 : vector<192x32xf32>
    %35 = arith.truncf %34 : vector<192x32xf32> to vector<192x32xbf16>
    %c0_24 = arith.constant 0 : index
    %c0_25 = arith.constant 0 : index
    %c0_26 = arith.constant 0 : index
    %36 = vector.load %arg9[%c0_24, %c0_25, %c0_26] : memref<8x32x32xbf16, #tpu.memory_space<vmem>>, vector<1x32x32xbf16>
    %37 = vector.shape_cast %36 : vector<1x32x32xbf16> to vector<32x32xbf16>
    %cst_27 = arith.constant dense<0.000000e+00> : vector<192x32xf32>
    %38 = tpu.matmul %35, %37, %cst_27 {dimension_numbers = #tpu.dot_dimension_numbers<[1], [0], [0], [1], [0, 0, 1, 1], [], []>} : vector<192x32xbf16>, vector<32x32xbf16>, vector<192x32xf32> -> vector<192x32xf32>
    %c0_28 = arith.constant 0 : index
    %c0_29 = arith.constant 0 : index
    %c0_30 = arith.constant 0 : index
    %39 = vector.load %arg10[%c0_28, %c0_29, %c0_30] : memref<8x32x32xbf16, #tpu.memory_space<vmem>>, vector<1x32x32xbf16>
    %40 = vector.shape_cast %39 : vector<1x32x32xbf16> to vector<32x32xbf16>
    %cst_31 = arith.constant dense<0.000000e+00> : vector<192x32xf32>
    %41 = tpu.matmul %35, %40, %cst_31 {dimension_numbers = #tpu.dot_dimension_numbers<[1], [0], [0], [1], [0, 0, 1, 1], [], []>} : vector<192x32xbf16>, vector<32x32xbf16>, vector<192x32xf32> -> vector<192x32xf32>
    %42 = vector.shape_cast %38 : vector<192x32xf32> to vector<12x16x32xf32>
    %43 = arith.truncf %42 : vector<12x16x32xf32> to vector<12x16x32xbf16>
    %44 = vector.shape_cast %41 : vector<192x32xf32> to vector<12x16x32xf32>
    %45 = arith.truncf %44 : vector<12x16x32xf32> to vector<12x16x32xbf16>
    %46 = vector.shape_cast %2 : vector<16x16xbf16> to vector<1x16x16xbf16>
    %47 = vector.broadcast %46 : vector<1x16x16xbf16> to vector<12x16x16xbf16>
    %48 = vector.shape_cast %3 : vector<16x16xbf16> to vector<1x16x16xbf16>
    %49 = vector.broadcast %48 : vector<1x16x16xbf16> to vector<12x16x16xbf16>
    %cst_32 = arith.constant dense<0.000000e+00> : vector<12x16x32xf32>
    %50 = tpu.matmul %47, %43, %cst_32 {dimension_numbers = #tpu.dot_dimension_numbers<[2], [1], [1], [2], [0, 0, 0, 1, 1, 2], [0], [0]>} : vector<12x16x16xbf16>, vector<12x16x32xbf16>, vector<12x16x32xf32> -> vector<12x16x32xf32>
    %cst_33 = arith.constant dense<0.000000e+00> : vector<12x16x32xf32>
    %51 = tpu.matmul %49, %45, %cst_33 {dimension_numbers = #tpu.dot_dimension_numbers<[2], [1], [1], [2], [0, 0, 0, 1, 1, 2], [0], [0]>} : vector<12x16x16xbf16>, vector<12x16x32xbf16>, vector<12x16x32xf32> -> vector<12x16x32xf32>
    %52 = arith.addf %50, %51 : vector<12x16x32xf32>
    %53 = vector.shape_cast %52 : vector<12x16x32xf32> to vector<192x32xf32>
    %c0_34 = arith.constant 0 : index
    %c0_35 = arith.constant 0 : index
    %c0_36 = arith.constant 0 : index
    %54 = vector.load %arg11[%c0_34, %c0_35, %c0_36] : memref<8x1x32xf32, #tpu.memory_space<vmem>>, vector<1x1x32xf32>
    %55 = vector.shape_cast %54 : vector<1x1x32xf32> to vector<1x32xf32>
    %56 = vector.broadcast %55 : vector<1x32xf32> to vector<192x32xf32>
    %57 = arith.addf %53, %56 : vector<192x32xf32>
    %58 = vector.extract_strided_slice %1 {offsets = [16, 0], sizes = [192, 32], strides = [1, 1]} : vector<208x32xf32> to vector<192x32xf32>
    %59 = arith.addf %57, %58 : vector<192x32xf32>
    %60 = arith.truncf %59 : vector<192x32xf32> to vector<192x32xbf16>
    %61 = vector.extract_strided_slice %60 {offsets = [0, 0], sizes = [160, 32], strides = [1, 1]} : vector<192x32xbf16> to vector<160x32xbf16>
    %62 = vector.extract_strided_slice %60 {offsets = [32, 0], sizes = [160, 32], strides = [1, 1]} : vector<192x32xbf16> to vector<160x32xbf16>
    %63 = vector.extract_strided_slice %60 {offsets = [176, 0], sizes = [16, 32], strides = [1, 1]} : vector<192x32xbf16> to vector<16x32xbf16>
    %c1 = arith.constant 1 : index
    %c0_37 = arith.constant 0 : index
    %c0_38 = arith.constant 0 : index
    %64 = vector.load %arg7[%c1, %c0_37, %c0_38] : memref<8x32x64xbf16, #tpu.memory_space<vmem>>, vector<1x32x64xbf16>
    %65 = vector.shape_cast %64 : vector<1x32x64xbf16> to vector<32x64xbf16>
    %cst_39 = arith.constant dense<0.000000e+00> : vector<16x64xf32>
    %66 = tpu.matmul %63, %65, %cst_39 {dimension_numbers = #tpu.dot_dimension_numbers<[1], [0], [0], [1], [0, 0, 1, 1], [], []>} : vector<16x32xbf16>, vector<32x64xbf16>, vector<16x64xf32> -> vector<16x64xf32>
    %c1_40 = arith.constant 1 : index
    %c0_41 = arith.constant 0 : index
    %c0_42 = arith.constant 0 : index
    %67 = vector.load %arg8[%c1_40, %c0_41, %c0_42] : memref<8x1x64xf32, #tpu.memory_space<vmem>>, vector<1x1x64xf32>
    %68 = vector.shape_cast %67 : vector<1x1x64xf32> to vector<1x64xf32>
    %69 = vector.broadcast %68 : vector<1x64xf32> to vector<16x64xf32>
    %70 = arith.addf %66, %69 : vector<16x64xf32>
    %71 = arith.addf %14, %70 : vector<16x64xf32>
    %c1_43 = arith.constant 1 : index
    %c0_44 = arith.constant 0 : index
    %c0_45 = arith.constant 0 : index
    %72 = vector.load %arg4[%c1_43, %c0_44, %c0_45] : memref<8x32x64xbf16, #tpu.memory_space<vmem>>, vector<1x32x64xbf16>
    %73 = vector.shape_cast %72 : vector<1x32x64xbf16> to vector<32x64xbf16>
    %cst_46 = arith.constant dense<0.000000e+00> : vector<160x64xf32>
    %74 = tpu.matmul %61, %73, %cst_46 {dimension_numbers = #tpu.dot_dimension_numbers<[1], [0], [0], [1], [0, 0, 1, 1], [], []>} : vector<160x32xbf16>, vector<32x64xbf16>, vector<160x64xf32> -> vector<160x64xf32>
    %c1_47 = arith.constant 1 : index
    %c0_48 = arith.constant 0 : index
    %c0_49 = arith.constant 0 : index
    %75 = vector.load %arg5[%c1_47, %c0_48, %c0_49] : memref<8x32x64xbf16, #tpu.memory_space<vmem>>, vector<1x32x64xbf16>
    %76 = vector.shape_cast %75 : vector<1x32x64xbf16> to vector<32x64xbf16>
    %cst_50 = arith.constant dense<0.000000e+00> : vector<160x64xf32>
    %77 = tpu.matmul %62, %76, %cst_50 {dimension_numbers = #tpu.dot_dimension_numbers<[1], [0], [0], [1], [0, 0, 1, 1], [], []>} : vector<160x32xbf16>, vector<32x64xbf16>, vector<160x64xf32> -> vector<160x64xf32>
    %78 = arith.addf %74, %77 : vector<160x64xf32>
    %c1_51 = arith.constant 1 : index
    %c0_52 = arith.constant 0 : index
    %c0_53 = arith.constant 0 : index
    %79 = vector.load %arg6[%c1_51, %c0_52, %c0_53] : memref<8x1x64xf32, #tpu.memory_space<vmem>>, vector<1x1x64xf32>
    %80 = vector.shape_cast %79 : vector<1x1x64xf32> to vector<1x64xf32>
    %81 = vector.broadcast %80 : vector<1x64xf32> to vector<160x64xf32>
    %82 = arith.addf %78, %81 : vector<160x64xf32>
    %83 = vector.extract_strided_slice %82 {offsets = [0, 0], sizes = [160, 32], strides = [1, 1]} : vector<160x64xf32> to vector<160x32xf32>
    %84 = math.tanh %83 : vector<160x32xf32>
    %85 = vector.extract_strided_slice %82 {offsets = [0, 32], sizes = [160, 32], strides = [1, 1]} : vector<160x64xf32> to vector<160x32xf32>
    %86 = arith.negf %85 : vector<160x32xf32>
    %87 = math.exp %86 : vector<160x32xf32>
    %cst_54 = arith.constant 1.000000e+00 : f32
    %88 = vector.broadcast %cst_54 : f32 to vector<160x32xf32>
    %89 = arith.addf %88, %87 : vector<160x32xf32>
    %90 = arith.divf %88, %89 : vector<160x32xf32>
    %91 = arith.mulf %84, %90 : vector<160x32xf32>
    %92 = arith.truncf %91 : vector<160x32xf32> to vector<160x32xbf16>
    %c1_55 = arith.constant 1 : index
    %c0_56 = arith.constant 0 : index
    %c0_57 = arith.constant 0 : index
    %93 = vector.load %arg9[%c1_55, %c0_56, %c0_57] : memref<8x32x32xbf16, #tpu.memory_space<vmem>>, vector<1x32x32xbf16>
    %94 = vector.shape_cast %93 : vector<1x32x32xbf16> to vector<32x32xbf16>
    %cst_58 = arith.constant dense<0.000000e+00> : vector<160x32xf32>
    %95 = tpu.matmul %92, %94, %cst_58 {dimension_numbers = #tpu.dot_dimension_numbers<[1], [0], [0], [1], [0, 0, 1, 1], [], []>} : vector<160x32xbf16>, vector<32x32xbf16>, vector<160x32xf32> -> vector<160x32xf32>
    %c1_59 = arith.constant 1 : index
    %c0_60 = arith.constant 0 : index
    %c0_61 = arith.constant 0 : index
    %96 = vector.load %arg10[%c1_59, %c0_60, %c0_61] : memref<8x32x32xbf16, #tpu.memory_space<vmem>>, vector<1x32x32xbf16>
    %97 = vector.shape_cast %96 : vector<1x32x32xbf16> to vector<32x32xbf16>
    %cst_62 = arith.constant dense<0.000000e+00> : vector<160x32xf32>
    %98 = tpu.matmul %92, %97, %cst_62 {dimension_numbers = #tpu.dot_dimension_numbers<[1], [0], [0], [1], [0, 0, 1, 1], [], []>} : vector<160x32xbf16>, vector<32x32xbf16>, vector<160x32xf32> -> vector<160x32xf32>
    %99 = vector.shape_cast %95 : vector<160x32xf32> to vector<10x16x32xf32>
    %100 = arith.truncf %99 : vector<10x16x32xf32> to vector<10x16x32xbf16>
    %101 = vector.shape_cast %98 : vector<160x32xf32> to vector<10x16x32xf32>
    %102 = arith.truncf %101 : vector<10x16x32xf32> to vector<10x16x32xbf16>
    %103 = vector.shape_cast %2 : vector<16x16xbf16> to vector<1x16x16xbf16>
    %104 = vector.broadcast %103 : vector<1x16x16xbf16> to vector<10x16x16xbf16>
    %105 = vector.shape_cast %3 : vector<16x16xbf16> to vector<1x16x16xbf16>
    %106 = vector.broadcast %105 : vector<1x16x16xbf16> to vector<10x16x16xbf16>
    %cst_63 = arith.constant dense<0.000000e+00> : vector<10x16x32xf32>
    %107 = tpu.matmul %104, %100, %cst_63 {dimension_numbers = #tpu.dot_dimension_numbers<[2], [1], [1], [2], [0, 0, 0, 1, 1, 2], [0], [0]>} : vector<10x16x16xbf16>, vector<10x16x32xbf16>, vector<10x16x32xf32> -> vector<10x16x32xf32>
    %cst_64 = arith.constant dense<0.000000e+00> : vector<10x16x32xf32>
    %108 = tpu.matmul %106, %102, %cst_64 {dimension_numbers = #tpu.dot_dimension_numbers<[2], [1], [1], [2], [0, 0, 0, 1, 1, 2], [0], [0]>} : vector<10x16x16xbf16>, vector<10x16x32xbf16>, vector<10x16x32xf32> -> vector<10x16x32xf32>
    %109 = arith.addf %107, %108 : vector<10x16x32xf32>
    %110 = vector.shape_cast %109 : vector<10x16x32xf32> to vector<160x32xf32>
    %c1_65 = arith.constant 1 : index
    %c0_66 = arith.constant 0 : index
    %c0_67 = arith.constant 0 : index
    %111 = vector.load %arg11[%c1_65, %c0_66, %c0_67] : memref<8x1x32xf32, #tpu.memory_space<vmem>>, vector<1x1x32xf32>
    %112 = vector.shape_cast %111 : vector<1x1x32xf32> to vector<1x32xf32>
    %113 = vector.broadcast %112 : vector<1x32xf32> to vector<160x32xf32>
    %114 = arith.addf %110, %113 : vector<160x32xf32>
    %115 = vector.extract_strided_slice %59 {offsets = [32, 0], sizes = [160, 32], strides = [1, 1]} : vector<192x32xf32> to vector<160x32xf32>
    %116 = arith.addf %114, %115 : vector<160x32xf32>
    %117 = arith.truncf %116 : vector<160x32xf32> to vector<160x32xbf16>
    %118 = vector.extract_strided_slice %117 {offsets = [0, 0], sizes = [144, 32], strides = [1, 1]} : vector<160x32xbf16> to vector<144x32xbf16>
    %119 = vector.extract_strided_slice %117 {offsets = [16, 0], sizes = [144, 32], strides = [1, 1]} : vector<160x32xbf16> to vector<144x32xbf16>
    %120 = vector.extract_strided_slice %117 {offsets = [144, 0], sizes = [16, 32], strides = [1, 1]} : vector<160x32xbf16> to vector<16x32xbf16>
    %c2 = arith.constant 2 : index
    %c0_68 = arith.constant 0 : index
    %c0_69 = arith.constant 0 : index
    %121 = vector.load %arg7[%c2, %c0_68, %c0_69] : memref<8x32x64xbf16, #tpu.memory_space<vmem>>, vector<1x32x64xbf16>
    %122 = vector.shape_cast %121 : vector<1x32x64xbf16> to vector<32x64xbf16>
    %cst_70 = arith.constant dense<0.000000e+00> : vector<16x64xf32>
    %123 = tpu.matmul %120, %122, %cst_70 {dimension_numbers = #tpu.dot_dimension_numbers<[1], [0], [0], [1], [0, 0, 1, 1], [], []>} : vector<16x32xbf16>, vector<32x64xbf16>, vector<16x64xf32> -> vector<16x64xf32>
    %c2_71 = arith.constant 2 : index
    %c0_72 = arith.constant 0 : index
    %c0_73 = arith.constant 0 : index
    %124 = vector.load %arg8[%c2_71, %c0_72, %c0_73] : memref<8x1x64xf32, #tpu.memory_space<vmem>>, vector<1x1x64xf32>
    %125 = vector.shape_cast %124 : vector<1x1x64xf32> to vector<1x64xf32>
    %126 = vector.broadcast %125 : vector<1x64xf32> to vector<16x64xf32>
    %127 = arith.addf %123, %126 : vector<16x64xf32>
    %128 = arith.addf %71, %127 : vector<16x64xf32>
    %c2_74 = arith.constant 2 : index
    %c0_75 = arith.constant 0 : index
    %c0_76 = arith.constant 0 : index
    %129 = vector.load %arg4[%c2_74, %c0_75, %c0_76] : memref<8x32x64xbf16, #tpu.memory_space<vmem>>, vector<1x32x64xbf16>
    %130 = vector.shape_cast %129 : vector<1x32x64xbf16> to vector<32x64xbf16>
    %cst_77 = arith.constant dense<0.000000e+00> : vector<144x64xf32>
    %131 = tpu.matmul %118, %130, %cst_77 {dimension_numbers = #tpu.dot_dimension_numbers<[1], [0], [0], [1], [0, 0, 1, 1], [], []>} : vector<144x32xbf16>, vector<32x64xbf16>, vector<144x64xf32> -> vector<144x64xf32>
    %c2_78 = arith.constant 2 : index
    %c0_79 = arith.constant 0 : index
    %c0_80 = arith.constant 0 : index
    %132 = vector.load %arg5[%c2_78, %c0_79, %c0_80] : memref<8x32x64xbf16, #tpu.memory_space<vmem>>, vector<1x32x64xbf16>
    %133 = vector.shape_cast %132 : vector<1x32x64xbf16> to vector<32x64xbf16>
    %cst_81 = arith.constant dense<0.000000e+00> : vector<144x64xf32>
    %134 = tpu.matmul %119, %133, %cst_81 {dimension_numbers = #tpu.dot_dimension_numbers<[1], [0], [0], [1], [0, 0, 1, 1], [], []>} : vector<144x32xbf16>, vector<32x64xbf16>, vector<144x64xf32> -> vector<144x64xf32>
    %135 = arith.addf %131, %134 : vector<144x64xf32>
    %c2_82 = arith.constant 2 : index
    %c0_83 = arith.constant 0 : index
    %c0_84 = arith.constant 0 : index
    %136 = vector.load %arg6[%c2_82, %c0_83, %c0_84] : memref<8x1x64xf32, #tpu.memory_space<vmem>>, vector<1x1x64xf32>
    %137 = vector.shape_cast %136 : vector<1x1x64xf32> to vector<1x64xf32>
    %138 = vector.broadcast %137 : vector<1x64xf32> to vector<144x64xf32>
    %139 = arith.addf %135, %138 : vector<144x64xf32>
    %140 = vector.extract_strided_slice %139 {offsets = [0, 0], sizes = [144, 32], strides = [1, 1]} : vector<144x64xf32> to vector<144x32xf32>
    %141 = math.tanh %140 : vector<144x32xf32>
    %142 = vector.extract_strided_slice %139 {offsets = [0, 32], sizes = [144, 32], strides = [1, 1]} : vector<144x64xf32> to vector<144x32xf32>
    %143 = arith.negf %142 : vector<144x32xf32>
    %144 = math.exp %143 : vector<144x32xf32>
    %cst_85 = arith.constant 1.000000e+00 : f32
    %145 = vector.broadcast %cst_85 : f32 to vector<144x32xf32>
    %146 = arith.addf %145, %144 : vector<144x32xf32>
    %147 = arith.divf %145, %146 : vector<144x32xf32>
    %148 = arith.mulf %141, %147 : vector<144x32xf32>
    %149 = arith.truncf %148 : vector<144x32xf32> to vector<144x32xbf16>
    %c2_86 = arith.constant 2 : index
    %c0_87 = arith.constant 0 : index
    %c0_88 = arith.constant 0 : index
    %150 = vector.load %arg9[%c2_86, %c0_87, %c0_88] : memref<8x32x32xbf16, #tpu.memory_space<vmem>>, vector<1x32x32xbf16>
    %151 = vector.shape_cast %150 : vector<1x32x32xbf16> to vector<32x32xbf16>
    %cst_89 = arith.constant dense<0.000000e+00> : vector<144x32xf32>
    %152 = tpu.matmul %149, %151, %cst_89 {dimension_numbers = #tpu.dot_dimension_numbers<[1], [0], [0], [1], [0, 0, 1, 1], [], []>} : vector<144x32xbf16>, vector<32x32xbf16>, vector<144x32xf32> -> vector<144x32xf32>
    %c2_90 = arith.constant 2 : index
    %c0_91 = arith.constant 0 : index
    %c0_92 = arith.constant 0 : index
    %153 = vector.load %arg10[%c2_90, %c0_91, %c0_92] : memref<8x32x32xbf16, #tpu.memory_space<vmem>>, vector<1x32x32xbf16>
    %154 = vector.shape_cast %153 : vector<1x32x32xbf16> to vector<32x32xbf16>
    %cst_93 = arith.constant dense<0.000000e+00> : vector<144x32xf32>
    %155 = tpu.matmul %149, %154, %cst_93 {dimension_numbers = #tpu.dot_dimension_numbers<[1], [0], [0], [1], [0, 0, 1, 1], [], []>} : vector<144x32xbf16>, vector<32x32xbf16>, vector<144x32xf32> -> vector<144x32xf32>
    %156 = vector.shape_cast %152 : vector<144x32xf32> to vector<9x16x32xf32>
    %157 = arith.truncf %156 : vector<9x16x32xf32> to vector<9x16x32xbf16>
    %158 = vector.shape_cast %155 : vector<144x32xf32> to vector<9x16x32xf32>
    %159 = arith.truncf %158 : vector<9x16x32xf32> to vector<9x16x32xbf16>
    %160 = vector.shape_cast %2 : vector<16x16xbf16> to vector<1x16x16xbf16>
    %161 = vector.broadcast %160 : vector<1x16x16xbf16> to vector<9x16x16xbf16>
    %162 = vector.shape_cast %3 : vector<16x16xbf16> to vector<1x16x16xbf16>
    %163 = vector.broadcast %162 : vector<1x16x16xbf16> to vector<9x16x16xbf16>
    %cst_94 = arith.constant dense<0.000000e+00> : vector<9x16x32xf32>
    %164 = tpu.matmul %161, %157, %cst_94 {dimension_numbers = #tpu.dot_dimension_numbers<[2], [1], [1], [2], [0, 0, 0, 1, 1, 2], [0], [0]>} : vector<9x16x16xbf16>, vector<9x16x32xbf16>, vector<9x16x32xf32> -> vector<9x16x32xf32>
    %cst_95 = arith.constant dense<0.000000e+00> : vector<9x16x32xf32>
    %165 = tpu.matmul %163, %159, %cst_95 {dimension_numbers = #tpu.dot_dimension_numbers<[2], [1], [1], [2], [0, 0, 0, 1, 1, 2], [0], [0]>} : vector<9x16x16xbf16>, vector<9x16x32xbf16>, vector<9x16x32xf32> -> vector<9x16x32xf32>
    %166 = arith.addf %164, %165 : vector<9x16x32xf32>
    %167 = vector.shape_cast %166 : vector<9x16x32xf32> to vector<144x32xf32>
    %c2_96 = arith.constant 2 : index
    %c0_97 = arith.constant 0 : index
    %c0_98 = arith.constant 0 : index
    %168 = vector.load %arg11[%c2_96, %c0_97, %c0_98] : memref<8x1x32xf32, #tpu.memory_space<vmem>>, vector<1x1x32xf32>
    %169 = vector.shape_cast %168 : vector<1x1x32xf32> to vector<1x32xf32>
    %170 = vector.broadcast %169 : vector<1x32xf32> to vector<144x32xf32>
    %171 = arith.addf %167, %170 : vector<144x32xf32>
    %172 = vector.extract_strided_slice %116 {offsets = [16, 0], sizes = [144, 32], strides = [1, 1]} : vector<160x32xf32> to vector<144x32xf32>
    %173 = arith.addf %171, %172 : vector<144x32xf32>
    %174 = arith.truncf %173 : vector<144x32xf32> to vector<144x32xbf16>
    %175 = vector.extract_strided_slice %174 {offsets = [0, 0], sizes = [112, 32], strides = [1, 1]} : vector<144x32xbf16> to vector<112x32xbf16>
    %176 = vector.extract_strided_slice %174 {offsets = [32, 0], sizes = [112, 32], strides = [1, 1]} : vector<144x32xbf16> to vector<112x32xbf16>
    %177 = vector.extract_strided_slice %174 {offsets = [128, 0], sizes = [16, 32], strides = [1, 1]} : vector<144x32xbf16> to vector<16x32xbf16>
    %c3 = arith.constant 3 : index
    %c0_99 = arith.constant 0 : index
    %c0_100 = arith.constant 0 : index
    %178 = vector.load %arg7[%c3, %c0_99, %c0_100] : memref<8x32x64xbf16, #tpu.memory_space<vmem>>, vector<1x32x64xbf16>
    %179 = vector.shape_cast %178 : vector<1x32x64xbf16> to vector<32x64xbf16>
    %cst_101 = arith.constant dense<0.000000e+00> : vector<16x64xf32>
    %180 = tpu.matmul %177, %179, %cst_101 {dimension_numbers = #tpu.dot_dimension_numbers<[1], [0], [0], [1], [0, 0, 1, 1], [], []>} : vector<16x32xbf16>, vector<32x64xbf16>, vector<16x64xf32> -> vector<16x64xf32>
    %c3_102 = arith.constant 3 : index
    %c0_103 = arith.constant 0 : index
    %c0_104 = arith.constant 0 : index
    %181 = vector.load %arg8[%c3_102, %c0_103, %c0_104] : memref<8x1x64xf32, #tpu.memory_space<vmem>>, vector<1x1x64xf32>
    %182 = vector.shape_cast %181 : vector<1x1x64xf32> to vector<1x64xf32>
    %183 = vector.broadcast %182 : vector<1x64xf32> to vector<16x64xf32>
    %184 = arith.addf %180, %183 : vector<16x64xf32>
    %185 = arith.addf %128, %184 : vector<16x64xf32>
    %c3_105 = arith.constant 3 : index
    %c0_106 = arith.constant 0 : index
    %c0_107 = arith.constant 0 : index
    %186 = vector.load %arg4[%c3_105, %c0_106, %c0_107] : memref<8x32x64xbf16, #tpu.memory_space<vmem>>, vector<1x32x64xbf16>
    %187 = vector.shape_cast %186 : vector<1x32x64xbf16> to vector<32x64xbf16>
    %cst_108 = arith.constant dense<0.000000e+00> : vector<112x64xf32>
    %188 = tpu.matmul %175, %187, %cst_108 {dimension_numbers = #tpu.dot_dimension_numbers<[1], [0], [0], [1], [0, 0, 1, 1], [], []>} : vector<112x32xbf16>, vector<32x64xbf16>, vector<112x64xf32> -> vector<112x64xf32>
    %c3_109 = arith.constant 3 : index
    %c0_110 = arith.constant 0 : index
    %c0_111 = arith.constant 0 : index
    %189 = vector.load %arg5[%c3_109, %c0_110, %c0_111] : memref<8x32x64xbf16, #tpu.memory_space<vmem>>, vector<1x32x64xbf16>
    %190 = vector.shape_cast %189 : vector<1x32x64xbf16> to vector<32x64xbf16>
    %cst_112 = arith.constant dense<0.000000e+00> : vector<112x64xf32>
    %191 = tpu.matmul %176, %190, %cst_112 {dimension_numbers = #tpu.dot_dimension_numbers<[1], [0], [0], [1], [0, 0, 1, 1], [], []>} : vector<112x32xbf16>, vector<32x64xbf16>, vector<112x64xf32> -> vector<112x64xf32>
    %192 = arith.addf %188, %191 : vector<112x64xf32>
    %c3_113 = arith.constant 3 : index
    %c0_114 = arith.constant 0 : index
    %c0_115 = arith.constant 0 : index
    %193 = vector.load %arg6[%c3_113, %c0_114, %c0_115] : memref<8x1x64xf32, #tpu.memory_space<vmem>>, vector<1x1x64xf32>
    %194 = vector.shape_cast %193 : vector<1x1x64xf32> to vector<1x64xf32>
    %195 = vector.broadcast %194 : vector<1x64xf32> to vector<112x64xf32>
    %196 = arith.addf %192, %195 : vector<112x64xf32>
    %197 = vector.extract_strided_slice %196 {offsets = [0, 0], sizes = [112, 32], strides = [1, 1]} : vector<112x64xf32> to vector<112x32xf32>
    %198 = math.tanh %197 : vector<112x32xf32>
    %199 = vector.extract_strided_slice %196 {offsets = [0, 32], sizes = [112, 32], strides = [1, 1]} : vector<112x64xf32> to vector<112x32xf32>
    %200 = arith.negf %199 : vector<112x32xf32>
    %201 = math.exp %200 : vector<112x32xf32>
    %cst_116 = arith.constant 1.000000e+00 : f32
    %202 = vector.broadcast %cst_116 : f32 to vector<112x32xf32>
    %203 = arith.addf %202, %201 : vector<112x32xf32>
    %204 = arith.divf %202, %203 : vector<112x32xf32>
    %205 = arith.mulf %198, %204 : vector<112x32xf32>
    %206 = arith.truncf %205 : vector<112x32xf32> to vector<112x32xbf16>
    %c3_117 = arith.constant 3 : index
    %c0_118 = arith.constant 0 : index
    %c0_119 = arith.constant 0 : index
    %207 = vector.load %arg9[%c3_117, %c0_118, %c0_119] : memref<8x32x32xbf16, #tpu.memory_space<vmem>>, vector<1x32x32xbf16>
    %208 = vector.shape_cast %207 : vector<1x32x32xbf16> to vector<32x32xbf16>
    %cst_120 = arith.constant dense<0.000000e+00> : vector<112x32xf32>
    %209 = tpu.matmul %206, %208, %cst_120 {dimension_numbers = #tpu.dot_dimension_numbers<[1], [0], [0], [1], [0, 0, 1, 1], [], []>} : vector<112x32xbf16>, vector<32x32xbf16>, vector<112x32xf32> -> vector<112x32xf32>
    %c3_121 = arith.constant 3 : index
    %c0_122 = arith.constant 0 : index
    %c0_123 = arith.constant 0 : index
    %210 = vector.load %arg10[%c3_121, %c0_122, %c0_123] : memref<8x32x32xbf16, #tpu.memory_space<vmem>>, vector<1x32x32xbf16>
    %211 = vector.shape_cast %210 : vector<1x32x32xbf16> to vector<32x32xbf16>
    %cst_124 = arith.constant dense<0.000000e+00> : vector<112x32xf32>
    %212 = tpu.matmul %206, %211, %cst_124 {dimension_numbers = #tpu.dot_dimension_numbers<[1], [0], [0], [1], [0, 0, 1, 1], [], []>} : vector<112x32xbf16>, vector<32x32xbf16>, vector<112x32xf32> -> vector<112x32xf32>
    %213 = vector.shape_cast %209 : vector<112x32xf32> to vector<7x16x32xf32>
    %214 = arith.truncf %213 : vector<7x16x32xf32> to vector<7x16x32xbf16>
    %215 = vector.shape_cast %212 : vector<112x32xf32> to vector<7x16x32xf32>
    %216 = arith.truncf %215 : vector<7x16x32xf32> to vector<7x16x32xbf16>
    %217 = vector.shape_cast %2 : vector<16x16xbf16> to vector<1x16x16xbf16>
    %218 = vector.broadcast %217 : vector<1x16x16xbf16> to vector<7x16x16xbf16>
    %219 = vector.shape_cast %3 : vector<16x16xbf16> to vector<1x16x16xbf16>
    %220 = vector.broadcast %219 : vector<1x16x16xbf16> to vector<7x16x16xbf16>
    %cst_125 = arith.constant dense<0.000000e+00> : vector<7x16x32xf32>
    %221 = tpu.matmul %218, %214, %cst_125 {dimension_numbers = #tpu.dot_dimension_numbers<[2], [1], [1], [2], [0, 0, 0, 1, 1, 2], [0], [0]>} : vector<7x16x16xbf16>, vector<7x16x32xbf16>, vector<7x16x32xf32> -> vector<7x16x32xf32>
    %cst_126 = arith.constant dense<0.000000e+00> : vector<7x16x32xf32>
    %222 = tpu.matmul %220, %216, %cst_126 {dimension_numbers = #tpu.dot_dimension_numbers<[2], [1], [1], [2], [0, 0, 0, 1, 1, 2], [0], [0]>} : vector<7x16x16xbf16>, vector<7x16x32xbf16>, vector<7x16x32xf32> -> vector<7x16x32xf32>
    %223 = arith.addf %221, %222 : vector<7x16x32xf32>
    %224 = vector.shape_cast %223 : vector<7x16x32xf32> to vector<112x32xf32>
    %c3_127 = arith.constant 3 : index
    %c0_128 = arith.constant 0 : index
    %c0_129 = arith.constant 0 : index
    %225 = vector.load %arg11[%c3_127, %c0_128, %c0_129] : memref<8x1x32xf32, #tpu.memory_space<vmem>>, vector<1x1x32xf32>
    %226 = vector.shape_cast %225 : vector<1x1x32xf32> to vector<1x32xf32>
    %227 = vector.broadcast %226 : vector<1x32xf32> to vector<112x32xf32>
    %228 = arith.addf %224, %227 : vector<112x32xf32>
    %229 = vector.extract_strided_slice %173 {offsets = [32, 0], sizes = [112, 32], strides = [1, 1]} : vector<144x32xf32> to vector<112x32xf32>
    %230 = arith.addf %228, %229 : vector<112x32xf32>
    %231 = arith.truncf %230 : vector<112x32xf32> to vector<112x32xbf16>
    %232 = vector.extract_strided_slice %231 {offsets = [0, 0], sizes = [96, 32], strides = [1, 1]} : vector<112x32xbf16> to vector<96x32xbf16>
    %233 = vector.extract_strided_slice %231 {offsets = [16, 0], sizes = [96, 32], strides = [1, 1]} : vector<112x32xbf16> to vector<96x32xbf16>
    %234 = vector.extract_strided_slice %231 {offsets = [96, 0], sizes = [16, 32], strides = [1, 1]} : vector<112x32xbf16> to vector<16x32xbf16>
    %c4 = arith.constant 4 : index
    %c0_130 = arith.constant 0 : index
    %c0_131 = arith.constant 0 : index
    %235 = vector.load %arg7[%c4, %c0_130, %c0_131] : memref<8x32x64xbf16, #tpu.memory_space<vmem>>, vector<1x32x64xbf16>
    %236 = vector.shape_cast %235 : vector<1x32x64xbf16> to vector<32x64xbf16>
    %cst_132 = arith.constant dense<0.000000e+00> : vector<16x64xf32>
    %237 = tpu.matmul %234, %236, %cst_132 {dimension_numbers = #tpu.dot_dimension_numbers<[1], [0], [0], [1], [0, 0, 1, 1], [], []>} : vector<16x32xbf16>, vector<32x64xbf16>, vector<16x64xf32> -> vector<16x64xf32>
    %c4_133 = arith.constant 4 : index
    %c0_134 = arith.constant 0 : index
    %c0_135 = arith.constant 0 : index
    %238 = vector.load %arg8[%c4_133, %c0_134, %c0_135] : memref<8x1x64xf32, #tpu.memory_space<vmem>>, vector<1x1x64xf32>
    %239 = vector.shape_cast %238 : vector<1x1x64xf32> to vector<1x64xf32>
    %240 = vector.broadcast %239 : vector<1x64xf32> to vector<16x64xf32>
    %241 = arith.addf %237, %240 : vector<16x64xf32>
    %242 = arith.addf %185, %241 : vector<16x64xf32>
    %c4_136 = arith.constant 4 : index
    %c0_137 = arith.constant 0 : index
    %c0_138 = arith.constant 0 : index
    %243 = vector.load %arg4[%c4_136, %c0_137, %c0_138] : memref<8x32x64xbf16, #tpu.memory_space<vmem>>, vector<1x32x64xbf16>
    %244 = vector.shape_cast %243 : vector<1x32x64xbf16> to vector<32x64xbf16>
    %cst_139 = arith.constant dense<0.000000e+00> : vector<96x64xf32>
    %245 = tpu.matmul %232, %244, %cst_139 {dimension_numbers = #tpu.dot_dimension_numbers<[1], [0], [0], [1], [0, 0, 1, 1], [], []>} : vector<96x32xbf16>, vector<32x64xbf16>, vector<96x64xf32> -> vector<96x64xf32>
    %c4_140 = arith.constant 4 : index
    %c0_141 = arith.constant 0 : index
    %c0_142 = arith.constant 0 : index
    %246 = vector.load %arg5[%c4_140, %c0_141, %c0_142] : memref<8x32x64xbf16, #tpu.memory_space<vmem>>, vector<1x32x64xbf16>
    %247 = vector.shape_cast %246 : vector<1x32x64xbf16> to vector<32x64xbf16>
    %cst_143 = arith.constant dense<0.000000e+00> : vector<96x64xf32>
    %248 = tpu.matmul %233, %247, %cst_143 {dimension_numbers = #tpu.dot_dimension_numbers<[1], [0], [0], [1], [0, 0, 1, 1], [], []>} : vector<96x32xbf16>, vector<32x64xbf16>, vector<96x64xf32> -> vector<96x64xf32>
    %249 = arith.addf %245, %248 : vector<96x64xf32>
    %c4_144 = arith.constant 4 : index
    %c0_145 = arith.constant 0 : index
    %c0_146 = arith.constant 0 : index
    %250 = vector.load %arg6[%c4_144, %c0_145, %c0_146] : memref<8x1x64xf32, #tpu.memory_space<vmem>>, vector<1x1x64xf32>
    %251 = vector.shape_cast %250 : vector<1x1x64xf32> to vector<1x64xf32>
    %252 = vector.broadcast %251 : vector<1x64xf32> to vector<96x64xf32>
    %253 = arith.addf %249, %252 : vector<96x64xf32>
    %254 = vector.extract_strided_slice %253 {offsets = [0, 0], sizes = [96, 32], strides = [1, 1]} : vector<96x64xf32> to vector<96x32xf32>
    %255 = math.tanh %254 : vector<96x32xf32>
    %256 = vector.extract_strided_slice %253 {offsets = [0, 32], sizes = [96, 32], strides = [1, 1]} : vector<96x64xf32> to vector<96x32xf32>
    %257 = arith.negf %256 : vector<96x32xf32>
    %258 = math.exp %257 : vector<96x32xf32>
    %cst_147 = arith.constant 1.000000e+00 : f32
    %259 = vector.broadcast %cst_147 : f32 to vector<96x32xf32>
    %260 = arith.addf %259, %258 : vector<96x32xf32>
    %261 = arith.divf %259, %260 : vector<96x32xf32>
    %262 = arith.mulf %255, %261 : vector<96x32xf32>
    %263 = arith.truncf %262 : vector<96x32xf32> to vector<96x32xbf16>
    %c4_148 = arith.constant 4 : index
    %c0_149 = arith.constant 0 : index
    %c0_150 = arith.constant 0 : index
    %264 = vector.load %arg9[%c4_148, %c0_149, %c0_150] : memref<8x32x32xbf16, #tpu.memory_space<vmem>>, vector<1x32x32xbf16>
    %265 = vector.shape_cast %264 : vector<1x32x32xbf16> to vector<32x32xbf16>
    %cst_151 = arith.constant dense<0.000000e+00> : vector<96x32xf32>
    %266 = tpu.matmul %263, %265, %cst_151 {dimension_numbers = #tpu.dot_dimension_numbers<[1], [0], [0], [1], [0, 0, 1, 1], [], []>} : vector<96x32xbf16>, vector<32x32xbf16>, vector<96x32xf32> -> vector<96x32xf32>
    %c4_152 = arith.constant 4 : index
    %c0_153 = arith.constant 0 : index
    %c0_154 = arith.constant 0 : index
    %267 = vector.load %arg10[%c4_152, %c0_153, %c0_154] : memref<8x32x32xbf16, #tpu.memory_space<vmem>>, vector<1x32x32xbf16>
    %268 = vector.shape_cast %267 : vector<1x32x32xbf16> to vector<32x32xbf16>
    %cst_155 = arith.constant dense<0.000000e+00> : vector<96x32xf32>
    %269 = tpu.matmul %263, %268, %cst_155 {dimension_numbers = #tpu.dot_dimension_numbers<[1], [0], [0], [1], [0, 0, 1, 1], [], []>} : vector<96x32xbf16>, vector<32x32xbf16>, vector<96x32xf32> -> vector<96x32xf32>
    %270 = vector.shape_cast %266 : vector<96x32xf32> to vector<6x16x32xf32>
    %271 = arith.truncf %270 : vector<6x16x32xf32> to vector<6x16x32xbf16>
    %272 = vector.shape_cast %269 : vector<96x32xf32> to vector<6x16x32xf32>
    %273 = arith.truncf %272 : vector<6x16x32xf32> to vector<6x16x32xbf16>
    %274 = vector.shape_cast %2 : vector<16x16xbf16> to vector<1x16x16xbf16>
    %275 = vector.broadcast %274 : vector<1x16x16xbf16> to vector<6x16x16xbf16>
    %276 = vector.shape_cast %3 : vector<16x16xbf16> to vector<1x16x16xbf16>
    %277 = vector.broadcast %276 : vector<1x16x16xbf16> to vector<6x16x16xbf16>
    %cst_156 = arith.constant dense<0.000000e+00> : vector<6x16x32xf32>
    %278 = tpu.matmul %275, %271, %cst_156 {dimension_numbers = #tpu.dot_dimension_numbers<[2], [1], [1], [2], [0, 0, 0, 1, 1, 2], [0], [0]>} : vector<6x16x16xbf16>, vector<6x16x32xbf16>, vector<6x16x32xf32> -> vector<6x16x32xf32>
    %cst_157 = arith.constant dense<0.000000e+00> : vector<6x16x32xf32>
    %279 = tpu.matmul %277, %273, %cst_157 {dimension_numbers = #tpu.dot_dimension_numbers<[2], [1], [1], [2], [0, 0, 0, 1, 1, 2], [0], [0]>} : vector<6x16x16xbf16>, vector<6x16x32xbf16>, vector<6x16x32xf32> -> vector<6x16x32xf32>
    %280 = arith.addf %278, %279 : vector<6x16x32xf32>
    %281 = vector.shape_cast %280 : vector<6x16x32xf32> to vector<96x32xf32>
    %c4_158 = arith.constant 4 : index
    %c0_159 = arith.constant 0 : index
    %c0_160 = arith.constant 0 : index
    %282 = vector.load %arg11[%c4_158, %c0_159, %c0_160] : memref<8x1x32xf32, #tpu.memory_space<vmem>>, vector<1x1x32xf32>
    %283 = vector.shape_cast %282 : vector<1x1x32xf32> to vector<1x32xf32>
    %284 = vector.broadcast %283 : vector<1x32xf32> to vector<96x32xf32>
    %285 = arith.addf %281, %284 : vector<96x32xf32>
    %286 = vector.extract_strided_slice %230 {offsets = [16, 0], sizes = [96, 32], strides = [1, 1]} : vector<112x32xf32> to vector<96x32xf32>
    %287 = arith.addf %285, %286 : vector<96x32xf32>
    %288 = arith.truncf %287 : vector<96x32xf32> to vector<96x32xbf16>
    %289 = vector.extract_strided_slice %288 {offsets = [0, 0], sizes = [64, 32], strides = [1, 1]} : vector<96x32xbf16> to vector<64x32xbf16>
    %290 = vector.extract_strided_slice %288 {offsets = [32, 0], sizes = [64, 32], strides = [1, 1]} : vector<96x32xbf16> to vector<64x32xbf16>
    %291 = vector.extract_strided_slice %288 {offsets = [80, 0], sizes = [16, 32], strides = [1, 1]} : vector<96x32xbf16> to vector<16x32xbf16>
    %c5 = arith.constant 5 : index
    %c0_161 = arith.constant 0 : index
    %c0_162 = arith.constant 0 : index
    %292 = vector.load %arg7[%c5, %c0_161, %c0_162] : memref<8x32x64xbf16, #tpu.memory_space<vmem>>, vector<1x32x64xbf16>
    %293 = vector.shape_cast %292 : vector<1x32x64xbf16> to vector<32x64xbf16>
    %cst_163 = arith.constant dense<0.000000e+00> : vector<16x64xf32>
    %294 = tpu.matmul %291, %293, %cst_163 {dimension_numbers = #tpu.dot_dimension_numbers<[1], [0], [0], [1], [0, 0, 1, 1], [], []>} : vector<16x32xbf16>, vector<32x64xbf16>, vector<16x64xf32> -> vector<16x64xf32>
    %c5_164 = arith.constant 5 : index
    %c0_165 = arith.constant 0 : index
    %c0_166 = arith.constant 0 : index
    %295 = vector.load %arg8[%c5_164, %c0_165, %c0_166] : memref<8x1x64xf32, #tpu.memory_space<vmem>>, vector<1x1x64xf32>
    %296 = vector.shape_cast %295 : vector<1x1x64xf32> to vector<1x64xf32>
    %297 = vector.broadcast %296 : vector<1x64xf32> to vector<16x64xf32>
    %298 = arith.addf %294, %297 : vector<16x64xf32>
    %299 = arith.addf %242, %298 : vector<16x64xf32>
    %c5_167 = arith.constant 5 : index
    %c0_168 = arith.constant 0 : index
    %c0_169 = arith.constant 0 : index
    %300 = vector.load %arg4[%c5_167, %c0_168, %c0_169] : memref<8x32x64xbf16, #tpu.memory_space<vmem>>, vector<1x32x64xbf16>
    %301 = vector.shape_cast %300 : vector<1x32x64xbf16> to vector<32x64xbf16>
    %cst_170 = arith.constant dense<0.000000e+00> : vector<64x64xf32>
    %302 = tpu.matmul %289, %301, %cst_170 {dimension_numbers = #tpu.dot_dimension_numbers<[1], [0], [0], [1], [0, 0, 1, 1], [], []>} : vector<64x32xbf16>, vector<32x64xbf16>, vector<64x64xf32> -> vector<64x64xf32>
    %c5_171 = arith.constant 5 : index
    %c0_172 = arith.constant 0 : index
    %c0_173 = arith.constant 0 : index
    %303 = vector.load %arg5[%c5_171, %c0_172, %c0_173] : memref<8x32x64xbf16, #tpu.memory_space<vmem>>, vector<1x32x64xbf16>
    %304 = vector.shape_cast %303 : vector<1x32x64xbf16> to vector<32x64xbf16>
    %cst_174 = arith.constant dense<0.000000e+00> : vector<64x64xf32>
    %305 = tpu.matmul %290, %304, %cst_174 {dimension_numbers = #tpu.dot_dimension_numbers<[1], [0], [0], [1], [0, 0, 1, 1], [], []>} : vector<64x32xbf16>, vector<32x64xbf16>, vector<64x64xf32> -> vector<64x64xf32>
    %306 = arith.addf %302, %305 : vector<64x64xf32>
    %c5_175 = arith.constant 5 : index
    %c0_176 = arith.constant 0 : index
    %c0_177 = arith.constant 0 : index
    %307 = vector.load %arg6[%c5_175, %c0_176, %c0_177] : memref<8x1x64xf32, #tpu.memory_space<vmem>>, vector<1x1x64xf32>
    %308 = vector.shape_cast %307 : vector<1x1x64xf32> to vector<1x64xf32>
    %309 = vector.broadcast %308 : vector<1x64xf32> to vector<64x64xf32>
    %310 = arith.addf %306, %309 : vector<64x64xf32>
    %311 = vector.extract_strided_slice %310 {offsets = [0, 0], sizes = [64, 32], strides = [1, 1]} : vector<64x64xf32> to vector<64x32xf32>
    %312 = math.tanh %311 : vector<64x32xf32>
    %313 = vector.extract_strided_slice %310 {offsets = [0, 32], sizes = [64, 32], strides = [1, 1]} : vector<64x64xf32> to vector<64x32xf32>
    %314 = arith.negf %313 : vector<64x32xf32>
    %315 = math.exp %314 : vector<64x32xf32>
    %cst_178 = arith.constant 1.000000e+00 : f32
    %316 = vector.broadcast %cst_178 : f32 to vector<64x32xf32>
    %317 = arith.addf %316, %315 : vector<64x32xf32>
    %318 = arith.divf %316, %317 : vector<64x32xf32>
    %319 = arith.mulf %312, %318 : vector<64x32xf32>
    %320 = arith.truncf %319 : vector<64x32xf32> to vector<64x32xbf16>
    %c5_179 = arith.constant 5 : index
    %c0_180 = arith.constant 0 : index
    %c0_181 = arith.constant 0 : index
    %321 = vector.load %arg9[%c5_179, %c0_180, %c0_181] : memref<8x32x32xbf16, #tpu.memory_space<vmem>>, vector<1x32x32xbf16>
    %322 = vector.shape_cast %321 : vector<1x32x32xbf16> to vector<32x32xbf16>
    %cst_182 = arith.constant dense<0.000000e+00> : vector<64x32xf32>
    %323 = tpu.matmul %320, %322, %cst_182 {dimension_numbers = #tpu.dot_dimension_numbers<[1], [0], [0], [1], [0, 0, 1, 1], [], []>} : vector<64x32xbf16>, vector<32x32xbf16>, vector<64x32xf32> -> vector<64x32xf32>
    %c5_183 = arith.constant 5 : index
    %c0_184 = arith.constant 0 : index
    %c0_185 = arith.constant 0 : index
    %324 = vector.load %arg10[%c5_183, %c0_184, %c0_185] : memref<8x32x32xbf16, #tpu.memory_space<vmem>>, vector<1x32x32xbf16>
    %325 = vector.shape_cast %324 : vector<1x32x32xbf16> to vector<32x32xbf16>
    %cst_186 = arith.constant dense<0.000000e+00> : vector<64x32xf32>
    %326 = tpu.matmul %320, %325, %cst_186 {dimension_numbers = #tpu.dot_dimension_numbers<[1], [0], [0], [1], [0, 0, 1, 1], [], []>} : vector<64x32xbf16>, vector<32x32xbf16>, vector<64x32xf32> -> vector<64x32xf32>
    %327 = vector.shape_cast %323 : vector<64x32xf32> to vector<4x16x32xf32>
    %328 = arith.truncf %327 : vector<4x16x32xf32> to vector<4x16x32xbf16>
    %329 = vector.shape_cast %326 : vector<64x32xf32> to vector<4x16x32xf32>
    %330 = arith.truncf %329 : vector<4x16x32xf32> to vector<4x16x32xbf16>
    %331 = vector.shape_cast %2 : vector<16x16xbf16> to vector<1x16x16xbf16>
    %332 = vector.broadcast %331 : vector<1x16x16xbf16> to vector<4x16x16xbf16>
    %333 = vector.shape_cast %3 : vector<16x16xbf16> to vector<1x16x16xbf16>
    %334 = vector.broadcast %333 : vector<1x16x16xbf16> to vector<4x16x16xbf16>
    %cst_187 = arith.constant dense<0.000000e+00> : vector<4x16x32xf32>
    %335 = tpu.matmul %332, %328, %cst_187 {dimension_numbers = #tpu.dot_dimension_numbers<[2], [1], [1], [2], [0, 0, 0, 1, 1, 2], [0], [0]>} : vector<4x16x16xbf16>, vector<4x16x32xbf16>, vector<4x16x32xf32> -> vector<4x16x32xf32>
    %cst_188 = arith.constant dense<0.000000e+00> : vector<4x16x32xf32>
    %336 = tpu.matmul %334, %330, %cst_188 {dimension_numbers = #tpu.dot_dimension_numbers<[2], [1], [1], [2], [0, 0, 0, 1, 1, 2], [0], [0]>} : vector<4x16x16xbf16>, vector<4x16x32xbf16>, vector<4x16x32xf32> -> vector<4x16x32xf32>
    %337 = arith.addf %335, %336 : vector<4x16x32xf32>
    %338 = vector.shape_cast %337 : vector<4x16x32xf32> to vector<64x32xf32>
    %c5_189 = arith.constant 5 : index
    %c0_190 = arith.constant 0 : index
    %c0_191 = arith.constant 0 : index
    %339 = vector.load %arg11[%c5_189, %c0_190, %c0_191] : memref<8x1x32xf32, #tpu.memory_space<vmem>>, vector<1x1x32xf32>
    %340 = vector.shape_cast %339 : vector<1x1x32xf32> to vector<1x32xf32>
    %341 = vector.broadcast %340 : vector<1x32xf32> to vector<64x32xf32>
    %342 = arith.addf %338, %341 : vector<64x32xf32>
    %343 = vector.extract_strided_slice %287 {offsets = [32, 0], sizes = [64, 32], strides = [1, 1]} : vector<96x32xf32> to vector<64x32xf32>
    %344 = arith.addf %342, %343 : vector<64x32xf32>
    %345 = arith.truncf %344 : vector<64x32xf32> to vector<64x32xbf16>
    %346 = vector.extract_strided_slice %345 {offsets = [0, 0], sizes = [48, 32], strides = [1, 1]} : vector<64x32xbf16> to vector<48x32xbf16>
    %347 = vector.extract_strided_slice %345 {offsets = [16, 0], sizes = [48, 32], strides = [1, 1]} : vector<64x32xbf16> to vector<48x32xbf16>
    %348 = vector.extract_strided_slice %345 {offsets = [48, 0], sizes = [16, 32], strides = [1, 1]} : vector<64x32xbf16> to vector<16x32xbf16>
    %c6 = arith.constant 6 : index
    %c0_192 = arith.constant 0 : index
    %c0_193 = arith.constant 0 : index
    %349 = vector.load %arg7[%c6, %c0_192, %c0_193] : memref<8x32x64xbf16, #tpu.memory_space<vmem>>, vector<1x32x64xbf16>
    %350 = vector.shape_cast %349 : vector<1x32x64xbf16> to vector<32x64xbf16>
    %cst_194 = arith.constant dense<0.000000e+00> : vector<16x64xf32>
    %351 = tpu.matmul %348, %350, %cst_194 {dimension_numbers = #tpu.dot_dimension_numbers<[1], [0], [0], [1], [0, 0, 1, 1], [], []>} : vector<16x32xbf16>, vector<32x64xbf16>, vector<16x64xf32> -> vector<16x64xf32>
    %c6_195 = arith.constant 6 : index
    %c0_196 = arith.constant 0 : index
    %c0_197 = arith.constant 0 : index
    %352 = vector.load %arg8[%c6_195, %c0_196, %c0_197] : memref<8x1x64xf32, #tpu.memory_space<vmem>>, vector<1x1x64xf32>
    %353 = vector.shape_cast %352 : vector<1x1x64xf32> to vector<1x64xf32>
    %354 = vector.broadcast %353 : vector<1x64xf32> to vector<16x64xf32>
    %355 = arith.addf %351, %354 : vector<16x64xf32>
    %356 = arith.addf %299, %355 : vector<16x64xf32>
    %c6_198 = arith.constant 6 : index
    %c0_199 = arith.constant 0 : index
    %c0_200 = arith.constant 0 : index
    %357 = vector.load %arg4[%c6_198, %c0_199, %c0_200] : memref<8x32x64xbf16, #tpu.memory_space<vmem>>, vector<1x32x64xbf16>
    %358 = vector.shape_cast %357 : vector<1x32x64xbf16> to vector<32x64xbf16>
    %cst_201 = arith.constant dense<0.000000e+00> : vector<48x64xf32>
    %359 = tpu.matmul %346, %358, %cst_201 {dimension_numbers = #tpu.dot_dimension_numbers<[1], [0], [0], [1], [0, 0, 1, 1], [], []>} : vector<48x32xbf16>, vector<32x64xbf16>, vector<48x64xf32> -> vector<48x64xf32>
    %c6_202 = arith.constant 6 : index
    %c0_203 = arith.constant 0 : index
    %c0_204 = arith.constant 0 : index
    %360 = vector.load %arg5[%c6_202, %c0_203, %c0_204] : memref<8x32x64xbf16, #tpu.memory_space<vmem>>, vector<1x32x64xbf16>
    %361 = vector.shape_cast %360 : vector<1x32x64xbf16> to vector<32x64xbf16>
    %cst_205 = arith.constant dense<0.000000e+00> : vector<48x64xf32>
    %362 = tpu.matmul %347, %361, %cst_205 {dimension_numbers = #tpu.dot_dimension_numbers<[1], [0], [0], [1], [0, 0, 1, 1], [], []>} : vector<48x32xbf16>, vector<32x64xbf16>, vector<48x64xf32> -> vector<48x64xf32>
    %363 = arith.addf %359, %362 : vector<48x64xf32>
    %c6_206 = arith.constant 6 : index
    %c0_207 = arith.constant 0 : index
    %c0_208 = arith.constant 0 : index
    %364 = vector.load %arg6[%c6_206, %c0_207, %c0_208] : memref<8x1x64xf32, #tpu.memory_space<vmem>>, vector<1x1x64xf32>
    %365 = vector.shape_cast %364 : vector<1x1x64xf32> to vector<1x64xf32>
    %366 = vector.broadcast %365 : vector<1x64xf32> to vector<48x64xf32>
    %367 = arith.addf %363, %366 : vector<48x64xf32>
    %368 = vector.extract_strided_slice %367 {offsets = [0, 0], sizes = [48, 32], strides = [1, 1]} : vector<48x64xf32> to vector<48x32xf32>
    %369 = math.tanh %368 : vector<48x32xf32>
    %370 = vector.extract_strided_slice %367 {offsets = [0, 32], sizes = [48, 32], strides = [1, 1]} : vector<48x64xf32> to vector<48x32xf32>
    %371 = arith.negf %370 : vector<48x32xf32>
    %372 = math.exp %371 : vector<48x32xf32>
    %cst_209 = arith.constant 1.000000e+00 : f32
    %373 = vector.broadcast %cst_209 : f32 to vector<48x32xf32>
    %374 = arith.addf %373, %372 : vector<48x32xf32>
    %375 = arith.divf %373, %374 : vector<48x32xf32>
    %376 = arith.mulf %369, %375 : vector<48x32xf32>
    %377 = arith.truncf %376 : vector<48x32xf32> to vector<48x32xbf16>
    %c6_210 = arith.constant 6 : index
    %c0_211 = arith.constant 0 : index
    %c0_212 = arith.constant 0 : index
    %378 = vector.load %arg9[%c6_210, %c0_211, %c0_212] : memref<8x32x32xbf16, #tpu.memory_space<vmem>>, vector<1x32x32xbf16>
    %379 = vector.shape_cast %378 : vector<1x32x32xbf16> to vector<32x32xbf16>
    %cst_213 = arith.constant dense<0.000000e+00> : vector<48x32xf32>
    %380 = tpu.matmul %377, %379, %cst_213 {dimension_numbers = #tpu.dot_dimension_numbers<[1], [0], [0], [1], [0, 0, 1, 1], [], []>} : vector<48x32xbf16>, vector<32x32xbf16>, vector<48x32xf32> -> vector<48x32xf32>
    %c6_214 = arith.constant 6 : index
    %c0_215 = arith.constant 0 : index
    %c0_216 = arith.constant 0 : index
    %381 = vector.load %arg10[%c6_214, %c0_215, %c0_216] : memref<8x32x32xbf16, #tpu.memory_space<vmem>>, vector<1x32x32xbf16>
    %382 = vector.shape_cast %381 : vector<1x32x32xbf16> to vector<32x32xbf16>
    %cst_217 = arith.constant dense<0.000000e+00> : vector<48x32xf32>
    %383 = tpu.matmul %377, %382, %cst_217 {dimension_numbers = #tpu.dot_dimension_numbers<[1], [0], [0], [1], [0, 0, 1, 1], [], []>} : vector<48x32xbf16>, vector<32x32xbf16>, vector<48x32xf32> -> vector<48x32xf32>
    %384 = vector.shape_cast %380 : vector<48x32xf32> to vector<3x16x32xf32>
    %385 = arith.truncf %384 : vector<3x16x32xf32> to vector<3x16x32xbf16>
    %386 = vector.shape_cast %383 : vector<48x32xf32> to vector<3x16x32xf32>
    %387 = arith.truncf %386 : vector<3x16x32xf32> to vector<3x16x32xbf16>
    %388 = vector.shape_cast %2 : vector<16x16xbf16> to vector<1x16x16xbf16>
    %389 = vector.broadcast %388 : vector<1x16x16xbf16> to vector<3x16x16xbf16>
    %390 = vector.shape_cast %3 : vector<16x16xbf16> to vector<1x16x16xbf16>
    %391 = vector.broadcast %390 : vector<1x16x16xbf16> to vector<3x16x16xbf16>
    %cst_218 = arith.constant dense<0.000000e+00> : vector<3x16x32xf32>
    %392 = tpu.matmul %389, %385, %cst_218 {dimension_numbers = #tpu.dot_dimension_numbers<[2], [1], [1], [2], [0, 0, 0, 1, 1, 2], [0], [0]>} : vector<3x16x16xbf16>, vector<3x16x32xbf16>, vector<3x16x32xf32> -> vector<3x16x32xf32>
    %cst_219 = arith.constant dense<0.000000e+00> : vector<3x16x32xf32>
    %393 = tpu.matmul %391, %387, %cst_219 {dimension_numbers = #tpu.dot_dimension_numbers<[2], [1], [1], [2], [0, 0, 0, 1, 1, 2], [0], [0]>} : vector<3x16x16xbf16>, vector<3x16x32xbf16>, vector<3x16x32xf32> -> vector<3x16x32xf32>
    %394 = arith.addf %392, %393 : vector<3x16x32xf32>
    %395 = vector.shape_cast %394 : vector<3x16x32xf32> to vector<48x32xf32>
    %c6_220 = arith.constant 6 : index
    %c0_221 = arith.constant 0 : index
    %c0_222 = arith.constant 0 : index
    %396 = vector.load %arg11[%c6_220, %c0_221, %c0_222] : memref<8x1x32xf32, #tpu.memory_space<vmem>>, vector<1x1x32xf32>
    %397 = vector.shape_cast %396 : vector<1x1x32xf32> to vector<1x32xf32>
    %398 = vector.broadcast %397 : vector<1x32xf32> to vector<48x32xf32>
    %399 = arith.addf %395, %398 : vector<48x32xf32>
    %400 = vector.extract_strided_slice %344 {offsets = [16, 0], sizes = [48, 32], strides = [1, 1]} : vector<64x32xf32> to vector<48x32xf32>
    %401 = arith.addf %399, %400 : vector<48x32xf32>
    %402 = arith.truncf %401 : vector<48x32xf32> to vector<48x32xbf16>
    %403 = vector.extract_strided_slice %402 {offsets = [32, 0], sizes = [16, 32], strides = [1, 1]} : vector<48x32xbf16> to vector<16x32xbf16>
    %c7 = arith.constant 7 : index
    %c0_223 = arith.constant 0 : index
    %c0_224 = arith.constant 0 : index
    %404 = vector.load %arg7[%c7, %c0_223, %c0_224] : memref<8x32x64xbf16, #tpu.memory_space<vmem>>, vector<1x32x64xbf16>
    %405 = vector.shape_cast %404 : vector<1x32x64xbf16> to vector<32x64xbf16>
    %cst_225 = arith.constant dense<0.000000e+00> : vector<16x64xf32>
    %406 = tpu.matmul %403, %405, %cst_225 {dimension_numbers = #tpu.dot_dimension_numbers<[1], [0], [0], [1], [0, 0, 1, 1], [], []>} : vector<16x32xbf16>, vector<32x64xbf16>, vector<16x64xf32> -> vector<16x64xf32>
    %c7_226 = arith.constant 7 : index
    %c0_227 = arith.constant 0 : index
    %c0_228 = arith.constant 0 : index
    %407 = vector.load %arg8[%c7_226, %c0_227, %c0_228] : memref<8x1x64xf32, #tpu.memory_space<vmem>>, vector<1x1x64xf32>
    %408 = vector.shape_cast %407 : vector<1x1x64xf32> to vector<1x64xf32>
    %409 = vector.broadcast %408 : vector<1x64xf32> to vector<16x64xf32>
    %410 = arith.addf %406, %409 : vector<16x64xf32>
    %411 = arith.addf %356, %410 : vector<16x64xf32>
    %cst_229 = arith.constant 0.000000e+00 : f32
    %412 = vector.broadcast %cst_229 : f32 to vector<16x64xf32>
    %413 = arith.maximumf %411, %412 : vector<16x64xf32>
    %414 = arith.truncf %413 : vector<16x64xf32> to vector<16x64xbf16>
    %c0_230 = arith.constant 0 : index
    %c0_231 = arith.constant 0 : index
    %415 = vector.load %arg12[%c0_230, %c0_231] : memref<64x64xbf16, #tpu.memory_space<vmem>>, vector<64x64xbf16>
    %cst_232 = arith.constant dense<0.000000e+00> : vector<16x64xf32>
    %416 = tpu.matmul %414, %415, %cst_232 {dimension_numbers = #tpu.dot_dimension_numbers<[1], [0], [0], [1], [0, 0, 1, 1], [], []>} : vector<16x64xbf16>, vector<64x64xbf16>, vector<16x64xf32> -> vector<16x64xf32>
    %c0_233 = arith.constant 0 : index
    %c0_234 = arith.constant 0 : index
    %417 = vector.load %arg13[%c0_233, %c0_234] : memref<1x64xf32, #tpu.memory_space<vmem>>, vector<1x64xf32>
    %418 = vector.broadcast %417 : vector<1x64xf32> to vector<16x64xf32>
    %419 = arith.addf %416, %418 : vector<16x64xf32>
    %cst_235 = arith.constant 0.000000e+00 : f32
    %420 = vector.broadcast %cst_235 : f32 to vector<16x64xf32>
    %421 = arith.maximumf %419, %420 : vector<16x64xf32>
    %422 = arith.truncf %421 : vector<16x64xf32> to vector<16x64xbf16>
    %c0_236 = arith.constant 0 : index
    %c0_237 = arith.constant 0 : index
    %423 = vector.load %arg14[%c0_236, %c0_237] : memref<64x8xbf16, #tpu.memory_space<vmem>>, vector<64x8xbf16>
    %cst_238 = arith.constant dense<0.000000e+00> : vector<16x8xf32>
    %424 = tpu.matmul %422, %423, %cst_238 {dimension_numbers = #tpu.dot_dimension_numbers<[1], [0], [0], [1], [0, 0, 1, 1], [], []>} : vector<16x64xbf16>, vector<64x8xbf16>, vector<16x8xf32> -> vector<16x8xf32>
    %c0_239 = arith.constant 0 : index
    %c0_240 = arith.constant 0 : index
    %425 = vector.load %arg15[%c0_239, %c0_240] : memref<1x8xf32, #tpu.memory_space<vmem>>, vector<1x8xf32>
    %426 = vector.broadcast %425 : vector<1x8xf32> to vector<16x8xf32>
    %427 = arith.addf %424, %426 : vector<16x8xf32>
    %c0_241 = arith.constant 0 : index
    %c0_242 = arith.constant 0 : index
    %c0_243 = arith.constant 0 : index
    %428 = vector.load %arg16[%c0_241, %c0_242, %c0_243] : memref<1x16x8xf32, #tpu.memory_space<vmem>>, vector<1x16x8xf32>
    %429 = vector.shape_cast %428 : vector<1x16x8xf32> to vector<16x8xf32>
    %430 = vector.shape_cast %427 : vector<16x8xf32> to vector<1x16x8xf32>
    tpu.vector_store %arg16[%c0_241, %c0_242, %c0_243], %430 {strides = array<i32>} : memref<1x16x8xf32, #tpu.memory_space<vmem>>, vector<1x16x8xf32>,
    return
  }
  func.func @transform_0(%arg0: i32) -> (i32, i32, i32) {
    %c0_i32 = arith.constant 0 : i32
    %c0_i32_0 = arith.constant 0 : i32
    %c0_i32_1 = arith.constant 0 : i32
    return %arg0, %c0_i32, %c0_i32_0 : i32, i32, i32
  }
  func.func @transform_1(%arg0: i32) -> (i32, i32) {
    %c0_i32 = arith.constant 0 : i32
    %c0_i32_0 = arith.constant 0 : i32
    %c0_i32_1 = arith.constant 0 : i32
    return %c0_i32, %c0_i32_0 : i32, i32
  }
  func.func @transform_2(%arg0: i32) -> (i32, i32) {
    %c0_i32 = arith.constant 0 : i32
    %c0_i32_0 = arith.constant 0 : i32
    %c0_i32_1 = arith.constant 0 : i32
    return %c0_i32, %c0_i32_0 : i32, i32
  }
  func.func @transform_3(%arg0: i32) -> (i32, i32, i32) {
    %c0_i32 = arith.constant 0 : i32
    %c0_i32_0 = arith.constant 0 : i32
    %c0_i32_1 = arith.constant 0 : i32
    %c0_i32_2 = arith.constant 0 : i32
    return %c0_i32, %c0_i32_0, %c0_i32_1 : i32, i32, i32
  }
  func.func @transform_4(%arg0: i32) -> (i32, i32, i32) {
    %c0_i32 = arith.constant 0 : i32
    %c0_i32_0 = arith.constant 0 : i32
    %c0_i32_1 = arith.constant 0 : i32
    %c0_i32_2 = arith.constant 0 : i32
    return %c0_i32, %c0_i32_0, %c0_i32_1 : i32, i32, i32
  }
  func.func @transform_5(%arg0: i32) -> (i32, i32, i32) {
    %c0_i32 = arith.constant 0 : i32
    %c0_i32_0 = arith.constant 0 : i32
    %c0_i32_1 = arith.constant 0 : i32
    %c0_i32_2 = arith.constant 0 : i32
    return %c0_i32, %c0_i32_0, %c0_i32_1 : i32, i32, i32
  }
  func.func @transform_6(%arg0: i32) -> (i32, i32, i32) {
    %c0_i32 = arith.constant 0 : i32
    %c0_i32_0 = arith.constant 0 : i32
    %c0_i32_1 = arith.constant 0 : i32
    %c0_i32_2 = arith.constant 0 : i32
    return %c0_i32, %c0_i32_0, %c0_i32_1 : i32, i32, i32
  }
  func.func @transform_7(%arg0: i32) -> (i32, i32, i32) {
    %c0_i32 = arith.constant 0 : i32
    %c0_i32_0 = arith.constant 0 : i32
    %c0_i32_1 = arith.constant 0 : i32
    %c0_i32_2 = arith.constant 0 : i32
    return %c0_i32, %c0_i32_0, %c0_i32_1 : i32, i32, i32
  }
  func.func @transform_8(%arg0: i32) -> (i32, i32, i32) {
    %c0_i32 = arith.constant 0 : i32
    %c0_i32_0 = arith.constant 0 : i32
    %c0_i32_1 = arith.constant 0 : i32
    %c0_i32_2 = arith.constant 0 : i32
    return %c0_i32, %c0_i32_0, %c0_i32_1 : i32, i32, i32
  }
  func.func @transform_9(%arg0: i32) -> (i32, i32, i32) {
    %c0_i32 = arith.constant 0 : i32
    %c0_i32_0 = arith.constant 0 : i32
    %c0_i32_1 = arith.constant 0 : i32
    %c0_i32_2 = arith.constant 0 : i32
    return %c0_i32, %c0_i32_0, %c0_i32_1 : i32, i32, i32
  }
  func.func @transform_10(%arg0: i32) -> (i32, i32, i32) {
    %c0_i32 = arith.constant 0 : i32
    %c0_i32_0 = arith.constant 0 : i32
    %c0_i32_1 = arith.constant 0 : i32
    %c0_i32_2 = arith.constant 0 : i32
    return %c0_i32, %c0_i32_0, %c0_i32_1 : i32, i32, i32
  }
  func.func @transform_11(%arg0: i32) -> (i32, i32) {
    %c0_i32 = arith.constant 0 : i32
    %c0_i32_0 = arith.constant 0 : i32
    %c0_i32_1 = arith.constant 0 : i32
    return %c0_i32, %c0_i32_0 : i32, i32
  }
  func.func @transform_12(%arg0: i32) -> (i32, i32) {
    %c0_i32 = arith.constant 0 : i32
    %c0_i32_0 = arith.constant 0 : i32
    %c0_i32_1 = arith.constant 0 : i32
    return %c0_i32, %c0_i32_0 : i32, i32
  }
  func.func @transform_13(%arg0: i32) -> (i32, i32) {
    %c0_i32 = arith.constant 0 : i32
    %c0_i32_0 = arith.constant 0 : i32
    %c0_i32_1 = arith.constant 0 : i32
    return %c0_i32, %c0_i32_0 : i32, i32
  }
  func.func @transform_14(%arg0: i32) -> (i32, i32) {
    %c0_i32 = arith.constant 0 : i32
    %c0_i32_0 = arith.constant 0 : i32
    %c0_i32_1 = arith.constant 0 : i32
    return %c0_i32, %c0_i32_0 : i32, i32
  }
  func.func @transform_15(%arg0: i32) -> (i32, i32, i32) {
    %c0_i32 = arith.constant 0 : i32
    %c0_i32_0 = arith.constant 0 : i32
    %c0_i32_1 = arith.constant 0 : i32
    return %arg0, %c0_i32, %c0_i32_0 : i32, i32, i32
  }
}

</mosaic_0001>

<bundles_post_ra>
// kernel: graphwavenet_forward.1
= control target key start
LH: loop header
LB: loop body
LE: loop exit
PB: predicated region body
PF: predicated region fallthrough
CT: control target
= control target key end

     0   :  { %s13877_s18 = smov 0   ;;  %s16626_s0 = inlined_call_operand.vmem [shape: f32[2,208,32], index: 0, kind: input, shape index: {}]   ;;  %s16627_s1 = inlined_call_operand.vmem [shape: bf16[16,16], index: 1, kind: input, shape index: {}]   ;;  %s16628_s2 = inlined_call_operand.vmem [shape: bf16[16,16], index: 2, kind: input, shape index: {}]   ;;  %s16629_s3 = inlined_call_operand.vmem [shape: bf16[8,32,64], index: 3, kind: input, shape index: {}]   ;;  %s16630_s4 = inlined_call_operand.vmem [shape: bf16[8,32,64], index: 4, kind: input, shape index: {}]   ;;  %s16631_s5 = inlined_call_operand.vmem [shape: f32[8,1,64], index: 5, kind: input, shape index: {}]   ;;  %s16632_s6 = inlined_call_operand.vmem [shape: bf16[8,32,64], index: 6, kind: input, shape index: {}]   ;;  %s16633_s7 = inlined_call_operand.vmem [shape: f32[8,1,64], index: 7, kind: input, shape index: {}]   ;;  %s16634_s8 = inlined_call_operand.vmem [shape: bf16[8,32,32], index: 8, kind: input, shape index: {}]   ;;  %s16635_s9 = inlined_call_operand.vmem [shape: bf16[8,32,32], index: 9, kind: input, shape index: {}]   ;;  %s16636_s10 = inlined_call_operand.vmem [shape: f32[8,1,32], index: 10, kind: input, shape index: {}]   ;;  %s16637_s11 = inlined_call_operand.vmem [shape: bf16[64,64], index: 11, kind: input, shape index: {}]   ;;  %s16638_s12 = inlined_call_operand.vmem [shape: f32[1,64], index: 12, kind: input, shape index: {}]   ;;  %s16639_s13 = inlined_call_operand.vmem [shape: bf16[64,8], index: 13, kind: input, shape index: {}]   ;;  %s16640_s14 = inlined_call_operand.vmem [shape: f32[1,8], index: 14, kind: input, shape index: {}]   ;;  %s16641_s15 = inlined_call_operand.vmem [shape: f32[2,16,8], index: 15, kind: output, shape index: {}]  }
   0x1 LB: > { %s10535_s19 = sadd.s32 4294967295, %s13792_s18   ;;  %p10539_p0 = scmp.ge.s32.totalorder %s13792_s18, 1  ;;  %s13792_s18 = sphi %s13877_s18, %s25_s18  }
   0x2   : > { %p437_p1 = scmp.lt.s32.totalorder %s13792_s18, 3 }
   0x4   : > { %p438_p2 = pnand %p10539_p0, %p437_p1 }
   0x5   : > { %p485_p3 = scmp.lt.s32.totalorder (!%p438_p2), %s10535_s19, 1  ;;  %s13796_s21 = smov (!%p438_p2), 96  }
   0x6   : > { %441 = sbr.rel (%p438_p2) target bundleno = 6471 (0x1947), region = 80 }
   0xb   : > { %v13059_v0 = vld [vmem:[%s16632_s6 + $0x8] sm:$0xff]   ;;  %v13794_v1 = vmov 0.0   ;;  %v13061_v3 = vld [vmem:[%s16632_s6] sm:$0xff]   ;;  %vm13795_vm0 = vmmov 0   ;;  %s16643_s19 = smov (!%p485_p3, %s10535_s19), 1  ;;  %vm562_vm1 = vcmask 261120  }
   0xc   : > { %11699 = vmatprep.subr.bf16.mxu0 %v13794_v1  ;;  %v13060_v2 = vld [vmem:[%s16630_s4 + $0x8] sm:$0xff]   ;;  %11703 = vmatprep.mubr.msk.bf16.mxu0 %vm13795_vm0, %v13794_v1  ;;  %v13062_v4 = vld [vmem:[%s16630_s4] sm:$0xff]   ;;  %s13047_s30 = smul.u32 208, %s16643_s19  ;;  %vm1619_vm2 = vcmask 130048   ;;  %vm10346_vm3 = vcmask 523264   ;;  %s11208_s22 = sshll.u32 %s16643_s19, 4 }
   0xd   : > { %11700 = vmatpush3.bf16.msra.mxu0 %v13059_v0  ;;  %11707 = vmatprep.subr.bf16.mxu1 %v13060_v2  ;;  %v13063_v5 = vld [vmem:[%s16629_s3 + $0x8] sm:$0xff]   ;;  %v13064_v6 = vld [vmem:[%s16629_s3] sm:$0xff]   ;;  %s494_s27 = scalar_lea.vmem %s16641_s15, %s11208_s22  ;;  %vm10477_vm4 = vcmask 64512  }
   0xe   : > { %11701 = vmatprep.subr.bf16.mxu0 %v13794_v1  ;;  %11708 = vmatpush3.bf16.msra.mxu1 %v13060_v2  ;;  %s13910_s20 = scalar_lea.vmem %s16626_s0, %s13047_s30  ;;  %v13973_v55 = vld [vmem:[%s16631_s5] ss:$0 sm:$0xff] }
   0xf   : > { %11709 = vmatprep.subr.bf16.mxu1 %v13062_v4  ;;  %v520_v7 = vld [vmem:[%s13910_s20 + $0xc0] sm:$0xff]  ;;  %v521_v8 = vld [vmem:[%s13910_s20 + $0xc8] sm:$0xff]  ;;  %v498_v9 = vld [vmem:[%s13910_s20 + $0x10] sm:$0xff] }
  0x10   : > { %v538_v10 = vpack.c.bf16 %v521_v8, %v520_v7  ;;  %v499_v11 = vld [vmem:[%s13910_s20 + $0x18] sm:$0xff]  ;;  %v500_v12 = vld [vmem:[%s13910_s20 + $0x20] sm:$0xff]  ;;  %v501_v13 = vld [vmem:[%s13910_s20 + $0x28] sm:$0xff] }
  0x11   : > { %11702 = vmatpush3.bf16.msra.mxu0 %v13061_v3  ;;  %v527_v14 = vpack.c.bf16 %v499_v11, %v498_v9  ;;  %v528_v15 = vpack.c.bf16 %v501_v13, %v500_v12  ;;  %v496_v16 = vld [vmem:[%s13910_s20] sm:$0xff]  ;;  %v497_v17 = vld [vmem:[%s13910_s20 + $0x8] sm:$0xff]  ;;  %v502_v18 = vld [vmem:[%s13910_s20 + $0x30] sm:$0xff] }
  0x12   : > { %11735 = vmatprep.subr.bf16.mxu0 %v13063_v5  ;;  %11710 = vmatpush3.bf16.msra.mxu1 %v13062_v4  ;;  %v526_v19 = vpack.c.bf16 %v497_v17, %v496_v16  ;;  %v503_v20 = vld [vmem:[%s13910_s20 + $0x38] sm:$0xff]  ;;  %v504_v22 = vld [vmem:[%s13910_s20 + $0x40] sm:$0xff]  ;;  %v505_v23 = vld [vmem:[%s13910_s20 + $0x48] sm:$0xff] }
  0x13   : > { %11711 = vmatprep.mubr.msk.bf16.mxu1 %vm562_vm1, %v527_v14  ;;  %v529_v21 = vpack.c.bf16 %v503_v20, %v502_v18  ;;  %v506_v24 = vld [vmem:[%s13910_s20 + $0x50] sm:$0xff]  ;;  %v507_v25 = vld [vmem:[%s13910_s20 + $0x58] sm:$0xff]  ;;  %v530_v26 = vpack.c.bf16 %v505_v23, %v504_v22  ;;  %v508_v28 = vld [vmem:[%s13910_s20 + $0x60] sm:$0xff] }
  0x14   : > { %11704 = vmatmul.mubr.msk.bf16.vlgmr.msra.gmra.mxu0 %vm562_vm1, %v538_v10  ;;  %v531_v27 = vpack.c.bf16 %v507_v25, %v506_v24  ;;  %v509_v29 = vld [vmem:[%s13910_s20 + $0x68] sm:$0xff]  ;;  %v510_v30 = vld [vmem:[%s13910_s20 + $0x70] sm:$0xff]  ;;  %v511_v31 = vld [vmem:[%s13910_s20 + $0x78] sm:$0xff] }
  0x15   : > { %11736 = vmatpush3.bf16.msra.mxu0 %v13063_v5  ;;  %11712 = vmatmul.mubr.msk.bf16.vlgmr.msra.gmra.mxu1 %vm562_vm1, %v528_v15  ;;  %v532_v32 = vpack.c.bf16 %v509_v29, %v508_v28  ;;  %v533_v33 = vpack.c.bf16 %v511_v31, %v510_v30  ;;  %v512_v34 = vld [vmem:[%s13910_s20 + $0x80] sm:$0xff]  ;;  %v513_v35 = vld [vmem:[%s13910_s20 + $0x88] sm:$0xff]  ;;  %v514_v36 = vld [vmem:[%s13910_s20 + $0x90] sm:$0xff] }
  0x16   : > { %11737 = vmatprep.subr.bf16.mxu0 %v13064_v6  ;;  %11739 = vmatprep.mubr.msk.bf16.mxu0 %vm562_vm1, %v526_v19  ;;  %v515_v37 = vld [vmem:[%s13910_s20 + $0x98] sm:$0xff]  ;;  %v534_v38 = vpack.c.bf16 %v513_v35, %v512_v34  ;;  %v516_v40 = vld [vmem:[%s13910_s20 + $0xa0] sm:$0xff]  ;;  %v517_v41 = vld [vmem:[%s13910_s20 + $0xa8] sm:$0xff] }
  0x17   : > { %11715 = vmatprep.mubr.msk.bf16.mxu1 %vm562_vm1, %v529_v21  ;;  %v535_v39 = vpack.c.bf16 %v515_v37, %v514_v36  ;;  %v518_v42 = vld [vmem:[%s13910_s20 + $0xb0] sm:$0xff]  ;;  %v519_v43 = vld [vmem:[%s13910_s20 + $0xb8] sm:$0xff]  ;;  %v536_v44 = vpack.c.bf16 %v517_v41, %v516_v40 }
  0x18   : > { %v537_v45 = vpack.c.bf16 %v519_v43, %v518_v42 }
  0x19   : > { %11738 = vmatpush3.bf16.msra.mxu0 %v13064_v6 }
  0x1c   : > { %11740 = vmatmul.mubr.msk.bf16.vlgmr.msra.gmra.mxu0 %vm562_vm1, %v527_v14 }
  0x1d   : > { %11743 = vmatprep.mubr.msk.bf16.mxu0 %vm562_vm1, %v528_v15  ;;  %11716 = vmatmul.mubr.msk.bf16.gmra.mxu1 %vm562_vm1, %v530_v26 }
  0x1e   : > { %11719 = vmatprep.mubr.msk.bf16.mxu1 %vm562_vm1, %v531_v27 }
  0x24   : > { %11744 = vmatmul.mubr.msk.bf16.gmra.mxu0 %vm562_vm1, %v529_v21 }
  0x25   : > { %11747 = vmatprep.mubr.msk.bf16.mxu0 %vm562_vm1, %v530_v26  ;;  %11720 = vmatmul.mubr.msk.bf16.gmra.mxu1 %vm562_vm1, %v532_v32 }
  0x26   : > { %11723 = vmatprep.mubr.msk.bf16.mxu1 %vm562_vm1, %v533_v33 }
  0x2c   : > { %11748 = vmatmul.mubr.msk.bf16.gmra.mxu0 %vm562_vm1, %v531_v27 }
  0x2d   : > { %11751 = vmatprep.mubr.msk.bf16.mxu0 %vm562_vm1, %v532_v32  ;;  %11724 = vmatmul.mubr.msk.bf16.gmra.mxu1 %vm562_vm1, %v534_v38 }
  0x2e   : > { %11727 = vmatprep.mubr.msk.bf16.mxu1 %vm562_vm1, %v535_v39 }
  0x34   : > { %11752 = vmatmul.mubr.msk.bf16.gmra.mxu0 %vm562_vm1, %v533_v33 }
  0x35   : > { %11755 = vmatprep.mubr.msk.bf16.mxu0 %vm562_vm1, %v534_v38  ;;  %11728 = vmatmul.mubr.msk.bf16.gmra.mxu1 %vm562_vm1, %v536_v44 }
  0x36   : > { %11731 = vmatprep.mubr.msk.bf16.mxu1 %vm562_vm1, %v537_v45 }
  0x3c   : > { %11756 = vmatmul.mubr.msk.bf16.gmra.mxu0 %vm562_vm1, %v535_v39 }
  0x3d   : > { %11759 = vmatprep.mubr.msk.bf16.mxu0 %vm562_vm1, %v536_v44  ;;  %11732 = vmatmul.mubr.msk.bf16.gmra.mxu1 %vm562_vm1, %v538_v10 }
  0x44   : > { %11760 = vmatmul.mubr.msk.bf16.gmra.mxu0 %vm562_vm1, %v537_v45 }
  0xd4   : > { %v13966_v46 = vpop.f32.mrf.mxu0 }
  0xd5   : > { %v11713_v48 = vpop.f32.mrf.mxu1 }
  0xd6   : > { %v11705_v47 = vpop.f32.mrf.mxu0 }
  0xd7   : > { %v694_v50 = vpop.f32.mrf.mxu1 }
  0xd8   : > { %v13968_v49 = vpop.f32.mrf.mxu0 }
  0xd9   : > { %v11714_v52 = vpop.f32.mrf.mxu1 }
  0xda   : > { %v11706_v51 = vpop.f32.mrf.mxu0 }
  0xdb   : > { %v697_v53 = vpop.f32.mrf.mxu1 }
  0xdc   : > { %v11741_v54 = vpop.f32.mrf.mxu0 }
  0xdd   : > { %v847_v56 = vadd.f32 %v11741_v54, %v11713_v48  ;;  %v11717_v57 = vpop.f32.mrf.mxu1 }
  0xde   : > { %v838_v58 = vpop.f32.mrf.mxu0 }
  0xdf   : > { %v13976_v59 = vadd.f32 %v13973_v55, %v847_v56  ;;  %v839_v60 = vadd.f32 %v838_v58, %v694_v50  ;;  %v710_v61 = vpop.f32.mrf.mxu1 }
  0xe0   : > { %v11742_v62 = vpop.f32.mrf.mxu0 }
  0xe1   : > { %v10578_v63 = vmul.f32 -1.442695, %v13976_v59  ;;  %v13980_v0 = vadd.f32 %v13973_v55, %v839_v60  ;;  %v850_v2 = vadd.f32 %v11742_v62, %v11714_v52  ;;  %v11718_v3 = vpop.f32.mrf.mxu1  ;;  %v13066_v62 = vld [vmem:[%s16635_s9 + $0x8] sm:$0xff]  }
  0xe2   : > { %v841_v4 = vpop.f32.mrf.mxu0  ;;  %11791 = vmatprep.subr.bf16.mxu0 %v13066_v62 }
  0xe3   : > { %13141 = vpow2.f32 %v10578_v63  ;;  %v10576_v5 = vmul.f32 -1.442695, %v13980_v0  ;;  %v13984_v6 = vadd.f32 %v13973_v55, %v850_v2  ;;  %v842_v7 = vadd.f32 %v841_v4, %v697_v53  ;;  %v713_v8 = vpop.f32.mrf.mxu1  ;;  %11792 = vmatpush3.bf16.msra.mxu0 %v13066_v62 }
  0xe4   : > { %v11745_v9 = vpop.f32.mrf.mxu0 }
  0xe5   : > { %13143 = vpow2.f32 %v10576_v5  ;;  %v10579_v10 = vmul.f32 -1.442695, %v13984_v6  ;;  %v13988_v11 = vadd.f32 %v13973_v55, %v842_v7  ;;  %v863_v12 = vadd.f32 %v11745_v9, %v11717_v57  ;;  %v11721_v13 = vpop.f32.mrf.mxu1 }
  0xe6   : > { %v854_v14 = vpop.f32.mrf.mxu0 }
  0xe7   : > { %13145 = vpow2.f32 %v10579_v10  ;;  %v10577_v15 = vmul.f32 -1.442695, %v13988_v11  ;;  %v13992_v16 = vadd.f32 %v13973_v55, %v863_v12  ;;  %v855_v17 = vadd.f32 %v854_v14, %v710_v61  ;;  %v726_v18 = vpop.f32.mrf.mxu1  ;;  %v13065_v61 = vld [vmem:[%s16634_s8 + $0x8] sm:$0xff]  }
  0xe8   : > { %v11746_v19 = vpop.f32.mrf.mxu0  ;;  %11763 = vmatprep.subr.bf16.mxu1 %v13065_v61 }
  0xe9   : > { %13147 = vpow2.f32 %v10577_v15  ;;  %v10582_v20 = vmul.f32 -1.442695, %v13992_v16  ;;  %v13996_v21 = vadd.f32 %v13973_v55, %v855_v17  ;;  %v866_v22 = vadd.f32 %v11746_v19, %v11718_v3  ;;  %v11722_v23 = vpop.f32.mrf.mxu1  ;;  %11764 = vmatpush3.bf16.msra.mxu1 %v13065_v61  ;;  %v13067_v19 = vld [vmem:[%s16634_s8] sm:$0xff]  }
  0xea   : > { %v857_v24 = vpop.f32.mrf.mxu0  ;;  %11765 = vmatprep.subr.bf16.mxu1 %v13067_v19 }
  0xeb   : > { %13149 = vpow2.f32 %v10582_v20  ;;  %v10580_v25 = vmul.f32 -1.442695, %v13996_v21  ;;  %v14000_v26 = vadd.f32 %v13973_v55, %v866_v22  ;;  %v858_v27 = vadd.f32 %v857_v24, %v713_v8  ;;  %v729_v28 = vpop.f32.mrf.mxu1  ;;  %v13068_v20 = vld [vmem:[%s16635_s9] sm:$0xff]  }
  0xec   : > { %v11749_v29 = vpop.f32.mrf.mxu0  ;;  %11793 = vmatprep.subr.bf16.mxu0 %v13068_v20 }
  0xed   : > { %13151 = vpow2.f32 %v10580_v25  ;;  %v10583_v30 = vmul.f32 -1.442695, %v14000_v26  ;;  %v14004_v31 = vadd.f32 %v13973_v55, %v858_v27  ;;  %v879_v32 = vadd.f32 %v11749_v29, %v11721_v13  ;;  %v11725_v33 = vpop.f32.mrf.mxu1  ;;  %11766 = vmatpush3.bf16.msra.mxu1 %v13067_v19  ;;  %11794 = vmatpush3.bf16.msra.mxu0 %v13068_v20 }
  0xee   : > { %v870_v34 = vpop.f32.mrf.mxu0  ;;  %11825 = vmatprep.subr.bf16.mxu0 %v13794_v1  ;;  %11819 = vmatprep.subr.bf16.mxu1 %v13794_v1 }
  0xef   : > { %v10581_v35 = vmul.f32 -1.442695, %v14004_v31  ;;  %v14008_v36 = vadd.f32 %v13973_v55, %v879_v32  ;;  %v871_v37 = vadd.f32 %v870_v34, %v726_v18  ;;  %13153 = vpow2.f32 %v10583_v30  ;;  %v742_v39 = vpop.f32.mrf.mxu1 }
  0xf0   : > { %v13142_v38 = vpop.eup %13141  ;;  %v11750_v40 = vpop.f32.mrf.mxu0 }
  0xf1   : > { %v1062_v41 = vadd.f32 1.0, %v13142_v38  ;;  %13155 = vpow2.f32 %v10581_v35  ;;  %v14011_v42 = vadd.f32 %v13973_v55, %v871_v37  ;;  %v10586_v44 = vmul.f32 -1.442695, %v14008_v36  ;;  %v11726_v45 = vpop.f32.mrf.mxu1 }
  0xf2   : > { %v13144_v43 = vpop.eup %13143  ;;  %v873_v47 = vpop.f32.mrf.mxu0  ;;  %v882_v50 = vadd.f32 %v11750_v40, %v11722_v23 }
  0xf3   : > { %13157 = vrcp.f32 %v1062_v41  ;;  %v1060_v48 = vadd.f32 1.0, %v13144_v43  ;;  %v10584_v52 = vmul.f32 -1.442695, %v14011_v42  ;;  %v874_v53 = vadd.f32 %v873_v47, %v729_v28  ;;  %v745_v58 = vpop.f32.mrf.mxu1 }
  0xf4   : > { %v13146_v51 = vpop.eup %13145  ;;  %v11753_v54 = vpop.f32.mrf.mxu0  ;;  %v14022_v2 = vadd.f32 %v13973_v55, %v882_v50 }
  0xf5   : > { %13159 = vrcp.f32 %v1060_v48  ;;  %v1063_v56 = vadd.f32 1.0, %v13146_v51  ;;  %v14025_v4 = vadd.f32 %v13973_v55, %v874_v53  ;;  %v895_v7 = vadd.f32 %v11753_v54, %v11725_v33  ;;  %v11729_v10 = vpop.f32.mrf.mxu1 }
  0xf6   : > { %v13148_v57 = vpop.eup %13147  ;;  %13161 = vpow2.f32 %v10586_v44  ;;  %v886_v60 = vpop.f32.mrf.mxu0  ;;  %v10587_v15 = vmul.f32 -1.442695, %v14022_v2 }
  0xf7   : > { %13163 = vrcp.f32 %v1063_v56  ;;  %v1061_v63 = vadd.f32 1.0, %v13148_v57  ;;  %v887_v12 = vadd.f32 %v886_v60, %v742_v39  ;;  %v10585_v17 = vmul.f32 -1.442695, %v14025_v4  ;;  %v758_v27 = vpop.f32.mrf.mxu1 }
  0xf8   : > { %v13150_v3 = vpop.eup %13149  ;;  %13165 = vpow2.f32 %v10584_v52  ;;  %v11754_v5 = vpop.f32.mrf.mxu0  ;;  %v14036_v23 = vadd.f32 %v13973_v55, %v895_v7 }
  0xf9   : > { %13167 = vrcp.f32 %v1061_v63  ;;  %v1066_v9 = vadd.f32 1.0, %v13150_v3  ;;  %v14039_v25 = vadd.f32 %v13973_v55, %v887_v12  ;;  %v898_v28 = vadd.f32 %v11754_v5, %v11726_v45  ;;  %v11730_v41 = vpop.f32.mrf.mxu1 }
  0xfa   : > { %v13152_v8 = vpop.eup %13151  ;;  %v889_v13 = vpop.f32.mrf.mxu0  ;;  %v10590_v37 = vmul.f32 -1.442695, %v14036_v23 }
  0xfb   : > { %v1064_v14 = vadd.f32 1.0, %v13152_v8  ;;  %v890_v32 = vadd.f32 %v889_v13, %v745_v58  ;;  %v10588_v39 = vmul.f32 -1.442695, %v14039_v25  ;;  %v14047_v40 = vadd.f32 %v13973_v55, %v898_v28  ;;  %v761_v56 = vpop.f32.mrf.mxu1 }
  0xfc   : > { %v11757_v18 = vpop.f32.mrf.mxu0  ;;  %v13154_v22 = vpop.eup %13153 }
  0xfd   : > { %13169 = vrcp.f32 %v1064_v14  ;;  %v1067_v34 = vadd.f32 1.0, %v13154_v22  ;;  %v14050_v44 = vadd.f32 %v13973_v55, %v890_v32  ;;  %v911_v45 = vadd.f32 %v11757_v18, %v11729_v10  ;;  %v11733_v5 = vpop.f32.mrf.mxu1 }
  0xfe   : > { %v13156_v24 = vpop.eup %13155  ;;  %13171 = vrcp.f32 %v1066_v9  ;;  %v902_v29 = vpop.f32.mrf.mxu0  ;;  %v10591_v54 = vmul.f32 -1.442695, %v14047_v40 }
  0xff   : > { %v1065_v30 = vadd.f32 1.0, %v13156_v24  ;;  %13173 = vpow2.f32 %v10587_v15  ;;  %v903_v51 = vadd.f32 %v902_v29, %v758_v27  ;;  %v10589_v57 = vmul.f32 -1.442695, %v14050_v44  ;;  %v774_v19 = vpop.f32.mrf.mxu1 }
 0x100   : > { %v13158_v33 = vpop.eup %13157  ;;  %13175 = vpow2.f32 %v10585_v17  ;;  %v11758_v35 = vpop.f32.mrf.mxu0  ;;  %v14057_v58 = vadd.f32 %v13973_v55, %v911_v45 }
 0x101   : > { %13177 = vrcp.f32 %v1065_v30  ;;  %1160 = vrot.lane.b32.xlu1 %v13158_v33, %s13796_s21  ;;  %v14061_v62 = vadd.f32 %v13973_v55, %v903_v51  ;;  %v914_v63 = vadd.f32 %v11758_v35, %v11730_v41  ;;  %v11734_v33 = vpop.f32.mrf.mxu1 }
 0x102   : > { %v13160_v38 = vpop.eup %13159  ;;  %13179 = vrcp.f32 %v1067_v34  ;;  %v905_v48 = vpop.f32.mrf.mxu0  ;;  %v10594_v8 = vmul.f32 -1.442695, %v14057_v58 }
 0x103   : > { %v13162_v43 = vpop.eup %13161  ;;  %1156 = vrot.lane.b32.xlu0 %v13160_v38, %s13796_s21  ;;  %13181 = vpow2.f32 %v10590_v37  ;;  %v906_v9 = vadd.f32 %v905_v48, %v761_v56  ;;  %v10592_v14 = vmul.f32 -1.442695, %v14061_v62  ;;  %v14067_v15 = vadd.f32 %v13973_v55, %v914_v63 }
 0x104   : > { %v13164_v47 = vpop.eup %13163  ;;  %13183 = vpow2.f32 %v10588_v39  ;;  %v1070_v60 = vadd.f32 1.0, %v13162_v43  ;;  %v11761_v61 = vpop.f32.mrf.mxu0 }
 0x105   : > { %v13166_v50 = vpop.eup %13165  ;;  %1162 = vrot.lane.b32.xlu1 %v13164_v47, %s13796_s21  ;;  %v14070_v20 = vadd.f32 %v13973_v55, %v906_v9  ;;  %v927_v24 = vadd.f32 %v11761_v61, %v11733_v5  ;;  %v10595_v29 = vmul.f32 -1.442695, %v14067_v15  ;;  %v777_v47 = vpop.f32.mrf.mxu1 }
 0x106   : > { %v13168_v52 = vpop.eup %13167  ;;  %v1068_v53 = vadd.f32 1.0, %v13166_v50  ;;  %v918_v12 = vpop.f32.mrf.mxu0 }
 0x107   : > { %1158 = vrot.lane.b32.xlu0 %v13168_v52, %s13796_s21  ;;  %v919_v30 = vadd.f32 %v918_v12, %v774_v19  ;;  %v10593_v35 = vmul.f32 -1.442695, %v14070_v20  ;;  %v14078_v38 = vadd.f32 %v13973_v55, %v927_v24 }
 0x108   : > { %13185 = vrcp.f32 %v1068_v53  ;;  %v11762_v27 = vpop.f32.mrf.mxu0 }
 0x109   : > { %13187 = vpow2.f32 %v10591_v54  ;;  %v14081_v43 = vadd.f32 %v13973_v55, %v919_v30  ;;  %v930_v48 = vadd.f32 %v11762_v27, %v11734_v33  ;;  %v10598_v53 = vmul.f32 -1.442695, %v14078_v38 }
 0x10a   : > { %v13170_v3 = vpop.eup %13169  ;;  %13189 = vpow2.f32 %v10589_v57  ;;  %v921_v39 = vpop.f32.mrf.mxu0 }
 0x10b   : > { %v13172_v7 = vpop.eup %13171  ;;  %1164 = vrot.lane.b32.xlu0 %v13170_v3, %s13796_s21  ;;  %13191 = vrcp.f32 %v1070_v60  ;;  %v922_v51 = vadd.f32 %v921_v39, %v777_v47  ;;  %v10596_v57 = vmul.f32 -1.442695, %v14081_v43  ;;  %v14087_v60 = vadd.f32 %v13973_v55, %v930_v48 }
 0x10c   : > { %v13174_v10 = vpop.eup %13173  ;;  %13193 = vpow2.f32 %v10594_v8 }
 0x10d   : > { %v13176_v13 = vpop.eup %13175  ;;  %v1071_v22 = vadd.f32 1.0, %v13174_v10  ;;  %v14091_v63 = vadd.f32 %v13973_v55, %v922_v51  ;;  %v10599_v8 = vmul.f32 -1.442695, %v14087_v60 }
 0x10e   : > { %v13178_v17 = vpop.eup %13177  ;;  %v1069_v18 = vadd.f32 1.0, %v13176_v13 }
 0x10f   : > { %1166 = vrot.lane.b32.xlu1 %v13178_v17, %s13796_s21  ;;  %1168 = vrot.lane.b32.xlu0 %v13172_v7, %s13796_s21  ;;  %v13180_v28 = vpop.eup %13179  ;;  %v10597_v10 = vmul.f32 -1.442695, %v14091_v63 }
 0x110   : > { %13195 = vrcp.f32 %v1069_v18  ;;  %v13182_v32 = vpop.eup %13181 }
 0x111   : > { %13197 = vpow2.f32 %v10592_v14  ;;  %v13184_v34 = vpop.eup %13183  ;;  %v1074_v45 = vadd.f32 1.0, %v13182_v32 }
 0x112   : > { %13199 = vrcp.f32 %v1071_v22  ;;  %v1072_v37 = vadd.f32 1.0, %v13184_v34 }
 0x113   : > { %1170 = vrot.lane.b32.xlu1 %v13180_v28, %s13796_s21  ;;  %13201 = vpow2.f32 %v10595_v29 }
 0x114   : > { %13203 = vrcp.f32 %v1072_v37 }
 0x115   : > { %v13186_v41 = vpop.eup %13185  ;;  %13205 = vpow2.f32 %v10593_v35 }
 0x116   : > { %1172 = vrot.lane.b32.xlu0 %v13186_v41, %s13796_s21  ;;  %v13188_v50 = vpop.eup %13187  ;;  %13207 = vrcp.f32 %v1074_v45 }
 0x117   : > { %v13190_v52 = vpop.eup %13189  ;;  %v1075_v61 = vadd.f32 1.0, %v13188_v50 }
 0x118   : > { %v13192_v54 = vpop.eup %13191  ;;  %v1073_v56 = vadd.f32 1.0, %v13190_v52 }
 0x119   : > { %v13194_v3 = vpop.eup %13193 }
 0x11a   : > { %1176 = vrot.lane.b32.xlu0 %v13192_v54, %s13796_s21  ;;  %13209 = vrcp.f32 %v1073_v56  ;;  %v1078_v13 = vadd.f32 1.0, %v13194_v3 }
 0x11b   : > { %13211 = vpow2.f32 %v10598_v53 }
 0x11c   : > { %13213 = vpow2.f32 %v10596_v57 }
 0x11d   : > { %v13196_v5 = vpop.eup %13195  ;;  %13215 = vrcp.f32 %v1075_v61 }
 0x11e   : > { %v13198_v7 = vpop.eup %13197  ;;  %1174 = vrot.lane.b32.xlu1 %v13196_v5, %s13796_s21 }
 0x11f   : > { %v1076_v9 = vadd.f32 1.0, %v13198_v7  ;;  %v13200_v12 = vpop.eup %13199 }
 0x120   : > { %v13202_v14 = vpop.eup %13201 }
 0x121   : > { %13217 = vrcp.f32 %v1076_v9  ;;  %v13204_v55 = vpop.eup %13203  ;;  %v1079_v22 = vadd.f32 1.0, %v13202_v14 }
 0x122   : > { %13219 = vpow2.f32 %v10599_v8  ;;  %1178 = vrot.lane.b32.xlu1 %v13200_v12, %s13796_s21  ;;  %v13206_v17 = vpop.eup %13205  ;;  %1180 = vrot.lane.b32.xlu0 %v13204_v55, %s13796_s21 }
 0x123   : > { %13221 = vpow2.f32 %v10597_v10  ;;  %v1077_v18 = vadd.f32 1.0, %v13206_v17  ;;  %v13208_v19 = vpop.eup %13207 }
 0x124   : > { %13223 = vrcp.f32 %v1078_v13 }
 0x125   : > { %13225 = vrcp.f32 %v1077_v18 }
 0x126   : > { %1184 = vrot.lane.b32.xlu0 %v13208_v19, %s13796_s21  ;;  %13227 = vrcp.f32 %v1079_v22 }
 0x127   : > { %v13210_v24 = vpop.eup %13209 }
 0x128   : > { %v13212_v27 = vpop.eup %13211  ;;  %1182 = vrot.lane.b32.xlu1 %v13210_v24, %s13796_s21 }
 0x129   : > { %v13214_v28 = vpop.eup %13213  ;;  %v1082_v32 = vadd.f32 1.0, %v13212_v27 }
 0x12a   : > { %v1080_v29 = vadd.f32 1.0, %v13214_v28  ;;  %v13216_v30 = vpop.eup %13215 }
 0x12c   : > { %13229 = vrcp.f32 %v1080_v29  ;;  %1186 = vrot.lane.b32.xlu1 %v13216_v30, %s13796_s21 }
 0x12d   : > { %13231 = vrcp.f32 %v1082_v32 }
 0x12e   : > { %v13218_v33 = vpop.eup %13217 }
 0x12f   : > { %v13220_v34 = vpop.eup %13219  ;;  %1188 = vrot.lane.b32.xlu0 %v13218_v33, %s13796_s21 }
 0x130   : > { %v13222_v35 = vpop.eup %13221  ;;  %v1083_v41 = vadd.f32 1.0, %v13220_v34 }
 0x131   : > { %v1081_v37 = vadd.f32 1.0, %v13222_v35  ;;  %v13224_v39 = vpop.eup %13223 }
 0x132   : > { %v13226_v45 = vpop.eup %13225 }
 0x133   : > { %13233 = vrcp.f32 %v1081_v37  ;;  %1192 = vrot.lane.b32.xlu0 %v13224_v39, %s13796_s21  ;;  %1190 = vrot.lane.b32.xlu1 %v13226_v45, %s13796_s21  ;;  %v13228_v47 = vpop.eup %13227 }
 0x134   : > { %13235 = vrcp.f32 %v1083_v41 }
 0x135   : > { %13237 = vtanh.f32 %v13976_v59 }
 0x136   : > { %13239 = vtanh.f32 %v13984_v6 }
 0x137   : > { %1194 = vrot.lane.b32.xlu1 %v13228_v47, %s13796_s21  ;;  %13241 = vtanh.f32 %v13980_v0 }
 0x138   : > { %13243 = vtanh.f32 %v13988_v11 }
 0x139   : > { %v13230_v48 = vpop.eup %13229  ;;  %13245 = vtanh.f32 %v13996_v21 }
 0x13a   : > { %1196 = vrot.lane.b32.xlu0 %v13230_v48, %s13796_s21  ;;  %v13232_v50 = vpop.eup %13231  ;;  %13247 = vtanh.f32 %v14004_v31 }
 0x13b   : > { %13249 = vtanh.f32 %v13992_v16 }
 0x13c   : > { %13251 = vtanh.f32 %v14000_v26 }
 0x13d   : > { %13253 = vtanh.f32 %v14011_v42 }
 0x13e   : > { %1200 = vrot.lane.b32.xlu0 %v13232_v50, %s13796_s21  ;;  %13255 = vtanh.f32 %v14025_v4 }
 0x13f   : > { %13257 = vtanh.f32 %v14008_v36 }
 0x140   : > { %v13234_v51 = vpop.eup %13233  ;;  %13259 = vtanh.f32 %v14022_v2 }
 0x141   : > { %1198 = vrot.lane.b32.xlu1 %v13234_v51, %s13796_s21  ;;  %v13236_v52 = vpop.eup %13235  ;;  %13261 = vtanh.f32 %v14039_v25 }
 0x142   : > { %v13238_v56 = vpop.eup %13237  ;;  %13263 = vtanh.f32 %v14050_v44 }
 0x143   : > { %v13240_v57 = vpop.eup %13239  ;;  %13265 = vtanh.f32 %v14036_v23 }
 0x144   : > { %v13242_v3 = vpop.eup %13241  ;;  %13267 = vtanh.f32 %v14047_v40 }
 0x145   : > { %1202 = vrot.lane.b32.xlu1 %v13236_v52, %s13796_s21  ;;  %v13244_v5 = vpop.eup %13243  ;;  %13269 = vtanh.f32 %v14061_v62 }
 0x146   : > { %v13246_v16 = vpop.eup %13245  ;;  %13271 = vtanh.f32 %v14070_v20 }
 0x147   : > { %v13248_v31 = vpop.eup %13247  ;;  %13273 = vtanh.f32 %v14057_v58 }
 0x148   : > { %v13250_v14 = vpop.eup %13249  ;;  %13275 = vtanh.f32 %v14067_v15 }
 0x149   : > { %v13252_v17 = vpop.eup %13251  ;;  %13277 = vtanh.f32 %v14081_v43 }
 0x14a   : > { %v13254_v24 = vpop.eup %13253  ;;  %13279 = vtanh.f32 %v14091_v63 }
 0x14b   : > { %v13256_v36 = vpop.eup %13255  ;;  %13281 = vtanh.f32 %v14078_v38 }
 0x14c   : > { %v13258_v2 = vpop.eup %13257  ;;  %13283 = vtanh.f32 %v14087_v60 }
 0x14d   : > { %v13260_v33 = vpop.eup %13259 }
 0x14e   : > { %v13262_v23 = vpop.eup %13261 }
 0x14f   : > { %v13264_v40 = vpop.eup %13263 }
 0x150   : > { %v13266_v48 = vpop.eup %13265 }
 0x151   : > { %v13268_v51 = vpop.eup %13267 }
 0x152   : > { %v13270_v58 = vpop.eup %13269 }
 0x153   : > { %v13272_v15 = vpop.eup %13271 }
 0x173   : > { %v1161_v53 = vpop.permute.xlu1 %1160 }
 0x174   : > { %v1230_v59 = vmul.f32 %v13238_v56, %v1161_v53 }
 0x175   : > { %v1157_v54 = vpop.permute.xlu0 %1156 }
 0x176   : > { %v1228_v7 = vmul.f32 %v13242_v3, %v1157_v54 }
 0x177   : > { %v1163_v61 = vpop.permute.xlu1 %1162 }
 0x178   : > { %v1231_v6 = vmul.f32 %v13240_v57, %v1163_v61 }
 0x179   : > { %v1159_v0 = vpop.permute.xlu0 %1158 }
 0x17a   : > { %v1253_v11 = vpack.c.bf16 %v1231_v6, %v1230_v59  ;;  %v1229_v8 = vmul.f32 %v13244_v5, %v1159_v0  ;;  %v13274_v59 = vpop.eup %13273 }
 0x17b   : > { %v13276_v5 = vpop.eup %13275 }
 0x17c   : > { %v1252_v21 = vpack.c.bf16 %v1229_v8, %v1228_v7  ;;  %v13278_v38 = vpop.eup %13277 }
 0x17d   : > { %v1165_v9 = vpop.permute.xlu0 %1164  ;;  %v13280_v8 = vpop.eup %13279 }
 0x17e   : > { %11767 = vmatprep.mubr.msk.bf16.mxu1 %vm562_vm1, %v1252_v21  ;;  %11795 = vmatprep.mubr.msk.bf16.mxu0 %vm562_vm1, %v1252_v21  ;;  %v1232_v10 = vmul.f32 %v13246_v16, %v1165_v9 }
 0x17f   : > { %11768 = vmatmul.mubr.msk.bf16.vlgmr.msra.gmra.mxu1 %vm562_vm1, %v1253_v11  ;;  %11796 = vmatmul.mubr.msk.bf16.vlgmr.msra.gmra.mxu0 %vm562_vm1, %v1253_v11 }
 0x181   : > { %v1167_v26 = vpop.permute.xlu1 %1166  ;;  %v1169_v13 = vpop.permute.xlu0 %1168 }
 0x182   : > { %v1233_v12 = vmul.f32 %v13248_v31, %v1167_v26  ;;  %v1234_v19 = vmul.f32 %v13250_v14, %v1169_v13  ;;  %v13282_v31 = vpop.eup %13281 }
 0x184   : > { %v1254_v55 = vpack.c.bf16 %v1233_v12, %v1232_v10  ;;  %v13284_v10 = vpop.eup %13283 }
 0x185   : > { %v1171_v18 = vpop.permute.xlu1 %1170 }
 0x186   : > { %v1235_v22 = vmul.f32 %v13252_v17, %v1171_v18  ;;  %11771 = vmatprep.mubr.msk.bf16.mxu1 %vm562_vm1, %v1254_v55  ;;  %11799 = vmatprep.mubr.msk.bf16.mxu0 %vm562_vm1, %v1254_v55 }
 0x188   : > { %v1255_v42 = vpack.c.bf16 %v1235_v22, %v1234_v19  ;;  %v1173_v4 = vpop.permute.xlu0 %1172 }
 0x189   : > { %v1236_v28 = vmul.f32 %v13254_v24, %v1173_v4  ;;  %v14164_v4 = vld [vmem:[%s16628_s2] sm:$0xff]  }
 0x18a   : > { %11772 = vmatmul.mubr.msk.bf16.gmra.mxu1 %vm562_vm1, %v1255_v42  ;;  %11800 = vmatmul.mubr.msk.bf16.gmra.mxu0 %vm562_vm1, %v1255_v42 }
 0x18c   : > { %v1177_v30 = vpop.permute.xlu0 %1176 }
 0x18d   : > { %v1238_v35 = vmul.f32 %v13258_v2, %v1177_v30 }
 0x190   : > { %v1175_v27 = vpop.permute.xlu1 %1174 }
 0x191   : > { %v1237_v29 = vmul.f32 %v13256_v36, %v1175_v27 }
 0x193   : > { %v1256_v32 = vpack.c.bf16 %v1237_v29, %v1236_v28 }
 0x194   : > { %v1179_v34 = vpop.permute.xlu1 %1178  ;;  %v1181_v44 = vpop.permute.xlu0 %1180 }
 0x195   : > { %v1239_v37 = vmul.f32 %v13260_v33, %v1179_v34  ;;  %11775 = vmatprep.mubr.msk.bf16.mxu1 %vm562_vm1, %v1256_v32  ;;  %11803 = vmatprep.mubr.msk.bf16.mxu0 %vm562_vm1, %v1256_v32  ;;  %v1240_v41 = vmul.f32 %v13262_v23, %v1181_v44 }
 0x197   : > { %v1257_v25 = vpack.c.bf16 %v1239_v37, %v1238_v35 }
 0x198   : > { %v1185_v47 = vpop.permute.xlu0 %1184 }
 0x199   : > { %11776 = vmatmul.mubr.msk.bf16.gmra.mxu1 %vm562_vm1, %v1257_v25  ;;  %11804 = vmatmul.mubr.msk.bf16.gmra.mxu0 %vm562_vm1, %v1257_v25  ;;  %v1242_v52 = vmul.f32 %v13266_v48, %v1185_v47 }
 0x19a   : > { %v1183_v39 = vpop.permute.xlu1 %1182 }
 0x19b   : > { %v1241_v45 = vmul.f32 %v13264_v40, %v1183_v39 }
 0x19d   : > { %v1258_v50 = vpack.c.bf16 %v1241_v45, %v1240_v41 }
 0x19e   : > { %v1187_v62 = vpop.permute.xlu1 %1186 }
 0x19f   : > { %v1243_v53 = vmul.f32 %v13268_v51, %v1187_v62  ;;  %11779 = vmatprep.mubr.msk.bf16.mxu1 %vm562_vm1, %v1258_v50  ;;  %11807 = vmatprep.mubr.msk.bf16.mxu0 %vm562_vm1, %v1258_v50 }
 0x1a1   : > { %v1259_v20 = vpack.c.bf16 %v1243_v53, %v1242_v52  ;;  %v1189_v54 = vpop.permute.xlu0 %1188 }
 0x1a2   : > { %v1244_v57 = vmul.f32 %v13270_v58, %v1189_v54 }
 0x1a3   : > { %11780 = vmatmul.mubr.msk.bf16.gmra.mxu1 %vm562_vm1, %v1259_v20  ;;  %11808 = vmatmul.mubr.msk.bf16.gmra.mxu0 %vm562_vm1, %v1259_v20 }
 0x1a5   : > { %v1191_v56 = vpop.permute.xlu1 %1190  ;;  %v1193_v3 = vpop.permute.xlu0 %1192 }
 0x1a6   : > { %v1245_v61 = vmul.f32 %v13272_v15, %v1191_v56  ;;  %v1246_v7 = vmul.f32 %v13274_v59, %v1193_v3 }
 0x1a8   : > { %v1260_v6 = vpack.c.bf16 %v1245_v61, %v1244_v57 }
 0x1a9   : > { %v1195_v0 = vpop.permute.xlu1 %1194 }
 0x1aa   : > { %v1247_v11 = vmul.f32 %v13276_v5, %v1195_v0  ;;  %11783 = vmatprep.mubr.msk.bf16.mxu1 %vm562_vm1, %v1260_v6  ;;  %11811 = vmatprep.mubr.msk.bf16.mxu0 %vm562_vm1, %v1260_v6 }
 0x1ac   : > { %v1261_v43 = vpack.c.bf16 %v1247_v11, %v1246_v7  ;;  %v1197_v63 = vpop.permute.xlu0 %1196 }
 0x1ad   : > { %v1248_v9 = vmul.f32 %v13278_v38, %v1197_v63 }
 0x1ae   : > { %11784 = vmatmul.mubr.msk.bf16.gmra.mxu1 %vm562_vm1, %v1261_v43  ;;  %11812 = vmatmul.mubr.msk.bf16.gmra.mxu0 %vm562_vm1, %v1261_v43 }
 0x1b0   : > { %v1201_v16 = vpop.permute.xlu0 %1200 }
 0x1b1   : > { %v1250_v13 = vmul.f32 %v13282_v31, %v1201_v16  ;;  %v13070_v31 = vld [vmem:[%s16627_s1] sm:$0xff]  }
 0x1b3   : > { %v1199_v21 = vpop.permute.xlu1 %1198 }
 0x1b4   : > { %v1249_v60 = vmul.f32 %v13280_v8, %v1199_v21 }
 0x1b6   : > { %v1262_v26 = vpack.c.bf16 %v1249_v60, %v1248_v9 }
 0x1b7   : > { %v1203_v12 = vpop.permute.xlu1 %1202 }
 0x1b8   : > { %v1251_v14 = vmul.f32 %v13284_v10, %v1203_v12  ;;  %11787 = vmatprep.mubr.msk.bf16.mxu1 %vm562_vm1, %v1262_v26  ;;  %11815 = vmatprep.mubr.msk.bf16.mxu0 %vm562_vm1, %v1262_v26 }
 0x1ba   : > { %v1263_v55 = vpack.c.bf16 %v1251_v14, %v1250_v13 }
 0x1bc   : > { %11788 = vmatmul.mubr.msk.bf16.gmra.mxu1 %vm562_vm1, %v1263_v55  ;;  %11816 = vmatmul.mubr.msk.bf16.gmra.mxu0 %vm562_vm1, %v1263_v55 }
 0x1bd   : > { %11827 = vmatprep.mubr.msk.bf16.mxu0 %vm13795_vm0, %v13794_v1  ;;  %11821 = vmatprep.mubr.msk.bf16.mxu1 %vm13795_vm0, %v13794_v1 }
 0x23f   : > { %v11797_v17 = vpop.f32.mrf.mxu0  ;;  %v14176_v32 = vpop.f32.mrf.mxu1 }
 0x241   : > { %v1495_v18 = vpop.f32.mrf.mxu0  ;;  %v14184_v33 = vpop.f32.mrf.mxu1 }
 0x243   : > { %v11798_v19 = vpop.f32.mrf.mxu0  ;;  %v14190_v35 = vpop.f32.mrf.mxu1 }
 0x244   : > { %v1603_v22 = vpack.c.bf16 %v11798_v19, %v11797_v17  ;;  %v1591_v9 = vpack.c.bf16 %v14190_v35, %v14176_v32  ;;  %v13071_v32 = vld [vmem:[%s16630_s4 + $0x18] sm:$0xff]   ;;  %v13074_v35 = vld [vmem:[%s16632_s6 + $0x10] sm:$0xff]  }
 0x245   : > { %v1498_v42 = vpop.f32.mrf.mxu0  ;;  %v14192_v44 = vpop.f32.mrf.mxu1 }
 0x246   : > { %v1602_v24 = vpack.c.bf16 %v1498_v42, %v1495_v18  ;;  %11826 = vmatpush3.bf16.msra.mxu0 %v1603_v22  ;;  %v1590_v60 = vpack.c.bf16 %v14192_v44, %v14184_v33  ;;  %v13072_v33 = vld [vmem:[%s16630_s4 + $0x10] sm:$0xff]  }
 0x247   : > { %11837 = vmatprep.subr.bf16.mxu0 %v13794_v1 }
 0x248   : > { %11820 = vmatpush3.bf16.msra.mxu1 %v1602_v24 }
 0x249   : > { %11828 = vmatmul.mubr.msk.bf16.vlgmr.msra.gmra.mxu0 %vm1619_vm2, %v14164_v4  ;;  %11831 = vmatprep.subr.bf16.mxu1 %v13794_v1 }
 0x24a   : > { %v11801_v36 = vpop.f32.mrf.mxu0  ;;  %11839 = vmatprep.mubr.msk.bf16.mxu0 %vm13795_vm0, %v13794_v1  ;;  %v14194_v39 = vpop.f32.mrf.mxu1 }
 0x24b   : > { %11822 = vmatmul.mubr.msk.bf16.vlgmr.msra.gmra.mxu1 %vm1619_vm2, %v14164_v4 }
 0x24c   : > { %v1511_v27 = vpop.f32.mrf.mxu0  ;;  %11833 = vmatprep.mubr.msk.bf16.mxu1 %vm13795_vm0, %v13794_v1  ;;  %v14200_v45 = vpop.f32.mrf.mxu1 }
 0x24e   : > { %v11802_v28 = vpop.f32.mrf.mxu0  ;;  %v11774_v50 = vpop.f32.mrf.mxu1 }
 0x24f   : > { %v1605_v29 = vpack.c.bf16 %v11802_v28, %v11801_v36  ;;  %v1593_v10 = vpack.c.bf16 %v11774_v50, %v14194_v39 }
 0x250   : > { %v1514_v30 = vpop.f32.mrf.mxu0  ;;  %v1369_v20 = vpop.f32.mrf.mxu1 }
 0x251   : > { %v1604_v2 = vpack.c.bf16 %v1514_v30, %v1511_v27  ;;  %11838 = vmatpush3.bf16.msra.mxu0 %v1605_v29  ;;  %v1592_v12 = vpack.c.bf16 %v1369_v20, %v14200_v45 }
 0x252   : > { %11849 = vmatprep.subr.bf16.mxu0 %v13794_v1 }
 0x253   : > { %11832 = vmatpush3.bf16.msra.mxu1 %v1604_v2 }
 0x254   : > { %11840 = vmatmul.mubr.msk.bf16.vlgmr.msra.gmra.mxu0 %vm1619_vm2, %v14164_v4  ;;  %11843 = vmatprep.subr.bf16.mxu1 %v13794_v1 }
 0x255   : > { %11851 = vmatprep.mubr.msk.bf16.mxu0 %vm13795_vm0, %v13794_v1 }
 0x256   : > { %11834 = vmatmul.mubr.msk.bf16.vlgmr.msra.gmra.mxu1 %vm1619_vm2, %v14164_v4 }
 0x257   : > { %11845 = vmatprep.mubr.msk.bf16.mxu1 %vm13795_vm0, %v13794_v1 }
 0x259   : > { %v11805_v34 = vpop.f32.mrf.mxu0  ;;  %v11777_v54 = vpop.f32.mrf.mxu1 }
 0x25b   : > { %v1527_v37 = vpop.f32.mrf.mxu0  ;;  %v1382_v56 = vpop.f32.mrf.mxu1 }
 0x25d   : > { %v11806_v25 = vpop.f32.mrf.mxu0  ;;  %v11778_v6 = vpop.f32.mrf.mxu1 }
 0x25e   : > { %v1607_v23 = vpack.c.bf16 %v11806_v25, %v11805_v34  ;;  %v1595_v55 = vpack.c.bf16 %v11778_v6, %v11777_v54  ;;  %v13073_v34 = vld [vmem:[%s16632_s6 + $0x18] sm:$0xff]  }
 0x25f   : > { %v1530_v40 = vpop.f32.mrf.mxu0  ;;  %v1385_v5 = vpop.f32.mrf.mxu1 }
 0x260   : > { %v1606_v41 = vpack.c.bf16 %v1530_v40, %v1527_v37  ;;  %11850 = vmatpush3.bf16.msra.mxu0 %v1607_v23  ;;  %v1594_v17 = vpack.c.bf16 %v1385_v5, %v1382_v56  ;;  %v14308_v37 = vld [vmem:[%s16629_s3 + $0x18] sm:$0xff]  }
 0x261   : > { %11861 = vmatprep.subr.bf16.mxu0 %v13794_v1 }
 0x262   : > { %11844 = vmatpush3.bf16.msra.mxu1 %v1606_v41 }
 0x263   : > { %11852 = vmatmul.mubr.msk.bf16.vlgmr.msra.gmra.mxu0 %vm1619_vm2, %v14164_v4  ;;  %11855 = vmatprep.subr.bf16.mxu1 %v13794_v1  ;;  %v11809_v47 = vpop.f32.mrf.mxu0  ;;  %v11781_v11 = vpop.f32.mrf.mxu1 }
 0x264   : > { %11863 = vmatprep.mubr.msk.bf16.mxu0 %vm13795_vm0, %v13794_v1 }
 0x265   : > { %11846 = vmatmul.mubr.msk.bf16.vlgmr.msra.gmra.mxu1 %vm1619_vm2, %v14164_v4  ;;  %v1543_v48 = vpop.f32.mrf.mxu0  ;;  %v1398_v21 = vpop.f32.mrf.mxu1 }
 0x266   : > { %11857 = vmatprep.mubr.msk.bf16.mxu1 %vm13795_vm0, %v13794_v1 }
 0x267   : > { %v11810_v51 = vpop.f32.mrf.mxu0  ;;  %v11782_v16 = vpop.f32.mrf.mxu1 }
 0x268   : > { %v1609_v62 = vpack.c.bf16 %v11810_v51, %v11809_v47  ;;  %v1597_v22 = vpack.c.bf16 %v11782_v16, %v11781_v11 }
 0x269   : > { %v1546_v52 = vpop.f32.mrf.mxu0  ;;  %v1401_v26 = vpop.f32.mrf.mxu1 }
 0x26a   : > { %v1608_v53 = vpack.c.bf16 %v1546_v52, %v1543_v48  ;;  %11862 = vmatpush3.bf16.msra.mxu0 %v1609_v62  ;;  %v1596_v42 = vpack.c.bf16 %v1401_v26, %v1398_v21 }
 0x26b   : > { %11873 = vmatprep.subr.bf16.mxu0 %v13794_v1 }
 0x26c   : > { %11856 = vmatpush3.bf16.msra.mxu1 %v1608_v53 }
 0x26d   : > { %11864 = vmatmul.mubr.msk.bf16.vlgmr.msra.gmra.mxu0 %vm1619_vm2, %v14164_v4  ;;  %11867 = vmatprep.subr.bf16.mxu1 %v13794_v1 }
 0x26e   : > { %11875 = vmatprep.mubr.msk.bf16.mxu0 %vm13795_vm0, %v13794_v1  ;;  %v11813_v58 = vpop.f32.mrf.mxu0  ;;  %v11785_v13 = vpop.f32.mrf.mxu1 }
 0x26f   : > { %11858 = vmatmul.mubr.msk.bf16.vlgmr.msra.gmra.mxu1 %vm1619_vm2, %v14164_v4 }
 0x270   : > { %11869 = vmatprep.mubr.msk.bf16.mxu1 %vm13795_vm0, %v13794_v1  ;;  %v1559_v15 = vpop.f32.mrf.mxu0  ;;  %v1414_v14 = vpop.f32.mrf.mxu1 }
 0x272   : > { %v11814_v57 = vpop.f32.mrf.mxu0  ;;  %v11786_v18 = vpop.f32.mrf.mxu1 }
 0x273   : > { %v1611_v61 = vpack.c.bf16 %v11814_v57, %v11813_v58  ;;  %v1599_v36 = vpack.c.bf16 %v11786_v18, %v11785_v13 }
 0x274   : > { %v1562_v3 = vpop.f32.mrf.mxu0  ;;  %v1417_v19 = vpop.f32.mrf.mxu1 }
 0x275   : > { %v1610_v59 = vpack.c.bf16 %v1562_v3, %v1559_v15  ;;  %11874 = vmatpush3.bf16.msra.mxu0 %v1611_v61  ;;  %v1598_v27 = vpack.c.bf16 %v1417_v19, %v1414_v14 }
 0x276   : > { %11885 = vmatprep.subr.bf16.mxu0 %v13794_v1 }
 0x277   : > { %11868 = vmatpush3.bf16.msra.mxu1 %v1610_v59 }
 0x278   : > { %11876 = vmatmul.mubr.msk.bf16.vlgmr.msra.gmra.mxu0 %vm1619_vm2, %v14164_v4  ;;  %11879 = vmatprep.subr.bf16.mxu1 %v13794_v1 }
 0x279   : > { %11887 = vmatprep.mubr.msk.bf16.mxu0 %vm13795_vm0, %v13794_v1 }
 0x27a   : > { %11870 = vmatmul.mubr.msk.bf16.vlgmr.msra.gmra.mxu1 %vm1619_vm2, %v14164_v4 }
 0x27b   : > { %11881 = vmatprep.mubr.msk.bf16.mxu1 %vm13795_vm0, %v13794_v1 }
 0x27c   : > { %v11817_v0 = vpop.f32.mrf.mxu0 }
 0x27e   : > { %v1575_v7 = vpop.f32.mrf.mxu0 }
 0x280   : > { %v11818_v43 = vpop.f32.mrf.mxu0 }
 0x281   : > { %v1613_v63 = vpack.c.bf16 %v11818_v43, %v11817_v0 }
 0x282   : > { %v1578_v38 = vpop.f32.mrf.mxu0 }
 0x283   : > { %v1612_v8 = vpack.c.bf16 %v1578_v38, %v1575_v7  ;;  %11886 = vmatpush3.bf16.msra.mxu0 %v1613_v63 }
 0x284   : > { %11897 = vmatprep.subr.bf16.mxu0 %v13794_v1 }
 0x285   : > { %11880 = vmatpush3.bf16.msra.mxu1 %v1612_v8 }
 0x286   : > { %11888 = vmatmul.mubr.msk.bf16.vlgmr.msra.gmra.mxu0 %vm1619_vm2, %v14164_v4  ;;  %11891 = vmatprep.subr.bf16.mxu1 %v13794_v1 }
 0x287   : > { %11898 = vmatpush3.bf16.msra.mxu0 %v1591_v9  ;;  %11899 = vmatprep.mubr.msk.bf16.mxu0 %vm13795_vm0, %v13794_v1 }
 0x288   : > { %11882 = vmatmul.mubr.msk.bf16.vlgmr.msra.gmra.mxu1 %vm1619_vm2, %v14164_v4  ;;  %11909 = vmatprep.subr.bf16.mxu0 %v13794_v1  ;;  %v11789_v4 = vpop.f32.mrf.mxu1 }
 0x289   : > { %11892 = vmatpush3.bf16.msra.mxu1 %v1590_v60  ;;  %11893 = vmatprep.mubr.msk.bf16.mxu1 %vm13795_vm0, %v13794_v1 }
 0x28a   : > { %11903 = vmatprep.subr.bf16.mxu1 %v13794_v1  ;;  %v1430_v24 = vpop.f32.mrf.mxu1 }
 0x28c   : > { %v11790_v28 = vpop.f32.mrf.mxu1 }
 0x28d   : > { %v1601_v30 = vpack.c.bf16 %v11790_v28, %v11789_v4 }
 0x28e   : > { %11900 = vmatmul.mubr.msk.bf16.vlgmr.msra.gmra.mxu0 %vm1619_vm2, %v13070_v31  ;;  %v1433_v29 = vpop.f32.mrf.mxu1 }
 0x28f   : > { %11910 = vmatpush3.bf16.msra.mxu0 %v1593_v10  ;;  %11911 = vmatprep.mubr.msk.bf16.mxu0 %vm13795_vm0, %v13794_v1  ;;  %v1600_v2 = vpack.c.bf16 %v1433_v29, %v1430_v24 }
 0x290   : > { %11894 = vmatmul.mubr.msk.bf16.vlgmr.msra.gmra.mxu1 %vm1619_vm2, %v13070_v31  ;;  %11921 = vmatprep.subr.bf16.mxu0 %v13794_v1 }
 0x291   : > { %11904 = vmatpush3.bf16.msra.mxu1 %v1592_v12  ;;  %11905 = vmatprep.mubr.msk.bf16.mxu1 %vm13795_vm0, %v13794_v1 }
 0x292   : > { %11915 = vmatprep.subr.bf16.mxu1 %v13794_v1 }
 0x296   : > { %11912 = vmatmul.mubr.msk.bf16.vlgmr.msra.gmra.mxu0 %vm1619_vm2, %v13070_v31 }
 0x297   : > { %11922 = vmatpush3.bf16.msra.mxu0 %v1595_v55  ;;  %11923 = vmatprep.mubr.msk.bf16.mxu0 %vm13795_vm0, %v13794_v1 }
 0x298   : > { %11906 = vmatmul.mubr.msk.bf16.vlgmr.msra.gmra.mxu1 %vm1619_vm2, %v13070_v31  ;;  %11933 = vmatprep.subr.bf16.mxu0 %v13794_v1 }
 0x299   : > { %11916 = vmatpush3.bf16.msra.mxu1 %v1594_v17  ;;  %11917 = vmatprep.mubr.msk.bf16.mxu1 %vm13795_vm0, %v13794_v1 }
 0x29a   : > { %11927 = vmatprep.subr.bf16.mxu1 %v13794_v1 }
 0x29e   : > { %11924 = vmatmul.mubr.msk.bf16.vlgmr.msra.gmra.mxu0 %vm1619_vm2, %v13070_v31 }
 0x29f   : > { %11934 = vmatpush3.bf16.msra.mxu0 %v1597_v22  ;;  %11935 = vmatprep.mubr.msk.bf16.mxu0 %vm13795_vm0, %v13794_v1 }
 0x2a0   : > { %11918 = vmatmul.mubr.msk.bf16.vlgmr.msra.gmra.mxu1 %vm1619_vm2, %v13070_v31  ;;  %11945 = vmatprep.subr.bf16.mxu0 %v13794_v1 }
 0x2a1   : > { %11928 = vmatpush3.bf16.msra.mxu1 %v1596_v42  ;;  %11929 = vmatprep.mubr.msk.bf16.mxu1 %vm13795_vm0, %v13794_v1 }
 0x2a2   : > { %11939 = vmatprep.subr.bf16.mxu1 %v13794_v1 }
 0x2a6   : > { %11936 = vmatmul.mubr.msk.bf16.vlgmr.msra.gmra.mxu0 %vm1619_vm2, %v13070_v31 }
 0x2a7   : > { %11946 = vmatpush3.bf16.msra.mxu0 %v1599_v36  ;;  %11947 = vmatprep.mubr.msk.bf16.mxu0 %vm13795_vm0, %v13794_v1 }
 0x2a8   : > { %11930 = vmatmul.mubr.msk.bf16.vlgmr.msra.gmra.mxu1 %vm1619_vm2, %v13070_v31  ;;  %11957 = vmatprep.subr.bf16.mxu0 %v13794_v1 }
 0x2a9   : > { %11940 = vmatpush3.bf16.msra.mxu1 %v1598_v27  ;;  %11941 = vmatprep.mubr.msk.bf16.mxu1 %vm13795_vm0, %v13794_v1 }
 0x2aa   : > { %11951 = vmatprep.subr.bf16.mxu1 %v13794_v1 }
 0x2ae   : > { %11948 = vmatmul.mubr.msk.bf16.vlgmr.msra.gmra.mxu0 %vm1619_vm2, %v13070_v31 }
 0x2af   : > { %11958 = vmatpush3.bf16.msra.mxu0 %v1601_v30  ;;  %11959 = vmatprep.mubr.msk.bf16.mxu0 %vm13795_vm0, %v13794_v1 }
 0x2b0   : > { %11942 = vmatmul.mubr.msk.bf16.vlgmr.msra.gmra.mxu1 %vm1619_vm2, %v13070_v31  ;;  %11971 = vmatprep.subr.bf16.mxu0 %v13071_v32 }
 0x2b1   : > { %11952 = vmatpush3.bf16.msra.mxu1 %v1600_v2  ;;  %11953 = vmatprep.mubr.msk.bf16.mxu1 %vm13795_vm0, %v13794_v1 }
 0x2b2   : > { %11963 = vmatprep.subr.bf16.mxu1 %v13794_v1 }
 0x2b6   : > { %11960 = vmatmul.mubr.msk.bf16.vlgmr.msra.gmra.mxu0 %vm1619_vm2, %v13070_v31 }
 0x2b7   : > { %11972 = vmatpush3.bf16.msra.mxu0 %v13071_v32 }
 0x2b8   : > { %11954 = vmatmul.mubr.msk.bf16.vlgmr.msra.gmra.mxu1 %vm1619_vm2, %v13070_v31  ;;  %11973 = vmatprep.subr.bf16.mxu0 %v13072_v33 }
 0x2b9   : > { %11967 = vmatprep.mubr.msk.bf16.mxu1 %vm13795_vm0, %v13794_v1  ;;  %11964 = vmatpush3.bf16.msra.mxu1 %v13073_v34 }
 0x2ba   : > { %11965 = vmatprep.subr.bf16.mxu1 %v13794_v1 }
 0x2bb   : > { %11974 = vmatpush3.bf16.msra.mxu0 %v13072_v33 }
 0x2bd   : > { %11966 = vmatpush3.bf16.msra.mxu1 %v13074_v35 }
 0x2be   : > { %11995 = vmatprep.subr.bf16.mxu1 %v14308_v37 }
 0x309   : > { %v14311_v25 = vpop.f32.mrf.mxu0 }
 0x30b   : > { %v11829_v44 = vpop.f32.mrf.mxu0  ;;  %v14313_v23 = vpop.f32.mrf.mxu1 }
 0x30d   : > { %v14315_v40 = vpop.f32.mrf.mxu0  ;;  %v11823_v39 = vpop.f32.mrf.mxu1 }
 0x30f   : > { %v11830_v41 = vpop.f32.mrf.mxu0  ;;  %v14317_v45 = vpop.f32.mrf.mxu1 }
 0x311   : > { %v11824_v47 = vpop.f32.mrf.mxu1 }
 0x314   : > { %v1780_v48 = vpop.f32.mrf.mxu0 }
 0x316   : > { %v1739_v50 = vpop.f32.mrf.mxu1  ;;  %v11841_v51 = vpop.f32.mrf.mxu0 }
 0x317   : > { %v14362_v51 = vld [vmem:[%s16636_s10] ss:$0 sm:$0xff] }
 0x318   : > { %v11835_v62 = vpop.f32.mrf.mxu1  ;;  %v1783_v52 = vpop.f32.mrf.mxu0 }
 0x31a   : > { %v1742_v53 = vpop.f32.mrf.mxu1  ;;  %v11842_v20 = vpop.f32.mrf.mxu0 }
 0x31c   : > { %v11836_v54 = vpop.f32.mrf.mxu1 }
 0x323   : > { %v14319_v58 = vpop.f32.mrf.mxu0 }
 0x325   : > { %v14321_v15 = vpop.f32.mrf.mxu1  ;;  %v11853_v56 = vpop.f32.mrf.mxu0 }
 0x327   : > { %v11847_v57 = vpop.f32.mrf.mxu1  ;;  %v14323_v61 = vpop.f32.mrf.mxu0 }
 0x329   : > { %v14325_v3 = vpop.f32.mrf.mxu1  ;;  %v11854_v59 = vpop.f32.mrf.mxu0 }
 0x32b   : > { %v11848_v6 = vpop.f32.mrf.mxu1 }
 0x32c   : > { %v13753_v6 = vld [vmem:[%s13910_s20 + $0x48] sm:$0xff] }
 0x32d   : > { %v14327_v5 = vpop.f32.mrf.mxu0 }
 0x32f   : > { %v14329_v0 = vpop.f32.mrf.mxu1  ;;  %v11865_v7 = vpop.f32.mrf.mxu0 }
 0x331   : > { %v11859_v11 = vpop.f32.mrf.mxu1  ;;  %v14331_v43 = vpop.f32.mrf.mxu0 }
 0x333   : > { %v14333_v63 = vpop.f32.mrf.mxu1  ;;  %v11866_v38 = vpop.f32.mrf.mxu0 }
 0x335   : > { %v11860_v8 = vpop.f32.mrf.mxu1 }
 0x336   : > { %v13754_v8 = vld [vmem:[%s13910_s20 + $0x30] sm:$0xff] }
 0x338   : > { %v14335_v21 = vpop.f32.mrf.mxu0 }
 0x33a   : > { %v14337_v9 = vpop.f32.mrf.mxu1  ;;  %v11877_v60 = vpop.f32.mrf.mxu0 }
 0x33c   : > { %v11871_v16 = vpop.f32.mrf.mxu1  ;;  %v14339_v31 = vpop.f32.mrf.mxu0 }
 0x33d   : > { %v13755_v16 = vld [vmem:[%s13910_s20 + $0x38] sm:$0xff] }
 0x33e   : > { %v14341_v26 = vpop.f32.mrf.mxu1  ;;  %v11878_v10 = vpop.f32.mrf.mxu0 }
 0x340   : > { %v11872_v12 = vpop.f32.mrf.mxu1 }
 0x346   : > { %v14343_v13 = vpop.f32.mrf.mxu0 }
 0x348   : > { %v14345_v14 = vpop.f32.mrf.mxu1  ;;  %v11889_v55 = vpop.f32.mrf.mxu0 }
 0x34a   : > { %v11883_v17 = vpop.f32.mrf.mxu1  ;;  %v14347_v18 = vpop.f32.mrf.mxu0 }
 0x34c   : > { %v14349_v19 = vpop.f32.mrf.mxu1  ;;  %v11890_v22 = vpop.f32.mrf.mxu0 }
 0x34e   : > { %v11884_v42 = vpop.f32.mrf.mxu1  ;;  %v14351_v4 = vpop.f32.mrf.mxu0 }
 0x350   : > { %v14353_v24 = vpop.f32.mrf.mxu1  ;;  %v11901_v36 = vpop.f32.mrf.mxu0 }
 0x352   : > { %v11895_v27 = vpop.f32.mrf.mxu1  ;;  %v14355_v28 = vpop.f32.mrf.mxu0 }
 0x354   : > { %v14357_v29 = vpop.f32.mrf.mxu1  ;;  %v11902_v30 = vpop.f32.mrf.mxu0 }
 0x356   : > { %v11896_v2 = vpop.f32.mrf.mxu1  ;;  %v2280_v32 = vpop.f32.mrf.mxu0 }
 0x357   : > { %v2281_v44 = vadd.f32 %v2280_v32, %v1780_v48 }
 0x358   : > { %v2239_v33 = vpop.f32.mrf.mxu1  ;;  %v11913_v34 = vpop.f32.mrf.mxu0 }
 0x359   : > { %v2240_v35 = vadd.f32 %v2239_v33, %v1739_v50  ;;  %v2628_v48 = vadd.f32 %v14362_v51, %v2281_v44 }
 0x35a   : > { %v11907_v39 = vpop.f32.mrf.mxu1  ;;  %v2283_v41 = vpop.f32.mrf.mxu0 }
 0x35b   : > { %v2284_v47 = vadd.f32 %v2283_v41, %v1783_v52  ;;  %v2626_v54 = vadd.f32 %v14362_v51, %v2240_v35  ;;  %v13757_v39 = vld [vmem:[%s13910_s20 + $0x68] sm:$0xff] }
 0x35c   : > { %v2242_v62 = vpop.f32.mrf.mxu1  ;;  %v11914_v20 = vpop.f32.mrf.mxu0 }
 0x35d   : > { %v2629_v56 = vadd.f32 %v14362_v51, %v2284_v47  ;;  %v2243_v57 = vadd.f32 %v2242_v62, %v1742_v53  ;;  %v14372_v60 = vadd.f32 %v13754_v8, %v2626_v54  ;;  %v13756_v53 = vld [vmem:[%s13910_s20 + $0x40] sm:$0xff]  ;;  %v13758_v20 = vld [vmem:[%s13910_s20 + $0x50] sm:$0xff]  ;;  %v13759_v54 = vld [vmem:[%s13910_s20 + $0x58] sm:$0xff] }
 0x35e   : > { %v11908_v50 = vpop.f32.mrf.mxu1  ;;  %v2362_v59 = vpop.f32.mrf.mxu0  ;;  %v14379_v55 = vadd.f32 %v13756_v53, %v2628_v48  ;;  %v13760_v48 = vld [vmem:[%s13910_s20 + $0x60] sm:$0xff] }
 0x35f   : > { %v2627_v52 = vadd.f32 %v14362_v51, %v2243_v57  ;;  %v14369_v7 = vadd.f32 %v13753_v6, %v2629_v56  ;;  %v2363_v17 = vadd.f32 %v2362_v59, %v14319_v58 }
 0x360   : > { %v2321_v11 = vpop.f32.mrf.mxu1  ;;  %v11925_v38 = vpop.f32.mrf.mxu0 }
 0x361   : > { %v14375_v10 = vadd.f32 %v13755_v16, %v2627_v52  ;;  %v2322_v12 = vadd.f32 %v2321_v11, %v14321_v15  ;;  %v14389_v30 = vpack.c.bf16 %v14369_v7, %v14379_v55 }
 0x362   : > { %v11919_v22 = vpop.f32.mrf.mxu1  ;;  %v2365_v42 = vpop.f32.mrf.mxu0 }
 0x363   : > { %v14384_v36 = vpack.c.bf16 %v14375_v10, %v14372_v60  ;;  %v2366_v27 = vadd.f32 %v2365_v42, %v14323_v61  ;;  %v2630_v32 = vadd.f32 %v14362_v51, %v2322_v12  ;;  %v2632_v61 = vadd.f32 %v14362_v51, %v2363_v17 }
 0x364   : > { %v2324_v15 = vpop.f32.mrf.mxu1  ;;  %v11926_v2 = vpop.f32.mrf.mxu0 }
 0x365   : > { %v2633_v58 = vadd.f32 %v14362_v51, %v2366_v27  ;;  %v2325_v33 = vadd.f32 %v2324_v15, %v14325_v3  ;;  %11975 = vmatprep.mubr.msk.bf16.mxu0 %vm562_vm1, %v14384_v36  ;;  %v14404_v3 = vadd.f32 %v13758_v20, %v2630_v32  ;;  %v14411_v50 = vadd.f32 %v13760_v48, %v2632_v61  ;;  %v13761_v27 = vld [vmem:[%s13910_s20 + $0x88] sm:$0xff] }
 0x366   : > { %v11920_v34 = vpop.f32.mrf.mxu1  ;;  %v2444_v35 = vpop.f32.mrf.mxu0  ;;  %11976 = vmatmul.mubr.msk.bf16.vlgmr.msra.gmra.mxu0 %vm562_vm1, %v14389_v30 }
 0x367   : > { %v2631_v44 = vadd.f32 %v14362_v51, %v2325_v33  ;;  %v14401_v41 = vadd.f32 %v13757_v39, %v2633_v58  ;;  %v2445_v59 = vadd.f32 %v2444_v35, %v14327_v5  ;;  %v13762_v58 = vld [vmem:[%s13910_s20 + $0x70] sm:$0xff]  ;;  %v13763_v33 = vld [vmem:[%s13910_s20 + $0x78] sm:$0xff]  ;;  %v13764_v35 = vld [vmem:[%s13910_s20 + $0x80] sm:$0xff] }
 0x368   : > { %v2403_v47 = vpop.f32.mrf.mxu1  ;;  %v11937_v62 = vpop.f32.mrf.mxu0 }
 0x369   : > { %v14407_v56 = vadd.f32 %v13759_v54, %v2631_v44  ;;  %v2404_v57 = vadd.f32 %v2403_v47, %v14329_v0  ;;  %v14421_v8 = vpack.c.bf16 %v14401_v41, %v14411_v50 }
 0x36a   : > { %v11931_v52 = vpop.f32.mrf.mxu1  ;;  %v2447_v6 = vpop.f32.mrf.mxu0 }
 0x36b   : > { %v14416_v11 = vpack.c.bf16 %v14407_v56, %v14404_v3  ;;  %v2448_v38 = vadd.f32 %v2447_v6, %v14331_v43  ;;  %v2634_v12 = vadd.f32 %v14362_v51, %v2404_v57  ;;  %v2636_v43 = vadd.f32 %v14362_v51, %v2445_v59 }
 0x36c   : > { %v2406_v0 = vpop.f32.mrf.mxu1  ;;  %v11938_v16 = vpop.f32.mrf.mxu0 }
 0x36d   : > { %v2637_v5 = vadd.f32 %v14362_v51, %v2448_v38  ;;  %v2407_v53 = vadd.f32 %v2406_v0, %v14333_v63  ;;  %11979 = vmatprep.mubr.msk.bf16.mxu0 %vm562_vm1, %v14416_v11  ;;  %v14436_v63 = vadd.f32 %v13762_v58, %v2634_v12  ;;  %v14443_v44 = vadd.f32 %v13764_v35, %v2636_v43 }
 0x36e   : > { %v11932_v17 = vpop.f32.mrf.mxu1  ;;  %v2526_v22 = vpop.f32.mrf.mxu0  ;;  %11980 = vmatmul.mubr.msk.bf16.gmra.mxu0 %vm562_vm1, %v14421_v8 }
 0x36f   : > { %v2635_v42 = vadd.f32 %v14362_v51, %v2407_v53  ;;  %v14433_v15 = vadd.f32 %v13761_v27, %v2637_v5  ;;  %v2527_v39 = vadd.f32 %v2526_v22, %v14335_v21  ;;  %v13765_v5 = vld [vmem:[%s13910_s20 + $0xa8] sm:$0xff]  ;;  %v13767_v22 = vld [vmem:[%s13910_s20 + $0x98] sm:$0xff] }
 0x370   : > { %v2485_v2 = vpop.f32.mrf.mxu1  ;;  %v11949_v32 = vpop.f32.mrf.mxu0 }
 0x371   : > { %v14439_v61 = vadd.f32 %v13763_v33, %v2635_v42  ;;  %v2486_v34 = vadd.f32 %v2485_v2, %v14337_v9  ;;  %v14453_v57 = vpack.c.bf16 %v14433_v15, %v14443_v44  ;;  %v2640_v6 = vadd.f32 %v14362_v51, %v2527_v39  ;;  %v13768_v32 = vld [vmem:[%s13910_s20 + $0xa0] sm:$0xff] }
 0x372   : > { %v11943_v47 = vpop.f32.mrf.mxu1  ;;  %v2529_v62 = vpop.f32.mrf.mxu0 }
 0x373   : > { %v14448_v20 = vpack.c.bf16 %v14439_v61, %v14436_v63  ;;  %v2530_v54 = vadd.f32 %v2529_v62, %v14339_v31  ;;  %v2638_v59 = vadd.f32 %v14362_v51, %v2486_v34  ;;  %v2161_v31 = vadd.f32 %v14357_v29, %v14317_v45  ;;  %v13766_v29 = vld [vmem:[%s13910_s20 + $0x90] sm:$0xff] }
 0x374   : > { %v2488_v48 = vpop.f32.mrf.mxu1  ;;  %v11950_v9 = vpop.f32.mrf.mxu0  ;;  %v2202_v62 = vadd.f32 %v14355_v28, %v14315_v40  ;;  %v13771_v28 = vld [vmem:[%s13910_s20 + $0xc8] sm:$0xff] }
 0x375   : > { %v2641_v21 = vadd.f32 %v14362_v51, %v2530_v54  ;;  %v2489_v52 = vadd.f32 %v2488_v48, %v14341_v26  ;;  %11983 = vmatprep.mubr.msk.bf16.mxu0 %vm562_vm1, %v14448_v20  ;;  %v2158_v26 = vadd.f32 %v14353_v24, %v14313_v23  ;;  %v14473_v17 = vadd.f32 %v13766_v29, %v2638_v59 }
 0x376   : > { %v11944_v38 = vpop.f32.mrf.mxu1  ;;  %v2608_v0 = vpop.f32.mrf.mxu0  ;;  %11984 = vmatmul.mubr.msk.bf16.gmra.mxu0 %vm562_vm1, %v14453_v57  ;;  %v2623_v2 = vadd.f32 %v14362_v51, %v2161_v31  ;;  %v13770_v31 = vld [vmem:[%s13910_s20 + $0xc0] sm:$0xff] }
 0x377   : > { %v2639_v16 = vadd.f32 %v14362_v51, %v2489_v52  ;;  %v2609_v12 = vadd.f32 %v2608_v0, %v14343_v13  ;;  %v14470_v53 = vadd.f32 %v13765_v5, %v2641_v21  ;;  %v14481_v13 = vadd.f32 %v13768_v32, %v2640_v6  ;;  %v13776_v32 = vld [vmem:[%s13910_s20 + $0x20] sm:$0xff] }
 0x378   : > { %v2567_v43 = vpop.f32.mrf.mxu1  ;;  %v11961_v45 = vpop.f32.mrf.mxu0  ;;  %v2622_v35 = vadd.f32 %v14362_v51, %v2158_v26  ;;  %v2199_v52 = vadd.f32 %v14351_v4, %v14311_v25  ;;  %v13774_v4 = vld [vmem:[%s13910_s20 + $0xb8] sm:$0xff] }
 0x379   : > { %v14476_v42 = vadd.f32 %v13767_v22, %v2639_v16  ;;  %v2568_v27 = vadd.f32 %v2567_v43, %v14345_v14  ;;  %v2644_v33 = vadd.f32 %v14362_v51, %v2609_v12  ;;  %v2679_v14 = vpack.c.bf16 %v14470_v53, %v14481_v13  ;;  %v13773_v12 = vld [vmem:[%s13910_s20 + $0xb0] sm:$0xff] }
 0x37a   : > { %v11955_v23 = vpop.f32.mrf.mxu1  ;;  %v2611_v24 = vpop.f32.mrf.mxu0  ;;  %v2625_v16 = vadd.f32 %v14362_v51, %v2202_v62  ;;  %v13076_v43 = vld [vmem:[%s16629_s3 + $0x10] sm:$0xff]   ;;  %v2624_v29 = vadd.f32 %v14362_v51, %v2199_v52 }
 0x37b   : > { %v2678_v58 = vpack.c.bf16 %v14476_v42, %v14473_v17  ;;  %v2612_v34 = vadd.f32 %v2611_v24, %v14347_v18  ;;  %v2642_v54 = vadd.f32 %v14362_v51, %v2568_v27  ;;  %v13769_v18 = vld [vmem:[%s13910_s20 + $0x18] sm:$0xff]  ;;  %v14501_v40 = vadd.f32 %v13770_v31, %v2644_v33  ;;  %v13775_v27 = vld [vmem:[%s13910_s20 + $0x28] sm:$0xff] }
 0x37c   : > { %v2570_v39 = vpop.f32.mrf.mxu1  ;;  %v11962_v47 = vpop.f32.mrf.mxu0  ;;  %v2647_v59 = vadd.f32 %v13769_v18, %v2623_v2  ;;  %v2649_v2 = vadd.f32 %v13775_v27, %v2625_v16  ;;  %v2648_v23 = vadd.f32 %v13776_v32, %v2624_v29 }
 0x37d   : > { %v2645_v48 = vadd.f32 %v14362_v51, %v2612_v34  ;;  %v2571_v9 = vadd.f32 %v2570_v39, %v14349_v19  ;;  %11987 = vmatprep.mubr.msk.bf16.mxu0 %vm562_vm1, %v2678_v58  ;;  %v13772_v19 = vld [vmem:[%s13910_s20 + $0x10] sm:$0xff]  ;;  %v14510_v26 = vadd.f32 %v13773_v12, %v2642_v54 }
 0x37e   : > { %11988 = vmatmul.mubr.msk.bf16.gmra.mxu0 %vm562_vm1, %v2679_v14  ;;  %v11956_v21 = vpop.f32.mrf.mxu1  ;;  %v2646_v0 = vadd.f32 %v13772_v19, %v2622_v35 }
 0x37f   : > { %v14504_v6 = vadd.f32 %v13771_v28, %v2645_v48  ;;  %v2643_v38 = vadd.f32 %v14362_v51, %v2571_v9  ;;  %v2671_v51 = vpack.c.bf16 %v2649_v2, %v2648_v23  ;;  %v14560_v21 = vld [vmem:[%s16631_s5 + $0x1] ss:$0 sm:$0xff] }
 0x380   : > { %v2670_v45 = vpack.c.bf16 %v2647_v59, %v2646_v0 }
 0x381   : > { %v2681_v25 = vpack.c.bf16 %v14504_v6, %v14501_v40  ;;  %v14515_v5 = vadd.f32 %v13774_v4, %v2643_v38 }
 0x383   : > { %v2680_v22 = vpack.c.bf16 %v14515_v5, %v14510_v26  ;;  %11968 = vmatmul.mubr.msk.bf16.vlgmr.msra.gmra.mxu1 %vm562_vm1, %v2681_v25 }
 0x384   : > { %11996 = vmatpush3.bf16.msra.mxu1 %v14308_v37  ;;  %11999 = vmatprep.mubr.msk.bf16.mxu1 %vm562_vm1, %v2670_v45 }
 0x385   : > { %11991 = vmatprep.mubr.msk.bf16.mxu0 %vm562_vm1, %v2680_v22  ;;  %11997 = vmatprep.subr.bf16.mxu1 %v13076_v43 }
 0x386   : > { %11992 = vmatmul.mubr.msk.bf16.gmra.mxu0 %vm562_vm1, %v2681_v25 }
 0x388   : > { %11998 = vmatpush3.bf16.msra.mxu1 %v13076_v43 }
 0x38b   : > { %12000 = vmatmul.mubr.msk.bf16.vlgmr.msra.gmra.mxu1 %vm562_vm1, %v2671_v51 }
 0x38c   : > { %12003 = vmatprep.mubr.msk.bf16.mxu1 %vm562_vm1, %v14384_v36 }
 0x393   : > { %12004 = vmatmul.mubr.msk.bf16.gmra.mxu1 %vm562_vm1, %v14389_v30 }
 0x394   : > { %12007 = vmatprep.mubr.msk.bf16.mxu1 %vm562_vm1, %v14416_v11  ;;  %v10543_v11 = vld [vmem:[%s16633_s7] ss:$0 sm:$0xff] }
 0x395   : > { %v604_v62 = vadd.f32 %v10543_v11, %v13968_v49 }
 0x39b   : > { %12008 = vmatmul.mubr.msk.bf16.gmra.mxu1 %vm562_vm1, %v14421_v8 }
 0x39c   : > { %12011 = vmatprep.mubr.msk.bf16.mxu1 %vm562_vm1, %v14448_v20  ;;  %v10660_v20 = vld [vmem:[%s16633_s7 + $0x1] ss:$0 sm:$0xff] }
 0x3a3   : > { %12012 = vmatmul.mubr.msk.bf16.gmra.mxu1 %vm562_vm1, %v14453_v57  ;;  %v601_v57 = vadd.f32 %v10543_v11, %v13966_v46 }
 0x3a4   : > { %12015 = vmatprep.mubr.msk.bf16.mxu1 %vm562_vm1, %v2678_v58 }
 0x3ab   : > { %12016 = vmatmul.mubr.msk.bf16.gmra.mxu1 %vm562_vm1, %v2679_v14 }
 0x426   : > { %v11977_v37 = vpop.f32.mrf.mxu0 }
 0x428   : > { %v2836_v36 = vpop.f32.mrf.mxu0 }
 0x42a   : > { %v11978_v24 = vpop.f32.mrf.mxu0 }
 0x42c   : > { %v2839_v30 = vpop.f32.mrf.mxu0 }
 0x42e   : > { %v11981_v33 = vpop.f32.mrf.mxu0 }
 0x430   : > { %v2852_v8 = vpop.f32.mrf.mxu0 }
 0x432   : > { %v11982_v35 = vpop.f32.mrf.mxu0 }
 0x434   : > { %v2855_v48 = vpop.f32.mrf.mxu0 }
 0x436   : > { %v11985_v52 = vpop.f32.mrf.mxu0 }
 0x438   : > { %v2868_v12 = vpop.f32.mrf.mxu0 }
 0x43a   : > { %v11986_v32 = vpop.f32.mrf.mxu0 }
 0x443   : > { %v2744_v34 = vpop.f32.mrf.mxu1 }
 0x444   : > { %v2745_v58 = vadd.f32 %v10660_v20, %v2744_v34  ;;  %v2871_v34 = vpop.f32.mrf.mxu0 }
 0x445   : > { %v11969_v14 = vpop.f32.mrf.mxu1 }
 0x446   : > { %v14552_v39 = vadd.f32 %v2745_v58, %v601_v57 }
 0x447   : > { %v2747_v47 = vpop.f32.mrf.mxu1 }
 0x448   : > { %v2748_v54 = vadd.f32 %v10660_v20, %v2747_v47 }
 0x449   : > { %v11970_v9 = vpop.f32.mrf.mxu1 }
 0x44a   : > { %v14555_v18 = vadd.f32 %v2748_v54, %v604_v62  ;;  %v11989_v9 = vpop.f32.mrf.mxu0 }
 0x44b   : > { %v12001_v59 = vpop.f32.mrf.mxu1 }
 0x44c   : > { %v2976_v46 = vadd.f32 %v12001_v59, %v11977_v37 }
 0x44d   : > { %v2967_v31 = vpop.f32.mrf.mxu1 }
 0x44e   : > { %v14563_v28 = vadd.f32 %v14560_v21, %v2976_v46  ;;  %v2968_v38 = vadd.f32 %v2967_v31, %v2836_v36 }
 0x44f   : > { %v12002_v19 = vpop.f32.mrf.mxu1 }
 0x450   : > { %v10700_v49 = vmul.f32 -1.442695, %v14563_v28  ;;  %v14567_v0 = vadd.f32 %v14560_v21, %v2968_v38  ;;  %v2979_v16 = vadd.f32 %v12002_v19, %v11978_v24 }
 0x451   : > { %v2970_v25 = vpop.f32.mrf.mxu1 }
 0x452   : > { %13285 = vpow2.f32 %v10700_v49  ;;  %v10698_v4 = vmul.f32 -1.442695, %v14567_v0  ;;  %v14571_v43 = vadd.f32 %v14560_v21, %v2979_v16  ;;  %v2971_v45 = vadd.f32 %v2970_v25, %v2839_v30  ;;  %v2884_v16 = vpop.f32.mrf.mxu0 }
 0x453   : > { %v12005_v29 = vpop.f32.mrf.mxu1 }
 0x454   : > { %13287 = vpow2.f32 %v10698_v4  ;;  %v10701_v22 = vmul.f32 -1.442695, %v14571_v43  ;;  %v14575_v27 = vadd.f32 %v14560_v21, %v2971_v45  ;;  %v2992_v2 = vadd.f32 %v12005_v29, %v11981_v33 }
 0x455   : > { %v2983_v23 = vpop.f32.mrf.mxu1 }
 0x456   : > { %v10699_v51 = vmul.f32 -1.442695, %v14575_v27  ;;  %v14579_v37 = vadd.f32 %v14560_v21, %v2992_v2  ;;  %v2984_v36 = vadd.f32 %v2983_v23, %v2852_v8  ;;  %13289 = vpow2.f32 %v10701_v22 }
 0x457   : > { %v12006_v24 = vpop.f32.mrf.mxu1 }
 0x458   : > { %13291 = vpow2.f32 %v10699_v51  ;;  %v10704_v30 = vmul.f32 -1.442695, %v14579_v37  ;;  %v14583_v11 = vadd.f32 %v14560_v21, %v2984_v36  ;;  %v2995_v20 = vadd.f32 %v12006_v24, %v11982_v35  ;;  %v11990_v36 = vpop.f32.mrf.mxu0 }
 0x459   : > { %v2986_v57 = vpop.f32.mrf.mxu1 }
 0x45a   : > { %13293 = vpow2.f32 %v10704_v30  ;;  %v10702_v33 = vmul.f32 -1.442695, %v14583_v11  ;;  %v14587_v58 = vadd.f32 %v14560_v21, %v2995_v20  ;;  %v2987_v14 = vadd.f32 %v2986_v57, %v2855_v48 }
 0x45b   : > { %v12009_v47 = vpop.f32.mrf.mxu1 }
 0x45c   : > { %13295 = vpow2.f32 %v10702_v33  ;;  %v10705_v8 = vmul.f32 -1.442695, %v14587_v58  ;;  %v14591_v62 = vadd.f32 %v14560_v21, %v2987_v14  ;;  %v3008_v54 = vadd.f32 %v12009_v47, %v11985_v52 }
 0x45d   : > { %v2999_v59 = vpop.f32.mrf.mxu1 }
 0x45e   : > { %v10703_v35 = vmul.f32 -1.442695, %v14591_v62  ;;  %v14595_v46 = vadd.f32 %v14560_v21, %v3008_v54  ;;  %v3000_v31 = vadd.f32 %v2999_v59, %v2868_v12  ;;  %13297 = vpow2.f32 %v10705_v8  ;;  %v2887_v8 = vpop.f32.mrf.mxu0 }
 0x45f   : > { %v13286_v38 = vpop.eup %13285  ;;  %v12010_v19 = vpop.f32.mrf.mxu1 }
 0x460   : > { %13299 = vpow2.f32 %v10703_v35  ;;  %v14598_v48 = vadd.f32 %v14560_v21, %v3000_v31  ;;  %v3156_v25 = vadd.f32 1.0, %v13286_v38  ;;  %v10708_v45 = vmul.f32 -1.442695, %v14595_v46 }
 0x461   : > { %v13288_v49 = vpop.eup %13287  ;;  %v3002_v4 = vpop.f32.mrf.mxu1  ;;  %v3011_v29 = vadd.f32 %v12010_v19, %v11986_v32 }
 0x462   : > { %v3154_v52 = vadd.f32 1.0, %v13288_v49  ;;  %v10706_v22 = vmul.f32 -1.442695, %v14598_v48  ;;  %v3003_v2 = vadd.f32 %v3002_v4, %v2871_v34 }
 0x463   : > { %v12013_v23 = vpop.f32.mrf.mxu1  ;;  %v13290_v12 = vpop.eup %13289  ;;  %v14603_v20 = vadd.f32 %v14560_v21, %v3011_v29 }
 0x464   : > { %13301 = vrcp.f32 %v3154_v52  ;;  %v3157_v33 = vadd.f32 1.0, %v13290_v12  ;;  %v14606_v32 = vadd.f32 %v14560_v21, %v3003_v2  ;;  %v3024_v34 = vadd.f32 %v12013_v23, %v11989_v9  ;;  %v13078_v9 = vld [vmem:[%s16635_s9 + $0x18] sm:$0xff]  }
 0x465   : > { %v13292_v51 = vpop.eup %13291  ;;  %13303 = vrcp.f32 %v3156_v25  ;;  %v3015_v24 = vpop.f32.mrf.mxu1  ;;  %v10709_v38 = vmul.f32 -1.442695, %v14603_v20  ;;  %v13077_v25 = vld [vmem:[%s16634_s8 + $0x18] sm:$0xff]   ;;  %12043 = vmatprep.subr.bf16.mxu1 %v13078_v9 }
 0x466   : > { %v3155_v30 = vadd.f32 1.0, %v13292_v51  ;;  %13305 = vpow2.f32 %v10708_v45  ;;  %v3016_v59 = vadd.f32 %v3015_v24, %v2884_v16  ;;  %v10707_v19 = vmul.f32 -1.442695, %v14606_v32  ;;  %v11993_v45 = vpop.f32.mrf.mxu0  ;;  %12019 = vmatprep.subr.bf16.mxu0 %v13077_v25  ;;  %12044 = vmatpush3.bf16.msra.mxu1 %v13078_v9  ;;  %v13079_v24 = vld [vmem:[%s16634_s8 + $0x10] sm:$0xff]  }
 0x467   : > { %v13294_v57 = vpop.eup %13293  ;;  %13307 = vpow2.f32 %v10706_v22  ;;  %v12014_v14 = vpop.f32.mrf.mxu1  ;;  %v14617_v16 = vadd.f32 %v14560_v21, %v3024_v34  ;;  %12020 = vmatpush3.bf16.msra.mxu0 %v13077_v25 }
 0x468   : > { %13309 = vrcp.f32 %v3155_v30  ;;  %v3160_v54 = vadd.f32 1.0, %v13294_v57  ;;  %v14620_v29 = vadd.f32 %v14560_v21, %v3016_v59  ;;  %v3027_v22 = vadd.f32 %v12014_v14, %v11990_v36  ;;  %v13080_v30 = vld [vmem:[%s16635_s9 + $0x10] sm:$0xff]   ;;  %12021 = vmatprep.subr.bf16.mxu0 %v13079_v24 }
 0x469   : > { %v13296_v47 = vpop.eup %13295  ;;  %v3018_v35 = vpop.f32.mrf.mxu1  ;;  %13311 = vrcp.f32 %v3157_v33  ;;  %v10712_v36 = vmul.f32 -1.442695, %v14617_v16  ;;  %12045 = vmatprep.subr.bf16.mxu1 %v13080_v30 }
 0x46a   : > { %v3158_v31 = vadd.f32 1.0, %v13296_v47  ;;  %v3019_v23 = vadd.f32 %v3018_v35, %v2887_v8  ;;  %v2900_v33 = vpop.f32.mrf.mxu0  ;;  %v10710_v14 = vmul.f32 -1.442695, %v14620_v29  ;;  %v14631_v34 = vadd.f32 %v14560_v21, %v3027_v22  ;;  %12046 = vmatpush3.bf16.msra.mxu1 %v13080_v30 }
 0x46b   : > { %v12017_v49 = vpop.f32.mrf.mxu1  ;;  %v13298_v4 = vpop.eup %13297  ;;  %12022 = vmatpush3.bf16.msra.mxu0 %v13079_v24  ;;  %12073 = vmatprep.subr.bf16.mxu1 %v13794_v1 }
 0x46c   : > { %13313 = vrcp.f32 %v3158_v31  ;;  %v3161_v12 = vadd.f32 1.0, %v13298_v4  ;;  %v14634_v8 = vadd.f32 %v14560_v21, %v3019_v23  ;;  %12067 = vmatprep.subr.bf16.mxu0 %v13794_v1  ;;  %v11994_v25 = vpop.f32.mrf.mxu0 }
 0x46d   : > { %v13300_v52 = vpop.eup %13299  ;;  %13315 = vrcp.f32 %v3160_v54  ;;  %v3031_v51 = vpop.f32.mrf.mxu1  ;;  %v3040_v54 = vadd.f32 %v12017_v49, %v11993_v45  ;;  %v10713_v49 = vmul.f32 -1.442695, %v14631_v34 }
 0x46e   : > { %v3159_v2 = vadd.f32 1.0, %v13300_v52  ;;  %13317 = vpow2.f32 %v10709_v38  ;;  %v3032_v38 = vadd.f32 %v3031_v51, %v2900_v33  ;;  %v10711_v4 = vmul.f32 -1.442695, %v14634_v8  ;;  %v2903_v24 = vpop.f32.mrf.mxu0 }
 0x46f   : > { %13319 = vpow2.f32 %v10707_v19  ;;  %v12018_v35 = vpop.f32.mrf.mxu1  ;;  %v14642_v52 = vadd.f32 %v14560_v21, %v3040_v54 }
 0x470   : > { %13321 = vrcp.f32 %v3159_v2  ;;  %v14647_v23 = vadd.f32 %v14560_v21, %v3032_v38 }
 0x471   : > { %v13302_v57 = vpop.eup %13301  ;;  %13323 = vrcp.f32 %v3161_v12  ;;  %v3034_v22 = vpop.f32.mrf.mxu1  ;;  %v3043_v12 = vadd.f32 %v12018_v35, %v11994_v25 }
 0x472   : > { %v13304_v47 = vpop.eup %13303  ;;  %3234 = vrot.lane.b32.xlu0 %v13302_v57, %s13796_s21  ;;  %13325 = vpow2.f32 %v10712_v36  ;;  %v10716_v36 = vmul.f32 -1.442695, %v14642_v52  ;;  %v3035_v57 = vadd.f32 %v3034_v22, %v2903_v24 }
 0x473   : > { %v13306_v59 = vpop.eup %13305  ;;  %13327 = vpow2.f32 %v10710_v14  ;;  %v14654_v54 = vadd.f32 %v14560_v21, %v3043_v12 }
 0x474   : > { %v13308_v31 = vpop.eup %13307  ;;  %v3164_v45 = vadd.f32 1.0, %v13306_v59 }
 0x475   : > { %v13310_v19 = vpop.eup %13309  ;;  %v3162_v9 = vadd.f32 1.0, %v13308_v31  ;;  %v14657_v31 = vadd.f32 %v14560_v21, %v3035_v57  ;;  %v10717_v25 = vmul.f32 -1.442695, %v14654_v54 }
 0x476   : > { %3236 = vrot.lane.b32.xlu1 %v13310_v19, %s13796_s21  ;;  %3238 = vrot.lane.b32.xlu0 %v13304_v47, %s13796_s21  ;;  %v13312_v2 = vpop.eup %13311  ;;  %v10714_v47 = vmul.f32 -1.442695, %v14647_v23 }
 0x477   : > { %13329 = vrcp.f32 %v3162_v9 }
 0x478   : > { %13331 = vpow2.f32 %v10713_v49 }
 0x479   : > { %v13314_v51 = vpop.eup %13313  ;;  %13333 = vpow2.f32 %v10711_v4  ;;  %v10715_v4 = vmul.f32 -1.442695, %v14657_v31 }
 0x47a   : > { %v13316_v30 = vpop.eup %13315  ;;  %3240 = vrot.lane.b32.xlu1 %v13312_v2, %s13796_s21  ;;  %3242 = vrot.lane.b32.xlu0 %v13314_v51, %s13796_s21  ;;  %13335 = vrcp.f32 %v3164_v45 }
 0x47b   : > { %v13318_v33 = vpop.eup %13317  ;;  %13337 = vpow2.f32 %v10716_v36 }
 0x47c   : > { %v13320_v14 = vpop.eup %13319  ;;  %v3165_v38 = vadd.f32 1.0, %v13318_v33 }
 0x47d   : > { %v13322_v59 = vpop.eup %13321  ;;  %v3163_v35 = vadd.f32 1.0, %v13320_v14 }
 0x47e   : > { %3244 = vrot.lane.b32.xlu1 %v13322_v59, %s13796_s21  ;;  %3246 = vrot.lane.b32.xlu0 %v13316_v30, %s13796_s21  ;;  %v13324_v19 = vpop.eup %13323 }
 0x47f   : > { %13339 = vrcp.f32 %v3163_v35  ;;  %v13326_v9 = vpop.eup %13325 }
 0x480   : > { %13341 = vpow2.f32 %v10714_v47  ;;  %v13328_v49 = vpop.eup %13327  ;;  %v3168_v22 = vadd.f32 1.0, %v13326_v9 }
 0x481   : > { %13343 = vrcp.f32 %v3165_v38  ;;  %v3166_v45 = vadd.f32 1.0, %v13328_v49 }
 0x482   : > { %3248 = vrot.lane.b32.xlu1 %v13324_v19, %s13796_s21  ;;  %13345 = vpow2.f32 %v10717_v25 }
 0x483   : > { %13347 = vrcp.f32 %v3166_v45 }
 0x484   : > { %v13330_v21 = vpop.eup %13329  ;;  %13349 = vpow2.f32 %v10715_v4 }
 0x485   : > { %3250 = vrot.lane.b32.xlu0 %v13330_v21, %s13796_s21  ;;  %v13332_v2 = vpop.eup %13331  ;;  %13351 = vrcp.f32 %v3168_v22 }
 0x486   : > { %v13334_v12 = vpop.eup %13333  ;;  %v3169_v30 = vadd.f32 1.0, %v13332_v2 }
 0x487   : > { %v13336_v51 = vpop.eup %13335  ;;  %v3167_v24 = vadd.f32 1.0, %v13334_v12 }
 0x488   : > { %v13338_v36 = vpop.eup %13337 }
 0x489   : > { %3254 = vrot.lane.b32.xlu0 %v13336_v51, %s13796_s21  ;;  %13353 = vrcp.f32 %v3167_v24  ;;  %v3172_v59 = vadd.f32 1.0, %v13338_v36 }
 0x48a   : > { %13355 = vrcp.f32 %v3169_v30 }
 0x48c   : > { %v13340_v57 = vpop.eup %13339 }
 0x48d   : > { %v13342_v33 = vpop.eup %13341  ;;  %3252 = vrot.lane.b32.xlu1 %v13340_v57, %s13796_s21 }
 0x48e   : > { %v3170_v14 = vadd.f32 1.0, %v13342_v33  ;;  %v13344_v47 = vpop.eup %13343 }
 0x48f   : > { %v13346_v35 = vpop.eup %13345 }
 0x490   : > { %13357 = vrcp.f32 %v3170_v14  ;;  %v13348_v38 = vpop.eup %13347  ;;  %v3173_v49 = vadd.f32 1.0, %v13346_v35 }
 0x491   : > { %3256 = vrot.lane.b32.xlu1 %v13344_v47, %s13796_s21  ;;  %v13350_v19 = vpop.eup %13349  ;;  %3258 = vrot.lane.b32.xlu0 %v13348_v38, %s13796_s21  ;;  %13359 = vrcp.f32 %v3172_v59 }
 0x492   : > { %v3171_v25 = vadd.f32 1.0, %v13350_v19  ;;  %v13352_v9 = vpop.eup %13351 }
 0x494   : > { %13361 = vrcp.f32 %v3171_v25 }
 0x495   : > { %3262 = vrot.lane.b32.xlu0 %v13352_v9, %s13796_s21  ;;  %13363 = vrcp.f32 %v3173_v49 }
 0x496   : > { %v13354_v4 = vpop.eup %13353  ;;  %13365 = vtanh.f32 %v14567_v0 }
 0x497   : > { %3260 = vrot.lane.b32.xlu1 %v13354_v4, %s13796_s21  ;;  %v13356_v45 = vpop.eup %13355  ;;  %13367 = vtanh.f32 %v14575_v27 }
 0x498   : > { %13369 = vtanh.f32 %v14563_v28 }
 0x499   : > { %13371 = vtanh.f32 %v14571_v43 }
 0x49a   : > { %13373 = vtanh.f32 %v14583_v11 }
 0x49b   : > { %3264 = vrot.lane.b32.xlu1 %v13356_v45, %s13796_s21  ;;  %13375 = vtanh.f32 %v14591_v62 }
 0x49c   : > { %13377 = vtanh.f32 %v14579_v37 }
 0x49d   : > { %v13358_v21 = vpop.eup %13357  ;;  %13379 = vtanh.f32 %v14587_v58 }
 0x49e   : > { %3266 = vrot.lane.b32.xlu0 %v13358_v21, %s13796_s21  ;;  %v13360_v22 = vpop.eup %13359  ;;  %13381 = vtanh.f32 %v14598_v48 }
 0x49f   : > { %13383 = vtanh.f32 %v14606_v32 }
 0x4a0   : > { %13385 = vtanh.f32 %v14595_v46 }
 0x4a1   : > { %v13362_v2 = vpop.eup %13361  ;;  %13387 = vtanh.f32 %v14603_v20 }
 0x4a2   : > { %3270 = vrot.lane.b32.xlu0 %v13360_v22, %s13796_s21  ;;  %3268 = vrot.lane.b32.xlu1 %v13362_v2, %s13796_s21  ;;  %v13364_v12 = vpop.eup %13363  ;;  %13389 = vtanh.f32 %v14620_v29 }
 0x4a3   : > { %v13366_v24 = vpop.eup %13365  ;;  %13391 = vtanh.f32 %v14634_v8 }
 0x4a4   : > { %v13368_v30 = vpop.eup %13367  ;;  %13393 = vtanh.f32 %v14617_v16 }
 0x4a5   : > { %v13370_v27 = vpop.eup %13369  ;;  %13395 = vtanh.f32 %v14631_v34 }
 0x4a6   : > { %3272 = vrot.lane.b32.xlu1 %v13364_v12, %s13796_s21  ;;  %v13372_v28 = vpop.eup %13371  ;;  %13397 = vtanh.f32 %v14647_v23 }
 0x4a7   : > { %v13374_v37 = vpop.eup %13373  ;;  %13399 = vtanh.f32 %v14657_v31 }
 0x4a8   : > { %v13376_v35 = vpop.eup %13375  ;;  %13401 = vtanh.f32 %v14642_v52 }
 0x4a9   : > { %v13378_v9 = vpop.eup %13377  ;;  %13403 = vtanh.f32 %v14654_v54 }
 0x4aa   : > { %v13380_v4 = vpop.eup %13379 }
 0x4ab   : > { %v13382_v2 = vpop.eup %13381 }
 0x4ac   : > { %v13384_v46 = vpop.eup %13383 }
 0x4ad   : > { %v13386_v20 = vpop.eup %13385 }
 0x4e4   : > { %v3235_v51 = vpop.permute.xlu0 %3234 }
 0x4e5   : > { %v3294_v0 = vmul.f32 %v13366_v24, %v3235_v51 }
 0x4e8   : > { %v3237_v36 = vpop.permute.xlu1 %3236  ;;  %v3239_v57 = vpop.permute.xlu0 %3238 }
 0x4e9   : > { %v3295_v33 = vmul.f32 %v13368_v30, %v3237_v36  ;;  %v3296_v59 = vmul.f32 %v13370_v27, %v3239_v57  ;;  %v13388_v57 = vpop.eup %13387 }
 0x4ea   : > { %v13390_v16 = vpop.eup %13389 }
 0x4eb   : > { %v3314_v14 = vpack.c.bf16 %v3295_v33, %v3294_v0  ;;  %v13392_v34 = vpop.eup %13391 }
 0x4ec   : > { %v3241_v47 = vpop.permute.xlu1 %3240  ;;  %v3243_v43 = vpop.permute.xlu0 %3242 }
 0x4ed   : > { %v3297_v11 = vmul.f32 %v13372_v28, %v3241_v47  ;;  %12023 = vmatprep.mubr.msk.bf16.mxu0 %vm562_vm1, %v3314_v14  ;;  %12047 = vmatprep.mubr.msk.bf16.mxu1 %vm562_vm1, %v3314_v14  ;;  %v3298_v38 = vmul.f32 %v13374_v37, %v3243_v43 }
 0x4ef   : > { %v3315_v62 = vpack.c.bf16 %v3297_v11, %v3296_v59  ;;  %v13394_v59 = vpop.eup %13393 }
 0x4f0   : > { %v3245_v58 = vpop.permute.xlu1 %3244  ;;  %v3247_v25 = vpop.permute.xlu0 %3246 }
 0x4f1   : > { %v3299_v19 = vmul.f32 %v13376_v35, %v3245_v58  ;;  %12024 = vmatmul.mubr.msk.bf16.vlgmr.msra.gmra.mxu0 %vm562_vm1, %v3315_v62  ;;  %12048 = vmatmul.mubr.msk.bf16.vlgmr.msra.gmra.mxu1 %vm562_vm1, %v3315_v62  ;;  %v3300_v21 = vmul.f32 %v13378_v9, %v3247_v25  ;;  %v13396_v37 = vpop.eup %13395 }
 0x4f2   : > { %v13398_v52 = vpop.eup %13397 }
 0x4f3   : > { %v3316_v49 = vpack.c.bf16 %v3299_v19, %v3298_v38  ;;  %v13400_v38 = vpop.eup %13399 }
 0x4f4   : > { %v3249_v45 = vpop.permute.xlu1 %3248 }
 0x4f5   : > { %v3301_v22 = vmul.f32 %v13380_v4, %v3249_v45  ;;  %12027 = vmatprep.mubr.msk.bf16.mxu0 %vm562_vm1, %v3316_v49  ;;  %12051 = vmatprep.mubr.msk.bf16.mxu1 %vm562_vm1, %v3316_v49  ;;  %v13402_v49 = vpop.eup %13401 }
 0x4f6   : > { %v13404_v45 = vpop.eup %13403 }
 0x4f7   : > { %v3317_v48 = vpack.c.bf16 %v3301_v22, %v3300_v21  ;;  %v3251_v32 = vpop.permute.xlu0 %3250 }
 0x4f8   : > { %v3302_v51 = vmul.f32 %v13382_v2, %v3251_v32 }
 0x4f9   : > { %12028 = vmatmul.mubr.msk.bf16.gmra.mxu0 %vm562_vm1, %v3317_v48  ;;  %12052 = vmatmul.mubr.msk.bf16.gmra.mxu1 %vm562_vm1, %v3317_v48 }
 0x4fb   : > { %v3255_v30 = vpop.permute.xlu0 %3254 }
 0x4fc   : > { %v3304_v33 = vmul.f32 %v13386_v20, %v3255_v30 }
 0x4ff   : > { %v3253_v12 = vpop.permute.xlu1 %3252 }
 0x500   : > { %v3303_v24 = vmul.f32 %v13384_v46, %v3253_v12 }
 0x502   : > { %v3318_v36 = vpack.c.bf16 %v3303_v24, %v3302_v51 }
 0x503   : > { %v3257_v0 = vpop.permute.xlu1 %3256  ;;  %v3259_v8 = vpop.permute.xlu0 %3258 }
 0x504   : > { %v3305_v27 = vmul.f32 %v13388_v57, %v3257_v0  ;;  %12031 = vmatprep.mubr.msk.bf16.mxu0 %vm562_vm1, %v3318_v36  ;;  %12055 = vmatprep.mubr.msk.bf16.mxu1 %vm562_vm1, %v3318_v36  ;;  %v3306_v28 = vmul.f32 %v13390_v16, %v3259_v8  ;;  %v14726_v0 = vld [vmem:[%s16628_s2] sm:$0xff]  }
 0x506   : > { %v3319_v29 = vpack.c.bf16 %v3305_v27, %v3304_v33 }
 0x507   : > { %v3263_v43 = vpop.permute.xlu0 %3262 }
 0x508   : > { %12032 = vmatmul.mubr.msk.bf16.gmra.mxu0 %vm562_vm1, %v3319_v29  ;;  %12056 = vmatmul.mubr.msk.bf16.gmra.mxu1 %vm562_vm1, %v3319_v29  ;;  %v3308_v62 = vmul.f32 %v13394_v59, %v3263_v43 }
 0x509   : > { %v3261_v14 = vpop.permute.xlu1 %3260 }
 0x50a   : > { %v3307_v47 = vmul.f32 %v13392_v34, %v3261_v14 }
 0x50c   : > { %v3320_v11 = vpack.c.bf16 %v3307_v47, %v3306_v28 }
 0x50d   : > { %v3265_v23 = vpop.permute.xlu1 %3264 }
 0x50e   : > { %v3309_v35 = vmul.f32 %v13396_v37, %v3265_v23  ;;  %12035 = vmatprep.mubr.msk.bf16.mxu0 %vm562_vm1, %v3320_v11  ;;  %12059 = vmatprep.mubr.msk.bf16.mxu1 %vm562_vm1, %v3320_v11 }
 0x510   : > { %v3321_v31 = vpack.c.bf16 %v3309_v35, %v3308_v62  ;;  %v3267_v58 = vpop.permute.xlu0 %3266 }
 0x511   : > { %v3310_v25 = vmul.f32 %v13398_v52, %v3267_v58 }
 0x512   : > { %12036 = vmatmul.mubr.msk.bf16.gmra.mxu0 %vm562_vm1, %v3321_v31  ;;  %12060 = vmatmul.mubr.msk.bf16.gmra.mxu1 %vm562_vm1, %v3321_v31 }
 0x514   : > { %v3269_v19 = vpop.permute.xlu1 %3268  ;;  %v3271_v9 = vpop.permute.xlu0 %3270 }
 0x515   : > { %v3311_v54 = vmul.f32 %v13400_v38, %v3269_v19  ;;  %v3312_v22 = vmul.f32 %v13402_v49, %v3271_v9 }
 0x517   : > { %v3322_v4 = vpack.c.bf16 %v3311_v54, %v3310_v25 }
 0x518   : > { %v3273_v21 = vpop.permute.xlu1 %3272 }
 0x519   : > { %v3313_v48 = vmul.f32 %v13404_v45, %v3273_v21  ;;  %12039 = vmatprep.mubr.msk.bf16.mxu0 %vm562_vm1, %v3322_v4  ;;  %12063 = vmatprep.mubr.msk.bf16.mxu1 %vm562_vm1, %v3322_v4 }
 0x51b   : > { %v3323_v32 = vpack.c.bf16 %v3313_v48, %v3312_v22 }
 0x51d   : > { %12040 = vmatmul.mubr.msk.bf16.gmra.mxu0 %vm562_vm1, %v3323_v32  ;;  %12064 = vmatmul.mubr.msk.bf16.gmra.mxu1 %vm562_vm1, %v3323_v32 }
 0x51e   : > { %12075 = vmatprep.mubr.msk.bf16.mxu1 %vm13795_vm0, %v13794_v1  ;;  %12069 = vmatprep.mubr.msk.bf16.mxu0 %vm13795_vm0, %v13794_v1 }
 0x5b1   : > { %v12049_v2 = vpop.f32.mrf.mxu1  ;;  %v14721_v36 = vpop.f32.mrf.mxu0 }
 0x5b3   : > { %v3535_v46 = vpop.f32.mrf.mxu1  ;;  %v14737_v29 = vpop.f32.mrf.mxu0 }
 0x5b5   : > { %v12050_v12 = vpop.f32.mrf.mxu1  ;;  %v12026_v34 = vpop.f32.mrf.mxu0 }
 0x5b6   : > { %v3625_v51 = vpack.c.bf16 %v12050_v12, %v12049_v2  ;;  %v3615_v12 = vpack.c.bf16 %v12026_v34, %v14721_v36  ;;  %v13778_v36 = vld [vmem:[%s16627_s1] sm:$0xff]  }
 0x5b7   : > { %v3538_v24 = vpop.f32.mrf.mxu1  ;;  %v3408_v14 = vpop.f32.mrf.mxu0 }
 0x5b8   : > { %v3624_v30 = vpack.c.bf16 %v3538_v24, %v3535_v46  ;;  %12074 = vmatpush3.bf16.msra.mxu1 %v3625_v51  ;;  %v3614_v51 = vpack.c.bf16 %v3408_v14, %v14737_v29 }
 0x5b9   : > { %v12053_v20 = vpop.f32.mrf.mxu1  ;;  %12085 = vmatprep.subr.bf16.mxu1 %v13794_v1  ;;  %v12029_v43 = vpop.f32.mrf.mxu0 }
 0x5ba   : > { %12068 = vmatpush3.bf16.msra.mxu0 %v3624_v30 }
 0x5bb   : > { %v3551_v57 = vpop.f32.mrf.mxu1  ;;  %12076 = vmatmul.mubr.msk.bf16.vlgmr.msra.gmra.mxu1 %vm1619_vm2, %v14726_v0  ;;  %12079 = vmatprep.subr.bf16.mxu0 %v13794_v1  ;;  %v3421_v23 = vpop.f32.mrf.mxu0 }
 0x5bc   : > { %12087 = vmatprep.mubr.msk.bf16.mxu1 %vm13795_vm0, %v13794_v1 }
 0x5bd   : > { %v12054_v33 = vpop.f32.mrf.mxu1  ;;  %12070 = vmatmul.mubr.msk.bf16.vlgmr.msra.gmra.mxu0 %vm1619_vm2, %v14726_v0  ;;  %v12030_v35 = vpop.f32.mrf.mxu0 }
 0x5be   : > { %v3627_v27 = vpack.c.bf16 %v12054_v33, %v12053_v20  ;;  %12081 = vmatprep.mubr.msk.bf16.mxu0 %vm13795_vm0, %v13794_v1  ;;  %v3617_v20 = vpack.c.bf16 %v12030_v35, %v12029_v43 }
 0x5bf   : > { %v3554_v8 = vpop.f32.mrf.mxu1  ;;  %v3424_v52 = vpop.f32.mrf.mxu0 }
 0x5c0   : > { %v3626_v16 = vpack.c.bf16 %v3554_v8, %v3551_v57  ;;  %12086 = vmatpush3.bf16.msra.mxu1 %v3627_v27  ;;  %v3616_v57 = vpack.c.bf16 %v3424_v52, %v3421_v23  ;;  %v13083_v23 = vld [vmem:[%s16632_s6 + $0x28] sm:$0xff]  }
 0x5c1   : > { %12097 = vmatprep.subr.bf16.mxu1 %v13794_v1 }
 0x5c2   : > { %12080 = vmatpush3.bf16.msra.mxu0 %v3626_v16 }
 0x5c3   : > { %12088 = vmatmul.mubr.msk.bf16.vlgmr.msra.gmra.mxu1 %vm1619_vm2, %v14726_v0  ;;  %12091 = vmatprep.subr.bf16.mxu0 %v13794_v1 }
 0x5c4   : > { %12099 = vmatprep.mubr.msk.bf16.mxu1 %vm13795_vm0, %v13794_v1 }
 0x5c5   : > { %12082 = vmatmul.mubr.msk.bf16.vlgmr.msra.gmra.mxu0 %vm1619_vm2, %v14726_v0 }
 0x5c6   : > { %12093 = vmatprep.mubr.msk.bf16.mxu0 %vm13795_vm0, %v13794_v1 }
 0x5c8   : > { %v12057_v28 = vpop.f32.mrf.mxu1  ;;  %v12033_v9 = vpop.f32.mrf.mxu0 }
 0x5ca   : > { %v3567_v47 = vpop.f32.mrf.mxu1  ;;  %v3437_v49 = vpop.f32.mrf.mxu0 }
 0x5cc   : > { %v12058_v59 = vpop.f32.mrf.mxu1  ;;  %v12034_v21 = vpop.f32.mrf.mxu0 }
 0x5cd   : > { %v3629_v11 = vpack.c.bf16 %v12058_v59, %v12057_v28  ;;  %v3619_v27 = vpack.c.bf16 %v12034_v21, %v12033_v9 }
 0x5ce   : > { %v3570_v37 = vpop.f32.mrf.mxu1  ;;  %v3440_v46 = vpop.f32.mrf.mxu0 }
 0x5cf   : > { %v3628_v62 = vpack.c.bf16 %v3570_v37, %v3567_v47  ;;  %12098 = vmatpush3.bf16.msra.mxu1 %v3629_v11  ;;  %v3618_v29 = vpack.c.bf16 %v3440_v46, %v3437_v49  ;;  %v13081_v11 = vld [vmem:[%s16630_s4 + $0x28] sm:$0xff]   ;;  %v13082_v37 = vld [vmem:[%s16630_s4 + $0x20] sm:$0xff]  }
 0x5d0   : > { %12109 = vmatprep.subr.bf16.mxu1 %v13794_v1 }
 0x5d1   : > { %12092 = vmatpush3.bf16.msra.mxu0 %v3628_v62  ;;  %v13084_v62 = vld [vmem:[%s16632_s6 + $0x20] sm:$0xff]  }
 0x5d2   : > { %12100 = vmatmul.mubr.msk.bf16.vlgmr.msra.gmra.mxu1 %vm1619_vm2, %v14726_v0  ;;  %12103 = vmatprep.subr.bf16.mxu0 %v13794_v1  ;;  %v12061_v31 = vpop.f32.mrf.mxu1  ;;  %v12037_v24 = vpop.f32.mrf.mxu0 }
 0x5d3   : > { %12111 = vmatprep.mubr.msk.bf16.mxu1 %vm13795_vm0, %v13794_v1 }
 0x5d4   : > { %12094 = vmatmul.mubr.msk.bf16.vlgmr.msra.gmra.mxu0 %vm1619_vm2, %v14726_v0  ;;  %v3583_v58 = vpop.f32.mrf.mxu1  ;;  %v3453_v30 = vpop.f32.mrf.mxu0 }
 0x5d5   : > { %12105 = vmatprep.mubr.msk.bf16.mxu0 %vm13795_vm0, %v13794_v1 }
 0x5d6   : > { %v12062_v38 = vpop.f32.mrf.mxu1 }
 0x5d7   : > { %v3631_v19 = vpack.c.bf16 %v12062_v38, %v12061_v31 }
 0x5d8   : > { %v3586_v25 = vpop.f32.mrf.mxu1 }
 0x5d9   : > { %v3630_v54 = vpack.c.bf16 %v3586_v25, %v3583_v58  ;;  %12110 = vmatpush3.bf16.msra.mxu1 %v3631_v19 }
 0x5da   : > { %12121 = vmatprep.subr.bf16.mxu1 %v13794_v1 }
 0x5db   : > { %12104 = vmatpush3.bf16.msra.mxu0 %v3630_v54 }
 0x5dc   : > { %12112 = vmatmul.mubr.msk.bf16.vlgmr.msra.gmra.mxu1 %vm1619_vm2, %v14726_v0  ;;  %12115 = vmatprep.subr.bf16.mxu0 %v13794_v1 }
 0x5dd   : > { %12123 = vmatprep.mubr.msk.bf16.mxu1 %vm13795_vm0, %v13794_v1  ;;  %v12065_v4 = vpop.f32.mrf.mxu1 }
 0x5de   : > { %12106 = vmatmul.mubr.msk.bf16.vlgmr.msra.gmra.mxu0 %vm1619_vm2, %v14726_v0 }
 0x5df   : > { %12117 = vmatprep.mubr.msk.bf16.mxu0 %vm13795_vm0, %v13794_v1  ;;  %v3599_v45 = vpop.f32.mrf.mxu1 }
 0x5e1   : > { %v12066_v22 = vpop.f32.mrf.mxu1 }
 0x5e2   : > { %v3633_v48 = vpack.c.bf16 %v12066_v22, %v12065_v4 }
 0x5e3   : > { %v3602_v32 = vpop.f32.mrf.mxu1 }
 0x5e4   : > { %v3632_v2 = vpack.c.bf16 %v3602_v32, %v3599_v45  ;;  %12122 = vmatpush3.bf16.msra.mxu1 %v3633_v48 }
 0x5e5   : > { %12133 = vmatprep.subr.bf16.mxu1 %v13794_v1 }
 0x5e6   : > { %12116 = vmatpush3.bf16.msra.mxu0 %v3632_v2 }
 0x5e7   : > { %12124 = vmatmul.mubr.msk.bf16.vlgmr.msra.gmra.mxu1 %vm1619_vm2, %v14726_v0  ;;  %12127 = vmatprep.subr.bf16.mxu0 %v13794_v1 }
 0x5e8   : > { %12134 = vmatpush3.bf16.msra.mxu1 %v3615_v12  ;;  %12135 = vmatprep.mubr.msk.bf16.mxu1 %vm13795_vm0, %v13794_v1 }
 0x5e9   : > { %12118 = vmatmul.mubr.msk.bf16.vlgmr.msra.gmra.mxu0 %vm1619_vm2, %v14726_v0  ;;  %12145 = vmatprep.subr.bf16.mxu1 %v13794_v1  ;;  %v12038_v0 = vpop.f32.mrf.mxu0 }
 0x5ea   : > { %12128 = vmatpush3.bf16.msra.mxu0 %v3614_v51  ;;  %12129 = vmatprep.mubr.msk.bf16.mxu0 %vm13795_vm0, %v13794_v1  ;;  %v3621_v34 = vpack.c.bf16 %v12038_v0, %v12037_v24 }
 0x5eb   : > { %12139 = vmatprep.subr.bf16.mxu0 %v13794_v1  ;;  %v3456_v33 = vpop.f32.mrf.mxu0 }
 0x5ec   : > { %v3620_v14 = vpack.c.bf16 %v3456_v33, %v3453_v30 }
 0x5ed   : > { %v12041_v8 = vpop.f32.mrf.mxu0 }
 0x5ef   : > { %12136 = vmatmul.mubr.msk.bf16.vlgmr.msra.gmra.mxu1 %vm1619_vm2, %v13778_v36  ;;  %v3469_v16 = vpop.f32.mrf.mxu0 }
 0x5f0   : > { %12146 = vmatpush3.bf16.msra.mxu1 %v3617_v20  ;;  %12147 = vmatprep.mubr.msk.bf16.mxu1 %vm13795_vm0, %v13794_v1 }
 0x5f1   : > { %12130 = vmatmul.mubr.msk.bf16.vlgmr.msra.gmra.mxu0 %vm1619_vm2, %v13778_v36  ;;  %12157 = vmatprep.subr.bf16.mxu1 %v13794_v1  ;;  %v12042_v28 = vpop.f32.mrf.mxu0 }
 0x5f2   : > { %12140 = vmatpush3.bf16.msra.mxu0 %v3616_v57  ;;  %12141 = vmatprep.mubr.msk.bf16.mxu0 %vm13795_vm0, %v13794_v1  ;;  %v3623_v43 = vpack.c.bf16 %v12042_v28, %v12041_v8 }
 0x5f3   : > { %12151 = vmatprep.subr.bf16.mxu0 %v13794_v1  ;;  %v3472_v47 = vpop.f32.mrf.mxu0 }
 0x5f4   : > { %v3622_v59 = vpack.c.bf16 %v3472_v47, %v3469_v16 }
 0x5f7   : > { %12148 = vmatmul.mubr.msk.bf16.vlgmr.msra.gmra.mxu1 %vm1619_vm2, %v13778_v36 }
 0x5f8   : > { %12158 = vmatpush3.bf16.msra.mxu1 %v3619_v27  ;;  %12159 = vmatprep.mubr.msk.bf16.mxu1 %vm13795_vm0, %v13794_v1 }
 0x5f9   : > { %12142 = vmatmul.mubr.msk.bf16.vlgmr.msra.gmra.mxu0 %vm1619_vm2, %v13778_v36  ;;  %12169 = vmatprep.subr.bf16.mxu1 %v13794_v1 }
 0x5fa   : > { %12152 = vmatpush3.bf16.msra.mxu0 %v3618_v29  ;;  %12153 = vmatprep.mubr.msk.bf16.mxu0 %vm13795_vm0, %v13794_v1 }
 0x5fb   : > { %12163 = vmatprep.subr.bf16.mxu0 %v13794_v1 }
 0x5ff   : > { %12160 = vmatmul.mubr.msk.bf16.vlgmr.msra.gmra.mxu1 %vm1619_vm2, %v13778_v36 }
 0x600   : > { %12170 = vmatpush3.bf16.msra.mxu1 %v3621_v34  ;;  %12171 = vmatprep.mubr.msk.bf16.mxu1 %vm13795_vm0, %v13794_v1 }
 0x601   : > { %12154 = vmatmul.mubr.msk.bf16.vlgmr.msra.gmra.mxu0 %vm1619_vm2, %v13778_v36  ;;  %12181 = vmatprep.subr.bf16.mxu1 %v13794_v1 }
 0x602   : > { %12164 = vmatpush3.bf16.msra.mxu0 %v3620_v14  ;;  %12165 = vmatprep.mubr.msk.bf16.mxu0 %vm13795_vm0, %v13794_v1 }
 0x603   : > { %12175 = vmatprep.subr.bf16.mxu0 %v13794_v1 }
 0x607   : > { %12172 = vmatmul.mubr.msk.bf16.vlgmr.msra.gmra.mxu1 %vm1619_vm2, %v13778_v36 }
 0x608   : > { %12182 = vmatpush3.bf16.msra.mxu1 %v3623_v43  ;;  %12183 = vmatprep.mubr.msk.bf16.mxu1 %vm13795_vm0, %v13794_v1 }
 0x609   : > { %12166 = vmatmul.mubr.msk.bf16.vlgmr.msra.gmra.mxu0 %vm1619_vm2, %v13778_v36  ;;  %12195 = vmatprep.subr.bf16.mxu1 %v13794_v1 }
 0x60a   : > { %12176 = vmatpush3.bf16.msra.mxu0 %v3622_v59  ;;  %12177 = vmatprep.mubr.msk.bf16.mxu0 %vm13795_vm0, %v13794_v1 }
 0x60b   : > { %12187 = vmatprep.subr.bf16.mxu0 %v13794_v1 }
 0x60f   : > { %12184 = vmatmul.mubr.msk.bf16.vlgmr.msra.gmra.mxu1 %vm1619_vm2, %v13778_v36 }
 0x610   : > { %12199 = vmatprep.mubr.msk.bf16.mxu1 %vm13795_vm0, %v13794_v1  ;;  %12196 = vmatpush3.bf16.msra.mxu1 %v13081_v11 }
 0x611   : > { %12178 = vmatmul.mubr.msk.bf16.vlgmr.msra.gmra.mxu0 %vm1619_vm2, %v13778_v36  ;;  %12197 = vmatprep.subr.bf16.mxu1 %v13794_v1 }
 0x612   : > { %12191 = vmatprep.mubr.msk.bf16.mxu0 %vm13795_vm0, %v13794_v1  ;;  %12188 = vmatpush3.bf16.msra.mxu0 %v13083_v23 }
 0x613   : > { %12189 = vmatprep.subr.bf16.mxu0 %v13794_v1 }
 0x614   : > { %12198 = vmatpush3.bf16.msra.mxu1 %v13082_v37 }
 0x615   : > { %12275 = vmatprep.subr.bf16.mxu1 %v13794_v1 }
 0x616   : > { %12190 = vmatpush3.bf16.msra.mxu0 %v13084_v62 }
 0x617   : > { %12235 = vmatprep.subr.bf16.mxu0 %v13794_v1 }
 0x67b   : > { %v3709_v35 = vpop.f32.mrf.mxu1 }
 0x67d   : > { %v3668_v31 = vpop.f32.mrf.mxu0  ;;  %v12077_v58 = vpop.f32.mrf.mxu1 }
 0x67f   : > { %v12071_v52 = vpop.f32.mrf.mxu0  ;;  %v3712_v38 = vpop.f32.mrf.mxu1 }
 0x680   : > { %v14871_v52 = vld [vmem:[%s16636_s10 + $0x1] ss:$0 sm:$0xff] }
 0x681   : > { %v3671_v19 = vpop.f32.mrf.mxu0  ;;  %v12078_v25 = vpop.f32.mrf.mxu1 }
 0x683   : > { %v12072_v54 = vpop.f32.mrf.mxu0  ;;  %v14840_v9 = vpop.f32.mrf.mxu1 }
 0x685   : > { %v3750_v49 = vpop.f32.mrf.mxu0  ;;  %v12089_v4 = vpop.f32.mrf.mxu1 }
 0x687   : > { %v12083_v45 = vpop.f32.mrf.mxu0  ;;  %v14842_v21 = vpop.f32.mrf.mxu1 }
 0x689   : > { %v3753_v22 = vpop.f32.mrf.mxu0  ;;  %v12090_v48 = vpop.f32.mrf.mxu1 }
 0x68b   : > { %v12084_v32 = vpop.f32.mrf.mxu0 }
 0x692   : > { %v14844_v2 = vpop.f32.mrf.mxu1 }
 0x694   : > { %v14846_v46 = vpop.f32.mrf.mxu0  ;;  %v12101_v12 = vpop.f32.mrf.mxu1 }
 0x696   : > { %v12095_v51 = vpop.f32.mrf.mxu0  ;;  %v14848_v24 = vpop.f32.mrf.mxu1 }
 0x698   : > { %v14850_v30 = vpop.f32.mrf.mxu0  ;;  %v12102_v20 = vpop.f32.mrf.mxu1 }
 0x69a   : > { %v12096_v36 = vpop.f32.mrf.mxu0 }
 0x69c   : > { %v14852_v57 = vpop.f32.mrf.mxu1 }
 0x69e   : > { %v14854_v0 = vpop.f32.mrf.mxu0  ;;  %v12113_v33 = vpop.f32.mrf.mxu1 }
 0x6a0   : > { %v12107_v27 = vpop.f32.mrf.mxu0  ;;  %v14856_v29 = vpop.f32.mrf.mxu1 }
 0x6a2   : > { %v14858_v8 = vpop.f32.mrf.mxu0  ;;  %v12114_v16 = vpop.f32.mrf.mxu1 }
 0x6a4   : > { %v12108_v34 = vpop.f32.mrf.mxu0 }
 0x6a7   : > { %v14860_v14 = vpop.f32.mrf.mxu1 }
 0x6a9   : > { %v14862_v28 = vpop.f32.mrf.mxu0  ;;  %v12125_v47 = vpop.f32.mrf.mxu1 }
 0x6ab   : > { %v12119_v43 = vpop.f32.mrf.mxu0  ;;  %v14864_v59 = vpop.f32.mrf.mxu1 }
 0x6ad   : > { %v14866_v11 = vpop.f32.mrf.mxu0  ;;  %v12126_v37 = vpop.f32.mrf.mxu1 }
 0x6af   : > { %v12120_v23 = vpop.f32.mrf.mxu0  ;;  %v4119_v62 = vpop.f32.mrf.mxu1 }
 0x6b0   : > { %v4120_v58 = vadd.f32 %v4119_v62, %v3709_v35 }
 0x6b1   : > { %v4078_v25 = vpop.f32.mrf.mxu0  ;;  %v12137_v54 = vpop.f32.mrf.mxu1 }
 0x6b2   : > { %v4079_v4 = vadd.f32 %v4078_v25, %v3668_v31  ;;  %v4464_v32 = vadd.f32 %v14871_v52, %v4120_v58 }
 0x6b3   : > { %v12131_v45 = vpop.f32.mrf.mxu0  ;;  %v4122_v48 = vpop.f32.mrf.mxu1 }
 0x6b4   : > { %v4123_v12 = vadd.f32 %v4122_v48, %v3712_v38  ;;  %v4462_v36 = vadd.f32 %v14871_v52, %v4079_v4  ;;  %v14877_v34 = vadd.f32 %v4464_v32, %v14379_v55 }
 0x6b5   : > { %v4081_v51 = vpop.f32.mrf.mxu0  ;;  %v12138_v20 = vpop.f32.mrf.mxu1 }
 0x6b6   : > { %v4465_v33 = vadd.f32 %v14871_v52, %v4123_v12  ;;  %v4082_v35 = vadd.f32 %v4081_v51, %v3671_v19  ;;  %v14884_v38 = vadd.f32 %v4462_v36, %v14372_v60 }
 0x6b7   : > { %v12132_v27 = vpop.f32.mrf.mxu0  ;;  %v4201_v16 = vpop.f32.mrf.mxu1 }
 0x6b8   : > { %v14880_v47 = vadd.f32 %v4465_v33, %v14369_v7  ;;  %v4463_v31 = vadd.f32 %v14871_v52, %v4082_v35  ;;  %v4202_v51 = vadd.f32 %v4201_v16, %v14840_v9 }
 0x6b9   : > { %v4160_v43 = vpop.f32.mrf.mxu0  ;;  %v12149_v37 = vpop.f32.mrf.mxu1 }
 0x6ba   : > { %v14888_v23 = vpack.c.bf16 %v14880_v47, %v14877_v34  ;;  %v14891_v19 = vadd.f32 %v4463_v31, %v14375_v10  ;;  %v4161_v62 = vadd.f32 %v4160_v43, %v3750_v49  ;;  %v4468_v43 = vadd.f32 %v14871_v52, %v4202_v51 }
 0x6bb   : > { %v12143_v55 = vpop.f32.mrf.mxu0  ;;  %v4204_v58 = vpop.f32.mrf.mxu1 }
 0x6bc   : > { %v4502_v7 = vpack.c.bf16 %v14891_v19, %v14884_v38  ;;  %12200 = vmatmul.mubr.msk.bf16.vlgmr.msra.gmra.mxu1 %vm562_vm1, %v14888_v23  ;;  %v4466_v60 = vadd.f32 %v14871_v52, %v4161_v62  ;;  %v4205_v49 = vadd.f32 %v4204_v58, %v14842_v21  ;;  %v14924_v55 = vadd.f32 %v4468_v43, %v14411_v50 }
 0x6bd   : > { %v4163_v25 = vpop.f32.mrf.mxu0  ;;  %v12150_v54 = vpop.f32.mrf.mxu1  ;;  %12203 = vmatprep.mubr.msk.bf16.mxu1 %vm13795_vm0, %v13794_v1 }
 0x6be   : > { %v4164_v4 = vadd.f32 %v4163_v25, %v3753_v22  ;;  %v14904_v20 = vadd.f32 %v4466_v60, %v14404_v3  ;;  %v4469_v22 = vadd.f32 %v14871_v52, %v4205_v49 }
 0x6bf   : > { %v12144_v45 = vpop.f32.mrf.mxu0  ;;  %v4283_v10 = vpop.f32.mrf.mxu1 }
 0x6c0   : > { %v4467_v48 = vadd.f32 %v14871_v52, %v4164_v4 }
 0x6c1   : > { %v4242_v32 = vpop.f32.mrf.mxu0  ;;  %v12161_v12 = vpop.f32.mrf.mxu1 }
 0x6c2   : > { %v14907_v36 = vadd.f32 %v4467_v48, %v14407_v56  ;;  %v14920_v56 = vadd.f32 %v4469_v22, %v14401_v41  ;;  %v4243_v58 = vadd.f32 %v4242_v32, %v14846_v46 }
 0x6c3   : > { %v12155_v33 = vpop.f32.mrf.mxu0  ;;  %v4286_v35 = vpop.f32.mrf.mxu1 }
 0x6c4   : > { %v14912_v27 = vpack.c.bf16 %v14907_v36, %v14904_v20  ;;  %v14929_v60 = vpack.c.bf16 %v14920_v56, %v14924_v55  ;;  %v4470_v49 = vadd.f32 %v14871_v52, %v4243_v58  ;;  %v4287_v46 = vadd.f32 %v4286_v35, %v14848_v24 }
 0x6c5   : > { %v4245_v21 = vpop.f32.mrf.mxu0  ;;  %v12162_v31 = vpop.f32.mrf.mxu1  ;;  %v4284_v33 = vadd.f32 %v4283_v10, %v14844_v2 }
 0x6c6   : > { %12204 = vmatmul.mubr.msk.bf16.gmra.mxu1 %vm562_vm1, %v14912_v27  ;;  %v4246_v16 = vadd.f32 %v4245_v21, %v14850_v30  ;;  %v14944_v22 = vadd.f32 %v4470_v49, %v14436_v63  ;;  %v4473_v43 = vadd.f32 %v14871_v52, %v4287_v46  ;;  %v13087_v46 = vld [vmem:[%s16635_s9 + $0x28] sm:$0xff]  }
 0x6c7   : > { %v12156_v3 = vpop.f32.mrf.mxu0  ;;  %v4365_v9 = vpop.f32.mrf.mxu1  ;;  %12207 = vmatprep.mubr.msk.bf16.mxu1 %vm13795_vm0, %v13794_v1 }
 0x6c8   : > { %v4471_v4 = vadd.f32 %v14871_v52, %v4246_v16  ;;  %v4472_v16 = vadd.f32 %v14871_v52, %v4284_v33  ;;  %v14960_v10 = vadd.f32 %v4473_v43, %v14433_v15 }
 0x6c9   : > { %v4324_v37 = vpop.f32.mrf.mxu0  ;;  %v12173_v62 = vpop.f32.mrf.mxu1 }
 0x6ca   : > { %v14939_v48 = vadd.f32 %v4471_v4, %v14439_v61  ;;  %v14973_v4 = vadd.f32 %v4472_v16, %v14443_v44 }
 0x6cb   : > { %v12167_v25 = vpop.f32.mrf.mxu0  ;;  %v4368_v54 = vpop.f32.mrf.mxu1 }
 0x6cc   : > { %v14949_v3 = vpack.c.bf16 %v14939_v48, %v14944_v22  ;;  %v13085_v25 = vld [vmem:[%s16629_s3 + $0x28] sm:$0xff]  }
 0x6cd   : > { %v4327_v45 = vpop.f32.mrf.mxu0  ;;  %v12174_v41 = vpop.f32.mrf.mxu1 }
 0x6ce   : > { %12208 = vmatmul.mubr.msk.bf16.gmra.mxu1 %vm562_vm1, %v14929_v60  ;;  %v4328_v62 = vadd.f32 %v4327_v45, %v14858_v8  ;;  %v4325_v41 = vadd.f32 %v4324_v37, %v14854_v0  ;;  %v4507_v8 = vpack.c.bf16 %v14960_v10, %v14973_v4  ;;  %v4369_v0 = vadd.f32 %v4368_v54, %v14856_v29 }
 0x6cf   : > { %v12168_v30 = vpop.f32.mrf.mxu0  ;;  %v4447_v50 = vpop.f32.mrf.mxu1  ;;  %12211 = vmatprep.mubr.msk.bf16.mxu1 %vm13795_vm0, %v13794_v1  ;;  %v4366_v45 = vadd.f32 %v4365_v9, %v14852_v57 }
 0x6d0   : > { %v4448_v32 = vadd.f32 %v4447_v50, %v14860_v14  ;;  %v4474_v44 = vadd.f32 %v14871_v52, %v4325_v41  ;;  %v4477_v30 = vadd.f32 %v14871_v52, %v4369_v0 }
 0x6d1   : > { %v4406_v12 = vpop.f32.mrf.mxu0  ;;  %v12185_v51 = vpop.f32.mrf.mxu1 }
 0x6d2   : > { %v4480_v61 = vadd.f32 %v14871_v52, %v4448_v32  ;;  %v14998_v49 = vadd.f32 %v4474_v44, %v14473_v17  ;;  %v15015_v17 = vadd.f32 %v4477_v30, %v14470_v53  ;;  %v4407_v38 = vadd.f32 %v4406_v12, %v14862_v28  ;;  %v15095_v44 = vld [vmem:[%s16631_s5 + $0x2] ss:$0 sm:$0xff] }
 0x6d3   : > { %v12179_v21 = vpop.f32.mrf.mxu0  ;;  %v4450_v31 = vpop.f32.mrf.mxu1 }
 0x6d4   : > { %v4451_v24 = vadd.f32 %v4450_v31, %v14864_v59  ;;  %v14964_v59 = vadd.f32 %v4480_v61, %v14501_v40  ;;  %v4475_v40 = vadd.f32 %v14871_v52, %v4328_v62  ;;  %v4478_v53 = vadd.f32 %v14871_v52, %v4407_v38 }
 0x6d5   : > { %v4409_v14 = vpop.f32.mrf.mxu0  ;;  %v12186_v35 = vpop.f32.mrf.mxu1 }
 0x6d6   : > { %v4481_v2 = vadd.f32 %v14871_v52, %v4451_v24  ;;  %12212 = vmatmul.mubr.msk.bf16.gmra.mxu1 %vm562_vm1, %v14949_v3  ;;  %v14994_v37 = vadd.f32 %v4475_v40, %v14476_v42  ;;  %v4476_v42 = vadd.f32 %v14871_v52, %v4366_v45  ;;  %v4410_v57 = vadd.f32 %v4409_v14, %v14866_v11 }
 0x6d7   : > { %12215 = vmatprep.mubr.msk.bf16.mxu1 %vm13795_vm0, %v13794_v1  ;;  %v12180_v63 = vpop.f32.mrf.mxu0  ;;  %v15037_v28 = vadd.f32 %v4478_v53, %v14510_v26 }
 0x6d8   : > { %v14967_v58 = vadd.f32 %v4481_v2, %v14504_v6  ;;  %v13086_v6 = vld [vmem:[%s16629_s3 + $0x20] sm:$0xff]   ;;  %v4508_v50 = vpack.c.bf16 %v14994_v37, %v14998_v49  ;;  %v15019_v29 = vadd.f32 %v4476_v42, %v14481_v13 }
 0x6da   : > { %v4511_v15 = vpack.c.bf16 %v14967_v58, %v14964_v59  ;;  %v4509_v19 = vpack.c.bf16 %v15015_v17, %v15019_v29 }
 0x6dc   : > { %12192 = vmatmul.mubr.msk.bf16.vlgmr.msra.gmra.mxu0 %vm562_vm1, %v4511_v15 }
 0x6dd   : > { %12236 = vmatpush3.bf16.msra.mxu0 %v13085_v25  ;;  %12239 = vmatprep.mubr.msk.bf16.mxu0 %vm13795_vm0, %v13794_v1 }
 0x6de   : > { %12216 = vmatmul.mubr.msk.bf16.gmra.mxu1 %vm562_vm1, %v4507_v8  ;;  %12237 = vmatprep.subr.bf16.mxu0 %v13794_v1 }
 0x6df   : > { %12219 = vmatprep.mubr.msk.bf16.mxu1 %vm13795_vm0, %v13794_v1 }
 0x6e1   : > { %12238 = vmatpush3.bf16.msra.mxu0 %v13086_v6 }
 0x6e2   : > { %12315 = vmatprep.subr.bf16.mxu0 %v13794_v1 }
 0x6e4   : > { %12240 = vmatmul.mubr.msk.bf16.vlgmr.msra.gmra.mxu0 %vm562_vm1, %v4502_v7  ;;  %v4479_v7 = vadd.f32 %v14871_v52, %v4410_v57 }
 0x6e5   : > { %12243 = vmatprep.mubr.msk.bf16.mxu0 %vm13795_vm0, %v13794_v1  ;;  %12316 = vmatpush3.bf16.msra.mxu0 %v13087_v46 }
 0x6e6   : > { %12220 = vmatmul.mubr.msk.bf16.gmra.mxu1 %vm562_vm1, %v4508_v50  ;;  %v15034_v13 = vadd.f32 %v4479_v7, %v14515_v5  ;;  %12317 = vmatprep.subr.bf16.mxu0 %v13794_v1 }
 0x6e7   : > { %12223 = vmatprep.mubr.msk.bf16.mxu1 %vm13795_vm0, %v13794_v1 }
 0x6e8   : > { %v4510_v11 = vpack.c.bf16 %v15034_v13, %v15037_v28 }
 0x6ec   : > { %12244 = vmatmul.mubr.msk.bf16.gmra.mxu0 %vm562_vm1, %v14888_v23 }
 0x6ed   : > { %12247 = vmatprep.mubr.msk.bf16.mxu0 %vm13795_vm0, %v13794_v1 }
 0x6ee   : > { %12224 = vmatmul.mubr.msk.bf16.gmra.mxu1 %vm562_vm1, %v4509_v19 }
 0x6ef   : > { %12227 = vmatprep.mubr.msk.bf16.mxu1 %vm13795_vm0, %v13794_v1 }
 0x6f4   : > { %12248 = vmatmul.mubr.msk.bf16.gmra.mxu0 %vm562_vm1, %v14912_v27 }
 0x6f5   : > { %12251 = vmatprep.mubr.msk.bf16.mxu0 %vm13795_vm0, %v13794_v1 }
 0x6f6   : > { %12228 = vmatmul.mubr.msk.bf16.gmra.mxu1 %vm562_vm1, %v4510_v11 }
 0x6f7   : > { %12231 = vmatprep.mubr.msk.bf16.mxu1 %vm13795_vm0, %v13794_v1 }
 0x6fc   : > { %12252 = vmatmul.mubr.msk.bf16.gmra.mxu0 %vm562_vm1, %v14929_v60 }
 0x6fd   : > { %12255 = vmatprep.mubr.msk.bf16.mxu0 %vm13795_vm0, %v13794_v1 }
 0x6fe   : > { %12232 = vmatmul.mubr.msk.bf16.gmra.mxu1 %vm562_vm1, %v4511_v15 }
 0x6ff   : > { %12279 = vmatprep.mubr.msk.bf16.mxu1 %vm13795_vm0, %v13794_v1 }
 0x704   : > { %12256 = vmatmul.mubr.msk.bf16.gmra.mxu0 %vm562_vm1, %v14949_v3  ;;  %v10777_v3 = vld [vmem:[%s16633_s7 + $0x2] ss:$0 sm:$0xff] }
 0x705   : > { %12259 = vmatprep.mubr.msk.bf16.mxu0 %vm13795_vm0, %v13794_v1 }
 0x70c   : > { %12260 = vmatmul.mubr.msk.bf16.gmra.mxu0 %vm562_vm1, %v4507_v8 }
 0x70d   : > { %12263 = vmatprep.mubr.msk.bf16.mxu0 %vm13795_vm0, %v13794_v1 }
 0x714   : > { %12264 = vmatmul.mubr.msk.bf16.gmra.mxu0 %vm562_vm1, %v4508_v50 }
 0x715   : > { %12267 = vmatprep.mubr.msk.bf16.mxu0 %vm13795_vm0, %v13794_v1 }
 0x71c   : > { %12268 = vmatmul.mubr.msk.bf16.gmra.mxu0 %vm562_vm1, %v4509_v19 }
 0x71d   : > { %12271 = vmatprep.mubr.msk.bf16.mxu0 %vm13795_vm0, %v13794_v1 }
 0x724   : > { %12272 = vmatmul.mubr.msk.bf16.gmra.mxu0 %vm562_vm1, %v4510_v11 }
 0x725   : > { %12319 = vmatprep.mubr.msk.bf16.mxu0 %vm13795_vm0, %v13794_v1 }
 0x77c   : > { %v4663_v26 = vpop.f32.mrf.mxu1 }
 0x77e   : > { %v12201_v5 = vpop.f32.mrf.mxu1 }
 0x780   : > { %v4666_v52 = vpop.f32.mrf.mxu1 }
 0x782   : > { %v12202_v23 = vpop.f32.mrf.mxu1 }
 0x786   : > { %v4671_v27 = vpop.f32.mrf.mxu1 }
 0x788   : > { %v12205_v9 = vpop.f32.mrf.mxu1 }
 0x78a   : > { %v4674_v54 = vpop.f32.mrf.mxu1 }
 0x78c   : > { %v12206_v60 = vpop.f32.mrf.mxu1 }
 0x78e   : > { %v4679_v32 = vpop.f32.mrf.mxu1 }
 0x790   : > { %v12209_v12 = vpop.f32.mrf.mxu1 }
 0x792   : > { %v4682_v51 = vpop.f32.mrf.mxu1 }
 0x794   : > { %v12210_v33 = vpop.f32.mrf.mxu1 }
 0x796   : > { %v15075_v21 = vpop.f32.mrf.mxu1 }
 0x798   : > { %v12213_v31 = vpop.f32.mrf.mxu1 }
 0x79a   : > { %v15077_v43 = vpop.f32.mrf.mxu1 }
 0x79c   : > { %v4574_v61 = vpop.f32.mrf.mxu0  ;;  %v12214_v24 = vpop.f32.mrf.mxu1 }
 0x79d   : > { %v4575_v14 = vadd.f32 %v10777_v3, %v4574_v61 }
 0x79e   : > { %v12193_v35 = vpop.f32.mrf.mxu0  ;;  %v15082_v16 = vpop.f32.mrf.mxu1 }
 0x79f   : > { %v15085_v2 = vadd.f32 %v4575_v14, %v14552_v39 }
 0x7a0   : > { %v4577_v63 = vpop.f32.mrf.mxu0  ;;  %v12217_v62 = vpop.f32.mrf.mxu1 }
 0x7a1   : > { %v4578_v25 = vadd.f32 %v10777_v3, %v4577_v63 }
 0x7a2   : > { %v12194_v41 = vpop.f32.mrf.mxu0  ;;  %v15087_v15 = vpop.f32.mrf.mxu1 }
 0x7a3   : > { %v15090_v8 = vadd.f32 %v4578_v25, %v14555_v18 }
 0x7a4   : > { %v12218_v40 = vpop.f32.mrf.mxu1  ;;  %v4783_v6 = vpop.f32.mrf.mxu0 }
 0x7a5   : > { %v4784_v0 = vadd.f32 %v4783_v6, %v4663_v26 }
 0x7a6   : > { %v15097_v45 = vpop.f32.mrf.mxu1  ;;  %v12241_v39 = vpop.f32.mrf.mxu0 }
 0x7a7   : > { %v15100_v30 = vadd.f32 %v15095_v44, %v4784_v0 }
 0x7a8   : > { %v12221_v50 = vpop.f32.mrf.mxu1  ;;  %v4786_v42 = vpop.f32.mrf.mxu0 }
 0x7a9   : > { %v10813_v57 = vmul.f32 -1.442695, %v15100_v30  ;;  %v4787_v18 = vadd.f32 %v4786_v42, %v4666_v52 }
 0x7aa   : > { %v15103_v38 = vpop.f32.mrf.mxu1  ;;  %v12242_v19 = vpop.f32.mrf.mxu0 }
 0x7ab   : > { %13405 = vpow2.f32 %v10813_v57  ;;  %v15106_v7 = vadd.f32 %v15095_v44, %v4787_v18 }
 0x7ac   : > { %v12222_v53 = vpop.f32.mrf.mxu1  ;;  %v4791_v11 = vpop.f32.mrf.mxu0 }
 0x7ad   : > { %v10814_v26 = vmul.f32 -1.442695, %v15106_v7  ;;  %v4792_v5 = vadd.f32 %v4791_v11, %v4671_v27  ;;  %v13088_v53 = vld [vmem:[%s16634_s8 + $0x28] sm:$0xff]  }
 0x7ae   : > { %v15109_v23 = vpop.f32.mrf.mxu1  ;;  %v12245_v9 = vpop.f32.mrf.mxu0  ;;  %12276 = vmatpush3.bf16.msra.mxu1 %v13088_v53 }
 0x7af   : > { %13407 = vpow2.f32 %v10814_v26  ;;  %v15112_v60 = vadd.f32 %v15095_v44, %v4792_v5  ;;  %12277 = vmatprep.subr.bf16.mxu1 %v13794_v1 }
 0x7b0   : > { %v12225_v52 = vpop.f32.mrf.mxu1  ;;  %v4794_v46 = vpop.f32.mrf.mxu0 }
 0x7b1   : > { %v10815_v12 = vmul.f32 -1.442695, %v15112_v60  ;;  %v4795_v33 = vadd.f32 %v4794_v46, %v4674_v54 }
 0x7b2   : > { %v15115_v31 = vpop.f32.mrf.mxu1  ;;  %v12246_v3 = vpop.f32.mrf.mxu0 }
 0x7b3   : > { %13409 = vpow2.f32 %v10815_v12  ;;  %v15118_v61 = vadd.f32 %v15095_v44, %v4795_v33  ;;  %v13089_v3 = vld [vmem:[%s16634_s8 + $0x20] sm:$0xff]  }
 0x7b4   : > { %v12226_v27 = vpop.f32.mrf.mxu1  ;;  %v4799_v24 = vpop.f32.mrf.mxu0  ;;  %12278 = vmatpush3.bf16.msra.mxu1 %v13089_v3 }
 0x7b5   : > { %v10816_v14 = vmul.f32 -1.442695, %v15118_v61  ;;  %v4800_v35 = vadd.f32 %v4799_v24, %v4679_v32  ;;  %12355 = vmatprep.subr.bf16.mxu1 %v13794_v1 }
 0x7b6   : > { %v15121_v63 = vpop.f32.mrf.mxu1  ;;  %v12249_v62 = vpop.f32.mrf.mxu0 }
 0x7b7   : > { %13411 = vpow2.f32 %v10816_v14  ;;  %v15124_v25 = vadd.f32 %v15095_v44, %v4800_v35 }
 0x7b8   : > { %v13406_v54 = vpop.eup %13405  ;;  %v12229_v41 = vpop.f32.mrf.mxu1 }
 0x7b9   : > { %v4802_v40 = vpop.f32.mrf.mxu0  ;;  %v4952_v6 = vadd.f32 1.0, %v13406_v54  ;;  %v10817_v0 = vmul.f32 -1.442695, %v15124_v25 }
 0x7ba   : > { %v4803_v39 = vadd.f32 %v4802_v40, %v4682_v51  ;;  %v15127_v50 = vpop.f32.mrf.mxu1 }
 0x7bb   : > { %v12250_v42 = vpop.f32.mrf.mxu0  ;;  %13413 = vrcp.f32 %v4952_v6 }
 0x7bc   : > { %v15130_v32 = vadd.f32 %v15095_v44, %v4803_v39  ;;  %v13408_v57 = vpop.eup %13407  ;;  %13415 = vpow2.f32 %v10817_v0  ;;  %v12230_v18 = vpop.f32.mrf.mxu1 }
 0x7bd   : > { %v4807_v19 = vpop.f32.mrf.mxu0  ;;  %v4953_v11 = vadd.f32 1.0, %v13408_v57 }
 0x7be   : > { %v10818_v26 = vmul.f32 -1.442695, %v15130_v32  ;;  %v4808_v51 = vadd.f32 %v4807_v19, %v15075_v21  ;;  %v15137_v5 = vpop.f32.mrf.mxu1  ;;  %v13090_v21 = vld [vmem:[%s16635_s9 + $0x20] sm:$0xff]  }
 0x7bf   : > { %v12253_v9 = vpop.f32.mrf.mxu0  ;;  %13417 = vrcp.f32 %v4953_v11  ;;  %12318 = vmatpush3.bf16.msra.mxu0 %v13090_v21 }
 0x7c0   : > { %v15140_v52 = vadd.f32 %v15095_v44, %v4808_v51  ;;  %v13410_v46 = vpop.eup %13409  ;;  %13419 = vpow2.f32 %v10818_v26  ;;  %v12233_v12 = vpop.f32.mrf.mxu1  ;;  %12361 = vmatprep.subr.bf16.mxu0 %v13794_v1 }
 0x7c1   : > { %v4810_v33 = vpop.f32.mrf.mxu0  ;;  %v4954_v27 = vadd.f32 1.0, %v13410_v46 }
 0x7c2   : > { %v10819_v24 = vmul.f32 -1.442695, %v15140_v52  ;;  %v4811_v14 = vadd.f32 %v4810_v33, %v15077_v43  ;;  %v15151_v35 = vpop.f32.mrf.mxu1 }
 0x7c3   : > { %v12254_v62 = vpop.f32.mrf.mxu0  ;;  %13421 = vrcp.f32 %v4954_v27 }
 0x7c4   : > { %v15154_v54 = vadd.f32 %v15095_v44, %v4811_v14  ;;  %v13412_v41 = vpop.eup %13411  ;;  %13423 = vpow2.f32 %v10819_v24  ;;  %v12234_v40 = vpop.f32.mrf.mxu1 }
 0x7c5   : > { %v4815_v6 = vpop.f32.mrf.mxu0  ;;  %v4955_v0 = vadd.f32 1.0, %v13412_v41 }
 0x7c6   : > { %v10820_v43 = vmul.f32 -1.442695, %v15154_v54  ;;  %v4816_v39 = vadd.f32 %v4815_v6, %v15082_v16 }
 0x7c7   : > { %v12257_v42 = vpop.f32.mrf.mxu0  ;;  %13425 = vrcp.f32 %v4955_v0 }
 0x7c8   : > { %v15161_v57 = vadd.f32 %v15095_v44, %v4816_v39  ;;  %v13414_v18 = vpop.eup %13413  ;;  %13427 = vpow2.f32 %v10820_v43 }
 0x7c9   : > { %v4818_v19 = vpop.f32.mrf.mxu0  ;;  %v13416_v53 = vpop.eup %13415  ;;  %5024 = vrot.lane.b32.xlu0 %v13414_v18, %s13796_s21 }
 0x7ca   : > { %v10821_v11 = vmul.f32 -1.442695, %v15161_v57  ;;  %v4819_v26 = vadd.f32 %v4818_v19, %v15087_v15  ;;  %v4956_v51 = vadd.f32 1.0, %v13416_v53 }
 0x7cb   : > { %v12258_v9 = vpop.f32.mrf.mxu0 }
 0x7cc   : > { %13429 = vpow2.f32 %v10821_v11  ;;  %v15167_v16 = vadd.f32 %v15095_v44, %v4819_v26  ;;  %v13418_v46 = vpop.eup %13417 }
 0x7cd   : > { %13431 = vrcp.f32 %v4956_v51  ;;  %v4823_v12 = vpop.f32.mrf.mxu0  ;;  %v13420_v33 = vpop.eup %13419  ;;  %5026 = vrot.lane.b32.xlu1 %v13418_v46, %s13796_s21 }
 0x7ce   : > { %v10822_v3 = vmul.f32 -1.442695, %v15167_v16  ;;  %v4824_v21 = vadd.f32 %v4823_v12, %v15097_v45  ;;  %v4957_v27 = vadd.f32 1.0, %v13420_v33 }
 0x7cf   : > { %v12261_v15 = vpop.f32.mrf.mxu0 }
 0x7d0   : > { %13433 = vpow2.f32 %v10822_v3  ;;  %v15173_v24 = vadd.f32 %v15095_v44, %v4824_v21  ;;  %v13422_v14 = vpop.eup %13421 }
 0x7d1   : > { %13435 = vrcp.f32 %v4957_v27  ;;  %v4826_v62 = vpop.f32.mrf.mxu0  ;;  %v13424_v41 = vpop.eup %13423  ;;  %5028 = vrot.lane.b32.xlu0 %v13422_v14, %s13796_s21 }
 0x7d2   : > { %v10823_v40 = vmul.f32 -1.442695, %v15173_v24  ;;  %v4827_v6 = vadd.f32 %v4826_v62, %v15103_v38  ;;  %v4958_v0 = vadd.f32 1.0, %v13424_v41 }
 0x7d3   : > { %v12262_v45 = vpop.f32.mrf.mxu0 }
 0x7d4   : > { %13437 = vpow2.f32 %v10823_v40  ;;  %v15179_v43 = vadd.f32 %v15095_v44, %v4827_v6  ;;  %v13426_v39 = vpop.eup %13425 }
 0x7d5   : > { %13439 = vrcp.f32 %v4958_v0  ;;  %v4831_v42 = vpop.f32.mrf.mxu0  ;;  %v13428_v18 = vpop.eup %13427  ;;  %5030 = vrot.lane.b32.xlu1 %v13426_v39, %s13796_s21 }
 0x7d6   : > { %v10824_v19 = vmul.f32 -1.442695, %v15179_v43  ;;  %v4832_v53 = vadd.f32 %v4831_v42, %v15109_v23  ;;  %v4959_v11 = vadd.f32 1.0, %v13428_v18 }
 0x7d7   : > { %v12265_v38 = vpop.f32.mrf.mxu0 }
 0x7d8   : > { %13441 = vpow2.f32 %v10824_v19  ;;  %v15185_v26 = vadd.f32 %v15095_v44, %v4832_v53 }
 0x7d9   : > { %v13430_v51 = vpop.eup %13429  ;;  %13443 = vrcp.f32 %v4959_v11  ;;  %v4834_v9 = vpop.f32.mrf.mxu0 }
 0x7da   : > { %v13432_v46 = vpop.eup %13431  ;;  %v4960_v12 = vadd.f32 1.0, %v13430_v51  ;;  %v10825_v33 = vmul.f32 -1.442695, %v15185_v26  ;;  %v4835_v3 = vadd.f32 %v4834_v9, %v15115_v31 }
 0x7db   : > { %5032 = vrot.lane.b32.xlu0 %v13432_v46, %s13796_s21  ;;  %v12266_v23 = vpop.f32.mrf.mxu0 }
 0x7dc   : > { %13445 = vrcp.f32 %v4960_v12  ;;  %v15191_v21 = vadd.f32 %v15095_v44, %v4835_v3 }
 0x7dd   : > { %v13434_v27 = vpop.eup %13433  ;;  %13447 = vpow2.f32 %v10825_v33  ;;  %v4839_v15 = vpop.f32.mrf.mxu0 }
 0x7de   : > { %v13436_v14 = vpop.eup %13435  ;;  %v4961_v62 = vadd.f32 1.0, %v13434_v27  ;;  %v10826_v41 = vmul.f32 -1.442695, %v15191_v21  ;;  %v4840_v40 = vadd.f32 %v4839_v15, %v15121_v63 }
 0x7df   : > { %5034 = vrot.lane.b32.xlu1 %v13436_v14, %s13796_s21  ;;  %v12269_v6 = vpop.f32.mrf.mxu0 }
 0x7e0   : > { %13449 = vrcp.f32 %v4961_v62  ;;  %v15197_v31 = vadd.f32 %v15095_v44, %v4840_v40 }
 0x7e1   : > { %v13438_v0 = vpop.eup %13437  ;;  %13451 = vpow2.f32 %v10826_v41  ;;  %v4842_v45 = vpop.f32.mrf.mxu0 }
 0x7e2   : > { %v13440_v39 = vpop.eup %13439  ;;  %v4962_v42 = vadd.f32 1.0, %v13438_v0  ;;  %v10827_v18 = vmul.f32 -1.442695, %v15197_v31  ;;  %v4843_v19 = vadd.f32 %v4842_v45, %v15127_v50 }
 0x7e3   : > { %5036 = vrot.lane.b32.xlu0 %v13440_v39, %s13796_s21  ;;  %v12270_v53 = vpop.f32.mrf.mxu0 }
 0x7e4   : > { %13453 = vrcp.f32 %v4962_v42  ;;  %v15203_v63 = vadd.f32 %v15095_v44, %v4843_v19 }
 0x7e5   : > { %v13442_v11 = vpop.eup %13441  ;;  %13455 = vpow2.f32 %v10827_v18  ;;  %v4847_v38 = vpop.f32.mrf.mxu0 }
 0x7e6   : > { %v13444_v51 = vpop.eup %13443  ;;  %v4963_v9 = vadd.f32 1.0, %v13442_v11  ;;  %v10828_v46 = vmul.f32 -1.442695, %v15203_v63  ;;  %v4848_v12 = vadd.f32 %v4847_v38, %v15137_v5 }
 0x7e7   : > { %5038 = vrot.lane.b32.xlu1 %v13444_v51, %s13796_s21  ;;  %v12273_v33 = vpop.f32.mrf.mxu0 }
 0x7e8   : > { %13457 = vrcp.f32 %v4963_v9  ;;  %v15209_v50 = vadd.f32 %v15095_v44, %v4848_v12 }
 0x7e9   : > { %v13446_v3 = vpop.eup %13445  ;;  %13459 = vpow2.f32 %v10828_v46  ;;  %v4850_v23 = vpop.f32.mrf.mxu0 }
 0x7ea   : > { %v13448_v27 = vpop.eup %13447  ;;  %v10829_v15 = vmul.f32 -1.442695, %v15209_v50  ;;  %v4851_v14 = vadd.f32 %v4850_v23, %v15151_v35  ;;  %5040 = vrot.lane.b32.xlu0 %v13446_v3, %s13796_s21 }
 0x7eb   : > { %v4964_v62 = vadd.f32 1.0, %v13448_v27  ;;  %v12274_v41 = vpop.f32.mrf.mxu0 }
 0x7ec   : > { %13461 = vpow2.f32 %v10829_v15  ;;  %v15215_v5 = vadd.f32 %v15095_v44, %v4851_v14 }
 0x7ed   : > { %v13450_v40 = vpop.eup %13449  ;;  %13463 = vrcp.f32 %v4964_v62 }
 0x7ee   : > { %v13452_v6 = vpop.eup %13451  ;;  %v10830_v0 = vmul.f32 -1.442695, %v15215_v5  ;;  %5042 = vrot.lane.b32.xlu1 %v13450_v40, %s13796_s21 }
 0x7ef   : > { %v4965_v45 = vadd.f32 1.0, %v13452_v6 }
 0x7f0   : > { %13465 = vpow2.f32 %v10830_v0 }
 0x7f1   : > { %v13454_v39 = vpop.eup %13453  ;;  %13467 = vrcp.f32 %v4965_v45 }
 0x7f2   : > { %v13456_v35 = vpop.eup %13455  ;;  %5044 = vrot.lane.b32.xlu0 %v13454_v39, %s13796_s21 }
 0x7f3   : > { %v4966_v42 = vadd.f32 1.0, %v13456_v35 }
 0x7f5   : > { %v13458_v18 = vpop.eup %13457  ;;  %13469 = vrcp.f32 %v4966_v42 }
 0x7f6   : > { %v13460_v19 = vpop.eup %13459  ;;  %5046 = vrot.lane.b32.xlu1 %v13458_v18, %s13796_s21 }
 0x7f7   : > { %v4967_v44 = vadd.f32 1.0, %v13460_v19 }
 0x7f9   : > { %v13462_v53 = vpop.eup %13461  ;;  %13471 = vrcp.f32 %v4967_v44 }
 0x7fa   : > { %v13464_v11 = vpop.eup %13463  ;;  %v4968_v38 = vadd.f32 1.0, %v13462_v53 }
 0x7fb   : > { %5048 = vrot.lane.b32.xlu0 %v13464_v11, %s13796_s21 }
 0x7fc   : > { %13473 = vrcp.f32 %v4968_v38 }
 0x7fd   : > { %v13466_v51 = vpop.eup %13465 }
 0x7fe   : > { %v13468_v9 = vpop.eup %13467  ;;  %v4969_v46 = vadd.f32 1.0, %v13466_v51 }
 0x7ff   : > { %5050 = vrot.lane.b32.xlu1 %v13468_v9, %s13796_s21 }
 0x800   : > { %13475 = vrcp.f32 %v4969_v46 }
 0x801   : > { %13477 = vtanh.f32 %v15100_v30 }
 0x802   : > { %v13470_v12 = vpop.eup %13469  ;;  %13479 = vtanh.f32 %v15106_v7 }
 0x803   : > { %5052 = vrot.lane.b32.xlu0 %v13470_v12, %s13796_s21  ;;  %13481 = vtanh.f32 %v15112_v60 }
 0x804   : > { %13483 = vtanh.f32 %v15118_v61 }
 0x805   : > { %13485 = vtanh.f32 %v15124_v25 }
 0x806   : > { %v13472_v33 = vpop.eup %13471  ;;  %13487 = vtanh.f32 %v15130_v32 }
 0x807   : > { %5054 = vrot.lane.b32.xlu1 %v13472_v33, %s13796_s21  ;;  %13489 = vtanh.f32 %v15140_v52 }
 0x808   : > { %13491 = vtanh.f32 %v15154_v54 }
 0x809   : > { %v13474_v3 = vpop.eup %13473  ;;  %13493 = vtanh.f32 %v15161_v57 }
 0x80a   : > { %5056 = vrot.lane.b32.xlu0 %v13474_v3, %s13796_s21  ;;  %13495 = vtanh.f32 %v15167_v16 }
 0x80b   : > { %13497 = vtanh.f32 %v15173_v24 }
 0x80c   : > { %13499 = vtanh.f32 %v15179_v43 }
 0x80d   : > { %v13476_v23 = vpop.eup %13475  ;;  %13501 = vtanh.f32 %v15185_v26 }
 0x80e   : > { %5058 = vrot.lane.b32.xlu1 %v13476_v23, %s13796_s21  ;;  %v13478_v15 = vpop.eup %13477  ;;  %13503 = vtanh.f32 %v15191_v21 }
 0x80f   : > { %v13480_v14 = vpop.eup %13479  ;;  %13505 = vtanh.f32 %v15197_v31 }
 0x810   : > { %v13482_v7 = vpop.eup %13481  ;;  %13507 = vtanh.f32 %v15203_v63 }
 0x811   : > { %v13484_v60 = vpop.eup %13483  ;;  %13509 = vtanh.f32 %v15209_v50 }
 0x812   : > { %v13486_v39 = vpop.eup %13485  ;;  %13511 = vtanh.f32 %v15215_v5 }
 0x813   : > { %v13488_v35 = vpop.eup %13487 }
 0x814   : > { %v13490_v44 = vpop.eup %13489 }
 0x815   : > { %v13492_v53 = vpop.eup %13491 }
 0x816   : > { %v13494_v9 = vpop.eup %13493 }
 0x817   : > { %v13496_v46 = vpop.eup %13495 }
 0x818   : > { %v13498_v23 = vpop.eup %13497 }
 0x83b   : > { %v5025_v27 = vpop.permute.xlu0 %5024 }
 0x83c   : > { %v5078_v41 = vmul.f32 %v13478_v15, %v5025_v27  ;;  %v13500_v27 = vpop.eup %13499 }
 0x83f   : > { %v5027_v62 = vpop.permute.xlu1 %5026 }
 0x840   : > { %v5079_v40 = vmul.f32 %v13480_v14, %v5027_v62 }
 0x842   : > { %v5096_v6 = vpack.c.bf16 %v5079_v40, %v5078_v41  ;;  %v13502_v41 = vpop.eup %13501 }
 0x843   : > { %v5029_v30 = vpop.permute.xlu0 %5028  ;;  %v13504_v40 = vpop.eup %13503 }
 0x844   : > { %12280 = vmatmul.mubr.msk.bf16.vlgmr.msra.gmra.mxu1 %vm562_vm1, %v5096_v6  ;;  %12320 = vmatmul.mubr.msk.bf16.vlgmr.msra.gmra.mxu0 %vm562_vm1, %v5096_v6  ;;  %v5080_v0 = vmul.f32 %v13482_v7, %v5029_v30 }
 0x845   : > { %12283 = vmatprep.mubr.msk.bf16.mxu1 %vm13795_vm0, %v13794_v1  ;;  %12323 = vmatprep.mubr.msk.bf16.mxu0 %vm13795_vm0, %v13794_v1 }
 0x847   : > { %v5031_v61 = vpop.permute.xlu1 %5030 }
 0x848   : > { %v5081_v45 = vmul.f32 %v13484_v60, %v5031_v61  ;;  %v13506_v60 = vpop.eup %13505 }
 0x849   : > { %v13508_v61 = vpop.eup %13507 }
 0x84a   : > { %v5097_v25 = vpack.c.bf16 %v5081_v45, %v5080_v0  ;;  %v13510_v5 = vpop.eup %13509 }
 0x84c   : > { %12284 = vmatmul.mubr.msk.bf16.gmra.mxu1 %vm562_vm1, %v5097_v25  ;;  %12324 = vmatmul.mubr.msk.bf16.gmra.mxu0 %vm562_vm1, %v5097_v25 }
 0x84d   : > { %12287 = vmatprep.mubr.msk.bf16.mxu1 %vm13795_vm0, %v13794_v1  ;;  %12327 = vmatprep.mubr.msk.bf16.mxu0 %vm13795_vm0, %v13794_v1  ;;  %v5033_v32 = vpop.permute.xlu0 %5032 }
 0x84e   : > { %v5082_v52 = vmul.f32 %v13486_v39, %v5033_v32  ;;  %v13512_v39 = vpop.eup %13511 }
 0x851   : > { %v5035_v42 = vpop.permute.xlu1 %5034 }
 0x852   : > { %v5083_v18 = vmul.f32 %v13488_v35, %v5035_v42 }
 0x854   : > { %v5098_v54 = vpack.c.bf16 %v5083_v18, %v5082_v52 }
 0x855   : > { %v5037_v19 = vpop.permute.xlu0 %5036 }
 0x856   : > { %12288 = vmatmul.mubr.msk.bf16.gmra.mxu1 %vm562_vm1, %v5098_v54  ;;  %12328 = vmatmul.mubr.msk.bf16.gmra.mxu0 %vm562_vm1, %v5098_v54  ;;  %v5084_v57 = vmul.f32 %v13490_v44, %v5037_v19 }
 0x857   : > { %12291 = vmatprep.mubr.msk.bf16.mxu1 %vm13795_vm0, %v13794_v1  ;;  %12331 = vmatprep.mubr.msk.bf16.mxu0 %vm13795_vm0, %v13794_v1 }
 0x859   : > { %v5039_v11 = vpop.permute.xlu1 %5038 }
 0x85a   : > { %v5085_v38 = vmul.f32 %v13492_v53, %v5039_v11 }
 0x85c   : > { %v5099_v16 = vpack.c.bf16 %v5085_v38, %v5084_v57  ;;  %v5041_v51 = vpop.permute.xlu0 %5040 }
 0x85d   : > { %v5086_v24 = vmul.f32 %v13494_v9, %v5041_v51 }
 0x85e   : > { %12292 = vmatmul.mubr.msk.bf16.gmra.mxu1 %vm562_vm1, %v5099_v16  ;;  %12332 = vmatmul.mubr.msk.bf16.gmra.mxu0 %vm562_vm1, %v5099_v16 }
 0x85f   : > { %12295 = vmatprep.mubr.msk.bf16.mxu1 %vm13795_vm0, %v13794_v1  ;;  %12335 = vmatprep.mubr.msk.bf16.mxu0 %vm13795_vm0, %v13794_v1 }
 0x860   : > { %v5043_v12 = vpop.permute.xlu1 %5042 }
 0x861   : > { %v5087_v33 = vmul.f32 %v13496_v46, %v5043_v12 }
 0x863   : > { %v5100_v43 = vpack.c.bf16 %v5087_v33, %v5086_v24  ;;  %v15309_v33 = vld [vmem:[%s16628_s2] sm:$0xff]  }
 0x864   : > { %v5045_v3 = vpop.permute.xlu0 %5044 }
 0x865   : > { %v5088_v14 = vmul.f32 %v13498_v23, %v5045_v3 }
 0x866   : > { %12296 = vmatmul.mubr.msk.bf16.gmra.mxu1 %vm562_vm1, %v5100_v43  ;;  %12336 = vmatmul.mubr.msk.bf16.gmra.mxu0 %vm562_vm1, %v5100_v43 }
 0x867   : > { %12299 = vmatprep.mubr.msk.bf16.mxu1 %vm13795_vm0, %v13794_v1  ;;  %12339 = vmatprep.mubr.msk.bf16.mxu0 %vm13795_vm0, %v13794_v1 }
 0x868   : > { %v5047_v15 = vpop.permute.xlu1 %5046 }
 0x869   : > { %v5089_v62 = vmul.f32 %v13500_v27, %v5047_v15 }
 0x86b   : > { %v5101_v26 = vpack.c.bf16 %v5089_v62, %v5088_v14 }
 0x86d   : > { %v5049_v21 = vpop.permute.xlu0 %5048 }
 0x86e   : > { %12300 = vmatmul.mubr.msk.bf16.gmra.mxu1 %vm562_vm1, %v5101_v26  ;;  %12340 = vmatmul.mubr.msk.bf16.gmra.mxu0 %vm562_vm1, %v5101_v26  ;;  %v5090_v31 = vmul.f32 %v13502_v41, %v5049_v21 }
 0x86f   : > { %12303 = vmatprep.mubr.msk.bf16.mxu1 %vm13795_vm0, %v13794_v1  ;;  %12343 = vmatprep.mubr.msk.bf16.mxu0 %vm13795_vm0, %v13794_v1 }
 0x871   : > { %v5051_v6 = vpop.permute.xlu1 %5050 }
 0x872   : > { %v5091_v30 = vmul.f32 %v13504_v40, %v5051_v6 }
 0x874   : > { %v5102_v63 = vpack.c.bf16 %v5091_v30, %v5090_v31 }
 0x875   : > { %v5053_v7 = vpop.permute.xlu0 %5052 }
 0x876   : > { %12304 = vmatmul.mubr.msk.bf16.gmra.mxu1 %vm562_vm1, %v5102_v63  ;;  %12344 = vmatmul.mubr.msk.bf16.gmra.mxu0 %vm562_vm1, %v5102_v63  ;;  %v5092_v50 = vmul.f32 %v13506_v60, %v5053_v7 }
 0x877   : > { %12307 = vmatprep.mubr.msk.bf16.mxu1 %vm13795_vm0, %v13794_v1  ;;  %12347 = vmatprep.mubr.msk.bf16.mxu0 %vm13795_vm0, %v13794_v1 }
 0x879   : > { %v5055_v0 = vpop.permute.xlu1 %5054 }
 0x87a   : > { %v5093_v45 = vmul.f32 %v13508_v61, %v5055_v0 }
 0x87c   : > { %v5103_v25 = vpack.c.bf16 %v5093_v45, %v5092_v50  ;;  %v5057_v32 = vpop.permute.xlu0 %5056 }
 0x87d   : > { %v5094_v42 = vmul.f32 %v13510_v5, %v5057_v32 }
 0x87e   : > { %12308 = vmatmul.mubr.msk.bf16.gmra.mxu1 %vm562_vm1, %v5103_v25  ;;  %12348 = vmatmul.mubr.msk.bf16.gmra.mxu0 %vm562_vm1, %v5103_v25 }
 0x87f   : > { %12311 = vmatprep.mubr.msk.bf16.mxu1 %vm13795_vm0, %v13794_v1  ;;  %12351 = vmatprep.mubr.msk.bf16.mxu0 %vm13795_vm0, %v13794_v1 }
 0x880   : > { %v5059_v35 = vpop.permute.xlu1 %5058 }
 0x881   : > { %v5095_v52 = vmul.f32 %v13512_v39, %v5059_v35 }
 0x883   : > { %v5104_v18 = vpack.c.bf16 %v5095_v52, %v5094_v42 }
 0x886   : > { %12312 = vmatmul.mubr.msk.bf16.gmra.mxu1 %vm562_vm1, %v5104_v18  ;;  %12352 = vmatmul.mubr.msk.bf16.gmra.mxu0 %vm562_vm1, %v5104_v18 }
 0x887   : > { %12357 = vmatprep.mubr.msk.bf16.mxu1 %vm13795_vm0, %v13794_v1  ;;  %12363 = vmatprep.mubr.msk.bf16.mxu0 %vm13795_vm0, %v13794_v1 }
 0x904   : > { %v15299_v54 = vpop.f32.mrf.mxu1  ;;  %v5305_v19 = vpop.f32.mrf.mxu0 }
 0x906   : > { %v12281_v44 = vpop.f32.mrf.mxu1  ;;  %v12321_v53 = vpop.f32.mrf.mxu0 }
 0x908   : > { %v15301_v11 = vpop.f32.mrf.mxu1  ;;  %v5308_v57 = vpop.f32.mrf.mxu0 }
 0x909   : > { %v5385_v38 = vpack.c.bf16 %v5308_v57, %v5305_v19 }
 0x90a   : > { %v12282_v16 = vpop.f32.mrf.mxu1  ;;  %v12322_v51 = vpop.f32.mrf.mxu0 }
 0x90b   : > { %12356 = vmatpush3.bf16.msra.mxu1 %v5385_v38 }
 0x90c   : > { %v15303_v9 = vpop.f32.mrf.mxu1  ;;  %v5313_v46 = vpop.f32.mrf.mxu0  ;;  %12367 = vmatprep.subr.bf16.mxu1 %v13794_v1 }
 0x90e   : > { %v12285_v12 = vpop.f32.mrf.mxu1  ;;  %v12325_v24 = vpop.f32.mrf.mxu0  ;;  %12358 = vmatmul.mubr.msk.bf16.vlgmr.msra.gmra.mxu1 %vm1619_vm2, %v15309_v33 }
 0x90f   : > { %12369 = vmatprep.mubr.msk.bf16.mxu1 %vm13795_vm0, %v13794_v1 }
 0x910   : > { %v15315_v43 = vpop.f32.mrf.mxu1  ;;  %v5316_v3 = vpop.f32.mrf.mxu0 }
 0x911   : > { %v5386_v23 = vpack.c.bf16 %v5316_v3, %v5313_v46 }
 0x912   : > { %v12286_v27 = vpop.f32.mrf.mxu1  ;;  %v12326_v15 = vpop.f32.mrf.mxu0 }
 0x913   : > { %12362 = vmatpush3.bf16.msra.mxu0 %v5386_v23 }
 0x914   : > { %12373 = vmatprep.subr.bf16.mxu0 %v13794_v1 }
 0x916   : > { %v15318_v14 = vpop.f32.mrf.mxu1  ;;  %v5321_v62 = vpop.f32.mrf.mxu0  ;;  %12364 = vmatmul.mubr.msk.bf16.vlgmr.msra.gmra.mxu0 %vm1619_vm2, %v15309_v33 }
 0x917   : > { %12375 = vmatprep.mubr.msk.bf16.mxu0 %vm13795_vm0, %v13794_v1 }
 0x918   : > { %v12289_v26 = vpop.f32.mrf.mxu1  ;;  %v12329_v21 = vpop.f32.mrf.mxu0 }
 0x91a   : > { %v15324_v41 = vpop.f32.mrf.mxu1  ;;  %v5324_v40 = vpop.f32.mrf.mxu0 }
 0x91b   : > { %v5387_v6 = vpack.c.bf16 %v5324_v40, %v5321_v62 }
 0x91c   : > { %v12290_v31 = vpop.f32.mrf.mxu1  ;;  %v12330_v30 = vpop.f32.mrf.mxu0 }
 0x91d   : > { %12368 = vmatpush3.bf16.msra.mxu1 %v5387_v6 }
 0x91e   : > { %v15326_v63 = vpop.f32.mrf.mxu1  ;;  %v5329_v7 = vpop.f32.mrf.mxu0  ;;  %12379 = vmatprep.subr.bf16.mxu1 %v13794_v1 }
 0x920   : > { %v12293_v60 = vpop.f32.mrf.mxu1  ;;  %v12333_v61 = vpop.f32.mrf.mxu0  ;;  %12370 = vmatmul.mubr.msk.bf16.vlgmr.msra.gmra.mxu1 %vm1619_vm2, %v15309_v33 }
 0x921   : > { %12381 = vmatprep.mubr.msk.bf16.mxu1 %vm13795_vm0, %v13794_v1 }
 0x922   : > { %v15333_v0 = vpop.f32.mrf.mxu1  ;;  %v5332_v50 = vpop.f32.mrf.mxu0 }
 0x923   : > { %v5388_v45 = vpack.c.bf16 %v5332_v50, %v5329_v7 }
 0x924   : > { %v12294_v25 = vpop.f32.mrf.mxu1  ;;  %v12334_v32 = vpop.f32.mrf.mxu0 }
 0x925   : > { %12374 = vmatpush3.bf16.msra.mxu0 %v5388_v45 }
 0x926   : > { %v15335_v5 = vpop.f32.mrf.mxu1  ;;  %v5337_v39 = vpop.f32.mrf.mxu0  ;;  %12385 = vmatprep.subr.bf16.mxu0 %v13794_v1 }
 0x928   : > { %v12297_v35 = vpop.f32.mrf.mxu1  ;;  %v12337_v42 = vpop.f32.mrf.mxu0  ;;  %12376 = vmatmul.mubr.msk.bf16.vlgmr.msra.gmra.mxu0 %vm1619_vm2, %v15309_v33 }
 0x929   : > { %12387 = vmatprep.mubr.msk.bf16.mxu0 %vm13795_vm0, %v13794_v1 }
 0x92a   : > { %v15342_v52 = vpop.f32.mrf.mxu1  ;;  %v5340_v18 = vpop.f32.mrf.mxu0 }
 0x92b   : > { %v5389_v19 = vpack.c.bf16 %v5340_v18, %v5337_v39 }
 0x92c   : > { %v12298_v44 = vpop.f32.mrf.mxu1  ;;  %v12338_v53 = vpop.f32.mrf.mxu0 }
 0x92d   : > { %12380 = vmatpush3.bf16.msra.mxu1 %v5389_v19  ;;  %v5376_v19 = vpack.c.bf16 %v15301_v11, %v15299_v54  ;;  %v5377_v54 = vpack.c.bf16 %v15315_v43, %v15303_v9  ;;  %v5378_v11 = vpack.c.bf16 %v15324_v41, %v15318_v14  ;;  %v5379_v9 = vpack.c.bf16 %v15333_v0, %v15326_v63  ;;  %v13091_v0 = vld [vmem:[%s16630_s4 + $0x38] sm:$0xff]  }
 0x92e   : > { %v15344_v57 = vpop.f32.mrf.mxu1  ;;  %v5345_v38 = vpop.f32.mrf.mxu0  ;;  %12391 = vmatprep.subr.bf16.mxu1 %v13794_v1 }
 0x930   : > { %v12301_v16 = vpop.f32.mrf.mxu1  ;;  %v12341_v51 = vpop.f32.mrf.mxu0  ;;  %12382 = vmatmul.mubr.msk.bf16.vlgmr.msra.gmra.mxu1 %vm1619_vm2, %v15309_v33 }
 0x931   : > { %12393 = vmatprep.mubr.msk.bf16.mxu1 %vm13795_vm0, %v13794_v1 }
 0x932   : > { %v15351_v46 = vpop.f32.mrf.mxu1  ;;  %v5348_v12 = vpop.f32.mrf.mxu0 }
 0x933   : > { %v5390_v24 = vpack.c.bf16 %v5348_v12, %v5345_v38  ;;  %v5381_v43 = vpack.c.bf16 %v15351_v46, %v15344_v57  ;;  %v13094_v57 = vld [vmem:[%s16632_s6 + $0x30] sm:$0xff]  }
 0x934   : > { %v12302_v3 = vpop.f32.mrf.mxu1  ;;  %v12342_v23 = vpop.f32.mrf.mxu0 }
 0x935   : > { %12386 = vmatpush3.bf16.msra.mxu0 %v5390_v24  ;;  %v13780_v3 = vld [vmem:[%s16627_s1] sm:$0xff]  }
 0x936   : > { %v15353_v27 = vpop.f32.mrf.mxu1  ;;  %v5353_v15 = vpop.f32.mrf.mxu0  ;;  %12397 = vmatprep.subr.bf16.mxu0 %v13794_v1 }
 0x938   : > { %v12305_v62 = vpop.f32.mrf.mxu1  ;;  %v12345_v26 = vpop.f32.mrf.mxu0  ;;  %12388 = vmatmul.mubr.msk.bf16.vlgmr.msra.gmra.mxu0 %vm1619_vm2, %v15309_v33 }
 0x939   : > { %12399 = vmatprep.mubr.msk.bf16.mxu0 %vm13795_vm0, %v13794_v1 }
 0x93a   : > { %v5234_v21 = vpop.f32.mrf.mxu1  ;;  %v5356_v40 = vpop.f32.mrf.mxu0 }
 0x93b   : > { %v5391_v6 = vpack.c.bf16 %v5356_v40, %v5353_v15  ;;  %v5382_v14 = vpack.c.bf16 %v5234_v21, %v15353_v27 }
 0x93c   : > { %v12306_v31 = vpop.f32.mrf.mxu1  ;;  %v12346_v30 = vpop.f32.mrf.mxu0 }
 0x93d   : > { %12392 = vmatpush3.bf16.msra.mxu1 %v5391_v6 }
 0x93e   : > { %v15360_v7 = vpop.f32.mrf.mxu1  ;;  %v5361_v60 = vpop.f32.mrf.mxu0  ;;  %12403 = vmatprep.subr.bf16.mxu1 %v13794_v1 }
 0x940   : > { %v12309_v61 = vpop.f32.mrf.mxu1  ;;  %v12349_v50 = vpop.f32.mrf.mxu0  ;;  %12394 = vmatmul.mubr.msk.bf16.vlgmr.msra.gmra.mxu1 %vm1619_vm2, %v15309_v33 }
 0x941   : > { %12405 = vmatprep.mubr.msk.bf16.mxu1 %vm13795_vm0, %v13794_v1 }
 0x942   : > { %v5242_v45 = vpop.f32.mrf.mxu1  ;;  %v5364_v25 = vpop.f32.mrf.mxu0 }
 0x943   : > { %v5392_v32 = vpack.c.bf16 %v5364_v25, %v5361_v60  ;;  %v5383_v41 = vpack.c.bf16 %v5242_v45, %v15360_v7 }
 0x944   : > { %v12310_v39 = vpop.f32.mrf.mxu1  ;;  %v12350_v35 = vpop.f32.mrf.mxu0 }
 0x945   : > { %12398 = vmatpush3.bf16.msra.mxu0 %v5392_v32 }
 0x946   : > { %v5247_v42 = vpop.f32.mrf.mxu1  ;;  %v5369_v18 = vpop.f32.mrf.mxu0  ;;  %12409 = vmatprep.subr.bf16.mxu0 %v13794_v1 }
 0x948   : > { %v12313_v44 = vpop.f32.mrf.mxu1  ;;  %v12353_v53 = vpop.f32.mrf.mxu0  ;;  %12400 = vmatmul.mubr.msk.bf16.vlgmr.msra.gmra.mxu0 %vm1619_vm2, %v15309_v33 }
 0x949   : > { %12410 = vmatpush3.bf16.msra.mxu0 %v5376_v19  ;;  %12411 = vmatprep.mubr.msk.bf16.mxu0 %vm13795_vm0, %v13794_v1 }
 0x94a   : > { %v5250_v38 = vpop.f32.mrf.mxu1  ;;  %v5372_v16 = vpop.f32.mrf.mxu0  ;;  %12421 = vmatprep.subr.bf16.mxu0 %v13794_v1 }
 0x94b   : > { %v5393_v51 = vpack.c.bf16 %v5372_v16, %v5369_v18  ;;  %v5384_v63 = vpack.c.bf16 %v5250_v38, %v5247_v42 }
 0x94c   : > { %v12314_v12 = vpop.f32.mrf.mxu1  ;;  %v12354_v24 = vpop.f32.mrf.mxu0 }
 0x94d   : > { %12404 = vmatpush3.bf16.msra.mxu1 %v5393_v51 }
 0x94e   : > { %12415 = vmatprep.subr.bf16.mxu1 %v13794_v1 }
 0x950   : > { %12406 = vmatmul.mubr.msk.bf16.vlgmr.msra.gmra.mxu1 %vm1619_vm2, %v15309_v33  ;;  %12412 = vmatmul.mubr.msk.bf16.vlgmr.msra.gmra.mxu0 %vm1619_vm2, %v13780_v3  ;;  %v5380_v33 = vpack.c.bf16 %v15342_v52, %v15335_v5  ;;  %v13092_v5 = vld [vmem:[%s16630_s4 + $0x30] sm:$0xff]   ;;  %v13093_v52 = vld [vmem:[%s16632_s6 + $0x38] sm:$0xff]  }
 0x951   : > { %12422 = vmatpush3.bf16.msra.mxu0 %v5378_v11  ;;  %12416 = vmatpush3.bf16.msra.mxu1 %v5377_v54 }
 0x952   : > { %12417 = vmatprep.mubr.msk.bf16.mxu1 %vm13795_vm0, %v13794_v1  ;;  %12423 = vmatprep.mubr.msk.bf16.mxu0 %vm13795_vm0, %v13794_v1 }
 0x953   : > { %12427 = vmatprep.subr.bf16.mxu1 %v13794_v1  ;;  %12433 = vmatprep.subr.bf16.mxu0 %v13794_v1 }
 0x958   : > { %12418 = vmatmul.mubr.msk.bf16.vlgmr.msra.gmra.mxu1 %vm1619_vm2, %v13780_v3  ;;  %12424 = vmatmul.mubr.msk.bf16.vlgmr.msra.gmra.mxu0 %vm1619_vm2, %v13780_v3 }
 0x959   : > { %12428 = vmatpush3.bf16.msra.mxu1 %v5379_v9  ;;  %12434 = vmatpush3.bf16.msra.mxu0 %v5380_v33 }
 0x95a   : > { %12429 = vmatprep.mubr.msk.bf16.mxu1 %vm13795_vm0, %v13794_v1  ;;  %12435 = vmatprep.mubr.msk.bf16.mxu0 %vm13795_vm0, %v13794_v1 }
 0x95b   : > { %12439 = vmatprep.subr.bf16.mxu1 %v13794_v1  ;;  %12445 = vmatprep.subr.bf16.mxu0 %v13794_v1 }
 0x960   : > { %12430 = vmatmul.mubr.msk.bf16.vlgmr.msra.gmra.mxu1 %vm1619_vm2, %v13780_v3  ;;  %12436 = vmatmul.mubr.msk.bf16.vlgmr.msra.gmra.mxu0 %vm1619_vm2, %v13780_v3 }
 0x961   : > { %12440 = vmatpush3.bf16.msra.mxu1 %v5381_v43  ;;  %12446 = vmatpush3.bf16.msra.mxu0 %v5382_v14  ;;  %v15469_v43 = vld [vmem:[%s16636_s10 + $0x2] ss:$0 sm:$0xff] }
 0x962   : > { %12441 = vmatprep.mubr.msk.bf16.mxu1 %vm13795_vm0, %v13794_v1  ;;  %12447 = vmatprep.mubr.msk.bf16.mxu0 %vm13795_vm0, %v13794_v1 }
 0x963   : > { %12451 = vmatprep.subr.bf16.mxu1 %v13794_v1  ;;  %12457 = vmatprep.subr.bf16.mxu0 %v13794_v1 }
 0x968   : > { %12442 = vmatmul.mubr.msk.bf16.vlgmr.msra.gmra.mxu1 %vm1619_vm2, %v13780_v3  ;;  %12448 = vmatmul.mubr.msk.bf16.vlgmr.msra.gmra.mxu0 %vm1619_vm2, %v13780_v3 }
 0x969   : > { %12452 = vmatpush3.bf16.msra.mxu1 %v5383_v41  ;;  %12458 = vmatpush3.bf16.msra.mxu0 %v5384_v63 }
 0x96a   : > { %12453 = vmatprep.mubr.msk.bf16.mxu1 %vm13795_vm0, %v13794_v1  ;;  %12459 = vmatprep.mubr.msk.bf16.mxu0 %vm13795_vm0, %v13794_v1 }
 0x96b   : > { %12471 = vmatprep.subr.bf16.mxu0 %v13794_v1  ;;  %12463 = vmatprep.subr.bf16.mxu1 %v13794_v1 }
 0x970   : > { %12454 = vmatmul.mubr.msk.bf16.vlgmr.msra.gmra.mxu1 %vm1619_vm2, %v13780_v3  ;;  %12460 = vmatmul.mubr.msk.bf16.vlgmr.msra.gmra.mxu0 %vm1619_vm2, %v13780_v3 }
 0x971   : > { %12475 = vmatprep.mubr.msk.bf16.mxu0 %vm13795_vm0, %v13794_v1  ;;  %12467 = vmatprep.mubr.msk.bf16.mxu1 %vm13795_vm0, %v13794_v1 }
 0x972   : > { %12472 = vmatpush3.bf16.msra.mxu0 %v13091_v0  ;;  %12464 = vmatpush3.bf16.msra.mxu1 %v13093_v52 }
 0x973   : > { %12473 = vmatprep.subr.bf16.mxu0 %v13794_v1  ;;  %12465 = vmatprep.subr.bf16.mxu1 %v13794_v1 }
 0x976   : > { %12474 = vmatpush3.bf16.msra.mxu0 %v13092_v5  ;;  %12466 = vmatpush3.bf16.msra.mxu1 %v13094_v57 }
 0x977   : > { %12535 = vmatprep.subr.bf16.mxu0 %v13794_v1  ;;  %12503 = vmatprep.subr.bf16.mxu1 %v13794_v1 }
 0x9ce   : > { %v5428_v46 = vpop.f32.mrf.mxu1 }
 0x9d0   : > { %v12359_v23 = vpop.f32.mrf.mxu1 }
 0x9d2   : > { %v5431_v27 = vpop.f32.mrf.mxu1 }
 0x9d4   : > { %v12360_v15 = vpop.f32.mrf.mxu1 }
 0x9d6   : > { %v5469_v62 = vpop.f32.mrf.mxu0 }
 0x9d8   : > { %v12365_v26 = vpop.f32.mrf.mxu0 }
 0x9da   : > { %v5472_v21 = vpop.f32.mrf.mxu0 }
 0x9dc   : > { %v12366_v40 = vpop.f32.mrf.mxu0 }
 0x9e0   : > { %v5510_v6 = vpop.f32.mrf.mxu1 }
 0x9e2   : > { %v12371_v31 = vpop.f32.mrf.mxu1 }
 0x9e4   : > { %v5513_v30 = vpop.f32.mrf.mxu1 }
 0x9e6   : > { %v12372_v7 = vpop.f32.mrf.mxu1 }
 0x9e8   : > { %v5551_v60 = vpop.f32.mrf.mxu0 }
 0x9ea   : > { %v12377_v61 = vpop.f32.mrf.mxu0 }
 0x9ec   : > { %v15446_v50 = vpop.f32.mrf.mxu0 }
 0x9ee   : > { %v12378_v45 = vpop.f32.mrf.mxu0 }
 0x9f0   : > { %v15448_v25 = vpop.f32.mrf.mxu1 }
 0x9f2   : > { %v12383_v32 = vpop.f32.mrf.mxu1 }
 0x9f4   : > { %v15450_v39 = vpop.f32.mrf.mxu1 }
 0x9f6   : > { %v12384_v35 = vpop.f32.mrf.mxu1 }
 0x9f8   : > { %v15452_v42 = vpop.f32.mrf.mxu0 }
 0x9fa   : > { %v12389_v18 = vpop.f32.mrf.mxu0 }
 0x9fc   : > { %v15454_v19 = vpop.f32.mrf.mxu0 }
 0x9fe   : > { %v12390_v44 = vpop.f32.mrf.mxu0 }
 0xa00   : > { %v15456_v53 = vpop.f32.mrf.mxu1 }
 0xa02   : > { %v12395_v38 = vpop.f32.mrf.mxu1 }
 0xa04   : > { %v15458_v16 = vpop.f32.mrf.mxu1 }
 0xa06   : > { %v12396_v51 = vpop.f32.mrf.mxu1 }
 0xa08   : > { %v15460_v12 = vpop.f32.mrf.mxu0 }
 0xa0a   : > { %v12401_v24 = vpop.f32.mrf.mxu0 }
 0xa0c   : > { %v15462_v54 = vpop.f32.mrf.mxu0 }
 0xa0e   : > { %v12402_v11 = vpop.f32.mrf.mxu0 }
 0xa10   : > { %v15464_v3 = vpop.f32.mrf.mxu1  ;;  %v5797_v9 = vpop.f32.mrf.mxu0 }
 0xa11   : > { %v5798_v33 = vadd.f32 %v5797_v9, %v5428_v46 }
 0xa12   : > { %v12407_v14 = vpop.f32.mrf.mxu1  ;;  %v12413_v41 = vpop.f32.mrf.mxu0 }
 0xa13   : > { %v6140_v5 = vadd.f32 %v15469_v43, %v5798_v33 }
 0xa14   : > { %v15471_v63 = vpop.f32.mrf.mxu1  ;;  %v5800_v0 = vpop.f32.mrf.mxu0 }
 0xa15   : > { %v5801_v52 = vadd.f32 %v5800_v0, %v5431_v27  ;;  %v15476_v46 = vadd.f32 %v6140_v5, %v14877_v34 }
 0xa16   : > { %v12408_v57 = vpop.f32.mrf.mxu1  ;;  %v12414_v23 = vpop.f32.mrf.mxu0 }
 0xa17   : > { %v6141_v15 = vadd.f32 %v15469_v43, %v5801_v52 }
 0xa18   : > { %v5838_v26 = vpop.f32.mrf.mxu1  ;;  %v5879_v40 = vpop.f32.mrf.mxu0 }
 0xa19   : > { %v15479_v31 = vadd.f32 %v6141_v15, %v14880_v47  ;;  %v5839_v7 = vadd.f32 %v5838_v26, %v5469_v62  ;;  %v5880_v61 = vadd.f32 %v5879_v40, %v5510_v6 }
 0xa1a   : > { %v12419_v45 = vpop.f32.mrf.mxu1  ;;  %v12425_v32 = vpop.f32.mrf.mxu0 }
 0xa1b   : > { %v6176_v35 = vpack.c.bf16 %v15479_v31, %v15476_v46  ;;  %v6142_v27 = vadd.f32 %v15469_v43, %v5839_v7  ;;  %v6144_v38 = vadd.f32 %v15469_v43, %v5880_v61 }
 0xa1c   : > { %v5841_v18 = vpop.f32.mrf.mxu1  ;;  %v5882_v44 = vpop.f32.mrf.mxu0 }
 0xa1d   : > { %v5842_v51 = vadd.f32 %v5841_v18, %v5472_v21  ;;  %v5883_v24 = vadd.f32 %v5882_v44, %v5513_v30  ;;  %v15488_v6 = vadd.f32 %v6142_v27, %v14904_v20  ;;  %v15491_v14 = vadd.f32 %v6144_v38, %v14924_v55 }
 0xa1e   : > { %v12420_v34 = vpop.f32.mrf.mxu1  ;;  %v12426_v11 = vpop.f32.mrf.mxu0 }
 0xa1f   : > { %v6143_v47 = vadd.f32 %v15469_v43, %v5842_v51  ;;  %v6145_v62 = vadd.f32 %v15469_v43, %v5883_v24 }
 0xa20   : > { %v5920_v9 = vpop.f32.mrf.mxu1  ;;  %v5961_v33 = vpop.f32.mrf.mxu0 }
 0xa21   : > { %v15494_v41 = vadd.f32 %v6143_v47, %v14907_v36  ;;  %v15497_v21 = vadd.f32 %v6145_v62, %v14920_v56  ;;  %v5921_v30 = vadd.f32 %v5920_v9, %v5551_v60  ;;  %v5962_v45 = vadd.f32 %v5961_v33, %v15448_v25 }
 0xa22   : > { %v12431_v0 = vpop.f32.mrf.mxu1  ;;  %v12437_v5 = vpop.f32.mrf.mxu0 }
 0xa23   : > { %v6177_v52 = vpack.c.bf16 %v15494_v41, %v15488_v6  ;;  %v15503_v20 = vpack.c.bf16 %v15497_v21, %v15491_v14  ;;  %v6146_v55 = vadd.f32 %v15469_v43, %v5921_v30  ;;  %v6148_v51 = vadd.f32 %v15469_v43, %v5962_v45 }
 0xa24   : > { %v5923_v57 = vpop.f32.mrf.mxu1  ;;  %v5964_v23 = vpop.f32.mrf.mxu0 }
 0xa25   : > { %v5924_v36 = vadd.f32 %v5923_v57, %v15446_v50  ;;  %12476 = vmatmul.mubr.msk.bf16.vlgmr.msra.gmra.mxu0 %vm562_vm1, %v15503_v20  ;;  %v5965_v26 = vadd.f32 %v5964_v23, %v15450_v39  ;;  %v15514_v61 = vadd.f32 %v6146_v55, %v14944_v22  ;;  %v15535_v47 = vadd.f32 %v6148_v51, %v14973_v4  ;;  %v10886_v51 = vld [vmem:[%s16633_s7 + $0x3] ss:$0 sm:$0xff] }
 0xa26   : > { %v12432_v56 = vpop.f32.mrf.mxu1  ;;  %v12438_v60 = vpop.f32.mrf.mxu0  ;;  %12479 = vmatprep.mubr.msk.bf16.mxu0 %vm13795_vm0, %v13794_v1 }
 0xa27   : > { %v6147_v15 = vadd.f32 %v15469_v43, %v5924_v36  ;;  %v6149_v44 = vadd.f32 %v15469_v43, %v5965_v26 }
 0xa28   : > { %v6002_v40 = vpop.f32.mrf.mxu1  ;;  %v6043_v7 = vpop.f32.mrf.mxu0 }
 0xa29   : > { %v15518_v50 = vadd.f32 %v6147_v15, %v14939_v48  ;;  %v15531_v48 = vadd.f32 %v6149_v44, %v14960_v10  ;;  %v6003_v62 = vadd.f32 %v6002_v40, %v15452_v42  ;;  %v6044_v15 = vadd.f32 %v6043_v7, %v15456_v53 }
 0xa2a   : > { %v12443_v32 = vpop.f32.mrf.mxu1  ;;  %v12449_v27 = vpop.f32.mrf.mxu0 }
 0xa2b   : > { %v15522_v18 = vpack.c.bf16 %v15518_v50, %v15514_v61  ;;  %v6180_v0 = vpack.c.bf16 %v15531_v48, %v15535_v47  ;;  %v6152_v53 = vadd.f32 %v15469_v43, %v6044_v15 }
 0xa2c   : > { %v6005_v38 = vpop.f32.mrf.mxu1  ;;  %v6046_v39 = vpop.f32.mrf.mxu0 }
 0xa2d   : > { %12480 = vmatmul.mubr.msk.bf16.gmra.mxu0 %vm562_vm1, %v15522_v18  ;;  %v6006_v24 = vadd.f32 %v6005_v38, %v15454_v19  ;;  %v6150_v19 = vadd.f32 %v15469_v43, %v6003_v62  ;;  %v6047_v36 = vadd.f32 %v6046_v39, %v15458_v16  ;;  %v15587_v45 = vadd.f32 %v6152_v53, %v15019_v29 }
 0xa2e   : > { %v12444_v22 = vpop.f32.mrf.mxu1  ;;  %v12450_v25 = vpop.f32.mrf.mxu0  ;;  %12483 = vmatprep.mubr.msk.bf16.mxu0 %vm13795_vm0, %v13794_v1 }
 0xa2f   : > { %v6151_v5 = vadd.f32 %v15469_v43, %v6006_v24  ;;  %v15554_v60 = vadd.f32 %v6150_v19, %v14998_v49  ;;  %v6153_v40 = vadd.f32 %v15469_v43, %v6047_v36 }
 0xa30   : > { %v6084_v34 = vpop.f32.mrf.mxu1  ;;  %v6125_v11 = vpop.f32.mrf.mxu0 }
 0xa31   : > { %v6126_v9 = vadd.f32 %v6125_v11, %v15464_v3  ;;  %v15549_v55 = vadd.f32 %v6151_v5, %v14994_v37  ;;  %v13095_v37 = vld [vmem:[%s16629_s3 + $0x38] sm:$0xff]   ;;  %v6085_v32 = vadd.f32 %v6084_v34, %v15460_v12 }
 0xa32   : > { %v12455_v33 = vpop.f32.mrf.mxu1  ;;  %v12461_v30 = vpop.f32.mrf.mxu0 }
 0xa33   : > { %v6156_v23 = vadd.f32 %v15469_v43, %v6126_v9  ;;  %v6181_v16 = vpack.c.bf16 %v15549_v55, %v15554_v60 }
 0xa34   : > { %v6087_v10 = vpop.f32.mrf.mxu1  ;;  %v6128_v57 = vpop.f32.mrf.mxu0 }
 0xa35   : > { %v6129_v4 = vadd.f32 %v6128_v57, %v15471_v63  ;;  %12484 = vmatmul.mubr.msk.bf16.gmra.mxu0 %vm562_vm1, %v6180_v0  ;;  %v15558_v63 = vadd.f32 %v6156_v23, %v14964_v59  ;;  %v13096_v59 = vld [vmem:[%s16629_s3 + $0x30] sm:$0xff]   ;;  %v6088_v7 = vadd.f32 %v6087_v10, %v15462_v54  ;;  %v15663_v23 = vld [vmem:[%s16631_s5 + $0x3] ss:$0 sm:$0xff] }
 0xa36   : > { %v12462_v42 = vpop.f32.mrf.mxu0  ;;  %12487 = vmatprep.mubr.msk.bf16.mxu0 %vm13795_vm0, %v13794_v1  ;;  %v12456_v3 = vpop.f32.mrf.mxu1 }
 0xa37   : > { %v6157_v56 = vadd.f32 %v15469_v43, %v6129_v4  ;;  %v6155_v44 = vadd.f32 %v15469_v43, %v6088_v7 }
 0xa39   : > { %v15561_v26 = vadd.f32 %v6157_v56, %v14967_v58  ;;  %v15580_v58 = vadd.f32 %v6153_v40, %v15015_v17  ;;  %v6154_v17 = vadd.f32 %v15469_v43, %v6085_v32  ;;  %v15605_v29 = vadd.f32 %v6155_v44, %v15034_v13  ;;  %v13097_v13 = vld [vmem:[%s16635_s9 + $0x38] sm:$0xff]  }
 0xa3b   : > { %v6184_v49 = vpack.c.bf16 %v15561_v26, %v15558_v63  ;;  %v6182_v27 = vpack.c.bf16 %v15580_v58, %v15587_v45  ;;  %v15608_v12 = vadd.f32 %v6154_v17, %v15037_v28 }
 0xa3d   : > { %12468 = vmatmul.mubr.msk.bf16.vlgmr.msra.gmra.mxu1 %vm562_vm1, %v6184_v49  ;;  %12488 = vmatmul.mubr.msk.bf16.gmra.mxu0 %vm562_vm1, %v6181_v16  ;;  %v6183_v54 = vpack.c.bf16 %v15605_v29, %v15608_v12 }
 0xa3e   : > { %12504 = vmatpush3.bf16.msra.mxu1 %v13095_v37  ;;  %12491 = vmatprep.mubr.msk.bf16.mxu0 %vm13795_vm0, %v13794_v1 }
 0xa3f   : > { %12505 = vmatprep.subr.bf16.mxu1 %v13794_v1  ;;  %12507 = vmatprep.mubr.msk.bf16.mxu1 %vm13795_vm0, %v13794_v1 }
 0xa42   : > { %12506 = vmatpush3.bf16.msra.mxu1 %v13096_v59 }
 0xa43   : > { %12567 = vmatprep.subr.bf16.mxu1 %v13794_v1 }
 0xa45   : > { %12492 = vmatmul.mubr.msk.bf16.gmra.mxu0 %vm562_vm1, %v6182_v27  ;;  %12508 = vmatmul.mubr.msk.bf16.vlgmr.msra.gmra.mxu1 %vm562_vm1, %v6176_v35 }
 0xa46   : > { %12495 = vmatprep.mubr.msk.bf16.mxu0 %vm13795_vm0, %v13794_v1  ;;  %12511 = vmatprep.mubr.msk.bf16.mxu1 %vm13795_vm0, %v13794_v1 }
 0xa47   : > { %12568 = vmatpush3.bf16.msra.mxu1 %v13097_v13 }
 0xa48   : > { %12569 = vmatprep.subr.bf16.mxu1 %v13794_v1 }
 0xa4d   : > { %12496 = vmatmul.mubr.msk.bf16.gmra.mxu0 %vm562_vm1, %v6183_v54  ;;  %12512 = vmatmul.mubr.msk.bf16.gmra.mxu1 %vm562_vm1, %v6177_v52 }
 0xa4e   : > { %12499 = vmatprep.mubr.msk.bf16.mxu0 %vm13795_vm0, %v13794_v1  ;;  %12515 = vmatprep.mubr.msk.bf16.mxu1 %vm13795_vm0, %v13794_v1 }
 0xa55   : > { %12500 = vmatmul.mubr.msk.bf16.gmra.mxu0 %vm562_vm1, %v6184_v49  ;;  %12516 = vmatmul.mubr.msk.bf16.gmra.mxu1 %vm562_vm1, %v15503_v20 }
 0xa56   : > { %12519 = vmatprep.mubr.msk.bf16.mxu1 %vm13795_vm0, %v13794_v1  ;;  %12539 = vmatprep.mubr.msk.bf16.mxu0 %vm13795_vm0, %v13794_v1 }
 0xa5d   : > { %12520 = vmatmul.mubr.msk.bf16.gmra.mxu1 %vm562_vm1, %v15522_v18 }
 0xa5e   : > { %12523 = vmatprep.mubr.msk.bf16.mxu1 %vm13795_vm0, %v13794_v1 }
 0xa65   : > { %12524 = vmatmul.mubr.msk.bf16.gmra.mxu1 %vm562_vm1, %v6180_v0 }
 0xa66   : > { %12527 = vmatprep.mubr.msk.bf16.mxu1 %vm13795_vm0, %v13794_v1 }
 0xa6d   : > { %12528 = vmatmul.mubr.msk.bf16.gmra.mxu1 %vm562_vm1, %v6181_v16 }
 0xa6e   : > { %12531 = vmatprep.mubr.msk.bf16.mxu1 %vm13795_vm0, %v13794_v1 }
 0xa75   : > { %12532 = vmatmul.mubr.msk.bf16.gmra.mxu1 %vm562_vm1, %v6182_v27 }
 0xa76   : > { %12571 = vmatprep.mubr.msk.bf16.mxu1 %vm13795_vm0, %v13794_v1 }
 0xae5   : > { %v6330_v28 = vpop.f32.mrf.mxu0 }
 0xae7   : > { %v12477_v43 = vpop.f32.mrf.mxu0 }
 0xae9   : > { %v6333_v46 = vpop.f32.mrf.mxu0 }
 0xaeb   : > { %v12478_v31 = vpop.f32.mrf.mxu0 }
 0xaed   : > { %v6338_v35 = vpop.f32.mrf.mxu0 }
 0xaef   : > { %v12481_v6 = vpop.f32.mrf.mxu0 }
 0xaf1   : > { %v6341_v41 = vpop.f32.mrf.mxu0 }
 0xaf3   : > { %v12482_v52 = vpop.f32.mrf.mxu0 }
 0xaf5   : > { %v6346_v20 = vpop.f32.mrf.mxu0 }
 0xaf7   : > { %v12485_v18 = vpop.f32.mrf.mxu0 }
 0xaf9   : > { %v6349_v38 = vpop.f32.mrf.mxu0 }
 0xafb   : > { %v12486_v39 = vpop.f32.mrf.mxu0 }
 0xafd   : > { %v6247_v22 = vpop.f32.mrf.mxu1  ;;  %v15648_v25 = vpop.f32.mrf.mxu0 }
 0xafe   : > { %v6248_v24 = vadd.f32 %v10886_v51, %v6247_v22 }
 0xaff   : > { %v12469_v34 = vpop.f32.mrf.mxu1  ;;  %v12489_v11 = vpop.f32.mrf.mxu0 }
 0xb00   : > { %v15651_v62 = vadd.f32 %v6248_v24, %v15085_v2 }
 0xb01   : > { %v6250_v9 = vpop.f32.mrf.mxu1  ;;  %v15653_v33 = vpop.f32.mrf.mxu0 }
 0xb02   : > { %v6251_v30 = vadd.f32 %v10886_v51, %v6250_v9 }
 0xb03   : > { %v12470_v0 = vpop.f32.mrf.mxu1  ;;  %v12490_v5 = vpop.f32.mrf.mxu0 }
 0xb04   : > { %v15656_v10 = vadd.f32 %v6251_v30, %v15090_v8 }
 0xb05   : > { %v15658_v57 = vpop.f32.mrf.mxu0  ;;  %v6437_v19 = vpop.f32.mrf.mxu1 }
 0xb06   : > { %v6438_v4 = vadd.f32 %v6437_v19, %v6330_v28 }
 0xb07   : > { %v12493_v2 = vpop.f32.mrf.mxu0  ;;  %v12509_v42 = vpop.f32.mrf.mxu1 }
 0xb08   : > { %v15666_v3 = vadd.f32 %v15663_v23, %v6438_v4  ;;  %v13098_v2 = vld [vmem:[%s16634_s8 + $0x38] sm:$0xff]  }
 0xb09   : > { %v15668_v36 = vpop.f32.mrf.mxu0  ;;  %v6440_v56 = vpop.f32.mrf.mxu1  ;;  %12536 = vmatpush3.bf16.msra.mxu0 %v13098_v2 }
 0xb0a   : > { %v10918_v8 = vmul.f32 -1.442695, %v15666_v3  ;;  %v6441_v15 = vadd.f32 %v6440_v56, %v6333_v46  ;;  %12537 = vmatprep.subr.bf16.mxu0 %v13794_v1 }
 0xb0b   : > { %v12494_v37 = vpop.f32.mrf.mxu0  ;;  %v12510_v16 = vpop.f32.mrf.mxu1 }
 0xb0c   : > { %13513 = vpow2.f32 %v10918_v8  ;;  %v15672_v40 = vadd.f32 %v15663_v23, %v6441_v15 }
 0xb0d   : > { %v15674_v49 = vpop.f32.mrf.mxu0  ;;  %v6445_v53 = vpop.f32.mrf.mxu1 }
 0xb0e   : > { %v10919_v59 = vmul.f32 -1.442695, %v15672_v40  ;;  %v6446_v7 = vadd.f32 %v6445_v53, %v6338_v35  ;;  %v13099_v53 = vld [vmem:[%s16634_s8 + $0x30] sm:$0xff]  }
 0xb0f   : > { %v12497_v32 = vpop.f32.mrf.mxu0  ;;  %v12513_v27 = vpop.f32.mrf.mxu1  ;;  %12538 = vmatpush3.bf16.msra.mxu0 %v13099_v53 }
 0xb10   : > { %13515 = vpow2.f32 %v10919_v59  ;;  %v15678_v44 = vadd.f32 %v15663_v23, %v6446_v7  ;;  %v13100_v59 = vld [vmem:[%s16635_s9 + $0x30] sm:$0xff]   ;;  %12599 = vmatprep.subr.bf16.mxu0 %v13794_v1 }
 0xb11   : > { %v15680_v17 = vpop.f32.mrf.mxu0  ;;  %v6448_v54 = vpop.f32.mrf.mxu1  ;;  %12570 = vmatpush3.bf16.msra.mxu1 %v13100_v59 }
 0xb12   : > { %v10920_v13 = vmul.f32 -1.442695, %v15678_v44  ;;  %v6449_v28 = vadd.f32 %v6448_v54, %v6341_v41  ;;  %12605 = vmatprep.subr.bf16.mxu1 %v13794_v1 }
 0xb13   : > { %v12498_v43 = vpop.f32.mrf.mxu0  ;;  %v12514_v46 = vpop.f32.mrf.mxu1 }
 0xb14   : > { %13517 = vpow2.f32 %v10920_v13  ;;  %v15684_v31 = vadd.f32 %v15663_v23, %v6449_v28 }
 0xb15   : > { %v15686_v6 = vpop.f32.mrf.mxu0  ;;  %v6453_v35 = vpop.f32.mrf.mxu1 }
 0xb16   : > { %v10921_v52 = vmul.f32 -1.442695, %v15684_v31  ;;  %v6454_v18 = vadd.f32 %v6453_v35, %v6346_v20 }
 0xb17   : > { %v12501_v39 = vpop.f32.mrf.mxu0  ;;  %v12517_v51 = vpop.f32.mrf.mxu1 }
 0xb18   : > { %13519 = vpow2.f32 %v10921_v52  ;;  %v15690_v22 = vadd.f32 %v15663_v23, %v6454_v18 }
 0xb19   : > { %v13514_v24 = vpop.eup %13513  ;;  %v15692_v41 = vpop.f32.mrf.mxu0 }
 0xb1a   : > { %v6456_v34 = vpop.f32.mrf.mxu1  ;;  %v6570_v11 = vadd.f32 1.0, %v13514_v24  ;;  %v10922_v9 = vmul.f32 -1.442695, %v15690_v22 }
 0xb1b   : > { %v6457_v30 = vadd.f32 %v6456_v34, %v6349_v38  ;;  %v12502_v0 = vpop.f32.mrf.mxu0 }
 0xb1c   : > { %v12518_v5 = vpop.f32.mrf.mxu1  ;;  %13521 = vrcp.f32 %v6570_v11 }
 0xb1d   : > { %v15696_v19 = vadd.f32 %v15663_v23, %v6457_v30  ;;  %v13516_v20 = vpop.eup %13515  ;;  %13523 = vpow2.f32 %v10922_v9 }
 0xb1e   : > { %v6461_v4 = vpop.f32.mrf.mxu1  ;;  %v6571_v42 = vadd.f32 1.0, %v13516_v20 }
 0xb1f   : > { %v10923_v56 = vmul.f32 -1.442695, %v15696_v19  ;;  %v6462_v8 = vadd.f32 %v6461_v4, %v15648_v25 }
 0xb20   : > { %v12521_v15 = vpop.f32.mrf.mxu1  ;;  %13525 = vrcp.f32 %v6571_v42 }
 0xb21   : > { %v15704_v38 = vadd.f32 %v15663_v23, %v6462_v8  ;;  %v13518_v37 = vpop.eup %13517  ;;  %13527 = vpow2.f32 %v10923_v56 }
 0xb22   : > { %v6464_v16 = vpop.f32.mrf.mxu1  ;;  %v6572_v25 = vadd.f32 1.0, %v13518_v37 }
 0xb23   : > { %v10924_v7 = vmul.f32 -1.442695, %v15704_v38  ;;  %v6465_v32 = vadd.f32 %v6464_v16, %v15653_v33 }
 0xb24   : > { %v12522_v27 = vpop.f32.mrf.mxu1  ;;  %13529 = vrcp.f32 %v6572_v25 }
 0xb25   : > { %v15716_v54 = vadd.f32 %v15663_v23, %v6465_v32  ;;  %v13520_v13 = vpop.eup %13519  ;;  %13531 = vpow2.f32 %v10924_v7 }
 0xb26   : > { %v6469_v28 = vpop.f32.mrf.mxu1  ;;  %v6573_v43 = vadd.f32 1.0, %v13520_v13 }
 0xb27   : > { %v10925_v46 = vmul.f32 -1.442695, %v15716_v54  ;;  %v6470_v35 = vadd.f32 %v6469_v28, %v15658_v57 }
 0xb28   : > { %v12525_v33 = vpop.f32.mrf.mxu1  ;;  %13533 = vrcp.f32 %v6573_v43 }
 0xb29   : > { %v15723_v52 = vadd.f32 %v15663_v23, %v6470_v35  ;;  %v13522_v18 = vpop.eup %13521  ;;  %13535 = vpow2.f32 %v10925_v46 }
 0xb2a   : > { %v6472_v39 = vpop.f32.mrf.mxu1  ;;  %v13524_v51 = vpop.eup %13523  ;;  %6626 = vrot.lane.b32.xlu0 %v13522_v18, %s13796_s21 }
 0xb2b   : > { %v10926_v24 = vmul.f32 -1.442695, %v15723_v52  ;;  %v6473_v34 = vadd.f32 %v6472_v39, %v15668_v36  ;;  %v6574_v11 = vadd.f32 1.0, %v13524_v51 }
 0xb2c   : > { %v12526_v9 = vpop.f32.mrf.mxu1 }
 0xb2d   : > { %13537 = vpow2.f32 %v10926_v24  ;;  %v15729_v57 = vadd.f32 %v15663_v23, %v6473_v34  ;;  %v13526_v30 = vpop.eup %13525 }
 0xb2e   : > { %13539 = vrcp.f32 %v6574_v11  ;;  %v6477_v0 = vpop.f32.mrf.mxu1  ;;  %v13528_v5 = vpop.eup %13527  ;;  %6628 = vrot.lane.b32.xlu1 %v13526_v30, %s13796_s21 }
 0xb2f   : > { %v10927_v20 = vmul.f32 -1.442695, %v15729_v57  ;;  %v6478_v4 = vadd.f32 %v6477_v0, %v15674_v49  ;;  %v6575_v2 = vadd.f32 1.0, %v13528_v5 }
 0xb30   : > { %v12529_v36 = vpop.f32.mrf.mxu1 }
 0xb31   : > { %13541 = vpow2.f32 %v10927_v20  ;;  %v15735_v42 = vadd.f32 %v15663_v23, %v6478_v4  ;;  %v13530_v56 = vpop.eup %13529 }
 0xb32   : > { %13543 = vrcp.f32 %v6575_v2  ;;  %v6480_v8 = vpop.f32.mrf.mxu1  ;;  %v13532_v15 = vpop.eup %13531  ;;  %6630 = vrot.lane.b32.xlu0 %v13530_v56, %s13796_s21 }
 0xb33   : > { %v10928_v37 = vmul.f32 -1.442695, %v15735_v42  ;;  %v6481_v16 = vadd.f32 %v6480_v8, %v15680_v17  ;;  %v6576_v53 = vadd.f32 1.0, %v13532_v15 }
 0xb34   : > { %v12530_v49 = vpop.f32.mrf.mxu1 }
 0xb35   : > { %13545 = vpow2.f32 %v10928_v37  ;;  %v15741_v59 = vadd.f32 %v15663_v23, %v6481_v16  ;;  %v13534_v25 = vpop.eup %13533 }
 0xb36   : > { %13547 = vrcp.f32 %v6576_v53  ;;  %v6485_v7 = vpop.f32.mrf.mxu1  ;;  %v13536_v32 = vpop.eup %13535  ;;  %6632 = vrot.lane.b32.xlu1 %v13534_v25, %s13796_s21 }
 0xb37   : > { %v10929_v27 = vmul.f32 -1.442695, %v15741_v59  ;;  %v6486_v13 = vadd.f32 %v6485_v7, %v15686_v6  ;;  %v6577_v28 = vadd.f32 1.0, %v13536_v32 }
 0xb38   : > { %v12533_v17 = vpop.f32.mrf.mxu1 }
 0xb39   : > { %13549 = vpow2.f32 %v10929_v27  ;;  %v15747_v43 = vadd.f32 %v15663_v23, %v6486_v13 }
 0xb3a   : > { %v13538_v46 = vpop.eup %13537  ;;  %13551 = vrcp.f32 %v6577_v28  ;;  %v6488_v35 = vpop.f32.mrf.mxu1 }
 0xb3b   : > { %v13540_v33 = vpop.eup %13539  ;;  %v6578_v18 = vadd.f32 1.0, %v13538_v46  ;;  %v10930_v39 = vmul.f32 -1.442695, %v15747_v43  ;;  %v6489_v51 = vadd.f32 %v6488_v35, %v15692_v41 }
 0xb3c   : > { %6634 = vrot.lane.b32.xlu0 %v13540_v33, %s13796_s21  ;;  %v12534_v6 = vpop.f32.mrf.mxu1 }
 0xb3d   : > { %13553 = vrcp.f32 %v6578_v18  ;;  %v15753_v24 = vadd.f32 %v15663_v23, %v6489_v51 }
 0xb3e   : > { %v13542_v34 = vpop.eup %13541  ;;  %13555 = vpow2.f32 %v10930_v39 }
 0xb3f   : > { %v13544_v11 = vpop.eup %13543  ;;  %v6579_v9 = vadd.f32 1.0, %v13542_v34  ;;  %v10931_v30 = vmul.f32 -1.442695, %v15753_v24 }
 0xb40   : > { %6636 = vrot.lane.b32.xlu1 %v13544_v11, %s13796_s21 }
 0xb41   : > { %13557 = vrcp.f32 %v6579_v9 }
 0xb42   : > { %v13546_v0 = vpop.eup %13545  ;;  %13559 = vpow2.f32 %v10931_v30 }
 0xb43   : > { %v13548_v5 = vpop.eup %13547  ;;  %v6580_v41 = vadd.f32 1.0, %v13546_v0 }
 0xb44   : > { %6638 = vrot.lane.b32.xlu0 %v13548_v5, %s13796_s21 }
 0xb45   : > { %13561 = vrcp.f32 %v6580_v41 }
 0xb46   : > { %v13550_v20 = vpop.eup %13549 }
 0xb47   : > { %v13552_v4 = vpop.eup %13551  ;;  %v6581_v23 = vadd.f32 1.0, %v13550_v20 }
 0xb48   : > { %6640 = vrot.lane.b32.xlu1 %v13552_v4, %s13796_s21 }
 0xb49   : > { %13563 = vrcp.f32 %v6581_v23 }
 0xb4a   : > { %v13554_v2 = vpop.eup %13553 }
 0xb4b   : > { %v13556_v36 = vpop.eup %13555  ;;  %6642 = vrot.lane.b32.xlu0 %v13554_v2, %s13796_s21 }
 0xb4c   : > { %v6582_v56 = vadd.f32 1.0, %v13556_v36 }
 0xb4e   : > { %v13558_v8 = vpop.eup %13557  ;;  %13565 = vrcp.f32 %v6582_v56 }
 0xb4f   : > { %v13560_v15 = vpop.eup %13559  ;;  %6644 = vrot.lane.b32.xlu1 %v13558_v8, %s13796_s21 }
 0xb50   : > { %v6583_v37 = vadd.f32 1.0, %v13560_v15 }
 0xb52   : > { %v13562_v16 = vpop.eup %13561  ;;  %13567 = vrcp.f32 %v6583_v37 }
 0xb53   : > { %6646 = vrot.lane.b32.xlu0 %v13562_v16, %s13796_s21  ;;  %13569 = vtanh.f32 %v15666_v3 }
 0xb54   : > { %13571 = vtanh.f32 %v15672_v40 }
 0xb55   : > { %13573 = vtanh.f32 %v15678_v44 }
 0xb56   : > { %v13564_v53 = vpop.eup %13563  ;;  %13575 = vtanh.f32 %v15684_v31 }
 0xb57   : > { %6648 = vrot.lane.b32.xlu1 %v13564_v53, %s13796_s21  ;;  %13577 = vtanh.f32 %v15690_v22 }
 0xb58   : > { %13579 = vtanh.f32 %v15696_v19 }
 0xb59   : > { %13581 = vtanh.f32 %v15704_v38 }
 0xb5a   : > { %13583 = vtanh.f32 %v15716_v54 }
 0xb5b   : > { %v13566_v49 = vpop.eup %13565  ;;  %13585 = vtanh.f32 %v15723_v52 }
 0xb5c   : > { %6650 = vrot.lane.b32.xlu0 %v13566_v49, %s13796_s21  ;;  %13587 = vtanh.f32 %v15729_v57 }
 0xb5d   : > { %13589 = vtanh.f32 %v15735_v42 }
 0xb5e   : > { %13591 = vtanh.f32 %v15741_v59 }
 0xb5f   : > { %v13568_v25 = vpop.eup %13567  ;;  %13593 = vtanh.f32 %v15747_v43 }
 0xb60   : > { %6652 = vrot.lane.b32.xlu1 %v13568_v25, %s13796_s21  ;;  %v13570_v32 = vpop.eup %13569  ;;  %13595 = vtanh.f32 %v15753_v24 }
 0xb61   : > { %v13572_v27 = vpop.eup %13571 }
 0xb62   : > { %v13574_v40 = vpop.eup %13573 }
 0xb63   : > { %v13576_v44 = vpop.eup %13575 }
 0xb64   : > { %v13578_v18 = vpop.eup %13577 }
 0xb65   : > { %v13580_v39 = vpop.eup %13579 }
 0xb66   : > { %v13582_v11 = vpop.eup %13581 }
 0xb67   : > { %v13584_v9 = vpop.eup %13583 }
 0xb68   : > { %v13586_v41 = vpop.eup %13585 }
 0xb69   : > { %v13588_v20 = vpop.eup %13587 }
 0xb6a   : > { %v13590_v36 = vpop.eup %13589 }
 0xb6b   : > { %v13592_v56 = vpop.eup %13591 }
 0xb6c   : > { %v13594_v16 = vpop.eup %13593 }
 0xb6d   : > { %v13596_v53 = vpop.eup %13595 }
 0xb9c   : > { %v6627_v7 = vpop.permute.xlu0 %6626 }
 0xb9d   : > { %v6668_v28 = vmul.f32 %v13570_v32, %v6627_v7 }
 0xba0   : > { %v6629_v13 = vpop.permute.xlu1 %6628 }
 0xba1   : > { %v6669_v17 = vmul.f32 %v13572_v27, %v6629_v13 }
 0xba3   : > { %v6682_v46 = vpack.c.bf16 %v6669_v17, %v6668_v28 }
 0xba4   : > { %v6631_v3 = vpop.permute.xlu0 %6630 }
 0xba5   : > { %12540 = vmatmul.mubr.msk.bf16.vlgmr.msra.gmra.mxu0 %vm562_vm1, %v6682_v46  ;;  %12572 = vmatmul.mubr.msk.bf16.vlgmr.msra.gmra.mxu1 %vm562_vm1, %v6682_v46  ;;  %v6670_v35 = vmul.f32 %v13574_v40, %v6631_v3 }
 0xba6   : > { %12543 = vmatprep.mubr.msk.bf16.mxu0 %vm13795_vm0, %v13794_v1  ;;  %12575 = vmatprep.mubr.msk.bf16.mxu1 %vm13795_vm0, %v13794_v1 }
 0xba8   : > { %v6633_v31 = vpop.permute.xlu1 %6632 }
 0xba9   : > { %v6671_v33 = vmul.f32 %v13576_v44, %v6633_v31 }
 0xbab   : > { %v6683_v22 = vpack.c.bf16 %v6671_v33, %v6670_v35 }
 0xbad   : > { %12544 = vmatmul.mubr.msk.bf16.gmra.mxu0 %vm562_vm1, %v6683_v22  ;;  %12576 = vmatmul.mubr.msk.bf16.gmra.mxu1 %vm562_vm1, %v6683_v22 }
 0xbae   : > { %12547 = vmatprep.mubr.msk.bf16.mxu0 %vm13795_vm0, %v13794_v1  ;;  %12579 = vmatprep.mubr.msk.bf16.mxu1 %vm13795_vm0, %v13794_v1  ;;  %v6635_v19 = vpop.permute.xlu0 %6634 }
 0xbaf   : > { %v6672_v38 = vmul.f32 %v13578_v18, %v6635_v19  ;;  %v15831_v18 = vld [vmem:[%s16628_s2] sm:$0xff]  }
 0xbb2   : > { %v6637_v51 = vpop.permute.xlu1 %6636 }
 0xbb3   : > { %v6673_v6 = vmul.f32 %v13580_v39, %v6637_v51 }
 0xbb5   : > { %v6684_v54 = vpack.c.bf16 %v6673_v6, %v6672_v38 }
 0xbb6   : > { %v6639_v34 = vpop.permute.xlu0 %6638 }
 0xbb7   : > { %12548 = vmatmul.mubr.msk.bf16.gmra.mxu0 %vm562_vm1, %v6684_v54  ;;  %12580 = vmatmul.mubr.msk.bf16.gmra.mxu1 %vm562_vm1, %v6684_v54  ;;  %v6674_v52 = vmul.f32 %v13582_v11, %v6639_v34 }
 0xbb8   : > { %12551 = vmatprep.mubr.msk.bf16.mxu0 %vm13795_vm0, %v13794_v1  ;;  %12583 = vmatprep.mubr.msk.bf16.mxu1 %vm13795_vm0, %v13794_v1 }
 0xbba   : > { %v6641_v30 = vpop.permute.xlu1 %6640 }
 0xbbb   : > { %v6675_v0 = vmul.f32 %v13584_v9, %v6641_v30 }
 0xbbd   : > { %v6685_v57 = vpack.c.bf16 %v6675_v0, %v6674_v52  ;;  %v6643_v5 = vpop.permute.xlu0 %6642 }
 0xbbe   : > { %v6676_v42 = vmul.f32 %v13586_v41, %v6643_v5 }
 0xbbf   : > { %12552 = vmatmul.mubr.msk.bf16.gmra.mxu0 %vm562_vm1, %v6685_v57  ;;  %12584 = vmatmul.mubr.msk.bf16.gmra.mxu1 %vm562_vm1, %v6685_v57 }
 0xbc0   : > { %12555 = vmatprep.mubr.msk.bf16.mxu0 %vm13795_vm0, %v13794_v1  ;;  %12587 = vmatprep.mubr.msk.bf16.mxu1 %vm13795_vm0, %v13794_v1 }
 0xbc1   : > { %v6645_v4 = vpop.permute.xlu1 %6644 }
 0xbc2   : > { %v6677_v23 = vmul.f32 %v13588_v20, %v6645_v4 }
 0xbc4   : > { %v6686_v59 = vpack.c.bf16 %v6677_v23, %v6676_v42 }
 0xbc5   : > { %v6647_v2 = vpop.permute.xlu0 %6646 }
 0xbc6   : > { %v6678_v15 = vmul.f32 %v13590_v36, %v6647_v2 }
 0xbc7   : > { %12556 = vmatmul.mubr.msk.bf16.gmra.mxu0 %vm562_vm1, %v6686_v59  ;;  %12588 = vmatmul.mubr.msk.bf16.gmra.mxu1 %vm562_vm1, %v6686_v59 }
 0xbc8   : > { %12559 = vmatprep.mubr.msk.bf16.mxu0 %vm13795_vm0, %v13794_v1  ;;  %12591 = vmatprep.mubr.msk.bf16.mxu1 %vm13795_vm0, %v13794_v1 }
 0xbc9   : > { %v6649_v8 = vpop.permute.xlu1 %6648 }
 0xbca   : > { %v6679_v37 = vmul.f32 %v13592_v56, %v6649_v8 }
 0xbcc   : > { %v6687_v43 = vpack.c.bf16 %v6679_v37, %v6678_v15 }
 0xbce   : > { %v6651_v24 = vpop.permute.xlu0 %6650 }
 0xbcf   : > { %12560 = vmatmul.mubr.msk.bf16.gmra.mxu0 %vm562_vm1, %v6687_v43  ;;  %12592 = vmatmul.mubr.msk.bf16.gmra.mxu1 %vm562_vm1, %v6687_v43  ;;  %v6680_v25 = vmul.f32 %v13594_v16, %v6651_v24 }
 0xbd0   : > { %12563 = vmatprep.mubr.msk.bf16.mxu0 %vm13795_vm0, %v13794_v1  ;;  %12595 = vmatprep.mubr.msk.bf16.mxu1 %vm13795_vm0, %v13794_v1 }
 0xbd2   : > { %v6653_v49 = vpop.permute.xlu1 %6652 }
 0xbd3   : > { %v6681_v7 = vmul.f32 %v13596_v53, %v6653_v49 }
 0xbd5   : > { %v6688_v32 = vpack.c.bf16 %v6681_v7, %v6680_v25 }
 0xbd7   : > { %12564 = vmatmul.mubr.msk.bf16.gmra.mxu0 %vm562_vm1, %v6688_v32  ;;  %12596 = vmatmul.mubr.msk.bf16.gmra.mxu1 %vm562_vm1, %v6688_v32 }
 0xbd8   : > { %12601 = vmatprep.mubr.msk.bf16.mxu0 %vm13795_vm0, %v13794_v1  ;;  %12607 = vmatprep.mubr.msk.bf16.mxu1 %vm13795_vm0, %v13794_v1 }
 0xc65   : > { %v15821_v27 = vpop.f32.mrf.mxu0  ;;  %v6867_v13 = vpop.f32.mrf.mxu1 }
 0xc67   : > { %v12541_v28 = vpop.f32.mrf.mxu0  ;;  %v12573_v17 = vpop.f32.mrf.mxu1 }
 0xc69   : > { %v15823_v46 = vpop.f32.mrf.mxu0  ;;  %v6870_v3 = vpop.f32.mrf.mxu1 }
 0xc6a   : > { %v6929_v40 = vpack.c.bf16 %v6870_v3, %v6867_v13 }
 0xc6b   : > { %v12542_v44 = vpop.f32.mrf.mxu0  ;;  %v12574_v31 = vpop.f32.mrf.mxu1 }
 0xc6c   : > { %12600 = vmatpush3.bf16.msra.mxu0 %v6929_v40 }
 0xc6d   : > { %v15825_v35 = vpop.f32.mrf.mxu0  ;;  %v6875_v33 = vpop.f32.mrf.mxu1  ;;  %12611 = vmatprep.subr.bf16.mxu0 %v13794_v1 }
 0xc6f   : > { %v12545_v22 = vpop.f32.mrf.mxu0  ;;  %v12577_v19 = vpop.f32.mrf.mxu1  ;;  %12602 = vmatmul.mubr.msk.bf16.vlgmr.msra.gmra.mxu0 %vm1619_vm2, %v15831_v18 }
 0xc70   : > { %12613 = vmatprep.mubr.msk.bf16.mxu0 %vm13795_vm0, %v13794_v1 }
 0xc71   : > { %v15837_v39 = vpop.f32.mrf.mxu0  ;;  %v6878_v51 = vpop.f32.mrf.mxu1 }
 0xc72   : > { %v6930_v38 = vpack.c.bf16 %v6878_v51, %v6875_v33  ;;  %v6922_v51 = vpack.c.bf16 %v15823_v46, %v15821_v27  ;;  %v6923_v27 = vpack.c.bf16 %v15837_v39, %v15825_v35 }
 0xc73   : > { %v12546_v6 = vpop.f32.mrf.mxu0  ;;  %v12578_v54 = vpop.f32.mrf.mxu1 }
 0xc74   : > { %12606 = vmatpush3.bf16.msra.mxu1 %v6930_v38 }
 0xc75   : > { %12617 = vmatprep.subr.bf16.mxu1 %v13794_v1 }
 0xc77   : > { %v15840_v34 = vpop.f32.mrf.mxu0  ;;  %v6883_v11 = vpop.f32.mrf.mxu1  ;;  %12608 = vmatmul.mubr.msk.bf16.vlgmr.msra.gmra.mxu1 %vm1619_vm2, %v15831_v18 }
 0xc78   : > { %12619 = vmatprep.mubr.msk.bf16.mxu1 %vm13795_vm0, %v13794_v1 }
 0xc79   : > { %v12549_v9 = vpop.f32.mrf.mxu0  ;;  %v12581_v30 = vpop.f32.mrf.mxu1 }
 0xc7b   : > { %v15846_v52 = vpop.f32.mrf.mxu0  ;;  %v6886_v0 = vpop.f32.mrf.mxu1 }
 0xc7c   : > { %v6931_v57 = vpack.c.bf16 %v6886_v0, %v6883_v11  ;;  %v6924_v46 = vpack.c.bf16 %v15846_v52, %v15840_v34 }
 0xc7d   : > { %v12550_v5 = vpop.f32.mrf.mxu0  ;;  %v12582_v41 = vpop.f32.mrf.mxu1 }
 0xc7e   : > { %12612 = vmatpush3.bf16.msra.mxu0 %v6931_v57  ;;  %v15885_v57 = vld [vmem:[%s16627_s1] sm:$0xff]   ;;  %v13101_v5 = vld [vmem:[%s16630_s4 + $0x48] sm:$0xff]  }
 0xc7f   : > { %v15848_v20 = vpop.f32.mrf.mxu0  ;;  %v6891_v4 = vpop.f32.mrf.mxu1  ;;  %12623 = vmatprep.subr.bf16.mxu0 %v13794_v1  ;;  %v13102_v41 = vld [vmem:[%s16630_s4 + $0x40] sm:$0xff]  }
 0xc81   : > { %v12553_v42 = vpop.f32.mrf.mxu0  ;;  %v12585_v23 = vpop.f32.mrf.mxu1  ;;  %12614 = vmatmul.mubr.msk.bf16.vlgmr.msra.gmra.mxu0 %vm1619_vm2, %v15831_v18 }
 0xc82   : > { %12625 = vmatprep.mubr.msk.bf16.mxu0 %vm13795_vm0, %v13794_v1  ;;  %v15938_v42 = vld [vmem:[%s16629_s3 + $0x48] sm:$0xff]  }
 0xc83   : > { %v15855_v59 = vpop.f32.mrf.mxu0  ;;  %v6894_v2 = vpop.f32.mrf.mxu1 }
 0xc84   : > { %v6932_v36 = vpack.c.bf16 %v6894_v2, %v6891_v4  ;;  %v6925_v35 = vpack.c.bf16 %v15855_v59, %v15848_v20  ;;  %v13103_v20 = vld [vmem:[%s16632_s6 + $0x48] sm:$0xff]   ;;  %v13104_v4 = vld [vmem:[%s16632_s6 + $0x40] sm:$0xff]  }
 0xc85   : > { %v12554_v56 = vpop.f32.mrf.mxu0  ;;  %v12586_v8 = vpop.f32.mrf.mxu1 }
 0xc86   : > { %12618 = vmatpush3.bf16.msra.mxu1 %v6932_v36 }
 0xc87   : > { %v6793_v15 = vpop.f32.mrf.mxu0  ;;  %v6899_v37 = vpop.f32.mrf.mxu1  ;;  %12629 = vmatprep.subr.bf16.mxu1 %v13794_v1 }
 0xc89   : > { %v12557_v43 = vpop.f32.mrf.mxu0  ;;  %v12589_v24 = vpop.f32.mrf.mxu1  ;;  %12620 = vmatmul.mubr.msk.bf16.vlgmr.msra.gmra.mxu1 %vm1619_vm2, %v15831_v18 }
 0xc8a   : > { %12631 = vmatprep.mubr.msk.bf16.mxu1 %vm13795_vm0, %v13794_v1 }
 0xc8b   : > { %v6796_v16 = vpop.f32.mrf.mxu0  ;;  %v6902_v53 = vpop.f32.mrf.mxu1 }
 0xc8c   : > { %v6933_v49 = vpack.c.bf16 %v6902_v53, %v6899_v37  ;;  %v6926_v39 = vpack.c.bf16 %v6796_v16, %v6793_v15 }
 0xc8d   : > { %v12558_v25 = vpop.f32.mrf.mxu0  ;;  %v12590_v7 = vpop.f32.mrf.mxu1 }
 0xc8e   : > { %12624 = vmatpush3.bf16.msra.mxu0 %v6933_v49 }
 0xc8f   : > { %v6801_v32 = vpop.f32.mrf.mxu0  ;;  %v6907_v13 = vpop.f32.mrf.mxu1  ;;  %12635 = vmatprep.subr.bf16.mxu0 %v13794_v1 }
 0xc91   : > { %v12561_v28 = vpop.f32.mrf.mxu0  ;;  %v12593_v17 = vpop.f32.mrf.mxu1  ;;  %12626 = vmatmul.mubr.msk.bf16.vlgmr.msra.gmra.mxu0 %vm1619_vm2, %v15831_v18 }
 0xc92   : > { %12637 = vmatprep.mubr.msk.bf16.mxu0 %vm13795_vm0, %v13794_v1 }
 0xc93   : > { %v6804_v3 = vpop.f32.mrf.mxu0  ;;  %v6910_v40 = vpop.f32.mrf.mxu1 }
 0xc94   : > { %v6934_v44 = vpack.c.bf16 %v6910_v40, %v6907_v13  ;;  %v6927_v34 = vpack.c.bf16 %v6804_v3, %v6801_v32 }
 0xc95   : > { %v12562_v31 = vpop.f32.mrf.mxu0  ;;  %v12594_v33 = vpop.f32.mrf.mxu1 }
 0xc96   : > { %12630 = vmatpush3.bf16.msra.mxu1 %v6934_v44 }
 0xc97   : > { %v6809_v22 = vpop.f32.mrf.mxu0  ;;  %v6915_v19 = vpop.f32.mrf.mxu1  ;;  %12641 = vmatprep.subr.bf16.mxu1 %v13794_v1 }
 0xc99   : > { %v12565_v38 = vpop.f32.mrf.mxu0  ;;  %v12597_v6 = vpop.f32.mrf.mxu1  ;;  %12632 = vmatmul.mubr.msk.bf16.vlgmr.msra.gmra.mxu1 %vm1619_vm2, %v15831_v18 }
 0xc9a   : > { %12642 = vmatpush3.bf16.msra.mxu1 %v6922_v51  ;;  %12643 = vmatprep.mubr.msk.bf16.mxu1 %vm13795_vm0, %v13794_v1  ;;  %v15950_v38 = vld [vmem:[%s16636_s10 + $0x3] ss:$0 sm:$0xff] }
 0xc9b   : > { %v6812_v54 = vpop.f32.mrf.mxu0  ;;  %v6918_v11 = vpop.f32.mrf.mxu1  ;;  %12653 = vmatprep.subr.bf16.mxu1 %v13794_v1 }
 0xc9c   : > { %v6935_v9 = vpack.c.bf16 %v6918_v11, %v6915_v19  ;;  %v6928_v52 = vpack.c.bf16 %v6812_v54, %v6809_v22 }
 0xc9d   : > { %v12566_v30 = vpop.f32.mrf.mxu0  ;;  %v12598_v0 = vpop.f32.mrf.mxu1 }
 0xc9e   : > { %12636 = vmatpush3.bf16.msra.mxu0 %v6935_v9 }
 0xc9f   : > { %12647 = vmatprep.subr.bf16.mxu0 %v13794_v1 }
 0xca1   : > { %12638 = vmatmul.mubr.msk.bf16.vlgmr.msra.gmra.mxu0 %vm1619_vm2, %v15831_v18  ;;  %12644 = vmatmul.mubr.msk.bf16.vlgmr.msra.gmra.mxu1 %vm1619_vm2, %v15885_v57 }
 0xca2   : > { %12654 = vmatpush3.bf16.msra.mxu1 %v6924_v46  ;;  %12648 = vmatpush3.bf16.msra.mxu0 %v6923_v27 }
 0xca3   : > { %12649 = vmatprep.mubr.msk.bf16.mxu0 %vm13795_vm0, %v13794_v1  ;;  %12655 = vmatprep.mubr.msk.bf16.mxu1 %vm13795_vm0, %v13794_v1 }
 0xca4   : > { %12659 = vmatprep.subr.bf16.mxu0 %v13794_v1  ;;  %12665 = vmatprep.subr.bf16.mxu1 %v13794_v1 }
 0xca9   : > { %12650 = vmatmul.mubr.msk.bf16.vlgmr.msra.gmra.mxu0 %vm1619_vm2, %v15885_v57  ;;  %12656 = vmatmul.mubr.msk.bf16.vlgmr.msra.gmra.mxu1 %vm1619_vm2, %v15885_v57 }
 0xcaa   : > { %12660 = vmatpush3.bf16.msra.mxu0 %v6925_v35  ;;  %12666 = vmatpush3.bf16.msra.mxu1 %v6926_v39 }
 0xcab   : > { %12661 = vmatprep.mubr.msk.bf16.mxu0 %vm13795_vm0, %v13794_v1  ;;  %12667 = vmatprep.mubr.msk.bf16.mxu1 %vm13795_vm0, %v13794_v1 }
 0xcac   : > { %12671 = vmatprep.subr.bf16.mxu0 %v13794_v1  ;;  %12677 = vmatprep.subr.bf16.mxu1 %v13794_v1 }
 0xcb1   : > { %12662 = vmatmul.mubr.msk.bf16.vlgmr.msra.gmra.mxu0 %vm1619_vm2, %v15885_v57  ;;  %12668 = vmatmul.mubr.msk.bf16.vlgmr.msra.gmra.mxu1 %vm1619_vm2, %v15885_v57 }
 0xcb2   : > { %12672 = vmatpush3.bf16.msra.mxu0 %v6927_v34  ;;  %12678 = vmatpush3.bf16.msra.mxu1 %v6928_v52 }
 0xcb3   : > { %12673 = vmatprep.mubr.msk.bf16.mxu0 %vm13795_vm0, %v13794_v1  ;;  %12679 = vmatprep.mubr.msk.bf16.mxu1 %vm13795_vm0, %v13794_v1 }
 0xcb4   : > { %12683 = vmatprep.subr.bf16.mxu0 %v13794_v1  ;;  %12691 = vmatprep.subr.bf16.mxu1 %v13101_v5 }
 0xcb9   : > { %12674 = vmatmul.mubr.msk.bf16.vlgmr.msra.gmra.mxu0 %vm1619_vm2, %v15885_v57  ;;  %12680 = vmatmul.mubr.msk.bf16.vlgmr.msra.gmra.mxu1 %vm1619_vm2, %v15885_v57 }
 0xcba   : > { %12687 = vmatprep.mubr.msk.bf16.mxu0 %vm13795_vm0, %v13794_v1  ;;  %12692 = vmatpush3.bf16.msra.mxu1 %v13101_v5 }
 0xcbb   : > { %12693 = vmatprep.subr.bf16.mxu1 %v13102_v41  ;;  %12684 = vmatpush3.bf16.msra.mxu0 %v13103_v20 }
 0xcbc   : > { %12685 = vmatprep.subr.bf16.mxu0 %v13794_v1 }
 0xcbe   : > { %12694 = vmatpush3.bf16.msra.mxu1 %v13102_v41 }
 0xcbf   : > { %12686 = vmatpush3.bf16.msra.mxu0 %v13104_v4 }
 0xcc0   : > { %12707 = vmatprep.subr.bf16.mxu0 %v15938_v42 }
 0xd2f   : > { %v6970_v23 = vpop.f32.mrf.mxu0 }
 0xd31   : > { %v12603_v59 = vpop.f32.mrf.mxu0 }
 0xd33   : > { %v6973_v2 = vpop.f32.mrf.mxu0 }
 0xd35   : > { %v12604_v36 = vpop.f32.mrf.mxu0 }
 0xd37   : > { %v7011_v56 = vpop.f32.mrf.mxu1 }
 0xd39   : > { %v12609_v8 = vpop.f32.mrf.mxu1 }
 0xd3b   : > { %v7014_v15 = vpop.f32.mrf.mxu1 }
 0xd3d   : > { %v12610_v37 = vpop.f32.mrf.mxu1 }
 0xd41   : > { %v7052_v43 = vpop.f32.mrf.mxu0 }
 0xd43   : > { %v12615_v24 = vpop.f32.mrf.mxu0 }
 0xd45   : > { %v7055_v16 = vpop.f32.mrf.mxu0 }
 0xd47   : > { %v12616_v53 = vpop.f32.mrf.mxu0 }
 0xd49   : > { %v7093_v49 = vpop.f32.mrf.mxu1 }
 0xd4b   : > { %v12621_v25 = vpop.f32.mrf.mxu1 }
 0xd4d   : > { %v7096_v7 = vpop.f32.mrf.mxu1 }
 0xd4f   : > { %v12622_v32 = vpop.f32.mrf.mxu1 }
 0xd51   : > { %v7134_v13 = vpop.f32.mrf.mxu0 }
 0xd53   : > { %v12627_v28 = vpop.f32.mrf.mxu0 }
 0xd55   : > { %v7137_v17 = vpop.f32.mrf.mxu0 }
 0xd57   : > { %v12628_v3 = vpop.f32.mrf.mxu0 }
 0xd59   : > { %v15941_v40 = vpop.f32.mrf.mxu1 }
 0xd5b   : > { %v12633_v44 = vpop.f32.mrf.mxu1 }
 0xd5d   : > { %v15943_v31 = vpop.f32.mrf.mxu1 }
 0xd5f   : > { %v12634_v33 = vpop.f32.mrf.mxu1 }
 0xd61   : > { %v15945_v22 = vpop.f32.mrf.mxu0  ;;  %v7257_v19 = vpop.f32.mrf.mxu1 }
 0xd62   : > { %v7258_v51 = vadd.f32 %v7257_v19, %v6970_v23 }
 0xd63   : > { %v12639_v6 = vpop.f32.mrf.mxu0  ;;  %v12645_v54 = vpop.f32.mrf.mxu1 }
 0xd64   : > { %v7518_v30 = vadd.f32 %v15950_v38, %v7258_v51 }
 0xd65   : > { %v15952_v11 = vpop.f32.mrf.mxu0  ;;  %v7260_v9 = vpop.f32.mrf.mxu1 }
 0xd66   : > { %v7261_v0 = vadd.f32 %v7260_v9, %v6973_v2  ;;  %v15957_v52 = vadd.f32 %v7518_v30, %v15491_v14 }
 0xd67   : > { %v12640_v27 = vpop.f32.mrf.mxu0  ;;  %v12646_v46 = vpop.f32.mrf.mxu1 }
 0xd68   : > { %v7519_v35 = vadd.f32 %v15950_v38, %v7261_v0 }
 0xd69   : > { %v7298_v39 = vpop.f32.mrf.mxu0  ;;  %v7339_v34 = vpop.f32.mrf.mxu1 }
 0xd6a   : > { %v15960_v5 = vadd.f32 %v7519_v35, %v15497_v21  ;;  %v7299_v41 = vadd.f32 %v7298_v39, %v7011_v56  ;;  %v7340_v20 = vadd.f32 %v7339_v34, %v7052_v43 }
 0xd6b   : > { %v12651_v4 = vpop.f32.mrf.mxu0  ;;  %v12657_v23 = vpop.f32.mrf.mxu1 }
 0xd6c   : > { %v7546_v59 = vpack.c.bf16 %v15960_v5, %v15957_v52  ;;  %v7520_v2 = vadd.f32 %v15950_v38, %v7299_v41  ;;  %v7522_v36 = vadd.f32 %v15950_v38, %v7340_v20 }
 0xd6d   : > { %v7301_v8 = vpop.f32.mrf.mxu0  ;;  %v7342_v37 = vpop.f32.mrf.mxu1 }
 0xd6e   : > { %v7302_v24 = vadd.f32 %v7301_v8, %v7014_v15  ;;  %v7343_v53 = vadd.f32 %v7342_v37, %v7055_v16  ;;  %v15969_v43 = vadd.f32 %v7520_v2, %v15514_v61  ;;  %v15972_v32 = vadd.f32 %v7522_v36, %v15535_v47 }
 0xd6f   : > { %v12652_v14 = vpop.f32.mrf.mxu0  ;;  %v12658_v25 = vpop.f32.mrf.mxu1 }
 0xd70   : > { %v7521_v21 = vadd.f32 %v15950_v38, %v7302_v24  ;;  %v7523_v56 = vadd.f32 %v15950_v38, %v7343_v53 }
 0xd71   : > { %v7380_v28 = vpop.f32.mrf.mxu0  ;;  %v7421_v3 = vpop.f32.mrf.mxu1 }
 0xd72   : > { %v15975_v44 = vadd.f32 %v7521_v21, %v15518_v50  ;;  %v15978_v15 = vadd.f32 %v7523_v56, %v15531_v48  ;;  %v7381_v16 = vadd.f32 %v7380_v28, %v7093_v49  ;;  %v7422_v33 = vadd.f32 %v7421_v3, %v7134_v13 }
 0xd73   : > { %v12663_v19 = vpop.f32.mrf.mxu0  ;;  %v12669_v51 = vpop.f32.mrf.mxu1 }
 0xd74   : > { %v7547_v6 = vpack.c.bf16 %v15975_v44, %v15969_v43  ;;  %v7548_v61 = vpack.c.bf16 %v15978_v15, %v15972_v32  ;;  %v7524_v47 = vadd.f32 %v15950_v38, %v7381_v16  ;;  %v7526_v54 = vadd.f32 %v15950_v38, %v7422_v33 }
 0xd75   : > { %v7383_v9 = vpop.f32.mrf.mxu0  ;;  %v7424_v50 = vpop.f32.mrf.mxu1 }
 0xd76   : > { %v7384_v30 = vadd.f32 %v7383_v9, %v7096_v7  ;;  %v7425_v0 = vadd.f32 %v7424_v50, %v7137_v17  ;;  %12695 = vmatprep.mubr.msk.bf16.mxu1 %vm562_vm1, %v7547_v6  ;;  %v15991_v46 = vadd.f32 %v7524_v47, %v15554_v60  ;;  %v15994_v35 = vadd.f32 %v7526_v54, %v15587_v45  ;;  %v16060_v47 = vld [vmem:[%s16631_s5 + $0x4] ss:$0 sm:$0xff] }
 0xd77   : > { %v12664_v48 = vpop.f32.mrf.mxu0  ;;  %v12670_v49 = vpop.f32.mrf.mxu1  ;;  %12696 = vmatmul.mubr.msk.bf16.vlgmr.msra.gmra.mxu1 %vm562_vm1, %v7548_v61 }
 0xd78   : > { %v7525_v13 = vadd.f32 %v15950_v38, %v7384_v30  ;;  %v7527_v27 = vadd.f32 %v15950_v38, %v7425_v0 }
 0xd79   : > { %v7462_v39 = vpop.f32.mrf.mxu0  ;;  %v7503_v34 = vpop.f32.mrf.mxu1 }
 0xd7a   : > { %v15997_v7 = vadd.f32 %v7525_v13, %v15549_v55  ;;  %v16000_v17 = vadd.f32 %v7527_v27, %v15580_v58  ;;  %v7463_v41 = vadd.f32 %v7462_v39, %v15941_v40  ;;  %v7504_v20 = vadd.f32 %v7503_v34, %v15945_v22 }
 0xd7b   : > { %v12675_v4 = vpop.f32.mrf.mxu0  ;;  %v12681_v23 = vpop.f32.mrf.mxu1 }
 0xd7c   : > { %v7549_v60 = vpack.c.bf16 %v15997_v7, %v15991_v46  ;;  %v7550_v45 = vpack.c.bf16 %v16000_v17, %v15994_v35  ;;  %v7528_v55 = vadd.f32 %v15950_v38, %v7463_v41  ;;  %v7530_v8 = vadd.f32 %v15950_v38, %v7504_v20 }
 0xd7d   : > { %v7465_v2 = vpop.f32.mrf.mxu0  ;;  %v7506_v36 = vpop.f32.mrf.mxu1 }
 0xd7e   : > { %v7466_v58 = vadd.f32 %v7465_v2, %v15943_v31  ;;  %v7507_v40 = vadd.f32 %v7506_v36, %v15952_v11  ;;  %12699 = vmatprep.mubr.msk.bf16.mxu1 %vm562_vm1, %v7549_v60  ;;  %v16017_v14 = vadd.f32 %v7528_v55, %v15608_v12  ;;  %v16020_v25 = vadd.f32 %v7530_v8, %v15558_v63  ;;  %v13106_v12 = vld [vmem:[%s16629_s3 + $0x40] sm:$0xff]  }
 0xd7f   : > { %12700 = vmatmul.mubr.msk.bf16.gmra.mxu1 %vm562_vm1, %v7550_v45  ;;  %v12682_v22 = vpop.f32.mrf.mxu1  ;;  %v12676_v37 = vpop.f32.mrf.mxu0 }
 0xd80   : > { %v7529_v24 = vadd.f32 %v15950_v38, %v7466_v58  ;;  %v7531_v53 = vadd.f32 %v15950_v38, %v7507_v40 }
 0xd82   : > { %v16023_v31 = vadd.f32 %v7529_v24, %v15605_v29  ;;  %v16026_v11 = vadd.f32 %v7531_v53, %v15561_v26 }
 0xd84   : > { %v7551_v21 = vpack.c.bf16 %v16023_v31, %v16017_v14  ;;  %v7552_v56 = vpack.c.bf16 %v16026_v11, %v16020_v25 }
 0xd86   : > { %12688 = vmatmul.mubr.msk.bf16.vlgmr.msra.gmra.mxu0 %vm562_vm1, %v7552_v56  ;;  %12703 = vmatprep.mubr.msk.bf16.mxu1 %vm562_vm1, %v7551_v21 }
 0xd87   : > { %12704 = vmatmul.mubr.msk.bf16.gmra.mxu1 %vm562_vm1, %v7552_v56  ;;  %12708 = vmatpush3.bf16.msra.mxu0 %v15938_v42  ;;  %v10979_v42 = vld [vmem:[%s16633_s7 + $0x4] ss:$0 sm:$0xff] }
 0xd88   : > { %12711 = vmatprep.mubr.msk.bf16.mxu0 %vm562_vm1, %v7546_v59  ;;  %12709 = vmatprep.subr.bf16.mxu0 %v13106_v12 }
 0xd8b   : > { %12710 = vmatpush3.bf16.msra.mxu0 %v13106_v12 }
 0xd8e   : > { %12712 = vmatmul.mubr.msk.bf16.vlgmr.msra.gmra.mxu0 %vm562_vm1, %v7547_v6 }
 0xd8f   : > { %12715 = vmatprep.mubr.msk.bf16.mxu0 %vm562_vm1, %v7548_v61 }
 0xd96   : > { %12716 = vmatmul.mubr.msk.bf16.gmra.mxu0 %vm562_vm1, %v7549_v60 }
 0xd97   : > { %12719 = vmatprep.mubr.msk.bf16.mxu0 %vm562_vm1, %v7550_v45 }
 0xd9e   : > { %12720 = vmatmul.mubr.msk.bf16.gmra.mxu0 %vm562_vm1, %v7551_v21 }
 0xe37   : > { %v12697_v63 = vpop.f32.mrf.mxu1 }
 0xe39   : > { %v7695_v26 = vpop.f32.mrf.mxu1 }
 0xe3b   : > { %v12698_v29 = vpop.f32.mrf.mxu1 }
 0xe3d   : > { %v7698_v38 = vpop.f32.mrf.mxu1 }
 0xe3f   : > { %v12701_v28 = vpop.f32.mrf.mxu1 }
 0xe41   : > { %v7711_v51 = vpop.f32.mrf.mxu1 }
 0xe43   : > { %v12702_v50 = vpop.f32.mrf.mxu1 }
 0xe45   : > { %v7714_v27 = vpop.f32.mrf.mxu1 }
 0xe46   : > { %v7615_v52 = vpop.f32.mrf.mxu0 }
 0xe47   : > { %v7616_v5 = vadd.f32 %v10979_v42, %v7615_v52  ;;  %v12705_v2 = vpop.f32.mrf.mxu1 }
 0xe48   : > { %v12689_v59 = vpop.f32.mrf.mxu0 }
 0xe49   : > { %v16052_v3 = vadd.f32 %v7616_v5, %v15651_v62  ;;  %v7727_v53 = vpop.f32.mrf.mxu1 }
 0xe4a   : > { %v7618_v16 = vpop.f32.mrf.mxu0 }
 0xe4b   : > { %v7619_v33 = vadd.f32 %v10979_v42, %v7618_v16  ;;  %v12706_v52 = vpop.f32.mrf.mxu1 }
 0xe4c   : > { %v12690_v19 = vpop.f32.mrf.mxu0 }
 0xe4d   : > { %v16055_v6 = vadd.f32 %v7619_v33, %v15656_v10 }
 0xe4e   : > { %v12713_v61 = vpop.f32.mrf.mxu0 }
 0xe4f   : > { %v7800_v54 = vadd.f32 %v12713_v61, %v12697_v63 }
 0xe50   : > { %v7791_v9 = vpop.f32.mrf.mxu0 }
 0xe51   : > { %v16063_v30 = vadd.f32 %v16060_v47, %v7800_v54  ;;  %v7792_v62 = vadd.f32 %v7791_v9, %v7695_v26  ;;  %v7730_v9 = vpop.f32.mrf.mxu1 }
 0xe52   : > { %v12714_v0 = vpop.f32.mrf.mxu0 }
 0xe53   : > { %v11011_v48 = vmul.f32 -1.442695, %v16063_v30  ;;  %v16067_v49 = vadd.f32 %v16060_v47, %v7792_v62  ;;  %v7803_v10 = vadd.f32 %v12714_v0, %v12698_v29 }
 0xe54   : > { %v7794_v13 = vpop.f32.mrf.mxu0 }
 0xe55   : > { %13597 = vpow2.f32 %v11011_v48  ;;  %v11009_v39 = vmul.f32 -1.442695, %v16067_v49  ;;  %v16071_v34 = vadd.f32 %v16060_v47, %v7803_v10  ;;  %v7795_v41 = vadd.f32 %v7794_v13, %v7698_v38 }
 0xe56   : > { %v12717_v20 = vpop.f32.mrf.mxu0 }
 0xe57   : > { %13599 = vpow2.f32 %v11009_v39  ;;  %v11012_v4 = vmul.f32 -1.442695, %v16071_v34  ;;  %v16075_v23 = vadd.f32 %v16060_v47, %v7795_v41  ;;  %v7816_v60 = vadd.f32 %v12717_v20, %v12701_v28 }
 0xe58   : > { %v7807_v45 = vpop.f32.mrf.mxu0 }
 0xe59   : > { %v11010_v36 = vmul.f32 -1.442695, %v16075_v23  ;;  %v16079_v55 = vadd.f32 %v16060_v47, %v7816_v60  ;;  %v7808_v8 = vadd.f32 %v7807_v45, %v7711_v51  ;;  %13601 = vpow2.f32 %v11012_v4 }
 0xe5a   : > { %v12718_v58 = vpop.f32.mrf.mxu0 }
 0xe5b   : > { %13603 = vpow2.f32 %v11010_v36  ;;  %v11015_v40 = vmul.f32 -1.442695, %v16079_v55  ;;  %v16083_v22 = vadd.f32 %v16060_v47, %v7808_v8  ;;  %v7819_v37 = vadd.f32 %v12718_v58, %v12702_v50 }
 0xe5c   : > { %v7810_v24 = vpop.f32.mrf.mxu0 }
 0xe5d   : > { %13605 = vpow2.f32 %v11015_v40  ;;  %v11013_v21 = vmul.f32 -1.442695, %v16083_v22  ;;  %v16087_v56 = vadd.f32 %v16060_v47, %v7819_v37  ;;  %v7811_v12 = vadd.f32 %v7810_v24, %v7714_v27  ;;  %v13107_v40 = vld [vmem:[%s16634_s8 + $0x48] sm:$0xff]  }
 0xe5e   : > { %v12721_v63 = vpop.f32.mrf.mxu0  ;;  %v13108_v37 = vld [vmem:[%s16635_s9 + $0x48] sm:$0xff]   ;;  %12723 = vmatprep.subr.bf16.mxu1 %v13107_v40 }
 0xe5f   : > { %13607 = vpow2.f32 %v11013_v21  ;;  %v11016_v26 = vmul.f32 -1.442695, %v16087_v56  ;;  %v16091_v29 = vadd.f32 %v16060_v47, %v7811_v12  ;;  %v7832_v42 = vadd.f32 %v12721_v63, %v12705_v2  ;;  %12739 = vmatprep.subr.bf16.mxu0 %v13108_v37  ;;  %12724 = vmatpush3.bf16.msra.mxu1 %v13107_v40  ;;  %v13109_v21 = vld [vmem:[%s16634_s8 + $0x40] sm:$0xff]  }
 0xe60   : > { %v7823_v38 = vpop.f32.mrf.mxu0  ;;  %12740 = vmatpush3.bf16.msra.mxu0 %v13108_v37  ;;  %v13110_v12 = vld [vmem:[%s16635_s9 + $0x40] sm:$0xff]   ;;  %12725 = vmatprep.subr.bf16.mxu1 %v13109_v21 }
 0xe61   : > { %v11014_v5 = vmul.f32 -1.442695, %v16091_v29  ;;  %v16095_v59 = vadd.f32 %v16060_v47, %v7832_v42  ;;  %v7824_v28 = vadd.f32 %v7823_v38, %v7727_v53  ;;  %13609 = vpow2.f32 %v11016_v26  ;;  %12741 = vmatprep.subr.bf16.mxu0 %v13110_v12 }
 0xe62   : > { %v13598_v16 = vpop.eup %13597  ;;  %v12722_v33 = vpop.f32.mrf.mxu0 }
 0xe63   : > { %13611 = vpow2.f32 %v11014_v5  ;;  %v16098_v19 = vadd.f32 %v16060_v47, %v7824_v28  ;;  %v7908_v61 = vadd.f32 1.0, %v13598_v16  ;;  %v11019_v62 = vmul.f32 -1.442695, %v16095_v59  ;;  %12726 = vmatpush3.bf16.msra.mxu1 %v13109_v21 }
 0xe64   : > { %v13600_v51 = vpop.eup %13599  ;;  %v7826_v54 = vpop.f32.mrf.mxu0  ;;  %v7835_v0 = vadd.f32 %v12722_v33, %v12706_v52  ;;  %12742 = vmatpush3.bf16.msra.mxu0 %v13110_v12  ;;  %12755 = vmatprep.subr.bf16.mxu1 %v13794_v1 }
 0xe65   : > { %v7906_v50 = vadd.f32 1.0, %v13600_v51  ;;  %v11017_v48 = vmul.f32 -1.442695, %v16098_v19  ;;  %v7827_v10 = vadd.f32 %v7826_v54, %v7730_v9  ;;  %12761 = vmatprep.subr.bf16.mxu0 %v13794_v1 }
 0xe66   : > { %v13602_v13 = vpop.eup %13601  ;;  %v16103_v41 = vadd.f32 %v16060_v47, %v7835_v0 }
 0xe67   : > { %13613 = vrcp.f32 %v7906_v50  ;;  %v7909_v4 = vadd.f32 1.0, %v13602_v13  ;;  %v16106_v60 = vadd.f32 %v16060_v47, %v7827_v10 }
 0xe68   : > { %v13604_v27 = vpop.eup %13603  ;;  %13615 = vrcp.f32 %v7908_v61  ;;  %v11020_v8 = vmul.f32 -1.442695, %v16103_v41 }
 0xe69   : > { %v7907_v39 = vadd.f32 1.0, %v13604_v27  ;;  %13617 = vpow2.f32 %v11019_v62  ;;  %v11018_v58 = vmul.f32 -1.442695, %v16106_v60 }
 0xe6a   : > { %v13606_v20 = vpop.eup %13605  ;;  %13619 = vpow2.f32 %v11017_v48 }
 0xe6b   : > { %13621 = vrcp.f32 %v7907_v39  ;;  %v7912_v2 = vadd.f32 1.0, %v13606_v20 }
 0xe6c   : > { %v13608_v45 = vpop.eup %13607  ;;  %13623 = vrcp.f32 %v7909_v4 }
 0xe6d   : > { %v7910_v36 = vadd.f32 1.0, %v13608_v45 }
 0xe6e   : > { %v13610_v24 = vpop.eup %13609 }
 0xe6f   : > { %13625 = vrcp.f32 %v7910_v36  ;;  %v7913_v63 = vadd.f32 1.0, %v13610_v24 }
 0xe70   : > { %v13612_v47 = vpop.eup %13611  ;;  %13627 = vrcp.f32 %v7912_v2 }
 0xe71   : > { %v7911_v53 = vadd.f32 1.0, %v13612_v47  ;;  %13629 = vpow2.f32 %v11020_v8 }
 0xe72   : > { %13631 = vpow2.f32 %v11018_v58 }
 0xe73   : > { %13633 = vrcp.f32 %v7911_v53 }
 0xe74   : > { %v13614_v26 = vpop.eup %13613  ;;  %13635 = vrcp.f32 %v7913_v63 }
 0xe75   : > { %v13616_v42 = vpop.eup %13615  ;;  %7954 = vrot.lane.b32.xlu0 %v13614_v26, %s13796_s21 }
 0xe76   : > { %v13618_v38 = vpop.eup %13617 }
 0xe77   : > { %v13620_v52 = vpop.eup %13619  ;;  %v7916_v16 = vadd.f32 1.0, %v13618_v38 }
 0xe78   : > { %v13622_v5 = vpop.eup %13621  ;;  %v7914_v28 = vadd.f32 1.0, %v13620_v52 }
 0xe79   : > { %7956 = vrot.lane.b32.xlu1 %v13622_v5, %s13796_s21  ;;  %7958 = vrot.lane.b32.xlu0 %v13616_v42, %s13796_s21  ;;  %v13624_v33 = vpop.eup %13623 }
 0xe7a   : > { %13637 = vrcp.f32 %v7914_v28 }
 0xe7b   : > { %13639 = vrcp.f32 %v7916_v16 }
 0xe7c   : > { %v13626_v51 = vpop.eup %13625 }
 0xe7d   : > { %v13628_v61 = vpop.eup %13627  ;;  %7960 = vrot.lane.b32.xlu1 %v13624_v33, %s13796_s21  ;;  %7962 = vrot.lane.b32.xlu0 %v13626_v51, %s13796_s21 }
 0xe7e   : > { %v13630_v54 = vpop.eup %13629 }
 0xe7f   : > { %v13632_v9 = vpop.eup %13631  ;;  %v7917_v0 = vadd.f32 1.0, %v13630_v54 }
 0xe80   : > { %v13634_v50 = vpop.eup %13633  ;;  %v7915_v62 = vadd.f32 1.0, %v13632_v9 }
 0xe81   : > { %7964 = vrot.lane.b32.xlu1 %v13634_v50, %s13796_s21  ;;  %7966 = vrot.lane.b32.xlu0 %v13628_v61, %s13796_s21  ;;  %v13636_v48 = vpop.eup %13635 }
 0xe82   : > { %13641 = vrcp.f32 %v7915_v62 }
 0xe83   : > { %13643 = vrcp.f32 %v7917_v0 }
 0xe84   : > { %13645 = vtanh.f32 %v16067_v49 }
 0xe85   : > { %7968 = vrot.lane.b32.xlu1 %v13636_v48, %s13796_s21  ;;  %13647 = vtanh.f32 %v16075_v23 }
 0xe86   : > { %13649 = vtanh.f32 %v16063_v30 }
 0xe87   : > { %v13638_v10 = vpop.eup %13637  ;;  %13651 = vtanh.f32 %v16071_v34 }
 0xe88   : > { %7970 = vrot.lane.b32.xlu0 %v13638_v10, %s13796_s21  ;;  %v13640_v13 = vpop.eup %13639  ;;  %13653 = vtanh.f32 %v16083_v22 }
 0xe89   : > { %13655 = vtanh.f32 %v16091_v29 }
 0xe8a   : > { %13657 = vtanh.f32 %v16079_v55 }
 0xe8b   : > { %13659 = vtanh.f32 %v16087_v56 }
 0xe8c   : > { %7974 = vrot.lane.b32.xlu0 %v13640_v13, %s13796_s21  ;;  %13661 = vtanh.f32 %v16098_v19 }
 0xe8d   : > { %13663 = vtanh.f32 %v16106_v60 }
 0xe8e   : > { %13665 = vtanh.f32 %v16095_v59 }
 0xe8f   : > { %v13642_v27 = vpop.eup %13641  ;;  %13667 = vtanh.f32 %v16103_v41 }
 0xe90   : > { %7972 = vrot.lane.b32.xlu1 %v13642_v27, %s13796_s21  ;;  %v13644_v39 = vpop.eup %13643 }
 0xe91   : > { %v13646_v4 = vpop.eup %13645 }
 0xe92   : > { %v13648_v45 = vpop.eup %13647 }
 0xe93   : > { %v13650_v23 = vpop.eup %13649 }
 0xe94   : > { %7976 = vrot.lane.b32.xlu1 %v13644_v39, %s13796_s21  ;;  %v13652_v30 = vpop.eup %13651 }
 0xe95   : > { %v13654_v55 = vpop.eup %13653 }
 0xe96   : > { %v13656_v24 = vpop.eup %13655 }
 0xe97   : > { %v13658_v12 = vpop.eup %13657 }
 0xe98   : > { %v13660_v26 = vpop.eup %13659 }
 0xe99   : > { %v13662_v5 = vpop.eup %13661 }
 0xe9a   : > { %v13664_v28 = vpop.eup %13663 }
 0xe9b   : > { %v13666_v61 = vpop.eup %13665 }
 0xe9c   : > { %v13668_v9 = vpop.eup %13667 }
 0xee7   : > { %v7955_v20 = vpop.permute.xlu0 %7954 }
 0xee8   : > { %v7990_v49 = vmul.f32 %v13646_v4, %v7955_v20 }
 0xeeb   : > { %v7957_v2 = vpop.permute.xlu1 %7956  ;;  %v7959_v36 = vpop.permute.xlu0 %7958 }
 0xeec   : > { %v7991_v8 = vmul.f32 %v13648_v45, %v7957_v2  ;;  %v7992_v37 = vmul.f32 %v13650_v23, %v7959_v36 }
 0xeee   : > { %v8002_v58 = vpack.c.bf16 %v7991_v8, %v7990_v49 }
 0xeef   : > { %v7961_v40 = vpop.permute.xlu1 %7960  ;;  %v7963_v34 = vpop.permute.xlu0 %7962 }
 0xef0   : > { %v7993_v22 = vmul.f32 %v13652_v30, %v7961_v40  ;;  %12727 = vmatprep.mubr.msk.bf16.mxu1 %vm562_vm1, %v8002_v58  ;;  %12743 = vmatprep.mubr.msk.bf16.mxu0 %vm562_vm1, %v8002_v58  ;;  %v7994_v47 = vmul.f32 %v13654_v55, %v7963_v34 }
 0xef2   : > { %v8003_v29 = vpack.c.bf16 %v7993_v22, %v7992_v37 }
 0xef3   : > { %v7965_v56 = vpop.permute.xlu1 %7964  ;;  %v7967_v21 = vpop.permute.xlu0 %7966 }
 0xef4   : > { %v7995_v53 = vmul.f32 %v13656_v24, %v7965_v56  ;;  %12728 = vmatmul.mubr.msk.bf16.vlgmr.msra.gmra.mxu1 %vm562_vm1, %v8003_v29  ;;  %12744 = vmatmul.mubr.msk.bf16.vlgmr.msra.gmra.mxu0 %vm562_vm1, %v8003_v29  ;;  %v7996_v38 = vmul.f32 %v13658_v12, %v7967_v21 }
 0xef6   : > { %v8004_v63 = vpack.c.bf16 %v7995_v53, %v7994_v47 }
 0xef7   : > { %v7969_v42 = vpop.permute.xlu1 %7968 }
 0xef8   : > { %v7997_v52 = vmul.f32 %v13660_v26, %v7969_v42  ;;  %12731 = vmatprep.mubr.msk.bf16.mxu1 %vm562_vm1, %v8004_v63  ;;  %12747 = vmatprep.mubr.msk.bf16.mxu0 %vm562_vm1, %v8004_v63 }
 0xefa   : > { %v8005_v19 = vpack.c.bf16 %v7997_v52, %v7996_v38  ;;  %v7971_v60 = vpop.permute.xlu0 %7970 }
 0xefb   : > { %v7998_v33 = vmul.f32 %v13662_v5, %v7971_v60 }
 0xefc   : > { %12732 = vmatmul.mubr.msk.bf16.gmra.mxu1 %vm562_vm1, %v8005_v19  ;;  %12748 = vmatmul.mubr.msk.bf16.gmra.mxu0 %vm562_vm1, %v8005_v19 }
 0xefe   : > { %v7975_v59 = vpop.permute.xlu0 %7974 }
 0xeff   : > { %v8000_v62 = vmul.f32 %v13666_v61, %v7975_v59  ;;  %v16242_v59 = vld [vmem:[%s16629_s3 + $0x58] sm:$0xff]  }
 0xf02   : > { %v7973_v16 = vpop.permute.xlu1 %7972 }
 0xf03   : > { %v7999_v51 = vmul.f32 %v13664_v28, %v7973_v16  ;;  %v13111_v16 = vld [vmem:[%s16630_s4 + $0x58] sm:$0xff]  }
 0xf05   : > { %v8006_v54 = vpack.c.bf16 %v7999_v51, %v7998_v33  ;;  %v13112_v33 = vld [vmem:[%s16630_s4 + $0x50] sm:$0xff]   ;;  %v13113_v51 = vld [vmem:[%s16632_s6 + $0x58] sm:$0xff]  }
 0xf06   : > { %v7977_v50 = vpop.permute.xlu1 %7976 }
 0xf07   : > { %v8001_v0 = vmul.f32 %v13668_v9, %v7977_v50  ;;  %12735 = vmatprep.mubr.msk.bf16.mxu1 %vm562_vm1, %v8006_v54  ;;  %12751 = vmatprep.mubr.msk.bf16.mxu0 %vm562_vm1, %v8006_v54 }
 0xf09   : > { %v8007_v41 = vpack.c.bf16 %v8001_v0, %v8000_v62 }
 0xf0b   : > { %12736 = vmatmul.mubr.msk.bf16.gmra.mxu1 %vm562_vm1, %v8007_v41  ;;  %12752 = vmatmul.mubr.msk.bf16.gmra.mxu0 %vm562_vm1, %v8007_v41 }
 0xf0c   : > { %12763 = vmatprep.mubr.msk.bf16.mxu0 %vm13795_vm0, %v13794_v1  ;;  %12757 = vmatprep.mubr.msk.bf16.mxu1 %vm13795_vm0, %v13794_v1 }
 0xfb4   : > { %v12745_v48 = vpop.f32.mrf.mxu0  ;;  %v12729_v13 = vpop.f32.mrf.mxu1 }
 0xfb6   : > { %v8175_v10 = vpop.f32.mrf.mxu0  ;;  %v8077_v4 = vpop.f32.mrf.mxu1 }
 0xfb8   : > { %v12746_v27 = vpop.f32.mrf.mxu0  ;;  %v12730_v49 = vpop.f32.mrf.mxu1 }
 0xfb9   : > { %v8229_v39 = vpack.c.bf16 %v12746_v27, %v12745_v48  ;;  %v8223_v12 = vpack.c.bf16 %v12730_v49, %v12729_v13 }
 0xfba   : > { %v8178_v20 = vpop.f32.mrf.mxu0  ;;  %v8080_v30 = vpop.f32.mrf.mxu1 }
 0xfbb   : > { %v8228_v45 = vpack.c.bf16 %v8178_v20, %v8175_v10  ;;  %12762 = vmatpush3.bf16.msra.mxu0 %v8229_v39  ;;  %v8222_v63 = vpack.c.bf16 %v8080_v30, %v8077_v4 }
 0xfbc   : > { %v12749_v2 = vpop.f32.mrf.mxu0  ;;  %12773 = vmatprep.subr.bf16.mxu0 %v13794_v1  ;;  %v12733_v34 = vpop.f32.mrf.mxu1 }
 0xfbd   : > { %12756 = vmatpush3.bf16.msra.mxu1 %v8228_v45 }
 0xfbe   : > { %v8191_v36 = vpop.f32.mrf.mxu0  ;;  %12764 = vmatmul.mubr.msk.bf16.vlgmr.msra.gmra.mxu0 %vm1619_vm2, %v15831_v18  ;;  %12767 = vmatprep.subr.bf16.mxu1 %v13794_v1  ;;  %v8093_v37 = vpop.f32.mrf.mxu1 }
 0xfbf   : > { %12775 = vmatprep.mubr.msk.bf16.mxu0 %vm13795_vm0, %v13794_v1 }
 0xfc0   : > { %v12750_v8 = vpop.f32.mrf.mxu0  ;;  %12758 = vmatmul.mubr.msk.bf16.vlgmr.msra.gmra.mxu1 %vm1619_vm2, %v15831_v18  ;;  %v12734_v29 = vpop.f32.mrf.mxu1 }
 0xfc1   : > { %v8231_v23 = vpack.c.bf16 %v12750_v8, %v12749_v2  ;;  %12769 = vmatprep.mubr.msk.bf16.mxu1 %vm13795_vm0, %v13794_v1  ;;  %v8225_v38 = vpack.c.bf16 %v12734_v29, %v12733_v34 }
 0xfc2   : > { %v8194_v58 = vpop.f32.mrf.mxu0  ;;  %v8096_v21 = vpop.f32.mrf.mxu1 }
 0xfc3   : > { %v8230_v40 = vpack.c.bf16 %v8194_v58, %v8191_v36  ;;  %12774 = vmatpush3.bf16.msra.mxu0 %v8231_v23  ;;  %v8224_v52 = vpack.c.bf16 %v8096_v21, %v8093_v37 }
 0xfc4   : > { %12785 = vmatprep.subr.bf16.mxu0 %v13794_v1 }
 0xfc5   : > { %12768 = vmatpush3.bf16.msra.mxu1 %v8230_v40 }
 0xfc6   : > { %12776 = vmatmul.mubr.msk.bf16.vlgmr.msra.gmra.mxu0 %vm1619_vm2, %v15831_v18  ;;  %12779 = vmatprep.subr.bf16.mxu1 %v13794_v1 }
 0xfc7   : > { %12787 = vmatprep.mubr.msk.bf16.mxu0 %vm13795_vm0, %v13794_v1 }
 0xfc8   : > { %12770 = vmatmul.mubr.msk.bf16.vlgmr.msra.gmra.mxu1 %vm1619_vm2, %v15831_v18  ;;  %v16188_v18 = vld [vmem:[%s16628_s2] sm:$0xff]  }
 0xfc9   : > { %12781 = vmatprep.mubr.msk.bf16.mxu1 %vm13795_vm0, %v13794_v1 }
 0xfcb   : > { %v12753_v22 = vpop.f32.mrf.mxu0  ;;  %v12737_v26 = vpop.f32.mrf.mxu1 }
 0xfcd   : > { %v8207_v55 = vpop.f32.mrf.mxu0  ;;  %v8109_v42 = vpop.f32.mrf.mxu1 }
 0xfcf   : > { %v12754_v24 = vpop.f32.mrf.mxu0  ;;  %v12738_v19 = vpop.f32.mrf.mxu1 }
 0xfd0   : > { %v8233_v56 = vpack.c.bf16 %v12754_v24, %v12753_v22  ;;  %v8227_v5 = vpack.c.bf16 %v12738_v19, %v12737_v26 }
 0xfd1   : > { %v8210_v47 = vpop.f32.mrf.mxu0  ;;  %v8112_v60 = vpop.f32.mrf.mxu1 }
 0xfd2   : > { %v8232_v53 = vpack.c.bf16 %v8210_v47, %v8207_v55  ;;  %12786 = vmatpush3.bf16.msra.mxu0 %v8233_v56  ;;  %v8226_v28 = vpack.c.bf16 %v8112_v60, %v8109_v42  ;;  %v11058_v60 = vld [vmem:[%s16636_s10 + $0x4] ss:$0 sm:$0xff] }
 0xfd3   : > { %12797 = vmatprep.subr.bf16.mxu0 %v13794_v1 }
 0xfd4   : > { %12780 = vmatpush3.bf16.msra.mxu1 %v8232_v53 }
 0xfd5   : > { %12788 = vmatmul.mubr.msk.bf16.vlgmr.msra.gmra.mxu0 %vm1619_vm2, %v16188_v18  ;;  %12791 = vmatprep.subr.bf16.mxu1 %v13794_v1 }
 0xfd6   : > { %12798 = vmatpush3.bf16.msra.mxu0 %v8223_v12  ;;  %12799 = vmatprep.mubr.msk.bf16.mxu0 %vm13795_vm0, %v13794_v1 }
 0xfd7   : > { %12782 = vmatmul.mubr.msk.bf16.vlgmr.msra.gmra.mxu1 %vm1619_vm2, %v16188_v18  ;;  %12809 = vmatprep.subr.bf16.mxu0 %v13794_v1 }
 0xfd8   : > { %12792 = vmatpush3.bf16.msra.mxu1 %v8222_v63  ;;  %12793 = vmatprep.mubr.msk.bf16.mxu1 %vm13795_vm0, %v13794_v1 }
 0xfd9   : > { %12803 = vmatprep.subr.bf16.mxu1 %v13794_v1 }
 0xfdd   : > { %12800 = vmatmul.mubr.msk.bf16.vlgmr.msra.gmra.mxu0 %vm1619_vm2, %v15885_v57 }
 0xfde   : > { %12810 = vmatpush3.bf16.msra.mxu0 %v8225_v38  ;;  %12811 = vmatprep.mubr.msk.bf16.mxu0 %vm13795_vm0, %v13794_v1 }
 0xfdf   : > { %12794 = vmatmul.mubr.msk.bf16.vlgmr.msra.gmra.mxu1 %vm1619_vm2, %v15885_v57  ;;  %12821 = vmatprep.subr.bf16.mxu0 %v13794_v1 }
 0xfe0   : > { %12804 = vmatpush3.bf16.msra.mxu1 %v8224_v52  ;;  %12805 = vmatprep.mubr.msk.bf16.mxu1 %vm13795_vm0, %v13794_v1 }
 0xfe1   : > { %12815 = vmatprep.subr.bf16.mxu1 %v13794_v1 }
 0xfe5   : > { %12812 = vmatmul.mubr.msk.bf16.vlgmr.msra.gmra.mxu0 %vm1619_vm2, %v15885_v57 }
 0xfe6   : > { %12822 = vmatpush3.bf16.msra.mxu0 %v8227_v5  ;;  %12823 = vmatprep.mubr.msk.bf16.mxu0 %vm13795_vm0, %v13794_v1 }
 0xfe7   : > { %12806 = vmatmul.mubr.msk.bf16.vlgmr.msra.gmra.mxu1 %vm1619_vm2, %v15885_v57  ;;  %12835 = vmatprep.subr.bf16.mxu0 %v13111_v16 }
 0xfe8   : > { %12816 = vmatpush3.bf16.msra.mxu1 %v8226_v28  ;;  %12817 = vmatprep.mubr.msk.bf16.mxu1 %vm13795_vm0, %v13794_v1 }
 0xfe9   : > { %12827 = vmatprep.subr.bf16.mxu1 %v13794_v1 }
 0xfed   : > { %12824 = vmatmul.mubr.msk.bf16.vlgmr.msra.gmra.mxu0 %vm1619_vm2, %v15885_v57 }
 0xfee   : > { %12836 = vmatpush3.bf16.msra.mxu0 %v13111_v16 }
 0xfef   : > { %12818 = vmatmul.mubr.msk.bf16.vlgmr.msra.gmra.mxu1 %vm1619_vm2, %v15885_v57  ;;  %12837 = vmatprep.subr.bf16.mxu0 %v13112_v33  ;;  %v13114_v57 = vld [vmem:[%s16632_s6 + $0x50] sm:$0xff]  }
 0xff0   : > { %12831 = vmatprep.mubr.msk.bf16.mxu1 %vm13795_vm0, %v13794_v1  ;;  %12828 = vmatpush3.bf16.msra.mxu1 %v13113_v51 }
 0xff1   : > { %12829 = vmatprep.subr.bf16.mxu1 %v13794_v1 }
 0xff2   : > { %12838 = vmatpush3.bf16.msra.mxu0 %v13112_v33 }
 0xff4   : > { %12830 = vmatpush3.bf16.msra.mxu1 %v13114_v57 }
 0xff5   : > { %12847 = vmatprep.subr.bf16.mxu1 %v16242_v59 }
0x107e   : > { %v16245_v61 = vpop.f32.mrf.mxu0 }
0x1080   : > { %v8268_v54 = vpop.f32.mrf.mxu1  ;;  %v12765_v9 = vpop.f32.mrf.mxu0 }
0x1082   : > { %v12759_v50 = vpop.f32.mrf.mxu1  ;;  %v16247_v62 = vpop.f32.mrf.mxu0 }
0x1084   : > { %v8271_v0 = vpop.f32.mrf.mxu1  ;;  %v12766_v41 = vpop.f32.mrf.mxu0 }
0x1086   : > { %v12760_v48 = vpop.f32.mrf.mxu1  ;;  %v8391_v10 = vpop.f32.mrf.mxu0 }
0x1088   : > { %v8350_v13 = vpop.f32.mrf.mxu1  ;;  %v12777_v27 = vpop.f32.mrf.mxu0 }
0x108a   : > { %v12771_v39 = vpop.f32.mrf.mxu1  ;;  %v8394_v20 = vpop.f32.mrf.mxu0 }
0x108c   : > { %v8353_v4 = vpop.f32.mrf.mxu1  ;;  %v12778_v45 = vpop.f32.mrf.mxu0 }
0x108e   : > { %v12772_v2 = vpop.f32.mrf.mxu1 }
0x1095   : > { %v8473_v36 = vpop.f32.mrf.mxu0 }
0x1097   : > { %v8432_v49 = vpop.f32.mrf.mxu1  ;;  %v12789_v8 = vpop.f32.mrf.mxu0 }
0x1099   : > { %v12783_v23 = vpop.f32.mrf.mxu1  ;;  %v8476_v58 = vpop.f32.mrf.mxu0 }
0x109b   : > { %v8435_v30 = vpop.f32.mrf.mxu1  ;;  %v12790_v40 = vpop.f32.mrf.mxu0 }
0x109d   : > { %v12784_v34 = vpop.f32.mrf.mxu1  ;;  %v8555_v37 = vpop.f32.mrf.mxu0 }
0x109f   : > { %v8514_v22 = vpop.f32.mrf.mxu1  ;;  %v12801_v55 = vpop.f32.mrf.mxu0 }
0x10a1   : > { %v12795_v29 = vpop.f32.mrf.mxu1  ;;  %v8558_v24 = vpop.f32.mrf.mxu0 }
0x10a3   : > { %v8517_v56 = vpop.f32.mrf.mxu1  ;;  %v12802_v47 = vpop.f32.mrf.mxu0 }
0x10a4   : > { %v8518_v57 = vadd.f32 %v8517_v56, %v8271_v0 }
0x10a5   : > { %v12796_v53 = vpop.f32.mrf.mxu1  ;;  %v8637_v21 = vpop.f32.mrf.mxu0 }
0x10a6   : > { %v8638_v42 = vadd.f32 %v8637_v21, %v8391_v10 }
0x10a7   : > { %v8596_v12 = vpop.f32.mrf.mxu1  ;;  %v12813_v63 = vpop.f32.mrf.mxu0 }
0x10a8   : > { %v8597_v26 = vadd.f32 %v8596_v12, %v8350_v13  ;;  %v8740_v9 = vadd.f32 %v11058_v60, %v8638_v42  ;;  %v8515_v13 = vadd.f32 %v8514_v22, %v8268_v54 }
0x10a9   : > { %v12807_v38 = vpop.f32.mrf.mxu1  ;;  %v8640_v52 = vpop.f32.mrf.mxu0 }
0x10aa   : > { %v8641_v19 = vadd.f32 %v8640_v52, %v8394_v20  ;;  %v8738_v16 = vadd.f32 %v11058_v60, %v8597_v26  ;;  %v16262_v0 = vadd.f32 %v8740_v9, %v15994_v35  ;;  %v8734_v34 = vadd.f32 %v11058_v60, %v8515_v13 }
0x10ab   : > { %v8599_v5 = vpop.f32.mrf.mxu1  ;;  %v12814_v28 = vpop.f32.mrf.mxu0 }
0x10ac   : > { %v8741_v33 = vadd.f32 %v11058_v60, %v8641_v19  ;;  %v8600_v51 = vadd.f32 %v8599_v5, %v8353_v4  ;;  %v16256_v45 = vadd.f32 %v8738_v16, %v15991_v46  ;;  %v8735_v4 = vadd.f32 %v11058_v60, %v8518_v57  ;;  %v11089_v57 = vld [vmem:[%s16631_s5 + $0x5] ss:$0 sm:$0xff] }
0x10ad   : > { %v12808_v50 = vpop.f32.mrf.mxu1  ;;  %v8719_v41 = vpop.f32.mrf.mxu0 }
0x10ae   : > { %v8739_v48 = vadd.f32 %v11058_v60, %v8600_v51  ;;  %v8720_v27 = vadd.f32 %v8719_v41, %v8473_v36  ;;  %v16253_v10 = vadd.f32 %v8741_v33, %v16000_v17  ;;  %v8747_v35 = vadd.f32 %v8735_v4, %v15975_v44 }
0x10af   : > { %v8678_v39 = vpop.f32.mrf.mxu1  ;;  %v12825_v20 = vpop.f32.mrf.mxu0 }
0x10b0   : > { %v16259_v2 = vadd.f32 %v8739_v48, %v15997_v7  ;;  %v8679_v8 = vadd.f32 %v8678_v39, %v8432_v49  ;;  %v8744_v17 = vadd.f32 %v11058_v60, %v8720_v27  ;;  %v8761_v46 = vpack.c.bf16 %v16253_v10, %v16262_v0 }
0x10b1   : > { %v12819_v23 = vpop.f32.mrf.mxu1  ;;  %v8722_v40 = vpop.f32.mrf.mxu0  ;;  %v8559_v7 = vadd.f32 %v8558_v24, %v16247_v62  ;;  %v8746_v62 = vadd.f32 %v8734_v34, %v15969_v43 }
0x10b2   : > { %v8760_v54 = vpack.c.bf16 %v16259_v2, %v16256_v45  ;;  %v8723_v36 = vadd.f32 %v8722_v40, %v8476_v58  ;;  %v8742_v49 = vadd.f32 %v11058_v60, %v8679_v8  ;;  %v8556_v58 = vadd.f32 %v8555_v37, %v16245_v61 }
0x10b3   : > { %v8681_v22 = vpop.f32.mrf.mxu1  ;;  %v12826_v55 = vpop.f32.mrf.mxu0  ;;  %v16274_v53 = vadd.f32 %v8744_v17, %v16020_v25  ;;  %v8737_v24 = vadd.f32 %v11058_v60, %v8559_v7  ;;  %v13116_v25 = vld [vmem:[%s16629_s3 + $0x50] sm:$0xff]   ;;  %v8758_v61 = vpack.c.bf16 %v8747_v35, %v8746_v62 }
0x10b4   : > { %v8745_v29 = vadd.f32 %v11058_v60, %v8723_v36  ;;  %v8682_v56 = vadd.f32 %v8681_v22, %v8435_v30  ;;  %12839 = vmatprep.mubr.msk.bf16.mxu0 %vm562_vm1, %v8760_v54  ;;  %v16281_v30 = vadd.f32 %v8742_v49, %v16017_v14 }
0x10b5   : > { %12840 = vmatmul.mubr.msk.bf16.vlgmr.msra.gmra.mxu0 %vm562_vm1, %v8761_v46  ;;  %v12820_v47 = vpop.f32.mrf.mxu1  ;;  %v8749_v43 = vadd.f32 %v8737_v24, %v15978_v15  ;;  %v11064_v15 = vld [vmem:[%s16633_s7 + $0x5] ss:$0 sm:$0xff] }
0x10b6   : > { %v16277_v21 = vadd.f32 %v8745_v29, %v16026_v11  ;;  %v8743_v12 = vadd.f32 %v11058_v60, %v8682_v56  ;;  %v8736_v11 = vadd.f32 %v11058_v60, %v8556_v58 }
0x10b8   : > { %v8763_v44 = vpack.c.bf16 %v16277_v21, %v16274_v53  ;;  %v16286_v63 = vadd.f32 %v8743_v12, %v16023_v31  ;;  %v8748_v14 = vadd.f32 %v8736_v11, %v15972_v32 }
0x10ba   : > { %v8762_v37 = vpack.c.bf16 %v16286_v63, %v16281_v30  ;;  %12832 = vmatmul.mubr.msk.bf16.vlgmr.msra.gmra.mxu1 %vm562_vm1, %v8763_v44  ;;  %v8759_v31 = vpack.c.bf16 %v8749_v43, %v8748_v14 }
0x10bb   : > { %12848 = vmatpush3.bf16.msra.mxu1 %v16242_v59  ;;  %12851 = vmatprep.mubr.msk.bf16.mxu1 %vm562_vm1, %v8758_v61 }
0x10bc   : > { %12843 = vmatprep.mubr.msk.bf16.mxu0 %vm562_vm1, %v8762_v37  ;;  %12849 = vmatprep.subr.bf16.mxu1 %v13116_v25 }
0x10bd   : > { %12844 = vmatmul.mubr.msk.bf16.gmra.mxu0 %vm562_vm1, %v8763_v44 }
0x10bf   : > { %12850 = vmatpush3.bf16.msra.mxu1 %v13116_v25 }
0x10c2   : > { %12852 = vmatmul.mubr.msk.bf16.vlgmr.msra.gmra.mxu1 %vm562_vm1, %v8759_v31 }
0x10c3   : > { %12855 = vmatprep.mubr.msk.bf16.mxu1 %vm562_vm1, %v8760_v54 }
0x10ca   : > { %12856 = vmatmul.mubr.msk.bf16.gmra.mxu1 %vm562_vm1, %v8761_v46 }
0x1175   : > { %v12841_v59 = vpop.f32.mrf.mxu0 }
0x1177   : > { %v8900_v26 = vpop.f32.mrf.mxu0 }
0x1179   : > { %v12842_v52 = vpop.f32.mrf.mxu0 }
0x117a   : > { %v8826_v42 = vpop.f32.mrf.mxu1 }
0x117b   : > { %v8827_v38 = vadd.f32 %v11064_v15, %v8826_v42  ;;  %v8903_v28 = vpop.f32.mrf.mxu0 }
0x117c   : > { %v12833_v19 = vpop.f32.mrf.mxu1 }
0x117d   : > { %v16307_v32 = vadd.f32 %v8827_v38, %v16052_v3  ;;  %v12845_v50 = vpop.f32.mrf.mxu0  ;;  %v13118_v19 = vld [vmem:[%s16635_s9 + $0x58] sm:$0xff]  }
0x117e   : > { %v8829_v60 = vpop.f32.mrf.mxu1  ;;  %12871 = vmatprep.subr.bf16.mxu1 %v13118_v19 }
0x117f   : > { %v8830_v5 = vadd.f32 %v11064_v15, %v8829_v60  ;;  %v8916_v8 = vpop.f32.mrf.mxu0  ;;  %12872 = vmatpush3.bf16.msra.mxu1 %v13118_v19 }
0x1180   : > { %v12834_v16 = vpop.f32.mrf.mxu1 }
0x1181   : > { %v16310_v33 = vadd.f32 %v8830_v5, %v16055_v6  ;;  %v12846_v46 = vpop.f32.mrf.mxu0 }
0x1182   : > { %v12853_v51 = vpop.f32.mrf.mxu1 }
0x1183   : > { %v8992_v9 = vadd.f32 %v12853_v51, %v12841_v59  ;;  %v8919_v58 = vpop.f32.mrf.mxu0  ;;  %v13119_v51 = vld [vmem:[%s16634_s8 + $0x50] sm:$0xff]  }
0x1184   : > { %v8983_v41 = vpop.f32.mrf.mxu1 }
0x1185   : > { %v16315_v48 = vadd.f32 %v11089_v57, %v8992_v9  ;;  %v8984_v27 = vadd.f32 %v8983_v41, %v8900_v26 }
0x1186   : > { %v12854_v3 = vpop.f32.mrf.mxu1 }
0x1187   : > { %v11092_v13 = vmul.f32 -1.442695, %v16315_v48  ;;  %v16318_v39 = vadd.f32 %v11089_v57, %v8984_v27  ;;  %v8995_v20 = vadd.f32 %v12854_v3, %v12842_v52  ;;  %v13117_v52 = vld [vmem:[%s16634_s8 + $0x58] sm:$0xff]  }
0x1188   : > { %v8986_v6 = vpop.f32.mrf.mxu1  ;;  %12859 = vmatprep.subr.bf16.mxu0 %v13117_v52 }
0x1189   : > { %v11090_v4 = vmul.f32 -1.442695, %v16318_v39  ;;  %v16321_v23 = vadd.f32 %v11089_v57, %v8995_v20  ;;  %v8987_v40 = vadd.f32 %v8986_v6, %v8903_v28  ;;  %13669 = vpow2.f32 %v11092_v13  ;;  %12860 = vmatpush3.bf16.msra.mxu0 %v13117_v52 }
0x118a   : > { %v12857_v54 = vpop.f32.mrf.mxu1  ;;  %12861 = vmatprep.subr.bf16.mxu0 %v13119_v51 }
0x118b   : > { %13671 = vpow2.f32 %v11090_v4  ;;  %v11093_v17 = vmul.f32 -1.442695, %v16321_v23  ;;  %v16324_v36 = vadd.f32 %v11089_v57, %v8987_v40  ;;  %v9008_v34 = vadd.f32 %v12857_v54, %v12845_v50 }
0x118c   : > { %v8999_v22 = vpop.f32.mrf.mxu1 }
0x118d   : > { %v11091_v55 = vmul.f32 -1.442695, %v16324_v36  ;;  %v16327_v7 = vadd.f32 %v11089_v57, %v9008_v34  ;;  %v9000_v49 = vadd.f32 %v8999_v22, %v8916_v8  ;;  %13673 = vpow2.f32 %v11093_v17  ;;  %12862 = vmatpush3.bf16.msra.mxu0 %v13119_v51 }
0x118e   : > { %v12858_v29 = vpop.f32.mrf.mxu1  ;;  %12883 = vmatprep.subr.bf16.mxu0 %v13794_v1 }
0x118f   : > { %13675 = vpow2.f32 %v11091_v55  ;;  %v11096_v56 = vmul.f32 -1.442695, %v16327_v7  ;;  %v16330_v35 = vadd.f32 %v11089_v57, %v9000_v49  ;;  %v9011_v47 = vadd.f32 %v12858_v29, %v12846_v46 }
0x1190   : > { %v9002_v12 = vpop.f32.mrf.mxu1 }
0x1191   : > { %v11094_v62 = vmul.f32 -1.442695, %v16330_v35  ;;  %v16333_v24 = vadd.f32 %v11089_v57, %v9011_v47  ;;  %v9003_v44 = vadd.f32 %v9002_v12, %v8919_v58  ;;  %13677 = vpow2.f32 %v11096_v56 }
0x1193   : > { %13679 = vpow2.f32 %v11094_v62  ;;  %v11097_v25 = vmul.f32 -1.442695, %v16333_v24  ;;  %v9027_v61 = vadd.f32 %v11089_v57, %v9003_v44  ;;  %v13120_v57 = vld [vmem:[%s16635_s9 + $0x50] sm:$0xff]  }
0x1194   : > { %12873 = vmatprep.subr.bf16.mxu1 %v13120_v57 }
0x1195   : > { %v11095_v11 = vmul.f32 -1.442695, %v9027_v61  ;;  %13681 = vpow2.f32 %v11097_v25  ;;  %12874 = vmatpush3.bf16.msra.mxu1 %v13120_v57 }
0x1196   : > { %v13670_v37 = vpop.eup %13669  ;;  %12889 = vmatprep.subr.bf16.mxu1 %v13794_v1 }
0x1197   : > { %13683 = vpow2.f32 %v11095_v11  ;;  %v9064_v31 = vadd.f32 1.0, %v13670_v37 }
0x1198   : > { %v13672_v43 = vpop.eup %13671 }
0x1199   : > { %v9062_v14 = vadd.f32 1.0, %v13672_v43 }
0x119a   : > { %v13674_v59 = vpop.eup %13673 }
0x119b   : > { %13685 = vrcp.f32 %v9062_v14  ;;  %v9065_v42 = vadd.f32 1.0, %v13674_v59 }
0x119c   : > { %v13676_v26 = vpop.eup %13675  ;;  %13687 = vrcp.f32 %v9064_v31 }
0x119d   : > { %v9063_v15 = vadd.f32 1.0, %v13676_v26 }
0x119e   : > { %v13678_v38 = vpop.eup %13677 }
0x119f   : > { %13689 = vrcp.f32 %v9063_v15  ;;  %v9068_v28 = vadd.f32 1.0, %v13678_v38 }
0x11a0   : > { %v13680_v60 = vpop.eup %13679  ;;  %13691 = vrcp.f32 %v9065_v42 }
0x11a1   : > { %v9066_v5 = vadd.f32 1.0, %v13680_v60 }
0x11a2   : > { %v13682_v16 = vpop.eup %13681 }
0x11a3   : > { %13693 = vrcp.f32 %v9066_v5  ;;  %v9069_v41 = vadd.f32 1.0, %v13682_v16 }
0x11a4   : > { %v13684_v9 = vpop.eup %13683  ;;  %13695 = vrcp.f32 %v9068_v28 }
0x11a5   : > { %v9067_v50 = vadd.f32 1.0, %v13684_v9 }
0x11a7   : > { %13697 = vrcp.f32 %v9067_v50 }
0x11a8   : > { %v13686_v27 = vpop.eup %13685  ;;  %13699 = vrcp.f32 %v9069_v41 }
0x11a9   : > { %9094 = vrot.lane.b32.xlu0 %v13686_v27, %s13796_s21  ;;  %v13688_v3 = vpop.eup %13687  ;;  %13701 = vtanh.f32 %v16318_v39 }
0x11aa   : > { %13703 = vtanh.f32 %v16324_v36 }
0x11ab   : > { %13705 = vtanh.f32 %v16315_v48 }
0x11ac   : > { %v13690_v13 = vpop.eup %13689  ;;  %13707 = vtanh.f32 %v16321_v23 }
0x11ad   : > { %9096 = vrot.lane.b32.xlu1 %v13690_v13, %s13796_s21  ;;  %9098 = vrot.lane.b32.xlu0 %v13688_v3, %s13796_s21  ;;  %v13692_v20 = vpop.eup %13691  ;;  %13709 = vtanh.f32 %v16330_v35 }
0x11ae   : > { %13711 = vtanh.f32 %v9027_v61 }
0x11af   : > { %13713 = vtanh.f32 %v16327_v7 }
0x11b0   : > { %v13694_v8 = vpop.eup %13693  ;;  %13715 = vtanh.f32 %v16333_v24 }
0x11b1   : > { %9100 = vrot.lane.b32.xlu1 %v13692_v20, %s13796_s21  ;;  %9102 = vrot.lane.b32.xlu0 %v13694_v8, %s13796_s21  ;;  %v13696_v6 = vpop.eup %13695 }
0x11b4   : > { %v13698_v4 = vpop.eup %13697 }
0x11b5   : > { %9104 = vrot.lane.b32.xlu1 %v13698_v4, %s13796_s21  ;;  %9106 = vrot.lane.b32.xlu0 %v13696_v6, %s13796_s21  ;;  %v13700_v40 = vpop.eup %13699 }
0x11b6   : > { %v13702_v17 = vpop.eup %13701 }
0x11b7   : > { %v13704_v34 = vpop.eup %13703 }
0x11b8   : > { %v13706_v49 = vpop.eup %13705 }
0x11b9   : > { %9108 = vrot.lane.b32.xlu1 %v13700_v40, %s13796_s21  ;;  %v13708_v29 = vpop.eup %13707  ;;  %v16402_v40 = vld [vmem:[%s16627_s1] sm:$0xff]  }
0x11ba   : > { %v13710_v7 = vpop.eup %13709 }
0x11bb   : > { %v13712_v58 = vpop.eup %13711 }
0x11bc   : > { %v13714_v25 = vpop.eup %13713 }
0x11bd   : > { %v13716_v11 = vpop.eup %13715 }
0x121b   : > { %v9095_v54 = vpop.permute.xlu0 %9094 }
0x121c   : > { %v9118_v55 = vmul.f32 %v13702_v17, %v9095_v54  ;;  %v13122_v17 = vld [vmem:[%s16630_s4 + $0x60] sm:$0xff]  }
0x121f   : > { %v9097_v46 = vpop.permute.xlu1 %9096  ;;  %v9099_v22 = vpop.permute.xlu0 %9098 }
0x1220   : > { %v9119_v39 = vmul.f32 %v13704_v34, %v9097_v46  ;;  %v9120_v23 = vmul.f32 %v13706_v49, %v9099_v22  ;;  %v13123_v34 = vld [vmem:[%s16632_s6 + $0x68] sm:$0xff]   ;;  %v13124_v46 = vld [vmem:[%s16632_s6 + $0x60] sm:$0xff]  }
0x1222   : > { %v9126_v36 = vpack.c.bf16 %v9119_v39, %v9118_v55 }
0x1223   : > { %v9101_v48 = vpop.permute.xlu1 %9100  ;;  %v9103_v56 = vpop.permute.xlu0 %9102 }
0x1224   : > { %v9121_v47 = vmul.f32 %v13708_v29, %v9101_v48  ;;  %12863 = vmatprep.mubr.msk.bf16.mxu0 %vm562_vm1, %v9126_v36  ;;  %12875 = vmatprep.mubr.msk.bf16.mxu1 %vm562_vm1, %v9126_v36  ;;  %v9122_v62 = vmul.f32 %v13710_v7, %v9103_v56 }
0x1226   : > { %v9127_v35 = vpack.c.bf16 %v9121_v47, %v9120_v23 }
0x1227   : > { %v9105_v12 = vpop.permute.xlu1 %9104  ;;  %v9107_v44 = vpop.permute.xlu0 %9106 }
0x1228   : > { %v9123_v24 = vmul.f32 %v13712_v58, %v9105_v12  ;;  %12864 = vmatmul.mubr.msk.bf16.vlgmr.msra.gmra.mxu0 %vm562_vm1, %v9127_v35  ;;  %12876 = vmatmul.mubr.msk.bf16.vlgmr.msra.gmra.mxu1 %vm562_vm1, %v9127_v35  ;;  %v9124_v43 = vmul.f32 %v13714_v25, %v9107_v44 }
0x122a   : > { %v9128_v61 = vpack.c.bf16 %v9123_v24, %v9122_v62 }
0x122b   : > { %v9109_v37 = vpop.permute.xlu1 %9108 }
0x122c   : > { %v9125_v14 = vmul.f32 %v13716_v11, %v9109_v37  ;;  %12867 = vmatprep.mubr.msk.bf16.mxu0 %vm562_vm1, %v9128_v61  ;;  %12879 = vmatprep.mubr.msk.bf16.mxu1 %vm562_vm1, %v9128_v61  ;;  %v11127_v61 = vld [vmem:[%s16636_s10 + $0x5] ss:$0 sm:$0xff] }
0x122e   : > { %v9129_v31 = vpack.c.bf16 %v9125_v14, %v9124_v43 }
0x1230   : > { %12868 = vmatmul.mubr.msk.bf16.gmra.mxu0 %vm562_vm1, %v9129_v31  ;;  %12880 = vmatmul.mubr.msk.bf16.gmra.mxu1 %vm562_vm1, %v9129_v31 }
0x1231   : > { %12891 = vmatprep.mubr.msk.bf16.mxu1 %vm13795_vm0, %v13794_v1  ;;  %12885 = vmatprep.mubr.msk.bf16.mxu0 %vm13795_vm0, %v13794_v1 }
0x12e8   : > { %v12865_v59 = vpop.f32.mrf.mxu0  ;;  %v12877_v26 = vpop.f32.mrf.mxu1 }
0x12ea   : > { %v9193_v15 = vpop.f32.mrf.mxu0  ;;  %v9275_v42 = vpop.f32.mrf.mxu1 }
0x12ec   : > { %v12866_v38 = vpop.f32.mrf.mxu0  ;;  %v12878_v52 = vpop.f32.mrf.mxu1 }
0x12ed   : > { %v9311_v19 = vpack.c.bf16 %v12878_v52, %v12877_v26  ;;  %v9307_v13 = vpack.c.bf16 %v12866_v38, %v12865_v59 }
0x12ee   : > { %v9278_v60 = vpop.f32.mrf.mxu1  ;;  %v9196_v28 = vpop.f32.mrf.mxu0 }
0x12ef   : > { %v9310_v5 = vpack.c.bf16 %v9278_v60, %v9275_v42  ;;  %12890 = vmatpush3.bf16.msra.mxu1 %v9311_v19  ;;  %v9306_v20 = vpack.c.bf16 %v9196_v28, %v9193_v15 }
0x12f0   : > { %v12881_v16 = vpop.f32.mrf.mxu1  ;;  %12901 = vmatprep.subr.bf16.mxu1 %v13794_v1  ;;  %v12869_v57 = vpop.f32.mrf.mxu0 }
0x12f1   : > { %12884 = vmatpush3.bf16.msra.mxu0 %v9310_v5 }
0x12f2   : > { %v9291_v51 = vpop.f32.mrf.mxu1  ;;  %12892 = vmatmul.mubr.msk.bf16.vlgmr.msra.gmra.mxu1 %vm1619_vm2, %v16188_v18  ;;  %12895 = vmatprep.subr.bf16.mxu0 %v13794_v1  ;;  %v9209_v3 = vpop.f32.mrf.mxu0 }
0x12f3   : > { %12903 = vmatprep.mubr.msk.bf16.mxu1 %vm13795_vm0, %v13794_v1 }
0x12f4   : > { %v12882_v9 = vpop.f32.mrf.mxu1  ;;  %12886 = vmatmul.mubr.msk.bf16.vlgmr.msra.gmra.mxu0 %vm1619_vm2, %v16188_v18  ;;  %v12870_v8 = vpop.f32.mrf.mxu0 }
0x12f5   : > { %v9313_v50 = vpack.c.bf16 %v12882_v9, %v12881_v16  ;;  %12897 = vmatprep.mubr.msk.bf16.mxu0 %vm13795_vm0, %v13794_v1  ;;  %v9309_v4 = vpack.c.bf16 %v12870_v8, %v12869_v57 }
0x12f6   : > { %v9294_v41 = vpop.f32.mrf.mxu1  ;;  %v9212_v6 = vpop.f32.mrf.mxu0 }
0x12f7   : > { %v9312_v27 = vpack.c.bf16 %v9294_v41, %v9291_v51  ;;  %12902 = vmatpush3.bf16.msra.mxu1 %v9313_v50  ;;  %v9308_v54 = vpack.c.bf16 %v9212_v6, %v9209_v3 }
0x12f8   : > { %12913 = vmatprep.subr.bf16.mxu1 %v13794_v1 }
0x12f9   : > { %12896 = vmatpush3.bf16.msra.mxu0 %v9312_v27 }
0x12fa   : > { %12904 = vmatmul.mubr.msk.bf16.vlgmr.msra.gmra.mxu1 %vm1619_vm2, %v16188_v18  ;;  %12907 = vmatprep.subr.bf16.mxu0 %v13794_v1 }
0x12fb   : > { %12914 = vmatpush3.bf16.msra.mxu1 %v9307_v13  ;;  %12915 = vmatprep.mubr.msk.bf16.mxu1 %vm13795_vm0, %v13794_v1 }
0x12fc   : > { %12898 = vmatmul.mubr.msk.bf16.vlgmr.msra.gmra.mxu0 %vm1619_vm2, %v16188_v18  ;;  %12925 = vmatprep.subr.bf16.mxu1 %v13794_v1  ;;  %v13121_v18 = vld [vmem:[%s16630_s4 + $0x68] sm:$0xff]  }
0x12fd   : > { %12908 = vmatpush3.bf16.msra.mxu0 %v9306_v20  ;;  %12909 = vmatprep.mubr.msk.bf16.mxu0 %vm13795_vm0, %v13794_v1 }
0x12fe   : > { %12919 = vmatprep.subr.bf16.mxu0 %v13794_v1 }
0x1302   : > { %12916 = vmatmul.mubr.msk.bf16.vlgmr.msra.gmra.mxu1 %vm1619_vm2, %v16402_v40 }
0x1303   : > { %12926 = vmatpush3.bf16.msra.mxu1 %v9309_v4  ;;  %12927 = vmatprep.mubr.msk.bf16.mxu1 %vm13795_vm0, %v13794_v1 }
0x1304   : > { %12910 = vmatmul.mubr.msk.bf16.vlgmr.msra.gmra.mxu0 %vm1619_vm2, %v16402_v40  ;;  %12939 = vmatprep.subr.bf16.mxu1 %v13794_v1 }
0x1305   : > { %12920 = vmatpush3.bf16.msra.mxu0 %v9308_v54  ;;  %12921 = vmatprep.mubr.msk.bf16.mxu0 %vm13795_vm0, %v13794_v1 }
0x1306   : > { %12931 = vmatprep.subr.bf16.mxu0 %v13794_v1 }
0x130a   : > { %12928 = vmatmul.mubr.msk.bf16.vlgmr.msra.gmra.mxu1 %vm1619_vm2, %v16402_v40 }
0x130b   : > { %12943 = vmatprep.mubr.msk.bf16.mxu1 %vm13795_vm0, %v13794_v1  ;;  %12940 = vmatpush3.bf16.msra.mxu1 %v13121_v18 }
0x130c   : > { %12922 = vmatmul.mubr.msk.bf16.vlgmr.msra.gmra.mxu0 %vm1619_vm2, %v16402_v40  ;;  %12941 = vmatprep.subr.bf16.mxu1 %v13794_v1 }
0x130d   : > { %12935 = vmatprep.mubr.msk.bf16.mxu0 %vm13795_vm0, %v13794_v1  ;;  %12932 = vmatpush3.bf16.msra.mxu0 %v13123_v34  ;;  %v13125_v34 = vld [vmem:[%s16629_s3 + $0x68] sm:$0xff]  }
0x130e   : > { %12933 = vmatprep.subr.bf16.mxu0 %v13794_v1 }
0x130f   : > { %12942 = vmatpush3.bf16.msra.mxu1 %v13122_v17 }
0x1310   : > { %12971 = vmatprep.subr.bf16.mxu1 %v13794_v1 }
0x1311   : > { %12934 = vmatpush3.bf16.msra.mxu0 %v13124_v46 }
0x1312   : > { %12955 = vmatprep.subr.bf16.mxu0 %v13794_v1 }
0x13b2   : > { %v9389_v22 = vpop.f32.mrf.mxu1 }
0x13b4   : > { %v9348_v55 = vpop.f32.mrf.mxu0  ;;  %v12893_v39 = vpop.f32.mrf.mxu1 }
0x13b6   : > { %v12887_v49 = vpop.f32.mrf.mxu0  ;;  %v9392_v36 = vpop.f32.mrf.mxu1 }
0x13b8   : > { %v9351_v29 = vpop.f32.mrf.mxu0  ;;  %v12894_v48 = vpop.f32.mrf.mxu1 }
0x13ba   : > { %v12888_v56 = vpop.f32.mrf.mxu0  ;;  %v9471_v23 = vpop.f32.mrf.mxu1 }
0x13bb   : > { %v11133_v56 = vld [vmem:[%s16633_s7 + $0x6] ss:$0 sm:$0xff] }
0x13bc   : > { %v9430_v47 = vpop.f32.mrf.mxu0  ;;  %v12905_v7 = vpop.f32.mrf.mxu1 }
0x13be   : > { %v12899_v35 = vpop.f32.mrf.mxu0  ;;  %v9474_v58 = vpop.f32.mrf.mxu1 }
0x13c0   : > { %v9433_v12 = vpop.f32.mrf.mxu0  ;;  %v12906_v62 = vpop.f32.mrf.mxu1 }
0x13c2   : > { %v12900_v24 = vpop.f32.mrf.mxu0  ;;  %v9553_v44 = vpop.f32.mrf.mxu1 }
0x13c3   : > { %v9554_v25 = vadd.f32 %v9553_v44, %v9389_v22 }
0x13c4   : > { %v9512_v11 = vpop.f32.mrf.mxu0  ;;  %v12917_v37 = vpop.f32.mrf.mxu1 }
0x13c5   : > { %v9652_v31 = vadd.f32 %v11127_v61, %v9554_v25  ;;  %v9513_v4 = vadd.f32 %v9512_v11, %v9348_v55 }
0x13c6   : > { %v12911_v43 = vpop.f32.mrf.mxu0  ;;  %v9556_v14 = vpop.f32.mrf.mxu1 }
0x13c7   : > { %v9557_v59 = vadd.f32 %v9556_v14, %v9392_v36  ;;  %v9660_v19 = vadd.f32 %v9652_v31, %v16262_v0  ;;  %v9650_v55 = vadd.f32 %v11127_v61, %v9513_v4  ;;  %v11156_v43 = vld [vmem:[%s16631_s5 + $0x6] ss:$0 sm:$0xff] }
0x13c8   : > { %v9515_v26 = vpop.f32.mrf.mxu0  ;;  %v12918_v15 = vpop.f32.mrf.mxu1 }
0x13c9   : > { %v9653_v42 = vadd.f32 %v11127_v61, %v9557_v59  ;;  %v9516_v20 = vadd.f32 %v9515_v26, %v9351_v29 }
0x13ca   : > { %v12912_v38 = vpop.f32.mrf.mxu0  ;;  %v9635_v52 = vpop.f32.mrf.mxu1 }
0x13cb   : > { %v9661_v60 = vadd.f32 %v9653_v42, %v16253_v10  ;;  %v9636_v5 = vadd.f32 %v9635_v52, %v9471_v23  ;;  %v9651_v46 = vadd.f32 %v11127_v61, %v9516_v20 }
0x13cc   : > { %v9594_v28 = vpop.f32.mrf.mxu0  ;;  %v12929_v16 = vpop.f32.mrf.mxu1 }
0x13cd   : > { %v9667_v51 = vpack.c.bf16 %v9661_v60, %v9660_v19  ;;  %v9595_v57 = vadd.f32 %v9594_v28, %v9430_v47  ;;  %v9656_v41 = vadd.f32 %v11127_v61, %v9636_v5 }
0x13ce   : > { %v12923_v9 = vpop.f32.mrf.mxu0  ;;  %v9638_v50 = vpop.f32.mrf.mxu1 }
0x13cf   : > { %v9639_v27 = vadd.f32 %v9638_v50, %v9474_v58  ;;  %12944 = vmatmul.mubr.msk.bf16.vlgmr.msra.gmra.mxu1 %vm562_vm1, %v9667_v51  ;;  %v9654_v0 = vadd.f32 %v11127_v61, %v9595_v57  ;;  %v16447_v54 = vadd.f32 %v9656_v41, %v16274_v53  ;;  %v13126_v53 = vld [vmem:[%s16629_s3 + $0x60] sm:$0xff]  }
0x13d0   : > { %v9597_v3 = vpop.f32.mrf.mxu0  ;;  %12947 = vmatprep.mubr.msk.bf16.mxu1 %vm13795_vm0, %v13794_v1  ;;  %v12930_v13 = vpop.f32.mrf.mxu1 }
0x13d1   : > { %v9657_v8 = vadd.f32 %v11127_v61, %v9639_v27  ;;  %v9598_v10 = vadd.f32 %v9597_v3, %v9433_v12  ;;  %v9662_v22 = vadd.f32 %v9654_v0, %v16281_v30  ;;  %v9658_v30 = vadd.f32 %v9650_v55, %v16256_v45  ;;  %v13127_v55 = vld [vmem:[%s16634_s8 + $0x68] sm:$0xff]  }
0x13d2   : > { %v12924_v6 = vpop.f32.mrf.mxu0  ;;  %12972 = vmatpush3.bf16.msra.mxu1 %v13127_v55 }
0x13d3   : > { %v16450_v18 = vadd.f32 %v9657_v8, %v16277_v21  ;;  %v9655_v17 = vadd.f32 %v11127_v61, %v9598_v10  ;;  %v9659_v21 = vadd.f32 %v9651_v46, %v16259_v2  ;;  %12973 = vmatprep.subr.bf16.mxu1 %v13794_v1 }
0x13d5   : > { %v9669_v39 = vpack.c.bf16 %v16450_v18, %v16447_v54  ;;  %v9663_v49 = vadd.f32 %v9655_v17, %v16286_v63  ;;  %v9666_v63 = vpack.c.bf16 %v9659_v21, %v9658_v30 }
0x13d7   : > { %v9668_v36 = vpack.c.bf16 %v9663_v49, %v9662_v22  ;;  %12936 = vmatmul.mubr.msk.bf16.vlgmr.msra.gmra.mxu0 %vm562_vm1, %v9669_v39 }
0x13d8   : > { %12956 = vmatpush3.bf16.msra.mxu0 %v13125_v34  ;;  %12959 = vmatprep.mubr.msk.bf16.mxu0 %vm13795_vm0, %v13794_v1 }
0x13d9   : > { %12948 = vmatmul.mubr.msk.bf16.gmra.mxu1 %vm562_vm1, %v9668_v36  ;;  %12957 = vmatprep.subr.bf16.mxu0 %v13794_v1 }
0x13da   : > { %12951 = vmatprep.mubr.msk.bf16.mxu1 %vm13795_vm0, %v13794_v1 }
0x13dc   : > { %12958 = vmatpush3.bf16.msra.mxu0 %v13126_v53 }
0x13dd   : > { %12987 = vmatprep.subr.bf16.mxu0 %v13794_v1 }
0x13df   : > { %12960 = vmatmul.mubr.msk.bf16.vlgmr.msra.gmra.mxu0 %vm562_vm1, %v9666_v63  ;;  %v13129_v63 = vld [vmem:[%s16634_s8 + $0x60] sm:$0xff]  }
0x13e0   : > { %12963 = vmatprep.mubr.msk.bf16.mxu0 %vm13795_vm0, %v13794_v1  ;;  %12974 = vmatpush3.bf16.msra.mxu1 %v13129_v63 }
0x13e1   : > { %12952 = vmatmul.mubr.msk.bf16.gmra.mxu1 %vm562_vm1, %v9669_v39  ;;  %13003 = vmatprep.subr.bf16.mxu1 %v13794_v1 }
0x13e2   : > { %12975 = vmatprep.mubr.msk.bf16.mxu1 %vm13795_vm0, %v13794_v1 }
0x13e7   : > { %12964 = vmatmul.mubr.msk.bf16.gmra.mxu0 %vm562_vm1, %v9667_v51 }
0x13e8   : > { %12967 = vmatprep.mubr.msk.bf16.mxu0 %vm13795_vm0, %v13794_v1 }
0x13ef   : > { %12968 = vmatmul.mubr.msk.bf16.gmra.mxu0 %vm562_vm1, %v9668_v36  ;;  %v13128_v36 = vld [vmem:[%s16635_s9 + $0x68] sm:$0xff]  }
0x13f0   : > { %12991 = vmatprep.mubr.msk.bf16.mxu0 %vm13795_vm0, %v13794_v1  ;;  %12988 = vmatpush3.bf16.msra.mxu0 %v13128_v36 }
0x13f1   : > { %12989 = vmatprep.subr.bf16.mxu0 %v13794_v1 }
0x148f   : > { %v9803_v45 = vpop.f32.mrf.mxu1 }
0x1491   : > { %v12945_v2 = vpop.f32.mrf.mxu1 }
0x1493   : > { %v9806_v29 = vpop.f32.mrf.mxu1 }
0x1495   : > { %v12946_v48 = vpop.f32.mrf.mxu1 }
0x1497   : > { %v9732_v23 = vpop.f32.mrf.mxu0 }
0x1498   : > { %v9733_v47 = vadd.f32 %v11133_v56, %v9732_v23 }
0x1499   : > { %v12937_v7 = vpop.f32.mrf.mxu0  ;;  %v9811_v35 = vpop.f32.mrf.mxu1 }
0x149a   : > { %v16488_v58 = vadd.f32 %v9733_v47, %v16307_v32 }
0x149b   : > { %v9735_v12 = vpop.f32.mrf.mxu0  ;;  %v12949_v62 = vpop.f32.mrf.mxu1 }
0x149c   : > { %v9736_v24 = vadd.f32 %v11133_v56, %v9735_v12 }
0x149d   : > { %v12938_v44 = vpop.f32.mrf.mxu0  ;;  %v9814_v25 = vpop.f32.mrf.mxu1 }
0x149e   : > { %v16491_v61 = vadd.f32 %v9736_v24, %v16310_v33 }
0x149f   : > { %v12950_v11 = vpop.f32.mrf.mxu1  ;;  %v9875_v37 = vpop.f32.mrf.mxu0 }
0x14a0   : > { %v9876_v14 = vadd.f32 %v9875_v37, %v9803_v45  ;;  %v13130_v45 = vld [vmem:[%s16635_s9 + $0x60] sm:$0xff]  }
0x14a1   : > { %v9819_v31 = vpop.f32.mrf.mxu1  ;;  %v12961_v59 = vpop.f32.mrf.mxu0  ;;  %12990 = vmatpush3.bf16.msra.mxu0 %v13130_v45 }
0x14a2   : > { %v16496_v26 = vadd.f32 %v11156_v43, %v9876_v14  ;;  %13009 = vmatprep.subr.bf16.mxu0 %v13794_v1 }
0x14a3   : > { %v12953_v32 = vpop.f32.mrf.mxu1  ;;  %v9878_v15 = vpop.f32.mrf.mxu0 }
0x14a4   : > { %v11157_v42 = vmul.f32 -1.442695, %v16496_v26  ;;  %v9879_v38 = vadd.f32 %v9878_v15, %v9806_v29 }
0x14a5   : > { %v9822_v52 = vpop.f32.mrf.mxu1  ;;  %v12962_v19 = vpop.f32.mrf.mxu0 }
0x14a6   : > { %13717 = vpow2.f32 %v11157_v42  ;;  %v16499_v33 = vadd.f32 %v11156_v43, %v9879_v38 }
0x14a7   : > { %v12954_v60 = vpop.f32.mrf.mxu1  ;;  %v9883_v5 = vpop.f32.mrf.mxu0 }
0x14a8   : > { %v11158_v28 = vmul.f32 -1.442695, %v16499_v33  ;;  %v9884_v16 = vadd.f32 %v9883_v5, %v9811_v35 }
0x14a9   : > { %v12965_v51 = vpop.f32.mrf.mxu0 }
0x14aa   : > { %13719 = vpow2.f32 %v11158_v28  ;;  %v16502_v57 = vadd.f32 %v11156_v43, %v9884_v16 }
0x14ab   : > { %v9886_v9 = vpop.f32.mrf.mxu0 }
0x14ac   : > { %v11159_v50 = vmul.f32 -1.442695, %v16502_v57  ;;  %v9887_v41 = vadd.f32 %v9886_v9, %v9814_v25 }
0x14ad   : > { %v12966_v27 = vpop.f32.mrf.mxu0 }
0x14ae   : > { %13721 = vpow2.f32 %v11159_v50  ;;  %v9909_v3 = vadd.f32 %v11156_v43, %v9887_v41 }
0x14af   : > { %v9891_v13 = vpop.f32.mrf.mxu0 }
0x14b0   : > { %v11160_v20 = vmul.f32 -1.442695, %v9909_v3  ;;  %v9892_v0 = vadd.f32 %v9891_v13, %v9819_v31 }
0x14b1   : > { %v12969_v8 = vpop.f32.mrf.mxu0 }
0x14b2   : > { %13723 = vpow2.f32 %v11160_v20  ;;  %v9910_v10 = vadd.f32 %v11156_v43, %v9892_v0 }
0x14b3   : > { %v13718_v6 = vpop.eup %13717  ;;  %v9894_v4 = vpop.f32.mrf.mxu0 }
0x14b4   : > { %v9936_v17 = vadd.f32 1.0, %v13718_v6  ;;  %v11161_v34 = vmul.f32 -1.442695, %v9910_v10  ;;  %v9895_v46 = vadd.f32 %v9894_v4, %v9822_v52 }
0x14b5   : > { %v12970_v22 = vpop.f32.mrf.mxu0 }
0x14b6   : > { %13725 = vrcp.f32 %v9936_v17  ;;  %v9911_v39 = vadd.f32 %v11156_v43, %v9895_v46 }
0x14b7   : > { %v13720_v49 = vpop.eup %13719  ;;  %13727 = vpow2.f32 %v11161_v34 }
0x14b8   : > { %v9937_v53 = vadd.f32 1.0, %v13720_v49  ;;  %v11162_v21 = vmul.f32 -1.442695, %v9911_v39 }
0x14ba   : > { %13729 = vrcp.f32 %v9937_v53 }
0x14bb   : > { %v13722_v30 = vpop.eup %13721  ;;  %13731 = vpow2.f32 %v11162_v21 }
0x14bc   : > { %v9938_v2 = vadd.f32 1.0, %v13722_v30 }
0x14be   : > { %13733 = vrcp.f32 %v9938_v2 }
0x14bf   : > { %v13724_v29 = vpop.eup %13723 }
0x14c0   : > { %v9939_v48 = vadd.f32 1.0, %v13724_v29 }
0x14c2   : > { %13735 = vrcp.f32 %v9939_v48  ;;  %v13785_v48 = vld [vmem:[%s16628_s2] sm:$0xff]  }
0x14c3   : > { %v13726_v56 = vpop.eup %13725 }
0x14c4   : > { %v13728_v23 = vpop.eup %13727  ;;  %9960 = vrot.lane.b32.xlu0 %v13726_v56, %s13796_s21  ;;  %v13131_v56 = vld [vmem:[%s16632_s6 + $0x78] sm:$0xff]  }
0x14c5   : > { %v9940_v47 = vadd.f32 1.0, %v13728_v23  ;;  %v13132_v23 = vld [vmem:[%s16632_s6 + $0x70] sm:$0xff]  }
0x14c7   : > { %v13730_v7 = vpop.eup %13729  ;;  %13737 = vrcp.f32 %v9940_v47 }
0x14c8   : > { %v13732_v35 = vpop.eup %13731  ;;  %9962 = vrot.lane.b32.xlu1 %v13730_v7, %s13796_s21 }
0x14c9   : > { %v9941_v12 = vadd.f32 1.0, %v13732_v35 }
0x14cb   : > { %v13734_v62 = vpop.eup %13733  ;;  %13739 = vrcp.f32 %v9941_v12  ;;  %v11184_v12 = vld [vmem:[%s16636_s10 + $0x6] ss:$0 sm:$0xff] }
0x14cc   : > { %9964 = vrot.lane.b32.xlu0 %v13734_v62, %s13796_s21  ;;  %13741 = vtanh.f32 %v16496_v26 }
0x14cd   : > { %13743 = vtanh.f32 %v16499_v33 }
0x14ce   : > { %13745 = vtanh.f32 %v16502_v57 }
0x14cf   : > { %v13736_v24 = vpop.eup %13735  ;;  %13747 = vtanh.f32 %v9909_v3 }
0x14d0   : > { %9966 = vrot.lane.b32.xlu1 %v13736_v24, %s13796_s21  ;;  %13749 = vtanh.f32 %v9910_v10 }
0x14d1   : > { %13751 = vtanh.f32 %v9911_v39 }
0x14d4   : > { %v13738_v44 = vpop.eup %13737 }
0x14d5   : > { %9968 = vrot.lane.b32.xlu0 %v13738_v44, %s13796_s21 }
0x14d8   : > { %v13740_v25 = vpop.eup %13739 }
0x14d9   : > { %9970 = vrot.lane.b32.xlu1 %v13740_v25, %s13796_s21  ;;  %v13742_v37 = vpop.eup %13741 }
0x14da   : > { %v13744_v43 = vpop.eup %13743 }
0x14db   : > { %v13746_v26 = vpop.eup %13745 }
0x14dc   : > { %v13748_v42 = vpop.eup %13747 }
0x14dd   : > { %v13750_v5 = vpop.eup %13749 }
0x14de   : > { %v13752_v28 = vpop.eup %13751 }
0x1536   : > { %v9961_v11 = vpop.permute.xlu0 %9960 }
0x1537   : > { %v9978_v31 = vmul.f32 %v13742_v37, %v9961_v11 }
0x153a   : > { %v9963_v14 = vpop.permute.xlu1 %9962 }
0x153b   : > { %v9979_v59 = vmul.f32 %v13744_v43, %v9963_v14 }
0x153d   : > { %v9984_v32 = vpack.c.bf16 %v9979_v59, %v9978_v31 }
0x153e   : > { %v9965_v15 = vpop.permute.xlu0 %9964 }
0x153f   : > { %12976 = vmatmul.mubr.msk.bf16.vlgmr.msra.gmra.mxu1 %vm562_vm1, %v9984_v32  ;;  %12992 = vmatmul.mubr.msk.bf16.vlgmr.msra.gmra.mxu0 %vm562_vm1, %v9984_v32  ;;  %v9980_v52 = vmul.f32 %v13746_v26, %v9965_v15  ;;  %v13134_v26 = vld [vmem:[%s16637_s11 + $0x10] sm:$0xff]  }
0x1540   : > { %12979 = vmatprep.mubr.msk.bf16.mxu1 %vm13795_vm0, %v13794_v1  ;;  %12995 = vmatprep.mubr.msk.bf16.mxu0 %vm13795_vm0, %v13794_v1 }
0x1542   : > { %v9967_v38 = vpop.permute.xlu1 %9966 }
0x1543   : > { %v9981_v19 = vmul.f32 %v13748_v42, %v9967_v38  ;;  %v13135_v42 = vld [vmem:[%s16637_s11 + $0x8] sm:$0xff]   ;;  %v11190_v38 = vld [vmem:[%s16633_s7 + $0x7] ss:$0 sm:$0xff] }
0x1545   : > { %v9985_v33 = vpack.c.bf16 %v9981_v19, %v9980_v52 }
0x1547   : > { %12980 = vmatmul.mubr.msk.bf16.gmra.mxu1 %vm562_vm1, %v9985_v33  ;;  %12996 = vmatmul.mubr.msk.bf16.gmra.mxu0 %vm562_vm1, %v9985_v33  ;;  %v9969_v60 = vpop.permute.xlu0 %9968 }
0x1548   : > { %12983 = vmatprep.mubr.msk.bf16.mxu1 %vm13795_vm0, %v13794_v1  ;;  %12999 = vmatprep.mubr.msk.bf16.mxu0 %vm13795_vm0, %v13794_v1  ;;  %v9982_v51 = vmul.f32 %v13750_v5, %v9969_v60 }
0x154b   : > { %v9971_v16 = vpop.permute.xlu1 %9970 }
0x154c   : > { %v9983_v57 = vmul.f32 %v13752_v28, %v9971_v16 }
0x154e   : > { %v9986_v9 = vpack.c.bf16 %v9983_v57, %v9982_v51 }
0x1550   : > { %12984 = vmatmul.mubr.msk.bf16.gmra.mxu1 %vm562_vm1, %v9986_v9  ;;  %13000 = vmatmul.mubr.msk.bf16.gmra.mxu0 %vm562_vm1, %v9986_v9 }
0x1551   : > { %13005 = vmatprep.mubr.msk.bf16.mxu1 %vm13795_vm0, %v13794_v1  ;;  %13011 = vmatprep.mubr.msk.bf16.mxu0 %vm13795_vm0, %v13794_v1 }
0x15ff   : > { %v10047_v50 = vpop.f32.mrf.mxu1  ;;  %v10117_v41 = vpop.f32.mrf.mxu0 }
0x1600   : > { %v13138_v41 = vld [vmem:[%s16639_s13 + $0x10] sm:$0xff]  }
0x1601   : > { %v12977_v27 = vpop.f32.mrf.mxu1  ;;  %v12993_v3 = vpop.f32.mrf.mxu0 }
0x1602   : > { %v11194_v27 = vld [vmem:[%s16638_s12] ss:$0 sm:$0xff] }
0x1603   : > { %v10049_v13 = vpop.f32.mrf.mxu1  ;;  %v10119_v20 = vpop.f32.mrf.mxu0 }
0x1605   : > { %v12978_v0 = vpop.f32.mrf.mxu1  ;;  %v12994_v8 = vpop.f32.mrf.mxu0 }
0x1607   : > { %v10053_v10 = vpop.f32.mrf.mxu1  ;;  %v10123_v6 = vpop.f32.mrf.mxu0 }
0x1609   : > { %v12981_v4 = vpop.f32.mrf.mxu1  ;;  %v12997_v17 = vpop.f32.mrf.mxu0 }
0x160b   : > { %v10055_v34 = vpop.f32.mrf.mxu1  ;;  %v10125_v46 = vpop.f32.mrf.mxu0 }
0x160d   : > { %v12982_v22 = vpop.f32.mrf.mxu1  ;;  %v12998_v39 = vpop.f32.mrf.mxu0 }
0x1610   : > { %v10059_v49 = vpop.f32.mrf.mxu1  ;;  %v10129_v55 = vpop.f32.mrf.mxu0 }
0x1612   : > { %v12985_v36 = vpop.f32.mrf.mxu1  ;;  %v13001_v53 = vpop.f32.mrf.mxu0 }
0x1614   : > { %v10062_v21 = vpop.f32.mrf.mxu1  ;;  %v10132_v30 = vpop.f32.mrf.mxu0 }
0x1615   : > { %v10136_v63 = vpack.c.bf16 %v10062_v21, %v10059_v49  ;;  %v10137_v45 = vpack.c.bf16 %v10132_v30, %v10129_v55 }
0x1616   : > { %v12986_v2 = vpop.f32.mrf.mxu1  ;;  %v13002_v29 = vpop.f32.mrf.mxu0 }
0x1617   : > { %13004 = vmatpush3.bf16.msra.mxu1 %v10137_v45  ;;  %13010 = vmatpush3.bf16.msra.mxu0 %v10136_v63 }
0x1618   : > { %13015 = vmatprep.subr.bf16.mxu1 %v13794_v1  ;;  %13023 = vmatprep.subr.bf16.mxu0 %v13794_v1 }
0x161a   : > { %13006 = vmatmul.mubr.msk.bf16.vlgmr.msra.gmra.mxu1 %vm1619_vm2, %v13785_v48  ;;  %13012 = vmatmul.mubr.msk.bf16.vlgmr.msra.gmra.mxu0 %vm1619_vm2, %v16402_v40  ;;  %v13133_v40 = vld [vmem:[%s16637_s11 + $0x18] sm:$0xff]  }
0x161b   : > { %13019 = vmatprep.mubr.msk.bf16.mxu1 %vm13795_vm0, %v13794_v1  ;;  %13031 = vmatprep.mubr.msk.bf16.mxu0 %vm13795_vm0, %v13794_v1 }
0x161c   : > { %13016 = vmatpush3.bf16.msra.mxu1 %v13131_v56  ;;  %13024 = vmatpush3.bf16.msra.mxu0 %v13133_v40 }
0x161d   : > { %13017 = vmatprep.subr.bf16.mxu1 %v13794_v1  ;;  %13025 = vmatprep.subr.bf16.mxu0 %v13794_v1 }
0x1620   : > { %13018 = vmatpush3.bf16.msra.mxu1 %v13132_v23  ;;  %13026 = vmatpush3.bf16.msra.mxu0 %v13134_v26 }
0x1621   : > { %13035 = vmatprep.subr.bf16.mxu1 %v13794_v1  ;;  %13027 = vmatprep.subr.bf16.mxu0 %v13794_v1 }
0x1624   : > { %13028 = vmatpush3.bf16.msra.mxu0 %v13135_v42 }
0x1625   : > { %13029 = vmatprep.subr.bf16.mxu0 %v13794_v1 }
0x16da   : > { %v10172_v47 = vpop.f32.mrf.mxu1  ;;  %v10213_v7 = vpop.f32.mrf.mxu0 }
0x16db   : > { %v10214_v35 = vadd.f32 %v10213_v7, %v10172_v47 }
0x16dc   : > { %v13007_v62 = vpop.f32.mrf.mxu1  ;;  %v13013_v24 = vpop.f32.mrf.mxu0 }
0x16dd   : > { %v10228_v11 = vadd.f32 %v11184_v12, %v10214_v35 }
0x16de   : > { %v10175_v44 = vpop.f32.mrf.mxu1  ;;  %v10216_v25 = vpop.f32.mrf.mxu0 }
0x16df   : > { %v10217_v37 = vadd.f32 %v10216_v25, %v10175_v44  ;;  %v10230_v59 = vadd.f32 %v10228_v11, %v16447_v54  ;;  %v13136_v54 = vld [vmem:[%s16637_s11] sm:$0xff]  }
0x16e0   : > { %v13008_v43 = vpop.f32.mrf.mxu1  ;;  %v13014_v14 = vpop.f32.mrf.mxu0  ;;  %13030 = vmatpush3.bf16.msra.mxu0 %v13136_v54 }
0x16e1   : > { %v10229_v31 = vadd.f32 %v11184_v12, %v10217_v37 }
0x16e3   : > { %v10231_v32 = vadd.f32 %v10229_v31, %v16450_v18  ;;  %v13137_v18 = vld [vmem:[%s16639_s13 + $0x18] sm:$0xff]  }
0x16e5   : > { %v10232_v15 = vpack.c.bf16 %v10231_v32, %v10230_v59 }
0x16e7   : > { %13020 = vmatmul.mubr.msk.bf16.vlgmr.msra.gmra.mxu1 %vm562_vm1, %v10232_v15 }
0x16e8   : > { %13043 = vmatprep.mubr.msk.bf16.mxu1 %vm13795_vm0, %v13794_v1  ;;  %13036 = vmatpush3.bf16.msra.mxu1 %v13137_v18 }
0x16e9   : > { %13037 = vmatprep.subr.bf16.mxu1 %v13794_v1 }
0x16ec   : > { %13038 = vmatpush3.bf16.msra.mxu1 %v13138_v41 }
0x16ed   : > { %13039 = vmatprep.subr.bf16.mxu1 %v13794_v1 }
0x17a7   : > { %v10295_v52 = vpop.f32.mrf.mxu1 }
0x17a8   : > { %v10296_v19 = vadd.f32 %v11190_v38, %v10295_v52 }
0x17a9   : > { %v13021_v33 = vpop.f32.mrf.mxu1 }
0x17aa   : > { %v10302_v5 = vadd.f32 %v10296_v19, %v16488_v58  ;;  %v13139_v58 = vld [vmem:[%s16639_s13 + $0x8] sm:$0xff]  }
0x17ab   : > { %v10298_v60 = vpop.f32.mrf.mxu1  ;;  %13040 = vmatpush3.bf16.msra.mxu1 %v13139_v58 }
0x17ac   : > { %v10299_v28 = vadd.f32 %v11190_v38, %v10298_v60  ;;  %v10304_v57 = vmax.f32 %v10302_v5, 0.0  ;;  %13041 = vmatprep.subr.bf16.mxu1 %v13794_v1  ;;  %v11200_v1 = vld [vmem:[%s16640_s14] ss:$0 sm:$0xff] }
0x17ad   : > { %v13022_v16 = vpop.f32.mrf.mxu1 }
0x17ae   : > { %v10303_v51 = vadd.f32 %v10299_v28, %v16491_v61  ;;  %v13140_v61 = vld [vmem:[%s16639_s13] sm:$0xff]  }
0x17af   : > { %13042 = vmatpush3.bf16.msra.mxu1 %v13140_v61 }
0x17b0   : > { %v10305_v9 = vmax.f32 %v10303_v51, 0.0 }
0x17b2   : > { %v10306_v50 = vpack.c.bf16 %v10305_v9, %v10304_v57 }
0x17b4   : > { %13032 = vmatmul.mubr.msk.bf16.vlgmr.msra.gmra.mxu0 %vm10346_vm3, %v10306_v50 }
0x1874   : > { %v10384_v3 = vpop.f32.mrf.mxu0 }
0x1875   : > { %v10385_v20 = vadd.f32 %v11194_v27, %v10384_v3 }
0x1876   : > { %v13033_v13 = vpop.f32.mrf.mxu0 }
0x1877   : > { %v10391_v6 = vmax.f32 %v10385_v20, 0.0 }
0x1878   : > { %v10387_v0 = vpop.f32.mrf.mxu0 }
0x1879   : > { %v10388_v8 = vadd.f32 %v11194_v27, %v10387_v0 }
0x187a   : > { %v13034_v10 = vpop.f32.mrf.mxu0 }
0x187b   : > { %v10392_v4 = vmax.f32 %v10388_v8, 0.0 }
0x187d   : > { %v10393_v17 = vpack.c.bf16 %v10392_v4, %v10391_v6 }
0x187f   : > { %13044 = vmatmul.mubr.msk.bf16.vlgmr.msra.gmra.mxu1 %vm10346_vm3, %v10393_v17 }
0x193f   : > { %v10470_v34 = vpop.f32.mrf.mxu1 }
0x1940   : > { %v10471_v46 = vadd.f32 %v11200_v1, %v10470_v34 }
0x1941   : > { %v13045_v22 = vpop.f32.mrf.mxu1 }
0x1942   : > { %10478 = vst.msk [vmem:[%s494_s27] sm:$0xff] %vm10477_vm4, %v10471_v46 }
0x1943   : > { %v10473_v39 = vpop.f32.mrf.mxu1 }
0x1944   : > { %v10474_v49 = vadd.f32 %v11200_v1, %v10473_v39 }
0x1945   : > { %v13046_v55 = vpop.f32.mrf.mxu1 }
0x1946   : > { %10479 = vst.msk [vmem:[%s494_s27 + $0x8] sm:$0xff] %vm10477_vm4, %v10474_v49 }
0x1947 PF: > { %s25_s18 = sadd.s32 1, %s13792_s18  }
0x1948   : > { %p22_p4 = scmp.ge.s32.totalorder %s25_s18, 4  }
0x194a   :  { %24 = sbr.rel (!%p22_p4) target bundleno = 1 (0x1), region = 160 }

</bundles_post_ra>
